<compile_context>
chip_gen: v5e
topology: v5e:2x2
jax: 0.10.0
libtpu: 0.0.40
codegen_flags: <defaults>
</compile_context>

<pallas_src>
import functools

import jax
import jax.numpy as jnp
from jax.experimental import pallas as pl
from jax.experimental.pallas import tpu as pltpu


def _round_up(x, m):
    return -(-x // m) * m


# ----------------------------------------------------------------------------
# Kernel 1: vision conv-as-matmul + ReLU + global-average-pool.
#   bf16 patches stream over HW tiles; per-sublane partial sums in an
#   (8, c_pad) VMEM accumulator; one cross-sublane reduce + analytic
#   padded-row correction in the epilogue.  Output: pooled [B, 1, c_pad].
# Grid: (B, n_hw_tiles), B "parallel", HW "arbitrary" (accumulation).
# ----------------------------------------------------------------------------
def _vision_pool_kernel(p_ref, cw_ref, cb_ref, o_ref, acc_ref, *, hw, hw_pad):
    t = pl.program_id(1)

    @pl.when(t == 0)
    def _():
        acc_ref[...] = jnp.zeros_like(acc_ref)

    patches = p_ref[0]                                           # [tile_hw, Kp] bf16
    conv = jnp.dot(patches, cw_ref[...],
                   preferred_element_type=jnp.float32) + cb_ref[...]
    conv = jnp.maximum(conv, 0.0)                                # [tile_hw, Cp]
    tile_hw, c_pad = conv.shape
    # Per-sublane partial sums (VALU vreg adds); cross-sublane reduce deferred.
    acc_ref[...] += jnp.sum(conv.reshape(tile_hw // 8, 8, c_pad), axis=0)

    @pl.when(t == pl.num_programs(1) - 1)
    def _():
        total = jnp.sum(acc_ref[...], axis=0, keepdims=True)     # [1, Cp]
        if hw_pad != hw:
            # Zero-padded patch rows each contributed ReLU(conv_b); subtract.
            total = total - float(hw_pad - hw) * jnp.maximum(cb_ref[...], 0.0)
        o_ref[0] = total * (1.0 / hw)


def pallas_vision_pool(patches, hw, tile_hw, params):
    bsz, hw_pad, kp = patches.shape
    n_t = hw_pad // tile_hw
    cw, cb = params['conv_w'], params['conv_b']
    c_pad = cw.shape[1]
    pooled = pl.pallas_call(
        functools.partial(_vision_pool_kernel, hw=hw, hw_pad=hw_pad),
        out_shape=jax.ShapeDtypeStruct((bsz, 1, c_pad), jnp.float32),
        grid_spec=pltpu.PrefetchScalarGridSpec(
            num_scalar_prefetch=0,
            grid=(bsz, n_t),
            in_specs=[
                pl.BlockSpec((1, tile_hw, kp), lambda b, t: (b, t, 0)),
                pl.BlockSpec(cw.shape, lambda b, t: (0, 0)),
                pl.BlockSpec(cb.shape, lambda b, t: (0, 0)),
            ],
            out_specs=pl.BlockSpec((1, 1, c_pad), lambda b, t: (b, 0, 0)),
            scratch_shapes=[pltpu.VMEM((8, c_pad), jnp.float32)],
        ),
        compiler_params=pltpu.CompilerParams(
            dimension_semantics=("parallel", "arbitrary")),
    )(patches, cw, cb)
    return pooled.reshape(bsz, c_pad)


# ----------------------------------------------------------------------------
# Kernel 2: batched vision linear + image-token projection.
#   h = ReLU(pooled @ vis_w + vis_b)     [B, 2048]   (cheap, recomputed/tile)
#   out_tile = h @ img_tok_w[:, tile] + b            [B, tile_n]
# Grid: (n_out // tile_n,), "parallel".  The 8 MiB img_tok_w is streamed in
# 2 MiB column tiles; all B rows share each weight tile.
# ----------------------------------------------------------------------------
def _vision_proj_kernel(pooled_ref, vw_ref, vb_ref, iw_ref, ib_ref, o_ref):
    pooled = pooled_ref[...]                                     # [B, Cp] f32
    h = jnp.dot(pooled.astype(jnp.bfloat16), vw_ref[...],
                preferred_element_type=jnp.float32) + vb_ref[...]
    h = jnp.maximum(h, 0.0)                                      # [B, vis_dim]
    o_ref[...] = jnp.dot(h.astype(jnp.bfloat16), iw_ref[...],
                         preferred_element_type=jnp.float32) + ib_ref[...]


def pallas_vision_proj(pooled, params, *, tile_n=512):
    bsz, c_pad = pooled.shape
    vw, vb = params['vis_w'], params['vis_b']
    iw, ib = params['img_tok_w'], params['img_tok_b']
    vis_dim, n_out = iw.shape
    tile_n = min(tile_n, n_out)
    assert n_out % tile_n == 0
    return pl.pallas_call(
        _vision_proj_kernel,
        out_shape=jax.ShapeDtypeStruct((bsz, n_out), jnp.float32),
        grid_spec=pltpu.PrefetchScalarGridSpec(
            num_scalar_prefetch=0,
            grid=(n_out // tile_n,),
            in_specs=[
                pl.BlockSpec((bsz, c_pad), lambda j: (0, 0)),
                pl.BlockSpec(vw.shape, lambda j: (0, 0)),
                pl.BlockSpec(vb.shape, lambda j: (0, 0)),
                pl.BlockSpec((vis_dim, tile_n), lambda j: (0, j)),
                pl.BlockSpec((1, tile_n), lambda j: (0, j)),
            ],
            out_specs=pl.BlockSpec((bsz, tile_n), lambda j: (0, j)),
        ),
        compiler_params=pltpu.CompilerParams(
            dimension_semantics=("parallel",)),
    )(pooled, vw, vb, iw, ib)


# ----------------------------------------------------------------------------
# Kernel 3: fused text path.
#   ReLU(x @ W1 + b1) @ W2 + b2, tiled over the token (M) axis.
# ----------------------------------------------------------------------------
def _text_kernel(x_ref, w1_ref, b1_ref, w2_ref, b2_ref, o_ref):
    x = x_ref[...]
    h = jnp.dot(x.astype(jnp.bfloat16), w1_ref[...],
                preferred_element_type=jnp.float32) + b1_ref[...]
    h = jnp.maximum(h, 0.0)
    y = jnp.dot(h.astype(jnp.bfloat16), w2_ref[...],
                preferred_element_type=jnp.float32) + b2_ref[...]
    o_ref[...] = y


def pallas_text(x, params):
    m, k = x.shape
    w1, b1 = params['txt_w'], params['txt_b']
    w2, b2 = params['txt_tok_w'], params['txt_tok_b']
    n = w2.shape[1]
    tile_m = min(512, _round_up(m, 8))
    m_pad = _round_up(m, tile_m)
    if m_pad != m:
        x = jnp.pad(x, ((0, m_pad - m), (0, 0)))
    out = pl.pallas_call(
        _text_kernel,
        out_shape=jax.ShapeDtypeStruct((m_pad, n), jnp.float32),
        grid_spec=pltpu.PrefetchScalarGridSpec(
            num_scalar_prefetch=0,
            grid=(m_pad // tile_m,),
            in_specs=[
                pl.BlockSpec((tile_m, k), lambda i: (i, 0)),
                pl.BlockSpec(w1.shape, lambda i: (0, 0)),
                pl.BlockSpec(b1.shape, lambda i: (0, 0)),
                pl.BlockSpec(w2.shape, lambda i: (0, 0)),
                pl.BlockSpec(b2.shape, lambda i: (0, 0)),
            ],
            out_specs=pl.BlockSpec((tile_m, n), lambda i: (i, 0)),
        ),
        compiler_params=pltpu.CompilerParams(
            dimension_semantics=("parallel",)),
    )(x, w1, b1, w2, b2)
    return out[:m]


# ----------------------------------------------------------------------------
# Kernel 4: fused world model + action decoder, batched over Bt per grid step.
#   tokens [Bt,S,D] -> self-attention (+residual +LayerNorm) -> fused_features
#   -> masked mean-pool -> Linear -> exact softmax -> action_probs
# ----------------------------------------------------------------------------
def _world_kernel(x_ref, mask_ref, wq_ref, wk_ref, wv_ref, wo_ref,
                  g_ref, be_ref, dw_ref, db_ref, probs_ref, fused_ref,
                  *, token_dim):
    bt, seq, dim = x_ref.shape
    x = x_ref[...]                                               # [Bt, S, D] f32
    mask = mask_ref[...]                                         # [Bt, 1, S] f32

    # --- Q/K/V projections on (Bt*S) rows ---
    xf = x.reshape(bt * seq, dim).astype(jnp.bfloat16)
    q = jnp.dot(xf, wq_ref[...], preferred_element_type=jnp.float32).reshape(bt, seq, dim)
    k = jnp.dot(xf, wk_ref[...], preferred_element_type=jnp.float32).reshape(bt, seq, dim)
    v = jnp.dot(xf, wv_ref[...], preferred_element_type=jnp.float32).reshape(bt, seq, dim)

    # --- attention (keys masked) ---
    scale = 1.0 / float(token_dim) ** 0.5
    scores = jnp.einsum('bqd,bkd->bqk', q.astype(jnp.bfloat16),
                        k.astype(jnp.bfloat16),
                        preferred_element_type=jnp.float32) * scale   # [Bt,S,S]
    scores = scores + (1.0 - mask) * (-1e9)
    m = jnp.max(scores, axis=-1, keepdims=True)
    e = jnp.exp(scores - m)
    attn = e * pl.reciprocal(jnp.sum(e, axis=-1, keepdims=True), approx=True)

    ctx = jnp.einsum('bqk,bkd->bqd', attn.astype(jnp.bfloat16),
                     v.astype(jnp.bfloat16),
                     preferred_element_type=jnp.float32)              # [Bt,S,D]
    out = jnp.dot(ctx.reshape(bt * seq, dim).astype(jnp.bfloat16), wo_ref[...],
                  preferred_element_type=jnp.float32).reshape(bt, seq, dim) + x

    # --- LayerNorm ---
    mu = jnp.mean(out, axis=-1, keepdims=True)
    var = jnp.mean((out - mu) ** 2, axis=-1, keepdims=True)
    normed = (out - mu) * jax.lax.rsqrt(var + 1e-5)
    normed = normed * g_ref[...] + be_ref[...]
    fused_ref[...] = normed

    # --- action decoder: masked mean pool -> linear -> exact softmax ---
    denom = jnp.maximum(jnp.sum(mask, axis=-1, keepdims=True), 1.0)   # [Bt,1,1]
    pooled = jnp.einsum('bqs,bsd->bqd', mask, normed,
                        preferred_element_type=jnp.float32) / denom   # [Bt,1,D]
    logits = jnp.dot(pooled.reshape(bt, dim).astype(jnp.bfloat16), dw_ref[...],
                     preferred_element_type=jnp.float32) + db_ref[...]
    mm = jnp.max(logits, axis=-1, keepdims=True)
    ee = jnp.exp(logits - mm)
    probs = ee / jnp.sum(ee, axis=-1, keepdims=True)                  # exact
    probs_ref[...] = probs.reshape(bt, 1, -1)


def _pick_batch_tile(bsz):
    # Largest divisor of bsz that is <= 8 while keeping >= 2 grid steps when
    # possible (so v7x megacore still shards the batch-parallel grid axis).
    cap = min(8, max(1, bsz // 2)) if bsz >= 2 else 1
    for bt in range(cap, 0, -1):
        if bsz % bt == 0:
            return bt
    return 1


def pallas_world_decoder(tokens, mask, params, *, token_dim):
    bsz, seq, dim = tokens.shape
    num_actions = params['dec_w'].shape[1]
    bt = _pick_batch_tile(bsz)
    kernel = functools.partial(_world_kernel, token_dim=token_dim)
    probs, fused = pl.pallas_call(
        kernel,
        out_shape=(jax.ShapeDtypeStruct((bsz, 1, num_actions), jnp.float32),
                   jax.ShapeDtypeStruct((bsz, seq, dim), jnp.float32)),
        grid_spec=pltpu.PrefetchScalarGridSpec(
            num_scalar_prefetch=0,
            grid=(bsz // bt,),
            in_specs=[
                pl.BlockSpec((bt, seq, dim), lambda b: (b, 0, 0)),
                pl.BlockSpec((bt, 1, seq), lambda b: (b, 0, 0)),
                pl.BlockSpec(params['wq'].shape, lambda b: (0, 0)),
                pl.BlockSpec(params['wk'].shape, lambda b: (0, 0)),
                pl.BlockSpec(params['wv'].shape, lambda b: (0, 0)),
                pl.BlockSpec(params['wo'].shape, lambda b: (0, 0)),
                pl.BlockSpec(params['ln_g'].shape, lambda b: (0, 0)),
                pl.BlockSpec(params['ln_b'].shape, lambda b: (0, 0)),
                pl.BlockSpec(params['dec_w'].shape, lambda b: (0, 0)),
                pl.BlockSpec(params['dec_b'].shape, lambda b: (0, 0)),
            ],
            out_specs=(pl.BlockSpec((bt, 1, num_actions), lambda b: (b, 0, 0)),
                       pl.BlockSpec((bt, seq, dim), lambda b: (b, 0, 0))),
        ),
        compiler_params=pltpu.CompilerParams(
            dimension_semantics=("parallel",)),
    )(tokens, mask, params['wq'], params['wk'], params['wv'], params['wo'],
      params['ln_g'], params['ln_b'], params['dec_w'], params['dec_b'])
    return probs.reshape(bsz, num_actions), fused


# ----------------------------------------------------------------------------
# Parameter init (deterministic, synthetic).  Matmul weights in bf16; biases /
# LN params in f32.  Conv contraction dim padded 27->32, channels 32->128.
# ----------------------------------------------------------------------------
def init_params(key, *, c_in=3, conv_ch=32, vis_dim=2048, txt_dim=768,
                token_dim=256, num_image_tokens=8, num_action_tokens=256,
                vocab=100):
    ks = jax.random.split(key, 12)
    s = 0.02
    k_raw = c_in * 9
    k_pad = _round_up(k_raw, 32)     # 27 -> 32 (bf16 patches, minimal pad)
    c_pad = _round_up(conv_ch, 128)  # conv output channels, lane-aligned

    conv_w = jnp.zeros((k_pad, c_pad), jnp.float32)
    conv_w = conv_w.at[:k_raw, :conv_ch].set(
        jax.random.normal(ks[0], (k_raw, conv_ch), jnp.float32) * s)
    vis_w = jnp.zeros((c_pad, vis_dim), jnp.float32)
    vis_w = vis_w.at[:conv_ch, :].set(
        jax.random.normal(ks[1], (conv_ch, vis_dim), jnp.float32) * s)

    bf = jnp.bfloat16
    p = {
        'conv_w': conv_w.astype(bf),
        'conv_b': jnp.zeros((1, c_pad), jnp.float32),
        'vis_w': vis_w.astype(bf),
        'vis_b': jnp.zeros((1, vis_dim), jnp.float32),
        'emb': jax.random.normal(ks[2], (vocab, txt_dim), jnp.float32) * s,
        'txt_w': (jax.random.normal(ks[3], (txt_dim, txt_dim), jnp.float32) * s).astype(bf),
        'txt_b': jnp.zeros((1, txt_dim), jnp.float32),
        'txt_tok_w': (jax.random.normal(ks[5], (txt_dim, token_dim), jnp.float32) * s).astype(bf),
        'txt_tok_b': jnp.zeros((1, token_dim), jnp.float32),
        'img_tok_w': (jax.random.normal(
            ks[4], (vis_dim, num_image_tokens * token_dim), jnp.float32) * s).astype(bf),
        'img_tok_b': jnp.zeros((1, num_image_tokens * token_dim), jnp.float32),
        'wq': (jax.random.normal(ks[6], (token_dim, token_dim), jnp.float32) * s).astype(bf),
        'wk': (jax.random.normal(ks[7], (token_dim, token_dim), jnp.float32) * s).astype(bf),
        'wv': (jax.random.normal(ks[8], (token_dim, token_dim), jnp.float32) * s).astype(bf),
        'wo': (jax.random.normal(ks[9], (token_dim, token_dim), jnp.float32) * s).astype(bf),
        'ln_g': jnp.ones((1, token_dim), jnp.float32),
        'ln_b': jnp.zeros((1, token_dim), jnp.float32),
        'dec_w': (jax.random.normal(ks[10], (token_dim, num_action_tokens), jnp.float32) * s).astype(bf),
        'dec_b': jnp.zeros((1, num_action_tokens), jnp.float32),
    }
    return p


# ----------------------------------------------------------------------------
# Forward pass (glue in plain JAX, hot paths in Pallas)
# ----------------------------------------------------------------------------
def im2col_3x3_s2(images, k_pad, tile_hw_max=2048):
    """images [B,C,H,W] NCHW -> bf16 patches [B, HW_pad, k_pad], plus (HW, tile_hw)."""
    # TODO(synk): im2col still runs as XLA glue (one extra HBM copy of the
    # padded image); at real image sizes move the strided gather inside the
    # vision kernel or switch to NHWC layout.
    b, c, h, w = images.shape
    ho, wo = h // 2, w // 2
    hw = ho * wo
    xpad = jnp.pad(images, ((0, 0), (0, 0), (1, 1), (1, 1)))
    cols = []
    for dh in range(3):
        for dw in range(3):
            cols.append(xpad[:, :, dh:dh + h:2, dw:dw + w:2])    # [B, C, Ho, Wo]
    patches = jnp.stack(cols, axis=2)                            # [B, C, 9, Ho, Wo]
    patches = patches.transpose(0, 3, 4, 1, 2)                   # [B, Ho, Wo, C, 9]
    patches = patches.reshape(b, hw, c * 9)
    tile_hw = min(tile_hw_max, _round_up(hw, 8))
    hw_pad = _round_up(hw, tile_hw)
    patches = jnp.pad(patches, ((0, 0), (0, hw_pad - hw), (0, k_pad - c * 9)))
    return patches.astype(jnp.bfloat16), hw, tile_hw


def physical_ai_forward(params, images, input_ids, attention_mask,
                        *, num_image_tokens=8, token_dim=256):
    bsz = images.shape[0]
    tlen = input_ids.shape[1]
    k_pad = params['conv_w'].shape[0]

    # ---- vision processor: conv + ReLU + global-avg-pool (streaming) ----
    patches, hw, tile_hw = im2col_3x3_s2(images, k_pad)
    pooled = pallas_vision_pool(patches, hw, tile_hw, params)       # [B, 128]

    # ---- batched vision linear + image-token projection ----
    img_tok_flat = pallas_vision_proj(pooled, params)               # [B, 8*256]
    image_tokens = img_tok_flat.reshape(bsz, num_image_tokens, token_dim)

    # ---- text processor + text token projection (fused) ----
    tok_emb = jnp.take(params['emb'], input_ids, axis=0)            # [B, T, 768]
    text_tokens = pallas_text(tok_emb.reshape(bsz * tlen, -1), params)
    text_tokens = text_tokens.reshape(bsz, tlen, token_dim)         # [B, T, 256]

    # ---- token assembly in XLA (single lane-dense [B, S, 256] tensor) ----
    tokens = jnp.concatenate([image_tokens, text_tokens], axis=1)   # [B, S, 256]
    full_mask = jnp.concatenate(
        [jnp.ones((bsz, num_image_tokens), jnp.float32),
         attention_mask.astype(jnp.float32)], axis=1)               # [B, S]
    full_mask = full_mask.reshape(bsz, 1, num_image_tokens + tlen)

    # ---- world model + action decoder (fused, batched over B) ----
    action_probs, fused_features = pallas_world_decoder(
        tokens, full_mask, params, token_dim=token_dim)
    # TODO(synk): the world model's internal action_logits are unused by
    # PhysicalAI.forward's outputs; omitted.  Attention masks keys only;
    # padded text queries still produce rows in fused_features.
    return action_probs, fused_features


# ----------------------------------------------------------------------------
if __name__ == "__main__":
    key = jax.random.PRNGKey(0)
    k_img, k_ids, k_param = jax.random.split(key, 3)

    B, C, H, W = 2, 3, 16, 16
    T, VOCAB = 8, 100
    NUM_IMAGE_TOKENS, TOKEN_DIM, NUM_ACTIONS = 8, 256, 256

    images = jax.random.normal(k_img, (B, C, H, W), jnp.float32)
    input_ids = jax.random.randint(k_ids, (B, T), 0, VOCAB)
    attention_mask = jnp.array([[1, 1, 1, 1, 1, 1, 1, 1],
                                [1, 1, 1, 1, 1, 0, 0, 0]], jnp.float32)

    params = init_params(k_param)

    fwd = jax.jit(functools.partial(physical_ai_forward,
                                    num_image_tokens=NUM_IMAGE_TOKENS,
                                    token_dim=TOKEN_DIM))
    action_probs, fused_features = fwd(params, images, input_ids, attention_mask)
    jax.block_until_ready((action_probs, fused_features))

    assert action_probs.shape == (B, NUM_ACTIONS)
    assert fused_features.shape == (B, NUM_IMAGE_TOKENS + T, TOKEN_DIM)
    assert bool(jnp.all(jnp.isfinite(action_probs)))
    assert bool(jnp.all(jnp.isfinite(fused_features)))
    # Action softmax uses the exact reciprocal -> rows sum to 1 tightly.
    assert bool(jnp.allclose(jnp.sum(action_probs, axis=-1), 1.0, atol=1e-3))
    print("KERNEL_OK")
</pallas_src>

<mosaic_0001>
module attributes {stable_mosaic.version = 11 : i64} {
  func.func @_vision_pool_kernel(%arg0: i32, %arg1: i32, %arg2: memref<1x64x32xbf16, #tpu.memory_space<vmem>>, %arg3: memref<32x128xbf16, #tpu.memory_space<vmem>>, %arg4: memref<1x128xf32, #tpu.memory_space<vmem>>, %arg5: memref<1x1x128xf32, #tpu.memory_space<vmem>>, %arg6: memref<8x128xf32, #tpu.memory_space<vmem>>) attributes {dimension_semantics = [#tpu.dimension_semantics<parallel>, #tpu.dimension_semantics<arbitrary>], iteration_bounds = array<i64: 2, 1>, scalar_prefetch = 0 : i64, scratch_operands = 1 : i64, tpu.core_type = #tpu.core_type<tc>, window_params = [{transform_indices = @transform_0, window_bounds = array<i64: 1, 64, 32>}, {pipeline_mode = #tpu.pipeline_mode<synchronous>, transform_indices = @transform_1, window_bounds = array<i64: 32, 128>}, {pipeline_mode = #tpu.pipeline_mode<synchronous>, transform_indices = @transform_2, window_bounds = array<i64: 1, 128>}, {transform_indices = @transform_3, window_bounds = array<i64: 1, 1, 128>}]} {
    %c0_i32 = arith.constant 0 : i32
    %0 = arith.cmpi eq, %arg1, %c0_i32 : i32
    %1 = arith.extui %0 : i1 to i32
    %c0_i32_0 = arith.constant 0 : i32
    %2 = arith.cmpi ne, %1, %c0_i32_0 : i32
    scf.if %2 {
      %cst_15 = arith.constant 0.000000e+00 : f32
      %20 = vector.broadcast %cst_15 : f32 to vector<8x128xf32>
      %c0_16 = arith.constant 0 : index
      %c0_17 = arith.constant 0 : index
      %21 = vector.load %arg6[%c0_16, %c0_17] : memref<8x128xf32, #tpu.memory_space<vmem>>, vector<8x128xf32>
      tpu.vector_store %arg6[%c0_16, %c0_17], %20 {strides = array<i32>} : memref<8x128xf32, #tpu.memory_space<vmem>>, vector<8x128xf32>,
    } else {
    }
    %c0 = arith.constant 0 : index
    %c0_1 = arith.constant 0 : index
    %c0_2 = arith.constant 0 : index
    %3 = vector.load %arg2[%c0, %c0_1, %c0_2] : memref<1x64x32xbf16, #tpu.memory_space<vmem>>, vector<1x64x32xbf16>
    %4 = vector.shape_cast %3 : vector<1x64x32xbf16> to vector<64x32xbf16>
    %c0_3 = arith.constant 0 : index
    %c0_4 = arith.constant 0 : index
    %5 = vector.load %arg3[%c0_3, %c0_4] : memref<32x128xbf16, #tpu.memory_space<vmem>>, vector<32x128xbf16>
    %cst = arith.constant dense<0.000000e+00> : vector<64x128xf32>
    %6 = tpu.matmul %4, %5, %cst {dimension_numbers = #tpu.dot_dimension_numbers<[1], [0], [0], [1], [0, 0, 1, 1], [], []>} : vector<64x32xbf16>, vector<32x128xbf16>, vector<64x128xf32> -> vector<64x128xf32>
    %c0_5 = arith.constant 0 : index
    %c0_6 = arith.constant 0 : index
    %7 = vector.load %arg4[%c0_5, %c0_6] : memref<1x128xf32, #tpu.memory_space<vmem>>, vector<1x128xf32>
    %8 = vector.broadcast %7 : vector<1x128xf32> to vector<64x128xf32>
    %9 = arith.addf %6, %8 : vector<64x128xf32>
    %cst_7 = arith.constant 0.000000e+00 : f32
    %10 = vector.broadcast %cst_7 : f32 to vector<64x128xf32>
    %11 = arith.maximumf %9, %10 : vector<64x128xf32>
    %c0_8 = arith.constant 0 : index
    %c0_9 = arith.constant 0 : index
    %12 = vector.load %arg6[%c0_8, %c0_9] : memref<8x128xf32, #tpu.memory_space<vmem>>, vector<8x128xf32>
    %13 = vector.shape_cast %11 : vector<64x128xf32> to vector<8x8x128xf32>
    %cst_10 = arith.constant dense<0.000000e+00> : vector<8x128xf32>
    %14 = vector.multi_reduction <add>, %13, %cst_10 [0] : vector<8x8x128xf32> to vector<8x128xf32>
    %15 = arith.addf %12, %14 : vector<8x128xf32>
    %c0_11 = arith.constant 0 : index
    %c0_12 = arith.constant 0 : index
    %16 = vector.load %arg6[%c0_11, %c0_12] : memref<8x128xf32, #tpu.memory_space<vmem>>, vector<8x128xf32>
    tpu.vector_store %arg6[%c0_11, %c0_12], %15 {strides = array<i32>} : memref<8x128xf32, #tpu.memory_space<vmem>>, vector<8x128xf32>,
    %c0_i32_13 = arith.constant 0 : i32
    %17 = arith.cmpi eq, %arg1, %c0_i32_13 : i32
    %18 = arith.extui %17 : i1 to i32
    %c0_i32_14 = arith.constant 0 : i32
    %19 = arith.cmpi ne, %18, %c0_i32_14 : i32
    scf.if %19 {
      %c0_15 = arith.constant 0 : index
      %c0_16 = arith.constant 0 : index
      %20 = vector.load %arg6[%c0_15, %c0_16] : memref<8x128xf32, #tpu.memory_space<vmem>>, vector<8x128xf32>
      %cst_17 = arith.constant dense<0.000000e+00> : vector<128xf32>
      %21 = vector.multi_reduction <add>, %20, %cst_17 [0] : vector<8x128xf32> to vector<128xf32>
      %22 = vector.shape_cast %21 : vector<128xf32> to vector<1x128xf32>
      %cst_18 = arith.constant 1.562500e-02 : f32
      %23 = vector.broadcast %cst_18 : f32 to vector<1x128xf32>
      %24 = arith.mulf %22, %23 : vector<1x128xf32>
      %c0_19 = arith.constant 0 : index
      %c0_20 = arith.constant 0 : index
      %c0_21 = arith.constant 0 : index
      %25 = vector.load %arg5[%c0_19, %c0_20, %c0_21] : memref<1x1x128xf32, #tpu.memory_space<vmem>>, vector<1x1x128xf32>
      %26 = vector.shape_cast %25 : vector<1x1x128xf32> to vector<1x128xf32>
      %27 = vector.shape_cast %24 : vector<1x128xf32> to vector<1x1x128xf32>
      tpu.vector_store %arg5[%c0_19, %c0_20, %c0_21], %27 {strides = array<i32>} : memref<1x1x128xf32, #tpu.memory_space<vmem>>, vector<1x1x128xf32>,
    } else {
    }
    return
  }
  func.func @transform_0(%arg0: i32, %arg1: i32) -> (i32, i32, i32) {
    %c0_i32 = arith.constant 0 : i32
    %c0_i32_0 = arith.constant 0 : i32
    return %arg0, %arg1, %c0_i32 : i32, i32, i32
  }
  func.func @transform_1(%arg0: i32, %arg1: i32) -> (i32, i32) {
    %c0_i32 = arith.constant 0 : i32
    %c0_i32_0 = arith.constant 0 : i32
    %c0_i32_1 = arith.constant 0 : i32
    return %c0_i32, %c0_i32_0 : i32, i32
  }
  func.func @transform_2(%arg0: i32, %arg1: i32) -> (i32, i32) {
    %c0_i32 = arith.constant 0 : i32
    %c0_i32_0 = arith.constant 0 : i32
    %c0_i32_1 = arith.constant 0 : i32
    return %c0_i32, %c0_i32_0 : i32, i32
  }
  func.func @transform_3(%arg0: i32, %arg1: i32) -> (i32, i32, i32) {
    %c0_i32 = arith.constant 0 : i32
    %c0_i32_0 = arith.constant 0 : i32
    %c0_i32_1 = arith.constant 0 : i32
    return %arg0, %c0_i32, %c0_i32_0 : i32, i32, i32
  }
}

module attributes {stable_mosaic.version = 11 : i64} {
  func.func @_vision_proj_kernel(%arg0: i32, %arg1: memref<2x128xf32, #tpu.memory_space<vmem>>, %arg2: memref<128x2048xbf16, #tpu.memory_space<vmem>>, %arg3: memref<1x2048xf32, #tpu.memory_space<vmem>>, %arg4: memref<2048x512xbf16, #tpu.memory_space<vmem>>, %arg5: memref<1x512xf32, #tpu.memory_space<vmem>>, %arg6: memref<2x512xf32, #tpu.memory_space<vmem>>) attributes {dimension_semantics = [#tpu.dimension_semantics<parallel>], iteration_bounds = array<i64: 4>, scalar_prefetch = 0 : i64, scratch_operands = 0 : i64, tpu.core_type = #tpu.core_type<tc>, window_params = [{pipeline_mode = #tpu.pipeline_mode<synchronous>, transform_indices = @transform_0, window_bounds = array<i64: 2, 128>}, {pipeline_mode = #tpu.pipeline_mode<synchronous>, transform_indices = @transform_1, window_bounds = array<i64: 128, 2048>}, {pipeline_mode = #tpu.pipeline_mode<synchronous>, transform_indices = @transform_2, window_bounds = array<i64: 1, 2048>}, {transform_indices = @transform_3, window_bounds = array<i64: 2048, 512>}, {transform_indices = @transform_4, window_bounds = array<i64: 1, 512>}, {transform_indices = @transform_5, window_bounds = array<i64: 2, 512>}]} {
    %c0 = arith.constant 0 : index
    %c0_0 = arith.constant 0 : index
    %0 = vector.load %arg1[%c0, %c0_0] : memref<2x128xf32, #tpu.memory_space<vmem>>, vector<2x128xf32>
    %1 = arith.truncf %0 : vector<2x128xf32> to vector<2x128xbf16>
    %c0_1 = arith.constant 0 : index
    %c0_2 = arith.constant 0 : index
    %2 = vector.load %arg2[%c0_1, %c0_2] : memref<128x2048xbf16, #tpu.memory_space<vmem>>, vector<128x2048xbf16>
    %cst = arith.constant dense<0.000000e+00> : vector<2x2048xf32>
    %3 = tpu.matmul %1, %2, %cst {dimension_numbers = #tpu.dot_dimension_numbers<[1], [0], [0], [1], [0, 0, 1, 1], [], []>} : vector<2x128xbf16>, vector<128x2048xbf16>, vector<2x2048xf32> -> vector<2x2048xf32>
    %c0_3 = arith.constant 0 : index
    %c0_4 = arith.constant 0 : index
    %4 = vector.load %arg3[%c0_3, %c0_4] : memref<1x2048xf32, #tpu.memory_space<vmem>>, vector<1x2048xf32>
    %5 = vector.broadcast %4 : vector<1x2048xf32> to vector<2x2048xf32>
    %6 = arith.addf %3, %5 : vector<2x2048xf32>
    %cst_5 = arith.constant 0.000000e+00 : f32
    %7 = vector.broadcast %cst_5 : f32 to vector<2x2048xf32>
    %8 = arith.maximumf %6, %7 : vector<2x2048xf32>
    %9 = arith.truncf %8 : vector<2x2048xf32> to vector<2x2048xbf16>
    %c0_6 = arith.constant 0 : index
    %c0_7 = arith.constant 0 : index
    %10 = vector.load %arg4[%c0_6, %c0_7] : memref<2048x512xbf16, #tpu.memory_space<vmem>>, vector<2048x512xbf16>
    %cst_8 = arith.constant dense<0.000000e+00> : vector<2x512xf32>
    %11 = tpu.matmul %9, %10, %cst_8 {dimension_numbers = #tpu.dot_dimension_numbers<[1], [0], [0], [1], [0, 0, 1, 1], [], []>} : vector<2x2048xbf16>, vector<2048x512xbf16>, vector<2x512xf32> -> vector<2x512xf32>
    %c0_9 = arith.constant 0 : index
    %c0_10 = arith.constant 0 : index
    %12 = vector.load %arg5[%c0_9, %c0_10] : memref<1x512xf32, #tpu.memory_space<vmem>>, vector<1x512xf32>
    %13 = vector.broadcast %12 : vector<1x512xf32> to vector<2x512xf32>
    %14 = arith.addf %11, %13 : vector<2x512xf32>
    %c0_11 = arith.constant 0 : index
    %c0_12 = arith.constant 0 : index
    %15 = vector.load %arg6[%c0_11, %c0_12] : memref<2x512xf32, #tpu.memory_space<vmem>>, vector<2x512xf32>
    tpu.vector_store %arg6[%c0_11, %c0_12], %14 {strides = array<i32>} : memref<2x512xf32, #tpu.memory_space<vmem>>, vector<2x512xf32>,
    return
  }
  func.func @transform_0(%arg0: i32) -> (i32, i32) {
    %c0_i32 = arith.constant 0 : i32
    %c0_i32_0 = arith.constant 0 : i32
    %c0_i32_1 = arith.constant 0 : i32
    return %c0_i32, %c0_i32_0 : i32, i32
  }
  func.func @transform_1(%arg0: i32) -> (i32, i32) {
    %c0_i32 = arith.constant 0 : i32
    %c0_i32_0 = arith.constant 0 : i32
    %c0_i32_1 = arith.constant 0 : i32
    return %c0_i32, %c0_i32_0 : i32, i32
  }
  func.func @transform_2(%arg0: i32) -> (i32, i32) {
    %c0_i32 = arith.constant 0 : i32
    %c0_i32_0 = arith.constant 0 : i32
    %c0_i32_1 = arith.constant 0 : i32
    return %c0_i32, %c0_i32_0 : i32, i32
  }
  func.func @transform_3(%arg0: i32) -> (i32, i32) {
    %c0_i32 = arith.constant 0 : i32
    %c0_i32_0 = arith.constant 0 : i32
    return %c0_i32, %arg0 : i32, i32
  }
  func.func @transform_4(%arg0: i32) -> (i32, i32) {
    %c0_i32 = arith.constant 0 : i32
    %c0_i32_0 = arith.constant 0 : i32
    return %c0_i32, %arg0 : i32, i32
  }
  func.func @transform_5(%arg0: i32) -> (i32, i32) {
    %c0_i32 = arith.constant 0 : i32
    %c0_i32_0 = arith.constant 0 : i32
    return %c0_i32, %arg0 : i32, i32
  }
}

module attributes {stable_mosaic.version = 11 : i64} {
  func.func @_text_kernel(%arg0: i32, %arg1: memref<16x768xf32, #tpu.memory_space<vmem>>, %arg2: memref<768x768xbf16, #tpu.memory_space<vmem>>, %arg3: memref<1x768xf32, #tpu.memory_space<vmem>>, %arg4: memref<768x256xbf16, #tpu.memory_space<vmem>>, %arg5: memref<1x256xf32, #tpu.memory_space<vmem>>, %arg6: memref<16x256xf32, #tpu.memory_space<vmem>>) attributes {dimension_semantics = [#tpu.dimension_semantics<parallel>], iteration_bounds = array<i64: 1>, scalar_prefetch = 0 : i64, scratch_operands = 0 : i64, tpu.core_type = #tpu.core_type<tc>, window_params = [{transform_indices = @transform_0, window_bounds = array<i64: 16, 768>}, {pipeline_mode = #tpu.pipeline_mode<synchronous>, transform_indices = @transform_1, window_bounds = array<i64: 768, 768>}, {pipeline_mode = #tpu.pipeline_mode<synchronous>, transform_indices = @transform_2, window_bounds = array<i64: 1, 768>}, {pipeline_mode = #tpu.pipeline_mode<synchronous>, transform_indices = @transform_3, window_bounds = array<i64: 768, 256>}, {pipeline_mode = #tpu.pipeline_mode<synchronous>, transform_indices = @transform_4, window_bounds = array<i64: 1, 256>}, {transform_indices = @transform_5, window_bounds = array<i64: 16, 256>}]} {
    %c0 = arith.constant 0 : index
    %c0_0 = arith.constant 0 : index
    %0 = vector.load %arg1[%c0, %c0_0] : memref<16x768xf32, #tpu.memory_space<vmem>>, vector<16x768xf32>
    %1 = arith.truncf %0 : vector<16x768xf32> to vector<16x768xbf16>
    %c0_1 = arith.constant 0 : index
    %c0_2 = arith.constant 0 : index
    %2 = vector.load %arg2[%c0_1, %c0_2] : memref<768x768xbf16, #tpu.memory_space<vmem>>, vector<768x768xbf16>
    %cst = arith.constant dense<0.000000e+00> : vector<16x768xf32>
    %3 = tpu.matmul %1, %2, %cst {dimension_numbers = #tpu.dot_dimension_numbers<[1], [0], [0], [1], [0, 0, 1, 1], [], []>} : vector<16x768xbf16>, vector<768x768xbf16>, vector<16x768xf32> -> vector<16x768xf32>
    %c0_3 = arith.constant 0 : index
    %c0_4 = arith.constant 0 : index
    %4 = vector.load %arg3[%c0_3, %c0_4] : memref<1x768xf32, #tpu.memory_space<vmem>>, vector<1x768xf32>
    %5 = vector.broadcast %4 : vector<1x768xf32> to vector<16x768xf32>
    %6 = arith.addf %3, %5 : vector<16x768xf32>
    %cst_5 = arith.constant 0.000000e+00 : f32
    %7 = vector.broadcast %cst_5 : f32 to vector<16x768xf32>
    %8 = arith.maximumf %6, %7 : vector<16x768xf32>
    %9 = arith.truncf %8 : vector<16x768xf32> to vector<16x768xbf16>
    %c0_6 = arith.constant 0 : index
    %c0_7 = arith.constant 0 : index
    %10 = vector.load %arg4[%c0_6, %c0_7] : memref<768x256xbf16, #tpu.memory_space<vmem>>, vector<768x256xbf16>
    %cst_8 = arith.constant dense<0.000000e+00> : vector<16x256xf32>
    %11 = tpu.matmul %9, %10, %cst_8 {dimension_numbers = #tpu.dot_dimension_numbers<[1], [0], [0], [1], [0, 0, 1, 1], [], []>} : vector<16x768xbf16>, vector<768x256xbf16>, vector<16x256xf32> -> vector<16x256xf32>
    %c0_9 = arith.constant 0 : index
    %c0_10 = arith.constant 0 : index
    %12 = vector.load %arg5[%c0_9, %c0_10] : memref<1x256xf32, #tpu.memory_space<vmem>>, vector<1x256xf32>
    %13 = vector.broadcast %12 : vector<1x256xf32> to vector<16x256xf32>
    %14 = arith.addf %11, %13 : vector<16x256xf32>
    %c0_11 = arith.constant 0 : index
    %c0_12 = arith.constant 0 : index
    %15 = vector.load %arg6[%c0_11, %c0_12] : memref<16x256xf32, #tpu.memory_space<vmem>>, vector<16x256xf32>
    tpu.vector_store %arg6[%c0_11, %c0_12], %14 {strides = array<i32>} : memref<16x256xf32, #tpu.memory_space<vmem>>, vector<16x256xf32>,
    return
  }
  func.func @transform_0(%arg0: i32) -> (i32, i32) {
    %c0_i32 = arith.constant 0 : i32
    %c0_i32_0 = arith.constant 0 : i32
    return %arg0, %c0_i32 : i32, i32
  }
  func.func @transform_1(%arg0: i32) -> (i32, i32) {
    %c0_i32 = arith.constant 0 : i32
    %c0_i32_0 = arith.constant 0 : i32
    %c0_i32_1 = arith.constant 0 : i32
    return %c0_i32, %c0_i32_0 : i32, i32
  }
  func.func @transform_2(%arg0: i32) -> (i32, i32) {
    %c0_i32 = arith.constant 0 : i32
    %c0_i32_0 = arith.constant 0 : i32
    %c0_i32_1 = arith.constant 0 : i32
    return %c0_i32, %c0_i32_0 : i32, i32
  }
  func.func @transform_3(%arg0: i32) -> (i32, i32) {
    %c0_i32 = arith.constant 0 : i32
    %c0_i32_0 = arith.constant 0 : i32
    %c0_i32_1 = arith.constant 0 : i32
    return %c0_i32, %c0_i32_0 : i32, i32
  }
  func.func @transform_4(%arg0: i32) -> (i32, i32) {
    %c0_i32 = arith.constant 0 : i32
    %c0_i32_0 = arith.constant 0 : i32
    %c0_i32_1 = arith.constant 0 : i32
    return %c0_i32, %c0_i32_0 : i32, i32
  }
  func.func @transform_5(%arg0: i32) -> (i32, i32) {
    %c0_i32 = arith.constant 0 : i32
    %c0_i32_0 = arith.constant 0 : i32
    return %arg0, %c0_i32 : i32, i32
  }
}

module attributes {stable_mosaic.version = 11 : i64} {
  func.func @_world_kernel(%arg0: i32, %arg1: memref<1x16x256xf32, #tpu.memory_space<vmem>>, %arg2: memref<1x1x16xf32, #tpu.memory_space<vmem>>, %arg3: memref<256x256xbf16, #tpu.memory_space<vmem>>, %arg4: memref<256x256xbf16, #tpu.memory_space<vmem>>, %arg5: memref<256x256xbf16, #tpu.memory_space<vmem>>, %arg6: memref<256x256xbf16, #tpu.memory_space<vmem>>, %arg7: memref<1x256xf32, #tpu.memory_space<vmem>>, %arg8: memref<1x256xf32, #tpu.memory_space<vmem>>, %arg9: memref<256x256xbf16, #tpu.memory_space<vmem>>, %arg10: memref<1x256xf32, #tpu.memory_space<vmem>>, %arg11: memref<1x1x256xf32, #tpu.memory_space<vmem>>, %arg12: memref<1x16x256xf32, #tpu.memory_space<vmem>>) attributes {dimension_semantics = [#tpu.dimension_semantics<parallel>], iteration_bounds = array<i64: 2>, scalar_prefetch = 0 : i64, scratch_operands = 0 : i64, tpu.core_type = #tpu.core_type<tc>, window_params = [{transform_indices = @transform_0, window_bounds = array<i64: 1, 16, 256>}, {transform_indices = @transform_1, window_bounds = array<i64: 1, 1, 16>}, {pipeline_mode = #tpu.pipeline_mode<synchronous>, transform_indices = @transform_2, window_bounds = array<i64: 256, 256>}, {pipeline_mode = #tpu.pipeline_mode<synchronous>, transform_indices = @transform_3, window_bounds = array<i64: 256, 256>}, {pipeline_mode = #tpu.pipeline_mode<synchronous>, transform_indices = @transform_4, window_bounds = array<i64: 256, 256>}, {pipeline_mode = #tpu.pipeline_mode<synchronous>, transform_indices = @transform_5, window_bounds = array<i64: 256, 256>}, {pipeline_mode = #tpu.pipeline_mode<synchronous>, transform_indices = @transform_6, window_bounds = array<i64: 1, 256>}, {pipeline_mode = #tpu.pipeline_mode<synchronous>, transform_indices = @transform_7, window_bounds = array<i64: 1, 256>}, {pipeline_mode = #tpu.pipeline_mode<synchronous>, transform_indices = @transform_8, window_bounds = array<i64: 256, 256>}, {pipeline_mode = #tpu.pipeline_mode<synchronous>, transform_indices = @transform_9, window_bounds = array<i64: 1, 256>}, {transform_indices = @transform_10, window_bounds = array<i64: 1, 1, 256>}, {transform_indices = @transform_11, window_bounds = array<i64: 1, 16, 256>}]} {
    %c0 = arith.constant 0 : index
    %c0_0 = arith.constant 0 : index
    %c0_1 = arith.constant 0 : index
    %0 = vector.load %arg1[%c0, %c0_0, %c0_1] : memref<1x16x256xf32, #tpu.memory_space<vmem>>, vector<1x16x256xf32>
    %c0_2 = arith.constant 0 : index
    %c0_3 = arith.constant 0 : index
    %c0_4 = arith.constant 0 : index
    %1 = vector.load %arg2[%c0_2, %c0_3, %c0_4] : memref<1x1x16xf32, #tpu.memory_space<vmem>>, vector<1x1x16xf32>
    %2 = vector.shape_cast %0 : vector<1x16x256xf32> to vector<16x256xf32>
    %3 = arith.truncf %2 : vector<16x256xf32> to vector<16x256xbf16>
    %c0_5 = arith.constant 0 : index
    %c0_6 = arith.constant 0 : index
    %4 = vector.load %arg3[%c0_5, %c0_6] : memref<256x256xbf16, #tpu.memory_space<vmem>>, vector<256x256xbf16>
    %cst = arith.constant dense<0.000000e+00> : vector<16x256xf32>
    %5 = tpu.matmul %3, %4, %cst {dimension_numbers = #tpu.dot_dimension_numbers<[1], [0], [0], [1], [0, 0, 1, 1], [], []>} : vector<16x256xbf16>, vector<256x256xbf16>, vector<16x256xf32> -> vector<16x256xf32>
    %6 = vector.shape_cast %5 : vector<16x256xf32> to vector<1x16x256xf32>
    %c0_7 = arith.constant 0 : index
    %c0_8 = arith.constant 0 : index
    %7 = vector.load %arg4[%c0_7, %c0_8] : memref<256x256xbf16, #tpu.memory_space<vmem>>, vector<256x256xbf16>
    %cst_9 = arith.constant dense<0.000000e+00> : vector<16x256xf32>
    %8 = tpu.matmul %3, %7, %cst_9 {dimension_numbers = #tpu.dot_dimension_numbers<[1], [0], [0], [1], [0, 0, 1, 1], [], []>} : vector<16x256xbf16>, vector<256x256xbf16>, vector<16x256xf32> -> vector<16x256xf32>
    %9 = vector.shape_cast %8 : vector<16x256xf32> to vector<1x16x256xf32>
    %c0_10 = arith.constant 0 : index
    %c0_11 = arith.constant 0 : index
    %10 = vector.load %arg5[%c0_10, %c0_11] : memref<256x256xbf16, #tpu.memory_space<vmem>>, vector<256x256xbf16>
    %cst_12 = arith.constant dense<0.000000e+00> : vector<16x256xf32>
    %11 = tpu.matmul %3, %10, %cst_12 {dimension_numbers = #tpu.dot_dimension_numbers<[1], [0], [0], [1], [0, 0, 1, 1], [], []>} : vector<16x256xbf16>, vector<256x256xbf16>, vector<16x256xf32> -> vector<16x256xf32>
    %12 = vector.shape_cast %11 : vector<16x256xf32> to vector<1x16x256xf32>
    %13 = arith.truncf %6 : vector<1x16x256xf32> to vector<1x16x256xbf16>
    %14 = arith.truncf %9 : vector<1x16x256xf32> to vector<1x16x256xbf16>
    "tpu.trace_start"() <{level = 10 : i32, message = "bqd,bkd->bqk"}> : () -> ()
    %cst_13 = arith.constant dense<0.000000e+00> : vector<1x16x16xf32>
    %15 = tpu.matmul %13, %14, %cst_13 {dimension_numbers = #tpu.dot_dimension_numbers<[2], [2], [1], [1], [0, 0, 0, 1, 1, 1], [0], [0]>} : vector<1x16x256xbf16>, vector<1x16x256xbf16>, vector<1x16x16xf32> -> vector<1x16x16xf32>
    "tpu.trace_stop"() : () -> ()
    %cst_14 = arith.constant 6.250000e-02 : f32
    %16 = vector.broadcast %cst_14 : f32 to vector<1x16x16xf32>
    %17 = arith.mulf %15, %16 : vector<1x16x16xf32>
    %cst_15 = arith.constant 1.000000e+00 : f32
    %18 = vector.broadcast %cst_15 : f32 to vector<1x1x16xf32>
    %19 = arith.subf %18, %1 : vector<1x1x16xf32>
    %cst_16 = arith.constant -1.000000e+09 : f32
    %20 = vector.broadcast %cst_16 : f32 to vector<1x1x16xf32>
    %21 = arith.mulf %19, %20 : vector<1x1x16xf32>
    %22 = vector.broadcast %21 : vector<1x1x16xf32> to vector<1x16x16xf32>
    %23 = arith.addf %17, %22 : vector<1x16x16xf32>
    %cst_17 = arith.constant dense<0xFF800000> : vector<1x16xf32>
    %24 = vector.multi_reduction <maximumf>, %23, %cst_17 [2] : vector<1x16x16xf32> to vector<1x16xf32>
    %25 = vector.shape_cast %24 : vector<1x16xf32> to vector<1x16x1xf32>
    %26 = vector.broadcast %25 : vector<1x16x1xf32> to vector<1x16x16xf32>
    %27 = arith.subf %23, %26 : vector<1x16x16xf32>
    %28 = math.exp %27 : vector<1x16x16xf32>
    %cst_18 = arith.constant dense<0.000000e+00> : vector<1x16xf32>
    %29 = vector.multi_reduction <add>, %28, %cst_18 [2] : vector<1x16x16xf32> to vector<1x16xf32>
    %30 = vector.shape_cast %29 : vector<1x16xf32> to vector<1x16x1xf32>
    %31 = tpu.reciprocal %30 {approx = true} : vector<1x16x1xf32> -> vector<1x16x1xf32>
    %32 = vector.broadcast %31 : vector<1x16x1xf32> to vector<1x16x16xf32>
    %33 = arith.mulf %28, %32 : vector<1x16x16xf32>
    %34 = arith.truncf %33 : vector<1x16x16xf32> to vector<1x16x16xbf16>
    %35 = arith.truncf %12 : vector<1x16x256xf32> to vector<1x16x256xbf16>
    "tpu.trace_start"() <{level = 10 : i32, message = "bqk,bkd->bqd"}> : () -> ()
    %cst_19 = arith.constant dense<0.000000e+00> : vector<1x16x256xf32>
    %36 = tpu.matmul %34, %35, %cst_19 {dimension_numbers = #tpu.dot_dimension_numbers<[2], [1], [1], [2], [0, 0, 0, 1, 1, 2], [0], [0]>} : vector<1x16x16xbf16>, vector<1x16x256xbf16>, vector<1x16x256xf32> -> vector<1x16x256xf32>
    "tpu.trace_stop"() : () -> ()
    %37 = vector.shape_cast %36 : vector<1x16x256xf32> to vector<16x256xf32>
    %38 = arith.truncf %37 : vector<16x256xf32> to vector<16x256xbf16>
    %c0_20 = arith.constant 0 : index
    %c0_21 = arith.constant 0 : index
    %39 = vector.load %arg6[%c0_20, %c0_21] : memref<256x256xbf16, #tpu.memory_space<vmem>>, vector<256x256xbf16>
    %cst_22 = arith.constant dense<0.000000e+00> : vector<16x256xf32>
    %40 = tpu.matmul %38, %39, %cst_22 {dimension_numbers = #tpu.dot_dimension_numbers<[1], [0], [0], [1], [0, 0, 1, 1], [], []>} : vector<16x256xbf16>, vector<256x256xbf16>, vector<16x256xf32> -> vector<16x256xf32>
    %41 = vector.shape_cast %40 : vector<16x256xf32> to vector<1x16x256xf32>
    %42 = arith.addf %41, %0 : vector<1x16x256xf32>
    %cst_23 = arith.constant dense<0.000000e+00> : vector<1x16xf32>
    %43 = vector.multi_reduction <add>, %42, %cst_23 [2] : vector<1x16x256xf32> to vector<1x16xf32>
    %44 = vector.shape_cast %43 : vector<1x16xf32> to vector<1x16x1xf32>
    %cst_24 = arith.constant 2.560000e+02 : f32
    %45 = vector.broadcast %cst_24 : f32 to vector<1x16x1xf32>
    %46 = arith.divf %44, %45 : vector<1x16x1xf32>
    %47 = vector.broadcast %46 : vector<1x16x1xf32> to vector<1x16x256xf32>
    %48 = arith.subf %42, %47 : vector<1x16x256xf32>
    %49 = arith.mulf %48, %48 : vector<1x16x256xf32>
    %cst_25 = arith.constant dense<0.000000e+00> : vector<1x16xf32>
    %50 = vector.multi_reduction <add>, %49, %cst_25 [2] : vector<1x16x256xf32> to vector<1x16xf32>
    %51 = vector.shape_cast %50 : vector<1x16xf32> to vector<1x16x1xf32>
    %cst_26 = arith.constant 2.560000e+02 : f32
    %52 = vector.broadcast %cst_26 : f32 to vector<1x16x1xf32>
    %53 = arith.divf %51, %52 : vector<1x16x1xf32>
    %54 = vector.broadcast %46 : vector<1x16x1xf32> to vector<1x16x256xf32>
    %55 = arith.subf %42, %54 : vector<1x16x256xf32>
    %cst_27 = arith.constant 9.99999974E-6 : f32
    %56 = vector.broadcast %cst_27 : f32 to vector<1x16x1xf32>
    %57 = arith.addf %53, %56 : vector<1x16x1xf32>
    %58 = math.rsqrt %57 : vector<1x16x1xf32>
    %59 = vector.broadcast %58 : vector<1x16x1xf32> to vector<1x16x256xf32>
    %60 = arith.mulf %55, %59 : vector<1x16x256xf32>
    %c0_28 = arith.constant 0 : index
    %c0_29 = arith.constant 0 : index
    %61 = vector.load %arg7[%c0_28, %c0_29] : memref<1x256xf32, #tpu.memory_space<vmem>>, vector<1x256xf32>
    %62 = vector.shape_cast %61 : vector<1x256xf32> to vector<1x1x256xf32>
    %63 = vector.broadcast %62 : vector<1x1x256xf32> to vector<1x16x256xf32>
    %64 = arith.mulf %60, %63 : vector<1x16x256xf32>
    %c0_30 = arith.constant 0 : index
    %c0_31 = arith.constant 0 : index
    %65 = vector.load %arg8[%c0_30, %c0_31] : memref<1x256xf32, #tpu.memory_space<vmem>>, vector<1x256xf32>
    %66 = vector.shape_cast %65 : vector<1x256xf32> to vector<1x1x256xf32>
    %67 = vector.broadcast %66 : vector<1x1x256xf32> to vector<1x16x256xf32>
    %68 = arith.addf %64, %67 : vector<1x16x256xf32>
    %c0_32 = arith.constant 0 : index
    %c0_33 = arith.constant 0 : index
    %c0_34 = arith.constant 0 : index
    %69 = vector.load %arg12[%c0_32, %c0_33, %c0_34] : memref<1x16x256xf32, #tpu.memory_space<vmem>>, vector<1x16x256xf32>
    tpu.vector_store %arg12[%c0_32, %c0_33, %c0_34], %68 {strides = array<i32>} : memref<1x16x256xf32, #tpu.memory_space<vmem>>, vector<1x16x256xf32>,
    %cst_35 = arith.constant dense<0.000000e+00> : vector<1x1xf32>
    %70 = vector.multi_reduction <add>, %1, %cst_35 [2] : vector<1x1x16xf32> to vector<1x1xf32>
    %71 = vector.shape_cast %70 : vector<1x1xf32> to vector<1x1x1xf32>
    %cst_36 = arith.constant 1.000000e+00 : f32
    %72 = vector.broadcast %cst_36 : f32 to vector<1x1x1xf32>
    %73 = arith.maximumf %71, %72 : vector<1x1x1xf32>
    "tpu.trace_start"() <{level = 10 : i32, message = "bqs,bsd->bqd"}> : () -> ()
    %cst_37 = arith.constant dense<0.000000e+00> : vector<1x1x256xf32>
    %74 = tpu.matmul %1, %68, %cst_37 {dimension_numbers = #tpu.dot_dimension_numbers<[2], [1], [1], [2], [0, 0, 0, 1, 1, 2], [0], [0]>} : vector<1x1x16xf32>, vector<1x16x256xf32>, vector<1x1x256xf32> -> vector<1x1x256xf32>
    "tpu.trace_stop"() : () -> ()
    %75 = vector.broadcast %73 : vector<1x1x1xf32> to vector<1x1x256xf32>
    %76 = arith.divf %74, %75 : vector<1x1x256xf32>
    %77 = vector.shape_cast %76 : vector<1x1x256xf32> to vector<1x256xf32>
    %78 = arith.truncf %77 : vector<1x256xf32> to vector<1x256xbf16>
    %c0_38 = arith.constant 0 : index
    %c0_39 = arith.constant 0 : index
    %79 = vector.load %arg9[%c0_38, %c0_39] : memref<256x256xbf16, #tpu.memory_space<vmem>>, vector<256x256xbf16>
    %cst_40 = arith.constant dense<0.000000e+00> : vector<1x256xf32>
    %80 = tpu.matmul %78, %79, %cst_40 {dimension_numbers = #tpu.dot_dimension_numbers<[1], [0], [0], [1], [0, 0, 1, 1], [], []>} : vector<1x256xbf16>, vector<256x256xbf16>, vector<1x256xf32> -> vector<1x256xf32>
    %c0_41 = arith.constant 0 : index
    %c0_42 = arith.constant 0 : index
    %81 = vector.load %arg10[%c0_41, %c0_42] : memref<1x256xf32, #tpu.memory_space<vmem>>, vector<1x256xf32>
    %82 = arith.addf %80, %81 : vector<1x256xf32>
    %cst_43 = arith.constant dense<0xFF800000> : vector<1xf32>
    %83 = vector.multi_reduction <maximumf>, %82, %cst_43 [1] : vector<1x256xf32> to vector<1xf32>
    %84 = vector.shape_cast %83 : vector<1xf32> to vector<1x1xf32>
    %85 = vector.broadcast %84 : vector<1x1xf32> to vector<1x256xf32>
    %86 = arith.subf %82, %85 : vector<1x256xf32>
    %87 = math.exp %86 : vector<1x256xf32>
    %cst_44 = arith.constant dense<0.000000e+00> : vector<1xf32>
    %88 = vector.multi_reduction <add>, %87, %cst_44 [1] : vector<1x256xf32> to vector<1xf32>
    %89 = vector.shape_cast %88 : vector<1xf32> to vector<1x1xf32>
    %90 = vector.broadcast %89 : vector<1x1xf32> to vector<1x256xf32>
    %91 = arith.divf %87, %90 : vector<1x256xf32>
    %92 = vector.shape_cast %91 : vector<1x256xf32> to vector<1x1x256xf32>
    %c0_45 = arith.constant 0 : index
    %c0_46 = arith.constant 0 : index
    %c0_47 = arith.constant 0 : index
    %93 = vector.load %arg11[%c0_45, %c0_46, %c0_47] : memref<1x1x256xf32, #tpu.memory_space<vmem>>, vector<1x1x256xf32>
    tpu.vector_store %arg11[%c0_45, %c0_46, %c0_47], %92 {strides = array<i32>} : memref<1x1x256xf32, #tpu.memory_space<vmem>>, vector<1x1x256xf32>,
    return
  }
  func.func @transform_0(%arg0: i32) -> (i32, i32, i32) {
    %c0_i32 = arith.constant 0 : i32
    %c0_i32_0 = arith.constant 0 : i32
    %c0_i32_1 = arith.constant 0 : i32
    return %arg0, %c0_i32, %c0_i32_0 : i32, i32, i32
  }
  func.func @transform_1(%arg0: i32) -> (i32, i32, i32) {
    %c0_i32 = arith.constant 0 : i32
    %c0_i32_0 = arith.constant 0 : i32
    %c0_i32_1 = arith.constant 0 : i32
    return %arg0, %c0_i32, %c0_i32_0 : i32, i32, i32
  }
  func.func @transform_2(%arg0: i32) -> (i32, i32) {
    %c0_i32 = arith.constant 0 : i32
    %c0_i32_0 = arith.constant 0 : i32
    %c0_i32_1 = arith.constant 0 : i32
    return %c0_i32, %c0_i32_0 : i32, i32
  }
  func.func @transform_3(%arg0: i32) -> (i32, i32) {
    %c0_i32 = arith.constant 0 : i32
    %c0_i32_0 = arith.constant 0 : i32
    %c0_i32_1 = arith.constant 0 : i32
    return %c0_i32, %c0_i32_0 : i32, i32
  }
  func.func @transform_4(%arg0: i32) -> (i32, i32) {
    %c0_i32 = arith.constant 0 : i32
    %c0_i32_0 = arith.constant 0 : i32
    %c0_i32_1 = arith.constant 0 : i32
    return %c0_i32, %c0_i32_0 : i32, i32
  }
  func.func @transform_5(%arg0: i32) -> (i32, i32) {
    %c0_i32 = arith.constant 0 : i32
    %c0_i32_0 = arith.constant 0 : i32
    %c0_i32_1 = arith.constant 0 : i32
    return %c0_i32, %c0_i32_0 : i32, i32
  }
  func.func @transform_6(%arg0: i32) -> (i32, i32) {
    %c0_i32 = arith.constant 0 : i32
    %c0_i32_0 = arith.constant 0 : i32
    %c0_i32_1 = arith.constant 0 : i32
    return %c0_i32, %c0_i32_0 : i32, i32
  }
  func.func @transform_7(%arg0: i32) -> (i32, i32) {
    %c0_i32 = arith.constant 0 : i32
    %c0_i32_0 = arith.constant 0 : i32
    %c0_i32_1 = arith.constant 0 : i32
    return %c0_i32, %c0_i32_0 : i32, i32
  }
  func.func @transform_8(%arg0: i32) -> (i32, i32) {
    %c0_i32 = arith.constant 0 : i32
    %c0_i32_0 = arith.constant 0 : i32
    %c0_i32_1 = arith.constant 0 : i32
    return %c0_i32, %c0_i32_0 : i32, i32
  }
  func.func @transform_9(%arg0: i32) -> (i32, i32) {
    %c0_i32 = arith.constant 0 : i32
    %c0_i32_0 = arith.constant 0 : i32
    %c0_i32_1 = arith.constant 0 : i32
    return %c0_i32, %c0_i32_0 : i32, i32
  }
  func.func @transform_10(%arg0: i32) -> (i32, i32, i32) {
    %c0_i32 = arith.constant 0 : i32
    %c0_i32_0 = arith.constant 0 : i32
    %c0_i32_1 = arith.constant 0 : i32
    return %arg0, %c0_i32, %c0_i32_0 : i32, i32, i32
  }
  func.func @transform_11(%arg0: i32) -> (i32, i32, i32) {
    %c0_i32 = arith.constant 0 : i32
    %c0_i32_0 = arith.constant 0 : i32
    %c0_i32_1 = arith.constant 0 : i32
    return %arg0, %c0_i32, %c0_i32_0 : i32, i32, i32
  }
}

</mosaic_0001>

<bundles_post_ra>
// kernel: physical_ai_forward.4
= control target key start
LH: loop header
LB: loop body
LE: loop exit
PB: predicated region body
PF: predicated region fallthrough
CT: control target
= control target key end

     0   :  { %8 = vsyncpa [#allocation4], 0  ;;  %s725_s0 = inlined_call_operand.vmem [shape: bf16[2,64,32], index: 0, kind: input, shape index: {}]   ;;  %s726_s1 = inlined_call_operand.hbm [shape: bf16[32,128], index: 1, kind: input, shape index: {}]   ;;  %s727_s2 = inlined_call_operand.hbm [shape: f32[1,128], index: 2, kind: input, shape index: {}]   ;;  %s728_s3 = inlined_call_operand.vmem [shape: f32[2,1,128], index: 3, kind: output, shape index: {}]  }
   0x1   :  { %9 = vsyncpa [#allocation6], 0  ;;  %s655_s12 = smov 0   ;;  %s657_s13 = smov 0  }
   0x2   :  { %s659_s14 = smov 0  }
   0x3 LB: > { %s437_s15 = sadd.s32 4294967295, %s629_s14   ;;  %s27_s16 = sadd.s32 1, %s625_s13  ;;  %s629_s14 = sphi %s659_s14, %s15_s14   ;;  %s625_s13 = sphi %s657_s13, %s732_s13   ;;  %s621_s12 = sphi %s655_s12, %s731_s12  }
   0x4   : > { %p29_p0 = scmp.ge.s32.totalorder %s27_s16, 2  ;;  %p439_p1 = scmp.ge.s32.totalorder %s629_s14, 1 }
   0x5   : > { %p128_p2 = scmp.lt.s32.totalorder %s629_s14, 3  ;;  %p680_p4 = scmp.eq.s32.totalorder %s437_s15, 0 }
   0x6   : > { %s734_s16 = smov (%p29_p0, %s27_s16), 0  ;;  %s139_s21 = sshll.u32 %s726_s1, 4  ;;  %s140_s21 = int_to_ptr.hbm [resolvable:$true] %s139_s21 }
   0x7   : > { %p676_p3 = pnand %p439_p1, %p128_p2  ;;  %s631_s22 = smov [#allocation3]  }
   0x8   : > { %s141_s23 = sshll.u32 %s631_s22, 4  ;;  %s154_s26 = sshll.u32 %s727_s2, 4  ;;  %s142_s23 = int_to_ptr.vmem [resolvable:$true] %s141_s23  ;;  %s155_s26 = int_to_ptr.hbm [resolvable:$true] %s154_s26 }
   0x9   : > { %p499_p5 = pneg %p676_p3  ;;  %s632_s27 = smov 64  }
   0xa   : > { %s633_s28 = smov 4   ;;  %s634_s29 = smov [#allocation5]  }
   0xb   : > { %p500_p6 = pnand %p680_p4, %p499_p5  ;;  %s156_s30 = sshll.u32 %s634_s29, 4  ;;  %s157_s30 = int_to_ptr.vmem [resolvable:$true] %s156_s30 }
   0xc   : > { %182 = sbr.rel (%p676_p3) target bundleno = 195 (0xc3), region = 32 }
   0xd   : > { %502 = dma.hbm_to_vmem [thread:$0]  (!%p500_p6), %s140_s21, 256, %s142_s23, [#allocation4], %s632_s27, %s632_s27, %s633_s28  }
   0xe   : > { %505 = dma.hbm_to_vmem [thread:$0]  (!%p500_p6), %s155_s26, 16, %s157_s30, [#allocation6]  }
  0x11   : > { %612 = dma.done.wait (%p680_p4), [#allocation4], 256  }
  0x12   : > { %614 = vsyncadd (%p680_p4), [#allocation4], 4294967040 }
  0x13   : > { %616 = dma.done.wait (%p680_p4), [#allocation6], 16  }
  0x14   : > { %618 = vsyncadd (%p680_p4), [#allocation6], 4294967280  ;;  %p215_p7 = scmp.lt.s32.totalorder %s621_s12, 1  ;;  %v484_v0 = vld [vmem:[#allocation3 + $0x8] sm:$0xff]  ;;  %v483_v1 = vld [vmem:[#allocation3] sm:$0xff]  ;;  %vm281_vm0 = vcmask 261120  }
  0x15   : > { %300 = vmatpush.bf16.msra.mxu0 %v484_v0  ;;  %485 = vmatpush.bf16.msra.mxu1 %v484_v0  ;;  %v538_v8 = vld [vmem:[#allocation5] ss:$0 sm:$0xff] }
  0x16   : > { %s736_s12 = smov (!%p215_p7, %s621_s12), 1  ;;  %486 = vmatpush.bf16.msra.mxu2 %v484_v0  ;;  %487 = vmatpush.bf16.msra.mxu3 %v484_v0 }
  0x17   : > { %s478_s4 = sshll.u32 %s736_s12, 5  ;;  %s226_s10 = scalar_lea.vmem %s728_s3, %s736_s12 }
  0x18   : > { %s222_s7 = scalar_lea.vmem %s725_s0, %s478_s4 }
  0x19   : > { %v479_v2 = vld [vmem:[%s222_s7] sm:$0xff]  ;;  %v480_v3 = vld [vmem:[%s222_s7 + $0x8] sm:$0xff]  ;;  %301 = vmatpush.bf16.msra.mxu0 %v483_v1  ;;  %488 = vmatpush.bf16.msra.mxu1 %v483_v1  ;;  %v481_v4 = vld [vmem:[%s222_s7 + $0x10] sm:$0xff] }
  0x1a   : > { %v482_v5 = vld [vmem:[%s222_s7 + $0x18] sm:$0xff]  ;;  %489 = vmatpush.bf16.msra.mxu2 %v483_v1  ;;  %490 = vmatpush.bf16.msra.mxu3 %v483_v1 }
  0x1c   : > { %472 = vmatmul.msk.bf16.vlgmr.msra.gmra.mxu0 %vm281_vm0, %v479_v2  ;;  %473 = vmatmul.msk.bf16.vlgmr.msra.gmra.mxu1 %vm281_vm0, %v480_v3 }
  0x1d   : > { %474 = vmatmul.msk.bf16.vlgmr.msra.gmra.mxu2 %vm281_vm0, %v481_v4  ;;  %475 = vmatmul.msk.bf16.vlgmr.msra.gmra.mxu3 %vm281_vm0, %v482_v5 }
  0x99   : > { %v303_v6 = vpop.f32.mrf.mxu0  ;;  %v308_v7 = vpop.f32.mrf.mxu1 }
  0x9a   : > { %v304_v9 = vadd.f32 %v538_v8, %v303_v6  ;;  %v309_v14 = vadd.f32 %v538_v8, %v308_v7 }
  0x9c   : > { %v323_v16 = vmax.f32 %v304_v9, 0.0  ;;  %v325_v19 = vmax.f32 %v309_v14, 0.0 }
  0xa0   : > { %v313_v10 = vpop.f32.mrf.mxu2  ;;  %v318_v11 = vpop.f32.mrf.mxu3 }
  0xa1   : > { %v305_v12 = vpop.f32.mrf.mxu0  ;;  %v310_v13 = vpop.f32.mrf.mxu1  ;;  %v314_v20 = vadd.f32 %v538_v8, %v313_v10  ;;  %v319_v28 = vadd.f32 %v538_v8, %v318_v11 }
  0xa2   : > { %v306_v15 = vadd.f32 %v538_v8, %v305_v12  ;;  %v311_v18 = vadd.f32 %v538_v8, %v310_v13 }
  0xa3   : > { %v327_v27 = vmax.f32 %v314_v20, 0.0  ;;  %v329_v33 = vmax.f32 %v319_v28, 0.0 }
  0xa4   : > { %v324_v17 = vmax.f32 %v306_v15, 0.0  ;;  %v326_v22 = vmax.f32 %v311_v18, 0.0 }
  0xa6   : > { %v332_v21 = vadd.f32 %v324_v17, %v323_v16 }
  0xa8   : > { %v333_v23 = vadd.f32 %v332_v21, %v325_v19  ;;  %v315_v24 = vpop.f32.mrf.mxu2  ;;  %v320_v26 = vpop.f32.mrf.mxu3 }
  0xa9   : > { %v316_v25 = vadd.f32 %v538_v8, %v315_v24  ;;  %v321_v32 = vadd.f32 %v538_v8, %v320_v26 }
  0xaa   : > { %v334_v29 = vadd.f32 %v333_v23, %v326_v22 }
  0xab   : > { %v328_v30 = vmax.f32 %v316_v25, 0.0  ;;  %v330_v35 = vmax.f32 %v321_v32, 0.0 }
  0xac   : > { %v335_v31 = vadd.f32 %v334_v29, %v327_v27 }
  0xae   : > { %v336_v34 = vadd.f32 %v335_v31, %v328_v30 }
  0xb0   : > { %v337_v36 = vadd.f32 %v336_v34, %v329_v33 }
  0xb2   : > { %v338_v37 = vadd.f32 %v337_v36, %v330_v35 }
  0xb4   : > { %v345_v38 = vrot.slane %v338_v37, 4 }
  0xb6   : > { %v346_v39 = vadd.f32 %v345_v38, %v338_v37 }
  0xb8   : > { %v347_v40 = vrot.slane %v346_v39, 2 }
  0xba   : > { %v348_v41 = vadd.f32 %v347_v40, %v346_v39 }
  0xbc   : > { %v349_v42 = vrot.slane %v348_v41, 1 }
  0xbe   : > { %v350_v43 = vadd.f32 %v349_v42, %v348_v41 }
  0xc0   : > { %v351_v44 = vmul.f32 0.015625, %v350_v43 }
  0xc2   : > { %352 = vst [vmem:[%s226_s10] sm:$0x1] %v351_v44 }
  0xc3 PF: > { %s15_s14 = sadd.s32 1, %s629_s14   ;;  %s731_s12 = smov %s625_s13 }
  0xc4   : > { %p12_p8 = scmp.ge.s32.totalorder %s15_s14, 4   ;;  %s732_s13 = smov %s734_s16 }
  0xc6   :  { %14 = sbr.rel (!%p12_p8) target bundleno = 3 (0x3), region = 79 }
  0xcb   :  { %370 = vsyncpa [#allocation4], 1 }
  0xcc   :  { %372 = vsyncpa [#allocation4 + $0x1], 1 }
  0xcd   :  { %373 = vsyncpa [#allocation6], 1 }

// kernel: physical_ai_forward.7
= control target key start
LH: loop header
LB: loop body
LE: loop exit
PB: predicated region body
PF: predicated region fallthrough
CT: control target
= control target key end

     0   :  { %s3959_s0 = inlined_call_operand.vmem [shape: f32[2,16,256], index: 0, kind: input, shape index: {}]   ;;  %s3960_s1 = inlined_call_operand.vmem [shape: f32[2,1,16], index: 1, kind: input, shape index: {}]   ;;  %s3961_s2 = inlined_call_operand.hbm [shape: bf16[256,256], index: 2, kind: input, shape index: {}]   ;;  %s3962_s3 = inlined_call_operand.hbm [shape: bf16[256,256], index: 3, kind: input, shape index: {}]   ;;  %s3963_s4 = inlined_call_operand.hbm [shape: bf16[256,256], index: 4, kind: input, shape index: {}]   ;;  %s3964_s5 = inlined_call_operand.hbm [shape: bf16[256,256], index: 5, kind: input, shape index: {}]   ;;  %s3965_s6 = inlined_call_operand.hbm [shape: f32[1,256], index: 6, kind: input, shape index: {}]   ;;  %s3966_s7 = inlined_call_operand.hbm [shape: f32[1,256], index: 7, kind: input, shape index: {}]   ;;  %s3967_s8 = inlined_call_operand.hbm [shape: bf16[256,256], index: 8, kind: input, shape index: {}]   ;;  %s3968_s9 = inlined_call_operand.hbm [shape: f32[1,256], index: 9, kind: input, shape index: {}]   ;;  %s3969_s10 = inlined_call_operand.vmem [shape: f32[2,1,256], index: 10, kind: output, shape index: {0}]   ;;  %s3970_s11 = inlined_call_operand.hbm [shape: f32[2,16,256], index: 11, kind: output, shape index: {1}]  }
   0x1   :  { %3975 = sst [smem:[#allocation27_spill]] %s3962_s3 }
   0x2   :  { %3976 = sst [smem:[#allocation28_spill]] %s3964_s5 }
   0x3   :  { %3977 = sst [smem:[#allocation29_spill]] %s3966_s7 }
   0x4   :  { %17 = vsyncpa [#allocation3], 0 }
   0x5   :  { %18 = vsyncpa [#allocation6], 0 }
   0x6   :  { %19 = vsyncpa [#allocation9], 0 }
   0x7   :  { %20 = vsyncpa [#allocation12], 0 }
   0x8   :  { %21 = vsyncpa [#allocation15], 0 }
   0x9   :  { %22 = vsyncpa [#allocation4], 0 }
   0xa   :  { %24 = vsyncpa [#allocation4 + $0x1], 0  ;;  %s3697_s17 = smov 0   ;;  %s3699_s18 = smov 0  }
   0xb   :  { %s3701_s19 = smov 0   ;;  %s3703_s20 = smov 0  }
   0xc LB: > { %3978 = sst [smem:[#allocation23_spill]] %s3618_s19  ;;  %s3718_s21 = sadd.s32 4294967295, %s3622_s20   ;;  %s3622_s20 = sphi %s3703_s20, %s3990_s20   ;;  %s3618_s19 = sphi %s3701_s19, %s3992_s19   ;;  %s3614_s18 = sphi %s3699_s18, %s3994_s18   ;;  %s3610_s17 = sphi %s3697_s17, %s3993_s17  }
   0xd   : > { %s2314_s22 = sadd.s32 4294967294, %s3622_s20   ;;  %s3722_s23 = sadd.s32 1, %s3622_s20  }
   0xe   : > { %3979 = sst [smem:[#allocation24_spill]] %s3722_s23  ;;  %s283_s24 = sadd.s32 1, %s3618_s19 }
   0xf   : > { %s280_s25 = ssub.s32 %s3622_s20, %s3722_s23  ;;  %p293_p0 = scmp.ne.s32.totalorder %s3618_s19, %s3614_s18 }
  0x10   : > { %p281_p1 = scmp.eq.s32.totalorder %s280_s25, 0  ;;  %p294_p2 = scmp.eq.s32.totalorder %s3718_s21, 1 }
  0x11   : > { %p299_p3 = scmp.ne.s32.totalorder %s3614_s18, %s3610_s17  ;;  %p300_p4 = scmp.eq.s32.totalorder %s2314_s22, 1 }
  0x12   : > { %s3733_s26 = scalar_select %p281_p1, %s3618_s19, %s283_s24  }
  0x13   : > { %p3735_p5 = por %p294_p2, %p293_p0  ;;  %p3739_p6 = por %p300_p4, %p299_p3 }
  0x14   : > { %3980 = sst [smem:[#allocation25_spill]] %s3733_s26  ;;  %p2315_p7 = scmp.ge.s32.totalorder %s3622_s20, 1 }
  0x15   : > { %s3982_s28 = scalar_select %p3739_p6, 1, 0 }
  0x16   : > { %p307_p8 = scmp.lt.s32.totalorder %s3622_s20, 3  ;;  %p3212_p9 = scmp.eq.s32.totalorder %s3718_s21, 0 }
  0x17   : > { %3983 = sst [smem:[#allocation26_spill]] %s3982_s28  ;;  %s3624_s24 = smov [#allocation5]  }
  0x18   : > { %p3746_p10 = pnand %p2315_p7, %p307_p8  ;;  %s3985_s3 = sld [smem:[#allocation27_spill]] }
  0x19   : > { %s3986_s5 = sld [smem:[#allocation28_spill]]  ;;  %s334_s25 = sshll.u32 %s3624_s24, 4  ;;  %s335_s25 = int_to_ptr.vmem [resolvable:$true] %s334_s25 }
  0x1a   : > { %p3183_p11 = pneg %p3746_p10  ;;  %s3625_s30 = smov 128  }
  0x1b   : > { %s3626_s12 = smov 8   ;;  %s3627_s14 = smov [#allocation8]  }
  0x1c   : > { %p3760_p12 = pnand %p3212_p9, %p3183_p11  ;;  %s362_s15 = sshll.u32 %s3627_s14, 4  ;;  %s363_s15 = int_to_ptr.vmem [resolvable:$true] %s362_s15 }
  0x1d   : > { %s3988_s7 = sld [smem:[#allocation29_spill]]  ;;  %s318_s23 = sshll.u32 %s3961_s2, 4  ;;  %s319_s23 = int_to_ptr.hbm [resolvable:$true] %s318_s23 }
  0x1e   : > { %s332_s13 = sshll.u32 %s3985_s3, 4  ;;  %s3628_s28 = smov [#allocation11]   ;;  %s333_s13 = int_to_ptr.hbm [resolvable:$true] %s332_s13 }
  0x1f   : > { %s360_s16 = sshll.u32 %s3986_s5, 4  ;;  %s3629_s3 = smov [#allocation2]   ;;  %s361_s16 = int_to_ptr.hbm [resolvable:$true] %s360_s16 }
  0x20   : > { %3189 = dma.hbm_to_vmem [thread:$0]  (!%p3760_p12), %s333_s13, 4096, %s335_s25, [#allocation6], %s3625_s30, %s3625_s30, %s3626_s12  }
  0x21   : > { %3195 = dma.hbm_to_vmem [thread:$0]  (!%p3760_p12), %s361_s16, 4096, %s363_s15, [#allocation9], %s3625_s30, %s3625_s30, %s3626_s12  }
  0x22   : > { %s389_s13 = sshll.u32 %s3628_s28, 4  ;;  %s320_s5 = sshll.u32 %s3629_s3, 4  ;;  %s390_s13 = int_to_ptr.vmem [resolvable:$true] %s389_s13  ;;  %s321_s5 = int_to_ptr.vmem [resolvable:$true] %s320_s5 }
  0x23   : > { %s387_s26 = sshll.u32 %s3988_s7, 4  ;;  %s346_s7 = sshll.u32 %s3963_s4, 4  ;;  %s388_s26 = int_to_ptr.hbm [resolvable:$true] %s387_s26  ;;  %s347_s7 = int_to_ptr.hbm [resolvable:$true] %s346_s7 }
  0x24   : > { %3201 = dma.hbm_to_vmem [thread:$0]  (!%p3760_p12), %s388_s26, 32, %s390_s13, [#allocation12]  }
  0x25   : > { %3186 = dma.hbm_to_vmem [thread:$0]  (!%p3760_p12), %s319_s23, 4096, %s321_s5, [#allocation3], %s3625_s30, %s3625_s30, %s3626_s12  }
  0x26   : > { %s375_s16 = sshll.u32 %s3965_s6, 4  ;;  %s3630_s15 = smov [#allocation7]   ;;  %s376_s16 = int_to_ptr.hbm [resolvable:$true] %s375_s16 }
  0x27   : > { %s348_s26 = sshll.u32 %s3630_s15, 4  ;;  %s3631_s24 = smov [#allocation10]   ;;  %s349_s26 = int_to_ptr.vmem [resolvable:$true] %s348_s26 }
  0x28   : > { %3192 = dma.hbm_to_vmem [thread:$0]  (!%p3760_p12), %s347_s7, 4096, %s349_s26, [#allocation6], %s3625_s30, %s3625_s30, %s3626_s12  }
  0x29   : > { %s377_s13 = sshll.u32 %s3631_s24, 4  ;;  %s398_s23 = sshll.u32 %s3967_s8, 4  ;;  %s378_s13 = int_to_ptr.vmem [resolvable:$true] %s377_s13  ;;  %s399_s23 = int_to_ptr.hbm [resolvable:$true] %s398_s23 }
  0x2a   : > { %3198 = dma.hbm_to_vmem [thread:$0]  (!%p3760_p12), %s376_s16, 32, %s378_s13, [#allocation9]  }
  0x2b   : > { %s413_s19 = sshll.u32 %s3968_s9, 4  ;;  %s3632_s28 = smov [#allocation13]   ;;  %s414_s19 = int_to_ptr.hbm [resolvable:$true] %s413_s19 }
  0x2c   : > { %s400_s15 = sshll.u32 %s3632_s28, 4  ;;  %s3633_s7 = smov [#allocation14]   ;;  %s401_s15 = int_to_ptr.vmem [resolvable:$true] %s400_s15 }
  0x2d   : > { %3204 = dma.hbm_to_vmem [thread:$0]  (!%p3760_p12), %s399_s23, 4096, %s401_s15, [#allocation12], %s3625_s30, %s3625_s30, %s3626_s12  }
  0x2e   : > { %s415_s26 = sshll.u32 %s3633_s7, 4  ;;  %442 = sbr.rel (%p3746_p10) target bundleno = 1789 (0x6fd), region = 60  ;;  %s416_s26 = int_to_ptr.vmem [resolvable:$true] %s415_s26 }
  0x2f   : > { %3207 = dma.hbm_to_vmem [thread:$0]  (!%p3760_p12), %s414_s19, 32, %s416_s26, [#allocation15]  }
  0x33   : > { %3585 = dma.done.wait (%p3212_p9), [#allocation3], 4096  }
  0x34   : > { %3587 = vsyncadd (%p3212_p9), [#allocation3], 4294963200 }
  0x35   : > { %3589 = dma.done.wait (%p3212_p9), [#allocation6], 8192  }
  0x36   : > { %3591 = vsyncadd (%p3212_p9), [#allocation6], 4294959104 }
  0x37   : > { %3593 = dma.done.wait (%p3212_p9), [#allocation9], 4128  }
  0x38   : > { %3595 = vsyncadd (%p3212_p9), [#allocation9], 4294963168 }
  0x39   : > { %3597 = dma.done.wait (%p3212_p9), [#allocation12], 4128  }
  0x3a   : > { %3599 = vsyncadd (%p3212_p9), [#allocation12], 4294963168 }
  0x3b   : > { %3601 = dma.done.wait (%p3212_p9), [#allocation15], 32  }
  0x3c   : > { %3603 = vsyncadd (%p3212_p9), [#allocation15], 4294967264  ;;  %v2396_v0 = vld [vmem:[#allocation2 + $0x70] sm:$0xf]  ;;  %v3003_v1 = vld [vmem:[#allocation2 + $0x74] sm:$0xf0] }
  0x3d   : > { %v2460_v2 = vld [vmem:[#allocation2 + $0xf0] sm:$0xf]  ;;  %v2397_v3 = vor.u32 %v3003_v1, %v2396_v0  ;;  %v3019_v4 = vld [vmem:[#allocation2 + $0xf4] sm:$0xf0]  ;;  %v3002_v5 = vld [vmem:[#allocation2 + $0x74] sm:$0xf] }
  0x3e   : > { %v2398_v6 = vld [vmem:[#allocation2 + $0x78] sm:$0xf0]  ;;  %v2461_v7 = vor.u32 %v3019_v4, %v2460_v2  ;;  %v3018_v9 = vld [vmem:[#allocation2 + $0xf4] sm:$0xf]  ;;  %v2388_v11 = vld [vmem:[#allocation2 + $0x60] sm:$0xf] }
  0x3f   : > { %v2401_v8 = vor.u32 %v3002_v5, %v2398_v6  ;;  %v2462_v10 = vld [vmem:[#allocation2 + $0xf8] sm:$0xf0]  ;;  %737 = vmatpush.bf16.msra.mxu0 %v2397_v3  ;;  %v3001_v13 = vld [vmem:[#allocation2 + $0x64] sm:$0xf0]  ;;  %v2452_v14 = vld [vmem:[#allocation2 + $0xe0] sm:$0xf] }
  0x40   : > { %v2465_v12 = vor.u32 %v3018_v9, %v2462_v10  ;;  %v3017_v15 = vld [vmem:[#allocation2 + $0xe4] sm:$0xf0]  ;;  %751 = vmatpush.bf16.msra.mxu1 %v2461_v7  ;;  %v2389_v16 = vor.u32 %v3001_v13, %v2388_v11  ;;  %v3000_v18 = vld [vmem:[#allocation2 + $0x64] sm:$0xf]  ;;  %v2390_v19 = vld [vmem:[#allocation2 + $0x68] sm:$0xf0] }
  0x41   : > { %765 = vmatpush.bf16.msra.mxu2 %v2401_v8  ;;  %v2453_v17 = vor.u32 %v3017_v15, %v2452_v14  ;;  %v3016_v20 = vld [vmem:[#allocation2 + $0xe4] sm:$0xf]  ;;  %v2393_v21 = vor.u32 %v3000_v18, %v2390_v19  ;;  %v2454_v22 = vld [vmem:[#allocation2 + $0xe8] sm:$0xf0]  ;;  %v2380_v23 = vld [vmem:[#allocation2 + $0x50] sm:$0xf] }
  0x42   : > { %779 = vmatpush.bf16.msra.mxu3 %v2465_v12  ;;  %v2999_v24 = vld [vmem:[#allocation2 + $0x54] sm:$0xf0]  ;;  %v2457_v25 = vor.u32 %v3016_v20, %v2454_v22  ;;  %v2444_v26 = vld [vmem:[#allocation2 + $0xd0] sm:$0xf]  ;;  %v2998_v28 = vld [vmem:[#allocation2 + $0x54] sm:$0xf] }
  0x43   : > { %v3015_v27 = vld [vmem:[#allocation2 + $0xd4] sm:$0xf0]  ;;  %738 = vmatpush.bf16.msra.mxu0 %v2389_v16  ;;  %v2381_v29 = vor.u32 %v2999_v24, %v2380_v23  ;;  %v2382_v30 = vld [vmem:[#allocation2 + $0x58] sm:$0xf0]  ;;  %v3014_v31 = vld [vmem:[#allocation2 + $0xd4] sm:$0xf] }
  0x44   : > { %v2446_v32 = vld [vmem:[#allocation2 + $0xd8] sm:$0xf0]  ;;  %752 = vmatpush.bf16.msra.mxu1 %v2453_v17  ;;  %v2445_v33 = vor.u32 %v3015_v27, %v2444_v26  ;;  %v2385_v34 = vor.u32 %v2998_v28, %v2382_v30  ;;  %v2372_v35 = vld [vmem:[#allocation2 + $0x40] sm:$0xf]  ;;  %v2997_v36 = vld [vmem:[#allocation2 + $0x44] sm:$0xf0] }
  0x45   : > { %766 = vmatpush.bf16.msra.mxu2 %v2393_v21  ;;  %v2436_v37 = vld [vmem:[#allocation2 + $0xc0] sm:$0xf]  ;;  %v2449_v38 = vor.u32 %v3014_v31, %v2446_v32  ;;  %v3013_v39 = vld [vmem:[#allocation2 + $0xc4] sm:$0xf0]  ;;  %v2996_v40 = vld [vmem:[#allocation2 + $0x44] sm:$0xf]  ;;  %v2373_v44 = vor.u32 %v2997_v36, %v2372_v35 }
  0x46   : > { %780 = vmatpush.bf16.msra.mxu3 %v2457_v25  ;;  %v2374_v41 = vld [vmem:[#allocation2 + $0x48] sm:$0xf0]  ;;  %v3012_v42 = vld [vmem:[#allocation2 + $0xc4] sm:$0xf]  ;;  %v2437_v45 = vor.u32 %v3013_v39, %v2436_v37  ;;  %v2364_v47 = vld [vmem:[#allocation2 + $0x30] sm:$0xf] }
  0x47   : > { %v2438_v43 = vld [vmem:[#allocation2 + $0xc8] sm:$0xf0]  ;;  %739 = vmatpush.bf16.msra.mxu0 %v2381_v29  ;;  %v2377_v46 = vor.u32 %v2996_v40, %v2374_v41  ;;  %v2995_v48 = vld [vmem:[#allocation2 + $0x34] sm:$0xf0]  ;;  %v2428_v49 = vld [vmem:[#allocation2 + $0xb0] sm:$0xf] }
  0x48   : > { %753 = vmatpush.bf16.msra.mxu1 %v2445_v33  ;;  %v2441_v50 = vor.u32 %v3012_v42, %v2438_v43  ;;  %v3011_v51 = vld [vmem:[#allocation2 + $0xb4] sm:$0xf0]  ;;  %v2994_v52 = vld [vmem:[#allocation2 + $0x34] sm:$0xf]  ;;  %v2366_v53 = vld [vmem:[#allocation2 + $0x38] sm:$0xf0]  ;;  %v2365_v56 = vor.u32 %v2995_v48, %v2364_v47 }
  0x49   : > { %767 = vmatpush.bf16.msra.mxu2 %v2385_v34  ;;  %v3010_v54 = vld [vmem:[#allocation2 + $0xb4] sm:$0xf]  ;;  %v2430_v55 = vld [vmem:[#allocation2 + $0xb8] sm:$0xf0]  ;;  %p525_p13 = scmp.lt.s32.totalorder %s3718_s21, 1  ;;  %v2429_v57 = vor.u32 %v3011_v51, %v2428_v49  ;;  %v2369_v58 = vor.u32 %v2994_v52, %v2366_v53  ;;  %vm1350_vm0 = vcmask 130048  }
  0x4a   : > { %781 = vmatpush.bf16.msra.mxu3 %v2449_v38  ;;  %v2356_v59 = vld [vmem:[#allocation2 + $0x20] sm:$0xf]  ;;  %v2993_v60 = vld [vmem:[#allocation2 + $0x24] sm:$0xf0]  ;;  %v2433_v62 = vor.u32 %v3010_v54, %v2430_v55  ;;  %v2992_v0 = vld [vmem:[#allocation2 + $0x24] sm:$0xf] }
  0x4b   : > { %740 = vmatpush.bf16.msra.mxu0 %v2373_v44  ;;  %v2420_v61 = vld [vmem:[#allocation2 + $0xa0] sm:$0xf]  ;;  %v3009_v63 = vld [vmem:[#allocation2 + $0xa4] sm:$0xf0]  ;;  %v2358_v1 = vld [vmem:[#allocation2 + $0x28] sm:$0xf0]  ;;  %v2357_v4 = vor.u32 %v2993_v60, %v2356_v59 }
  0x4c   : > { %754 = vmatpush.bf16.msra.mxu1 %v2437_v45  ;;  %v3008_v2 = vld [vmem:[#allocation2 + $0xa4] sm:$0xf]  ;;  %v2422_v3 = vld [vmem:[#allocation2 + $0xa8] sm:$0xf0]  ;;  %s3839_s29 = scalar_select %p525_p13, %s3718_s21, 1  ;;  %v2421_v5 = vor.u32 %v3009_v63, %v2420_v61  ;;  %v2361_v6 = vor.u32 %v2992_v0, %v2358_v1  ;;  %vm1758_vm2 = vcmask 122880  }
  0x4d   : > { %768 = vmatpush.bf16.msra.mxu2 %v2377_v46  ;;  %v2348_v7 = vld [vmem:[#allocation2 + $0x10] sm:$0xf]  ;;  %v2991_v8 = vld [vmem:[#allocation2 + $0x14] sm:$0xf0]  ;;  %v2425_v10 = vor.u32 %v3008_v2, %v2422_v3  ;;  %v2990_v12 = vld [vmem:[#allocation2 + $0x14] sm:$0xf] }
  0x4e   : > { %782 = vmatpush.bf16.msra.mxu3 %v2441_v50  ;;  %v2412_v9 = vld [vmem:[#allocation2 + $0x90] sm:$0xf]  ;;  %v3007_v11 = vld [vmem:[#allocation2 + $0x94] sm:$0xf0]  ;;  %v2350_v13 = vld [vmem:[#allocation2 + $0x18] sm:$0xf0]  ;;  %v2349_v16 = vor.u32 %v2991_v8, %v2348_v7  ;;  %s532_s3 = scalar_lea.vmem %s3960_s1, %s3839_s29 }
  0x4f   : > { %741 = vmatpush.bf16.msra.mxu0 %v2365_v56  ;;  %v3006_v14 = vld [vmem:[#allocation2 + $0x94] sm:$0xf]  ;;  %v2414_v15 = vld [vmem:[#allocation2 + $0x98] sm:$0xf0]  ;;  %s2987_s22 = sshll.u32 %s3839_s29, 5  ;;  %v2413_v20 = vor.u32 %v3007_v11, %v2412_v9  ;;  %v2353_v21 = vor.u32 %v2990_v12, %v2350_v13  ;;  %s522_s25 = sand.u32 1, %s3614_s18  }
  0x50   : > { %755 = vmatpush.bf16.msra.mxu1 %v2429_v57  ;;  %v2340_v17 = vld [vmem:[#allocation2] sm:$0xf]  ;;  %v2989_v18 = vld [vmem:[#allocation2 + $0x4] sm:$0xf0]  ;;  %v2988_v23 = vld [vmem:[#allocation2 + $0x4] sm:$0xf]  ;;  %v2417_v25 = vor.u32 %v3006_v14, %v2414_v15  ;;  %s3845_s16 = scalar_lea.vmem %s3959_s0, %s2987_s22 }
  0x51   : > { %769 = vmatpush.bf16.msra.mxu2 %v2369_v58  ;;  %v2404_v19 = vld [vmem:[#allocation2 + $0x80] sm:$0xf]  ;;  %v3005_v22 = vld [vmem:[#allocation2 + $0x84] sm:$0xf0]  ;;  %v2342_v24 = vld [vmem:[#allocation2 + $0x8] sm:$0xf0]  ;;  %v2341_v32 = vor.u32 %v2989_v18, %v2340_v17 }
  0x52   : > { %783 = vmatpush.bf16.msra.mxu3 %v2433_v62  ;;  %v3004_v26 = vld [vmem:[#allocation2 + $0x84] sm:$0xf]  ;;  %v2406_v27 = vld [vmem:[#allocation2 + $0x88] sm:$0xf0]  ;;  %v2524_v28 = vld [vmem:[#allocation5 + $0x70] sm:$0xf]  ;;  %v2405_v36 = vor.u32 %v3005_v22, %v2404_v19  ;;  %v2345_v37 = vor.u32 %v2988_v23, %v2342_v24 }
  0x53   : > { %742 = vmatpush.bf16.msra.mxu0 %v2357_v4  ;;  %v3035_v29 = vld [vmem:[#allocation5 + $0x74] sm:$0xf0]  ;;  %v2588_v30 = vld [vmem:[#allocation5 + $0xf0] sm:$0xf]  ;;  %v3034_v33 = vld [vmem:[#allocation5 + $0x74] sm:$0xf]  ;;  %v2409_v41 = vor.u32 %v3004_v26, %v2406_v27 }
  0x54   : > { %756 = vmatpush.bf16.msra.mxu1 %v2421_v5  ;;  %v3051_v31 = vld [vmem:[#allocation5 + $0xf4] sm:$0xf0]  ;;  %v2526_v34 = vld [vmem:[#allocation5 + $0x78] sm:$0xf0]  ;;  %v3050_v35 = vld [vmem:[#allocation5 + $0xf4] sm:$0xf]  ;;  %v2525_v42 = vor.u32 %v3035_v29, %v2524_v28 }
  0x55   : > { %770 = vmatpush.bf16.msra.mxu2 %v2361_v6  ;;  %v2590_v38 = vld [vmem:[#allocation5 + $0xf8] sm:$0xf0]  ;;  %v538_v39 = vld [vmem:[%s3845_s16] sm:$0xff]  ;;  %v540_v40 = vld [vmem:[%s3845_s16 + $0x10] sm:$0xff]  ;;  %v2589_v45 = vor.u32 %v3051_v31, %v2588_v30  ;;  %v2529_v46 = vor.u32 %v3034_v33, %v2526_v34  ;;  %s2334_s23 = sshll.u32 %s522_s25, 5  ;;  %vm2074_vm13 = vcmask 1040384  }
  0x56   : > { %784 = vmatpush.bf16.msra.mxu3 %v2425_v10  ;;  %v539_v43 = vld [vmem:[%s3845_s16 + $0x8] sm:$0xff]  ;;  %v541_v44 = vld [vmem:[%s3845_s16 + $0x18] sm:$0xff]  ;;  %v2516_v47 = vld [vmem:[#allocation5 + $0x60] sm:$0xf]  ;;  %v2593_v50 = vor.u32 %v3050_v35, %v2590_v38  ;;  %v3851_v54 = vpack.c.bf16 %v540_v40, %v538_v39  ;;  %s3904_s5 = scalar_lea.vmem [#allocation16], %s2334_s23  ;;  %s3148_s19 = sshll.u32 %s3718_s21, 5 }
  0x57   : > { %743 = vmatpush.bf16.msra.mxu0 %v2349_v16  ;;  %v3033_v48 = vld [vmem:[#allocation5 + $0x64] sm:$0xf0]  ;;  %v2580_v49 = vld [vmem:[#allocation5 + $0xe0] sm:$0xf]  ;;  %v3032_v52 = vld [vmem:[#allocation5 + $0x64] sm:$0xf]  ;;  %v3853_v57 = vpack.c.bf16 %v541_v44, %v539_v43  ;;  %s2136_s7 = scalar_lea.hbm %s3970_s11, %s3148_s19 }
  0x58   : > { %757 = vmatpush.bf16.msra.mxu1 %v2413_v20  ;;  %v3049_v51 = vld [vmem:[#allocation5 + $0xe4] sm:$0xf0]  ;;  %v2518_v53 = vld [vmem:[#allocation5 + $0x68] sm:$0xf0]  ;;  %v3048_v55 = vld [vmem:[#allocation5 + $0xe4] sm:$0xf]  ;;  %v2517_v58 = vor.u32 %v3033_v48, %v2516_v47 }
  0x59   : > { %771 = vmatpush.bf16.msra.mxu2 %v2353_v21  ;;  %v2582_v56 = vld [vmem:[#allocation5 + $0xe8] sm:$0xf0]  ;;  %v2581_v59 = vor.u32 %v3049_v51, %v2580_v49  ;;  %v2521_v60 = vor.u32 %v3032_v52, %v2518_v53  ;;  %v2508_v61 = vld [vmem:[#allocation5 + $0x50] sm:$0xf]  ;;  %v3031_v62 = vld [vmem:[#allocation5 + $0x54] sm:$0xf0] }
  0x5a   : > { %785 = vmatpush.bf16.msra.mxu3 %v2417_v25  ;;  %v2572_v63 = vld [vmem:[#allocation5 + $0xd0] sm:$0xf]  ;;  %v2585_v0 = vor.u32 %v3048_v55, %v2582_v56  ;;  %v3047_v1 = vld [vmem:[#allocation5 + $0xd4] sm:$0xf0]  ;;  %v3030_v2 = vld [vmem:[#allocation5 + $0x54] sm:$0xf]  ;;  %v2509_v6 = vor.u32 %v3031_v62, %v2508_v61 }
  0x5b   : > { %744 = vmatpush.bf16.msra.mxu0 %v2341_v32  ;;  %v2510_v3 = vld [vmem:[#allocation5 + $0x58] sm:$0xf0]  ;;  %v3046_v4 = vld [vmem:[#allocation5 + $0xd4] sm:$0xf]  ;;  %v2573_v7 = vor.u32 %v3047_v1, %v2572_v63  ;;  %v2500_v9 = vld [vmem:[#allocation5 + $0x40] sm:$0xf] }
  0x5c   : > { %758 = vmatpush.bf16.msra.mxu1 %v2405_v36  ;;  %v2574_v5 = vld [vmem:[#allocation5 + $0xd8] sm:$0xf0]  ;;  %v2513_v8 = vor.u32 %v3030_v2, %v2510_v3  ;;  %v3029_v10 = vld [vmem:[#allocation5 + $0x44] sm:$0xf0]  ;;  %v2564_v11 = vld [vmem:[#allocation5 + $0xc0] sm:$0xf] }
  0x5d   : > { %772 = vmatpush.bf16.msra.mxu2 %v2345_v37  ;;  %v2577_v12 = vor.u32 %v3046_v4, %v2574_v5  ;;  %v3045_v13 = vld [vmem:[#allocation5 + $0xc4] sm:$0xf0]  ;;  %v3028_v14 = vld [vmem:[#allocation5 + $0x44] sm:$0xf]  ;;  %v2502_v15 = vld [vmem:[#allocation5 + $0x48] sm:$0xf0]  ;;  %v2501_v18 = vor.u32 %v3029_v10, %v2500_v9 }
  0x5e   : > { %786 = vmatpush.bf16.msra.mxu3 %v2409_v41  ;;  %745 = vmatmul.bf16.vlgmr.msra.gmra.mxu0 %v3851_v54  ;;  %v3044_v16 = vld [vmem:[#allocation5 + $0xc4] sm:$0xf]  ;;  %v2566_v17 = vld [vmem:[#allocation5 + $0xc8] sm:$0xf0]  ;;  %v2565_v19 = vor.u32 %v3045_v13, %v2564_v11  ;;  %v2505_v20 = vor.u32 %v3028_v14, %v2502_v15  ;;  %v2492_v21 = vld [vmem:[#allocation5 + $0x30] sm:$0xf] }
  0x5f   : > { %985 = vmatpush.bf16.msrb.mxu0 %v2525_v42  ;;  %759 = vmatmul.bf16.vlgmr.msra.gmra.mxu1 %v3853_v57  ;;  %v3027_v22 = vld [vmem:[#allocation5 + $0x34] sm:$0xf0]  ;;  %v2556_v23 = vld [vmem:[#allocation5 + $0xb0] sm:$0xf]  ;;  %v2569_v24 = vor.u32 %v3044_v16, %v2566_v17  ;;  %v3026_v26 = vld [vmem:[#allocation5 + $0x34] sm:$0xf] }
  0x60   : > { %999 = vmatpush.bf16.msrb.mxu1 %v2589_v45  ;;  %773 = vmatmul.bf16.vlgmr.msra.gmra.mxu2 %v3851_v54  ;;  %v3043_v25 = vld [vmem:[#allocation5 + $0xb4] sm:$0xf0]  ;;  %v2494_v27 = vld [vmem:[#allocation5 + $0x38] sm:$0xf0]  ;;  %v3042_v28 = vld [vmem:[#allocation5 + $0xb4] sm:$0xf]  ;;  %v2493_v30 = vor.u32 %v3027_v22, %v2492_v21 }
  0x61   : > { %1013 = vmatpush.bf16.msrb.mxu2 %v2529_v46  ;;  %787 = vmatmul.bf16.vlgmr.msra.gmra.mxu3 %v3853_v57  ;;  %v2558_v29 = vld [vmem:[#allocation5 + $0xb8] sm:$0xf0]  ;;  %v2557_v31 = vor.u32 %v3043_v25, %v2556_v23  ;;  %v2497_v32 = vor.u32 %v3026_v26, %v2494_v27  ;;  %v2484_v33 = vld [vmem:[#allocation5 + $0x20] sm:$0xf]  ;;  %v3025_v34 = vld [vmem:[#allocation5 + $0x24] sm:$0xf0] }
  0x62   : > { %1027 = vmatpush.bf16.msrb.mxu3 %v2593_v50  ;;  %v2548_v35 = vld [vmem:[#allocation5 + $0xa0] sm:$0xf]  ;;  %v2561_v36 = vor.u32 %v3042_v28, %v2558_v29  ;;  %v3041_v37 = vld [vmem:[#allocation5 + $0xa4] sm:$0xf0]  ;;  %v3024_v38 = vld [vmem:[#allocation5 + $0x24] sm:$0xf]  ;;  %v2485_v42 = vor.u32 %v3025_v34, %v2484_v33 }
  0x63   : > { %986 = vmatpush.bf16.msrb.mxu0 %v2517_v58  ;;  %v2486_v39 = vld [vmem:[#allocation5 + $0x28] sm:$0xf0]  ;;  %v3040_v40 = vld [vmem:[#allocation5 + $0xa4] sm:$0xf]  ;;  %v2549_v43 = vor.u32 %v3041_v37, %v2548_v35  ;;  %v2476_v45 = vld [vmem:[#allocation5 + $0x10] sm:$0xf] }
  0x64   : > { %1000 = vmatpush.bf16.msrb.mxu1 %v2581_v59  ;;  %v2550_v41 = vld [vmem:[#allocation5 + $0xa8] sm:$0xf0]  ;;  %v2489_v44 = vor.u32 %v3024_v38, %v2486_v39  ;;  %v3023_v46 = vld [vmem:[#allocation5 + $0x14] sm:$0xf0]  ;;  %v2540_v47 = vld [vmem:[#allocation5 + $0x90] sm:$0xf] }
  0x65   : > { %1014 = vmatpush.bf16.msrb.mxu2 %v2521_v60  ;;  %v2553_v48 = vor.u32 %v3040_v40, %v2550_v41  ;;  %v3039_v49 = vld [vmem:[#allocation5 + $0x94] sm:$0xf0]  ;;  %v3022_v50 = vld [vmem:[#allocation5 + $0x14] sm:$0xf]  ;;  %v2478_v51 = vld [vmem:[#allocation5 + $0x18] sm:$0xf0]  ;;  %v2477_v55 = vor.u32 %v3023_v46, %v2476_v45 }
  0x66   : > { %1028 = vmatpush.bf16.msrb.mxu3 %v2585_v0  ;;  %v3038_v52 = vld [vmem:[#allocation5 + $0x94] sm:$0xf]  ;;  %v2542_v53 = vld [vmem:[#allocation5 + $0x98] sm:$0xf0]  ;;  %v2468_v56 = vld [vmem:[#allocation5] sm:$0xf]  ;;  %v2541_v58 = vor.u32 %v3039_v49, %v2540_v47  ;;  %v2481_v59 = vor.u32 %v3022_v50, %v2478_v51 }
  0x67   : > { %987 = vmatpush.bf16.msrb.mxu0 %v2509_v6  ;;  %v3021_v60 = vld [vmem:[#allocation5 + $0x4] sm:$0xf0]  ;;  %v2532_v61 = vld [vmem:[#allocation5 + $0x80] sm:$0xf]  ;;  %v2545_v63 = vor.u32 %v3038_v52, %v2542_v53  ;;  %v3020_v0 = vld [vmem:[#allocation5 + $0x4] sm:$0xf] }
  0x68   : > { %1001 = vmatpush.bf16.msrb.mxu1 %v2573_v7  ;;  %v3037_v62 = vld [vmem:[#allocation5 + $0x84] sm:$0xf0]  ;;  %v2470_v1 = vld [vmem:[#allocation5 + $0x8] sm:$0xf0]  ;;  %v3036_v2 = vld [vmem:[#allocation5 + $0x84] sm:$0xf]  ;;  %v2469_v6 = vor.u32 %v3021_v60, %v2468_v56 }
  0x69   : > { %1015 = vmatpush.bf16.msrb.mxu2 %v2513_v8  ;;  %v2534_v3 = vld [vmem:[#allocation5 + $0x88] sm:$0xf0]  ;;  %v3066_v4 = vld [vmem:[#allocation7 + $0x74] sm:$0xf]  ;;  %v2654_v5 = vld [vmem:[#allocation7 + $0x78] sm:$0xf0]  ;;  %v2533_v9 = vor.u32 %v3037_v62, %v2532_v61  ;;  %v2473_v10 = vor.u32 %v3020_v0, %v2470_v1 }
  0x6a   : > { %1029 = vmatpush.bf16.msrb.mxu3 %v2577_v12  ;;  %v3082_v7 = vld [vmem:[#allocation7 + $0xf4] sm:$0xf]  ;;  %v2718_v8 = vld [vmem:[#allocation7 + $0xf8] sm:$0xf0]  ;;  %v2537_v11 = vor.u32 %v3036_v2, %v2534_v3  ;;  %v2657_v12 = vor.u32 %v3066_v4, %v2654_v5  ;;  %v3064_v13 = vld [vmem:[#allocation7 + $0x64] sm:$0xf] }
  0x6b   : > { %988 = vmatpush.bf16.msrb.mxu0 %v2501_v18  ;;  %v2652_v14 = vld [vmem:[#allocation7 + $0x70] sm:$0xf]  ;;  %v3067_v15 = vld [vmem:[#allocation7 + $0x74] sm:$0xf0]  ;;  %v2721_v16 = vor.u32 %v3082_v7, %v2718_v8  ;;  %v2646_v17 = vld [vmem:[#allocation7 + $0x68] sm:$0xf0] }
  0x6c   : > { %1002 = vmatpush.bf16.msrb.mxu1 %v2565_v19  ;;  %v2716_v18 = vld [vmem:[#allocation7 + $0xf0] sm:$0xf]  ;;  %v3083_v19 = vld [vmem:[#allocation7 + $0xf4] sm:$0xf0]  ;;  %v2710_v21 = vld [vmem:[#allocation7 + $0xe8] sm:$0xf0]  ;;  %v2653_v22 = vor.u32 %v3067_v15, %v2652_v14  ;;  %v2649_v23 = vor.u32 %v3064_v13, %v2646_v17 }
  0x6d   : > { %1016 = vmatpush.bf16.msrb.mxu2 %v2505_v20  ;;  %v3080_v20 = vld [vmem:[#allocation7 + $0xe4] sm:$0xf]  ;;  %v3062_v25 = vld [vmem:[#allocation7 + $0x54] sm:$0xf]  ;;  %v2644_v26 = vld [vmem:[#allocation7 + $0x60] sm:$0xf] }
  0x6e   : > { %1030 = vmatpush.bf16.msrb.mxu3 %v2569_v24  ;;  %v2717_v24 = vor.u32 %v3083_v19, %v2716_v18  ;;  %v3065_v27 = vld [vmem:[#allocation7 + $0x64] sm:$0xf0]  ;;  %v2713_v28 = vor.u32 %v3080_v20, %v2710_v21  ;;  %v2638_v29 = vld [vmem:[#allocation7 + $0x58] sm:$0xf0]  ;;  %v3060_v38 = vld [vmem:[#allocation7 + $0x44] sm:$0xf] }
  0x6f   : > { %989 = vmatpush.bf16.msrb.mxu0 %v2493_v30  ;;  %v2708_v30 = vld [vmem:[#allocation7 + $0xe0] sm:$0xf]  ;;  %v2702_v33 = vld [vmem:[#allocation7 + $0xd8] sm:$0xf0]  ;;  %v2645_v34 = vor.u32 %v3065_v27, %v2644_v26  ;;  %v2641_v35 = vor.u32 %v3062_v25, %v2638_v29  ;;  %v2630_v39 = vld [vmem:[#allocation7 + $0x48] sm:$0xf0] }
  0x70   : > { %1003 = vmatpush.bf16.msrb.mxu1 %v2557_v31  ;;  %v3081_v31 = vld [vmem:[#allocation7 + $0xe4] sm:$0xf0]  ;;  %v3076_v40 = vld [vmem:[#allocation7 + $0xc4] sm:$0xf]  ;;  %v2633_v41 = vor.u32 %v3060_v38, %v2630_v39  ;;  %v3063_v45 = vld [vmem:[#allocation7 + $0x54] sm:$0xf0] }
  0x71   : > { %1017 = vmatpush.bf16.msrb.mxu2 %v2497_v32  ;;  %v3078_v32 = vld [vmem:[#allocation7 + $0xd4] sm:$0xf]  ;;  %v2700_v46 = vld [vmem:[#allocation7 + $0xd0] sm:$0xf]  ;;  %v2622_v50 = vld [vmem:[#allocation7 + $0x38] sm:$0xf0] }
  0x72   : > { %1031 = vmatpush.bf16.msrb.mxu3 %v2561_v36  ;;  %v2709_v36 = vor.u32 %v3081_v31, %v2708_v30  ;;  %v2705_v37 = vor.u32 %v3078_v32, %v2702_v33  ;;  %v3058_v49 = vld [vmem:[#allocation7 + $0x34] sm:$0xf]  ;;  %v2628_v56 = vld [vmem:[#allocation7 + $0x40] sm:$0xf]  ;;  %v3077_v61 = vld [vmem:[#allocation7 + $0xc4] sm:$0xf0] }
  0x73   : > { %990 = vmatpush.bf16.msrb.mxu0 %v2485_v42  ;;  %v2694_v42 = vld [vmem:[#allocation7 + $0xc8] sm:$0xf0]  ;;  %v2625_v52 = vor.u32 %v3058_v49, %v2622_v50  ;;  %v3074_v53 = vld [vmem:[#allocation7 + $0xb4] sm:$0xf]  ;;  %v2692_v60 = vld [vmem:[#allocation7 + $0xc0] sm:$0xf] }
  0x74   : > { %1004 = vmatpush.bf16.msrb.mxu1 %v2549_v43  ;;  %v2697_v43 = vor.u32 %v3076_v40, %v2694_v42  ;;  %v3056_v0 = vld [vmem:[#allocation7 + $0x24] sm:$0xf]  ;;  %v2614_v1 = vld [vmem:[#allocation7 + $0x28] sm:$0xf0]  ;;  %v3059_v7 = vld [vmem:[#allocation7 + $0x34] sm:$0xf0] }
  0x75   : > { %1018 = vmatpush.bf16.msrb.mxu2 %v2489_v44  ;;  %v2636_v44 = vld [vmem:[#allocation7 + $0x50] sm:$0xf]  ;;  %v3072_v2 = vld [vmem:[#allocation7 + $0xa4] sm:$0xf]  ;;  %v2617_v3 = vor.u32 %v3056_v0, %v2614_v1  ;;  %v2678_v4 = vld [vmem:[#allocation7 + $0xa8] sm:$0xf0] }
  0x76   : > { %1032 = vmatpush.bf16.msrb.mxu3 %v2553_v48  ;;  %v2637_v47 = vor.u32 %v3063_v45, %v2636_v44  ;;  %v3079_v48 = vld [vmem:[#allocation7 + $0xd4] sm:$0xf0]  ;;  %v2681_v5 = vor.u32 %v3072_v2, %v2678_v4  ;;  %v2684_v8 = vld [vmem:[#allocation7 + $0xb0] sm:$0xf]  ;;  %v2606_v13 = vld [vmem:[#allocation7 + $0x18] sm:$0xf0] }
  0x77   : > { %991 = vmatpush.bf16.msrb.mxu0 %v2477_v55  ;;  %v2701_v51 = vor.u32 %v3079_v48, %v2700_v46  ;;  %v2686_v55 = vld [vmem:[#allocation7 + $0xb8] sm:$0xf0]  ;;  %v3070_v14 = vld [vmem:[#allocation7 + $0x94] sm:$0xf]  ;;  %v2612_v17 = vld [vmem:[#allocation7 + $0x20] sm:$0xf] }
  0x78   : > { %1005 = vmatpush.bf16.msrb.mxu1 %v2541_v58  ;;  %v2689_v58 = vor.u32 %v3074_v53, %v2686_v55  ;;  %v3057_v18 = vld [vmem:[#allocation7 + $0x24] sm:$0xf0]  ;;  %v2676_v21 = vld [vmem:[#allocation7 + $0xa0] sm:$0xf]  ;;  %v2598_v25 = vld [vmem:[#allocation7 + $0x8] sm:$0xf0] }
  0x79   : > { %1019 = vmatpush.bf16.msrb.mxu2 %v2481_v59  ;;  %v3061_v59 = vld [vmem:[#allocation7 + $0x44] sm:$0xf0]  ;;  %v2613_v20 = vor.u32 %v3057_v18, %v2612_v17  ;;  %v3068_v26 = vld [vmem:[#allocation7 + $0x84] sm:$0xf]  ;;  %v2662_v27 = vld [vmem:[#allocation7 + $0x88] sm:$0xf0] }
  0x7a   : > { %1033 = vmatpush.bf16.msrb.mxu3 %v2545_v63  ;;  %v2629_v62 = vor.u32 %v3061_v59, %v2628_v56  ;;  %v2693_v63 = vor.u32 %v3077_v61, %v2692_v60  ;;  %v2665_v29 = vor.u32 %v3068_v26, %v2662_v27  ;;  %v2604_v30 = vld [vmem:[#allocation7 + $0x10] sm:$0xf]  ;;  %v3055_v31 = vld [vmem:[#allocation7 + $0x14] sm:$0xf0]  ;;  %v2660_v38 = vld [vmem:[#allocation7 + $0x80] sm:$0xf] }
  0x7b   : > { %992 = vmatpush.bf16.msrb.mxu0 %v2469_v6  ;;  %v2620_v6 = vld [vmem:[#allocation7 + $0x30] sm:$0xf]  ;;  %v2605_v33 = vor.u32 %v3055_v31, %v2604_v30  ;;  %v3069_v40 = vld [vmem:[#allocation7 + $0x84] sm:$0xf0]  ;;  %s2137_s14 = sshll.u32 %s3904_s5, 4  ;;  %s2139_s26 = sshll.u32 %s2136_s7, 4  ;;  %s2138_s14 = int_to_ptr.vmem [resolvable:$true] %s2137_s14  ;;  %s2140_s26 = int_to_ptr.hbm [resolvable:$true] %s2139_s26 }
  0x7c   : > { %1006 = vmatpush.bf16.msrb.mxu1 %v2533_v9  ;;  %v2621_v9 = vor.u32 %v3059_v7, %v2620_v6  ;;  %v2668_v32 = vld [vmem:[#allocation7 + $0x90] sm:$0xf]  ;;  %s2122_s22 = scalar_lea.sflag [#allocation4], %s522_s25  ;;  %s3554_s30 = sshra.s32 %s2140_s26, 4  ;;  %s3555_s30 = int_to_ptr.hbm [resolvable:$true] %s3554_s30 }
  0x7d   : > { %1020 = vmatpush.bf16.msrb.mxu2 %v2473_v10  ;;  %v3075_v10 = vld [vmem:[#allocation7 + $0xb4] sm:$0xf0]  ;;  %s3556_s12 = scalar_lea.hbm %s3555_s30, 32  ;;  %s3560_s21 = scalar_lea.hbm %s3970_s11, 64 }
  0x7e   : > { %1034 = vmatpush.bf16.msrb.mxu3 %v2537_v11  ;;  %993 = vmatmul.bf16.vlgmr.msrb.gmra.mxu0 %v3851_v54  ;;  %v2685_v11 = vor.u32 %v3075_v10, %v2684_v8  ;;  %p3557_p0 = scmp.ne.s32.totalorder %s3555_s30, %s3556_s12  ;;  %p3561_p3 = scmp.lt.s32.totalorder %s3555_s30, %s3970_s11 }
  0x7f   : > { %1007 = vmatmul.bf16.vlgmr.msrb.gmra.mxu1 %v3853_v57  ;;  %1233 = vmatpush.bf16.msra.mxu0 %v2653_v22  ;;  %v3073_v22 = vld [vmem:[#allocation7 + $0xa4] sm:$0xf0]  ;;  %p3562_p4 = scmp.lt.s32.totalorder %s3560_s21, %s3556_s12 }
  0x80   : > { %1021 = vmatmul.bf16.vlgmr.msrb.gmra.mxu2 %v3851_v54  ;;  %1247 = vmatpush.bf16.msra.mxu1 %v2717_v24  ;;  %v2677_v24 = vor.u32 %v3073_v22, %v2676_v21  ;;  %p3558_p1 = pnand %p3557_p0, %p3735_p5 }
  0x81   : > { %1261 = vmatpush.bf16.msra.mxu2 %v2657_v12  ;;  %1035 = vmatmul.bf16.vlgmr.msrb.gmra.mxu3 %v3853_v57  ;;  %v3054_v12 = vld [vmem:[#allocation7 + $0x14] sm:$0xf]  ;;  %p3563_p7 = por %p3562_p4, %p3561_p3 }
  0x82   : > { %1275 = vmatpush.bf16.msra.mxu3 %v2721_v16  ;;  %v2609_v15 = vor.u32 %v3054_v12, %v2606_v13  ;;  %v2670_v16 = vld [vmem:[#allocation7 + $0x98] sm:$0xf0]  ;;  %p3559_p2 = pneg %p3558_p1 }
  0x83   : > { %1234 = vmatpush.bf16.msra.mxu0 %v2645_v34  ;;  %v2673_v19 = vor.u32 %v3070_v14, %v2670_v16  ;;  %v3071_v34 = vld [vmem:[#allocation7 + $0x94] sm:$0xf0] }
  0x84   : > { %1248 = vmatpush.bf16.msra.mxu1 %v2709_v36  ;;  %v2596_v36 = vld [vmem:[#allocation7] sm:$0xf]  ;;  %p3564_p8 = pnand %p3563_p7, %p3559_p2 }
  0x85   : > { %1262 = vmatpush.bf16.msra.mxu2 %v2649_v23  ;;  %v3052_v23 = vld [vmem:[#allocation7 + $0x4] sm:$0xf] }
  0x86   : > { %1276 = vmatpush.bf16.msra.mxu3 %v2713_v28  ;;  %v2601_v28 = vor.u32 %v3052_v23, %v2598_v25 }
  0x87   : > { %1235 = vmatpush.bf16.msra.mxu0 %v2637_v47 }
  0x88   : > { %1249 = vmatpush.bf16.msra.mxu1 %v2701_v51 }
  0x89   : > { %1263 = vmatpush.bf16.msra.mxu2 %v2641_v35  ;;  %v2669_v35 = vor.u32 %v3071_v34, %v2668_v32 }
  0x8a   : > { %1277 = vmatpush.bf16.msra.mxu3 %v2705_v37  ;;  %v3053_v37 = vld [vmem:[#allocation7 + $0x4] sm:$0xf0] }
  0x8b   : > { %1236 = vmatpush.bf16.msra.mxu0 %v2629_v62  ;;  %v2597_v39 = vor.u32 %v3053_v37, %v2596_v36 }
  0x8c   : > { %1250 = vmatpush.bf16.msra.mxu1 %v2693_v63 }
  0x8d   : > { %1264 = vmatpush.bf16.msra.mxu2 %v2633_v41  ;;  %v2661_v41 = vor.u32 %v3069_v40, %v2660_v38  ;;  %v3871_v38 = vld [vmem:[%s532_s3] sm:$0x1] }
  0x8e   : > { %1278 = vmatpush.bf16.msra.mxu3 %v2697_v43 }
  0x8f   : > { %1237 = vmatpush.bf16.msra.mxu0 %v2621_v9 }
  0x90   : > { %1251 = vmatpush.bf16.msra.mxu1 %v2685_v11 }
  0x91   : > { %1265 = vmatpush.bf16.msra.mxu2 %v2625_v52 }
  0x92   : > { %1279 = vmatpush.bf16.msra.mxu3 %v2689_v58 }
  0x93   : > { %1238 = vmatpush.bf16.msra.mxu0 %v2613_v20 }
  0x94   : > { %1252 = vmatpush.bf16.msra.mxu1 %v2677_v24 }
  0x95   : > { %1266 = vmatpush.bf16.msra.mxu2 %v2617_v3 }
  0x96   : > { %1280 = vmatpush.bf16.msra.mxu3 %v2681_v5 }
  0x97   : > { %1239 = vmatpush.bf16.msra.mxu0 %v2605_v33 }
  0x98   : > { %1253 = vmatpush.bf16.msra.mxu1 %v2669_v35 }
  0x99   : > { %1267 = vmatpush.bf16.msra.mxu2 %v2609_v15 }
  0x9a   : > { %1281 = vmatpush.bf16.msra.mxu3 %v2673_v19 }
  0x9b   : > { %1240 = vmatpush.bf16.msra.mxu0 %v2597_v39  ;;  %v1343_v39 = vsub.f32 1.0, %v3871_v38 }
  0x9c   : > { %1254 = vmatpush.bf16.msra.mxu1 %v2661_v41 }
  0x9d   : > { %1268 = vmatpush.bf16.msra.mxu2 %v2601_v28  ;;  %v1344_v40 = vmul.f32 -1e+09, %v1343_v39  ;;  %v2822_v39 = vld [vmem:[#allocation8 + $0xc0] sm:$0xf] }
  0x9e   : > { %1282 = vmatpush.bf16.msra.mxu3 %v2665_v29  ;;  %1241 = vmatmul.bf16.vlgmr.msra.gmra.mxu0 %v3851_v54 }
  0x9f   : > { %1255 = vmatmul.bf16.vlgmr.msra.gmra.mxu1 %v3853_v57 }
  0xa0   : > { %1269 = vmatmul.bf16.vlgmr.msra.gmra.mxu2 %v3851_v54 }
  0xa1   : > { %1283 = vmatmul.bf16.vlgmr.msra.gmra.mxu3 %v3853_v57 }
  0xdb   : > { %v746_v42 = vpop.f32.mrf.mxu0 }
  0xdc   : > { %v760_v43 = vpop.f32.mrf.mxu1 }
  0xdd   : > { %v761_v63 = vadd.f32 %v760_v43, %v746_v42 }
  0xe3   : > { %v774_v44 = vpop.f32.mrf.mxu2  ;;  %v748_v46 = vpop.f32.mrf.mxu0 }
  0xe4   : > { %v788_v45 = vpop.f32.mrf.mxu3  ;;  %v762_v47 = vpop.f32.mrf.mxu1 }
  0xe5   : > { %v789_v0 = vadd.f32 %v788_v45, %v774_v44  ;;  %v763_v1 = vadd.f32 %v762_v47, %v748_v46  ;;  %v1346_v44 = vperm.slane %v1344_v40, 0 }
  0xe7   : > { %v1289_v8 = vpack.c.bf16 %v789_v0, %v761_v63  ;;  %v2782_v0 = vld [vmem:[#allocation8 + $0x70] sm:$0xf] }
  0xe9   : > { %v1295_v12 = vunpack.c.l.b16 %v1289_v8  ;;  %v1296_v13 = vunpack.c.h.b16 %v1289_v8 }
  0xeb   : > { %v776_v48 = vpop.f32.mrf.mxu2 }
  0xec   : > { %v790_v49 = vpop.f32.mrf.mxu3 }
  0xed   : > { %v791_v2 = vadd.f32 %v790_v49, %v776_v48 }
  0xef   : > { %v1290_v9 = vpack.c.bf16 %v791_v2, %v763_v1  ;;  %v3099_v1 = vld [vmem:[#allocation8 + $0x74] sm:$0xf0]  ;;  %v2846_v2 = vld [vmem:[#allocation8 + $0xf0] sm:$0xf] }
  0xf1   : > { %v1297_v14 = vunpack.c.l.b16 %v1290_v9  ;;  %v1298_v15 = vunpack.c.h.b16 %v1290_v9  ;;  %v3114_v9 = vld [vmem:[#allocation8 + $0xf4] sm:$0xf] }
  0xf3   : > { %v1299_v16 = vpack.c.b16 %v1297_v14, %v1295_v12  ;;  %v1300_v17 = vpack.c.b16 %v1298_v15, %v1296_v13  ;;  %v3097_v13 = vld [vmem:[#allocation8 + $0x64] sm:$0xf0]  ;;  %v2838_v14 = vld [vmem:[#allocation8 + $0xe0] sm:$0xf] }
  0xf4   : > { %v3113_v15 = vld [vmem:[#allocation8 + $0xe4] sm:$0xf0] }
  0xfb   : > { %v994_v50 = vpop.f32.mrf.mxu0 }
  0xfc   : > { %v1008_v51 = vpop.f32.mrf.mxu1 }
  0xfd   : > { %v1009_v55 = vadd.f32 %v1008_v51, %v994_v50 }
 0x103   : > { %v1022_v52 = vpop.f32.mrf.mxu2  ;;  %v996_v58 = vpop.f32.mrf.mxu0 }
 0x104   : > { %v1036_v53 = vpop.f32.mrf.mxu3  ;;  %v1010_v59 = vpop.f32.mrf.mxu1 }
 0x105   : > { %v1037_v56 = vadd.f32 %v1036_v53, %v1022_v52  ;;  %v1011_v57 = vadd.f32 %v1010_v59, %v996_v58 }
 0x107   : > { %v1291_v61 = vpack.c.bf16 %v1037_v56, %v1009_v55 }
 0x109   : > { %v1305_v4 = vunpack.c.l.b16 %v1291_v61  ;;  %v1306_v5 = vunpack.c.h.b16 %v1291_v61 }
 0x10b   : > { %v1024_v60 = vpop.f32.mrf.mxu2 }
 0x10c   : > { %v1038_v54 = vpop.f32.mrf.mxu3 }
 0x10d   : > { %v1039_v62 = vadd.f32 %v1038_v54, %v1024_v60 }
 0x10f   : > { %v1292_v3 = vpack.c.bf16 %v1039_v62, %v1011_v57 }
 0x111   : > { %v1307_v6 = vunpack.c.l.b16 %v1292_v3  ;;  %v1308_v7 = vunpack.c.h.b16 %v1292_v3  ;;  %v2783_v3 = vor.u32 %v3099_v1, %v2782_v0 }
 0x113   : > { %v1309_v10 = vpack.c.b16 %v1307_v6, %v1305_v4  ;;  %v1310_v11 = vpack.c.b16 %v1308_v7, %v1306_v5  ;;  %v3115_v4 = vld [vmem:[#allocation8 + $0xf4] sm:$0xf0]  ;;  %v3098_v5 = vld [vmem:[#allocation8 + $0x74] sm:$0xf]  ;;  %v2784_v6 = vld [vmem:[#allocation8 + $0x78] sm:$0xf0] }
 0x114   : > { %v2847_v7 = vor.u32 %v3115_v4, %v2846_v2  ;;  %v2787_v8 = vor.u32 %v3098_v5, %v2784_v6 }
 0x115   : > { %1320 = vmatpush.bf16.xpose.msrb.mxu0 %v1309_v10  ;;  %1334 = vmatpush.bf16.xpose.msrb.mxu1 %v1310_v11  ;;  %v2848_v10 = vld [vmem:[#allocation8 + $0xf8] sm:$0xf0]  ;;  %v2774_v11 = vld [vmem:[#allocation8 + $0x60] sm:$0xf] }
 0x116   : > { %v2851_v12 = vor.u32 %v3114_v9, %v2848_v10  ;;  %v2742_v10 = vld [vmem:[#allocation8 + $0x20] sm:$0xf] }
 0x11b   : > { %v1242_v18 = vpop.f32.mrf.mxu0 }
 0x11c   : > { %1321 = vmatmul.bf16.vlgmr.msrb.gmra.mxu0 %v1299_v16  ;;  %1335 = vmatmul.bf16.vlgmr.msrb.gmra.mxu1 %v1300_v17  ;;  %v1256_v20 = vpop.f32.mrf.mxu1  ;;  %v2775_v16 = vor.u32 %v3097_v13, %v2774_v11  ;;  %v2839_v17 = vor.u32 %v3113_v15, %v2838_v14  ;;  %v3089_v11 = vld [vmem:[#allocation8 + $0x24] sm:$0xf0]  ;;  %v3088_v14 = vld [vmem:[#allocation8 + $0x24] sm:$0xf]  ;;  %v2744_v15 = vld [vmem:[#allocation8 + $0x28] sm:$0xf0] }
 0x11d   : > { %v1257_v22 = vadd.f32 %v1256_v20, %v1242_v18  ;;  %1617 = vmatpush.bf16.msra.mxu0 %v2783_v3  ;;  %1631 = vmatpush.bf16.msra.mxu1 %v2847_v7  ;;  %v3096_v18 = vld [vmem:[#allocation8 + $0x64] sm:$0xf]  ;;  %v2743_v13 = vor.u32 %v3089_v11, %v2742_v10  ;;  %v3634_v11 = vmov 256.0  }
 0x11e   : > { %v3112_v20 = vld [vmem:[#allocation8 + $0xe4] sm:$0xf] }
 0x121   : > { %1618 = vmatpush.bf16.msra.mxu0 %v2775_v16  ;;  %1632 = vmatpush.bf16.msra.mxu1 %v2839_v17  ;;  %v2747_v17 = vor.u32 %v3088_v14, %v2744_v15 }
 0x123   : > { %v1270_v19 = vpop.f32.mrf.mxu2  ;;  %v1244_v25 = vpop.f32.mrf.mxu0 }
 0x124   : > { %v1284_v21 = vpop.f32.mrf.mxu3  ;;  %v1258_v27 = vpop.f32.mrf.mxu1 }
 0x125   : > { %v1285_v23 = vadd.f32 %v1284_v21, %v1270_v19  ;;  %v1259_v29 = vadd.f32 %v1258_v27, %v1244_v25  ;;  %v2776_v19 = vld [vmem:[#allocation8 + $0x68] sm:$0xf0]  ;;  %v3111_v27 = vld [vmem:[#allocation8 + $0xd4] sm:$0xf0] }
 0x126   : > { %v2779_v21 = vor.u32 %v3096_v18, %v2776_v19  ;;  %v3104_v18 = vld [vmem:[#allocation8 + $0xa4] sm:$0xf]  ;;  %v2808_v19 = vld [vmem:[#allocation8 + $0xa8] sm:$0xf0] }
 0x127   : > { %v1375_v24 = vpack.c.bf16 %v1285_v23, %v1257_v22  ;;  %v2840_v22 = vld [vmem:[#allocation8 + $0xe8] sm:$0xf0]  ;;  %v2766_v23 = vld [vmem:[#allocation8 + $0x50] sm:$0xf] }
 0x128   : > { %v2843_v25 = vor.u32 %v3112_v20, %v2840_v22  ;;  %v2734_v20 = vld [vmem:[#allocation8 + $0x10] sm:$0xf] }
 0x129   : > { %v1384_v31 = vunpack.c.l.b16 %v1375_v24  ;;  %v1385_v32 = vunpack.c.h.b16 %v1375_v24  ;;  %v3095_v24 = vld [vmem:[#allocation8 + $0x54] sm:$0xf0]  ;;  %v2798_v22 = vld [vmem:[#allocation8 + $0x90] sm:$0xf] }
 0x12b   : > { %v1272_v26 = vpop.f32.mrf.mxu2 }
 0x12c   : > { %v1286_v28 = vpop.f32.mrf.mxu3 }
 0x12d   : > { %v1287_v30 = vadd.f32 %v1286_v28, %v1272_v26  ;;  %v2830_v26 = vld [vmem:[#allocation8 + $0xd0] sm:$0xf]  ;;  %v3094_v28 = vld [vmem:[#allocation8 + $0x54] sm:$0xf] }
 0x12f   : > { %v1376_v33 = vpack.c.bf16 %v1287_v30, %v1259_v29  ;;  %v2767_v29 = vor.u32 %v3095_v24, %v2766_v23  ;;  %v2768_v30 = vld [vmem:[#allocation8 + $0x58] sm:$0xf0]  ;;  %v3103_v24 = vld [vmem:[#allocation8 + $0x94] sm:$0xf0] }
 0x131   : > { %v1386_v34 = vunpack.c.l.b16 %v1376_v33  ;;  %v1387_v35 = vunpack.c.h.b16 %v1376_v33  ;;  %1619 = vmatpush.bf16.msra.mxu0 %v2767_v29  ;;  %v3102_v29 = vld [vmem:[#allocation8 + $0x94] sm:$0xf] }
 0x133   : > { %v1388_v36 = vpack.c.b16 %v1386_v34, %v1384_v31  ;;  %v1389_v37 = vpack.c.b16 %v1387_v35, %v1385_v32  ;;  %v3110_v31 = vld [vmem:[#allocation8 + $0xd4] sm:$0xf]  ;;  %v2832_v32 = vld [vmem:[#allocation8 + $0xd8] sm:$0xf0]  ;;  %v2831_v34 = vor.u32 %v3111_v27, %v2830_v26  ;;  %v2771_v35 = vor.u32 %v3094_v28, %v2768_v30 }
 0x134   : > { %v2835_v40 = vor.u32 %v3110_v31, %v2832_v32  ;;  %v2736_v26 = vld [vmem:[#allocation8 + $0x18] sm:$0xf0]  ;;  %v2799_v27 = vor.u32 %v3103_v24, %v2798_v22  ;;  %v2726_v32 = vld [vmem:[#allocation8] sm:$0xf] }
 0x135   : > { %1402 = vmatpush.bf16.msrb.mxu2 %v1388_v36  ;;  %1416 = vmatpush.bf16.msrb.mxu3 %v1389_v37  ;;  %v2758_v36 = vld [vmem:[#allocation8 + $0x40] sm:$0xf]  ;;  %v3093_v37 = vld [vmem:[#allocation8 + $0x44] sm:$0xf0]  ;;  %v2800_v30 = vld [vmem:[#allocation8 + $0x98] sm:$0xf0] }
 0x136   : > { %1633 = vmatpush.bf16.msra.mxu1 %v2831_v34  ;;  %v2803_v31 = vor.u32 %v3102_v29, %v2800_v30  ;;  %v2790_v34 = vld [vmem:[#allocation8 + $0x80] sm:$0xf]  ;;  %v1759_v30 = vsel %vm1758_vm2, %v3871_v38, 0.0 }
 0x139   : > { %1645 = vmatpush.bf16.msra.mxu2 %v2787_v8  ;;  %1659 = vmatpush.bf16.msra.mxu3 %v2851_v12  ;;  %v2806_v12 = vld [vmem:[#allocation8 + $0xa0] sm:$0xf] }
 0x13d   : > { %1646 = vmatpush.bf16.msra.mxu2 %v2779_v21  ;;  %1660 = vmatpush.bf16.msra.mxu3 %v2843_v25  ;;  %v3087_v21 = vld [vmem:[#allocation8 + $0x14] sm:$0xf0]  ;;  %v3086_v25 = vld [vmem:[#allocation8 + $0x14] sm:$0xf] }
 0x13e   : > { %v2735_v23 = vor.u32 %v3087_v21, %v2734_v20  ;;  %v2739_v28 = vor.u32 %v3086_v25, %v2736_v26 }
 0x141   : > { %1647 = vmatpush.bf16.msra.mxu2 %v2771_v35  ;;  %1661 = vmatpush.bf16.msra.mxu3 %v2835_v40 }
 0x199   : > { %v1322_v41 = vpop.f32.mrf.mxu0  ;;  %v1336_v42 = vpop.f32.mrf.mxu1 }
 0x19a   : > { %v1337_v43 = vadd.f32 %v1336_v42, %v1322_v41  ;;  %v3109_v41 = vld [vmem:[#allocation8 + $0xc4] sm:$0xf0]  ;;  %v3092_v42 = vld [vmem:[#allocation8 + $0x44] sm:$0xf] }
 0x19c   : > { %v1341_v45 = vmul.f32 0.0625, %v1337_v43  ;;  %v2760_v43 = vld [vmem:[#allocation8 + $0x48] sm:$0xf0] }
 0x19e   : > { %v1348_v46 = vadd.f32 %v1346_v44, %v1341_v45  ;;  %v2824_v45 = vld [vmem:[#allocation8 + $0xc8] sm:$0xf0] }
 0x1a0   : > { %v1351_v47 = vsel %vm1350_vm0, %v1348_v46, -inf }
 0x1a1   : > { %v1338_v48 = vpop.f32.mrf.mxu1  ;;  %1352 = vmax.xlane.f32.xlu0 %v1351_v47  ;;  %v1324_v49 = vpop.f32.mrf.mxu0  ;;  %v2823_v47 = vor.u32 %v3109_v41, %v2822_v39  ;;  %v2728_v39 = vld [vmem:[#allocation8 + $0x8] sm:$0xf0] }
 0x1a2   : > { %v1339_v50 = vadd.f32 %v1338_v48, %v1324_v49  ;;  %v2763_v48 = vor.u32 %v3092_v42, %v2760_v43  ;;  %v2750_v49 = vld [vmem:[#allocation8 + $0x30] sm:$0xf]  ;;  %v3100_v42 = vld [vmem:[#allocation8 + $0x84] sm:$0xf]  ;;  %v2792_v43 = vld [vmem:[#allocation8 + $0x88] sm:$0xf0] }
 0x1a3   : > { %1634 = vmatpush.bf16.msra.mxu1 %v2823_v47 }
 0x1a4   : > { %v1342_v51 = vmul.f32 0.0625, %v1339_v50  ;;  %v3091_v50 = vld [vmem:[#allocation8 + $0x34] sm:$0xf0]  ;;  %1648 = vmatpush.bf16.msra.mxu2 %v2763_v48 }
 0x1a6   : > { %v1349_v52 = vadd.f32 %v1346_v44, %v1342_v51  ;;  %v3108_v44 = vld [vmem:[#allocation8 + $0xc4] sm:$0xf]  ;;  %v2814_v51 = vld [vmem:[#allocation8 + $0xb0] sm:$0xf] }
 0x1a8   : > { %v1354_v53 = vsel %vm1350_vm0, %v1349_v52, -inf }
 0x1a9   : > { %1355 = vmax.xlane.f32.xlu0 %v1354_v53  ;;  %v3107_v53 = vld [vmem:[#allocation8 + $0xb4] sm:$0xf0] }
 0x214   : > { %v1353_v55 = vpop.xlane.xlu0 %1352 }
 0x215   : > { %v1357_v56 = vsub.f32 %v1348_v46, %v1353_v55  ;;  %v2759_v46 = vor.u32 %v3093_v37, %v2758_v36  ;;  %v3090_v55 = vld [vmem:[#allocation8 + $0x34] sm:$0xf]  ;;  %v3101_v36 = vld [vmem:[#allocation8 + $0x84] sm:$0xf0]  ;;  %v3084_v37 = vld [vmem:[#allocation8 + $0x4] sm:$0xf] }
 0x216   : > { %v2791_v40 = vor.u32 %v3101_v36, %v2790_v34  ;;  %v2731_v41 = vor.u32 %v3084_v37, %v2728_v39  ;;  %v2912_v34 = vld [vmem:[#allocation13 + $0x70] sm:$0xf]  ;;  %v3147_v39 = vld [vmem:[#allocation13 + $0xf4] sm:$0xf0] }
 0x217   : > { %v1359_v58 = vmul.f32 1.442695, %v1357_v56  ;;  %v2752_v56 = vld [vmem:[#allocation8 + $0x38] sm:$0xf0]  ;;  %1620 = vmatpush.bf16.msra.mxu0 %v2759_v46  ;;  %v2976_v36 = vld [vmem:[#allocation13 + $0xf0] sm:$0xf] }
 0x219   : > { %3274 = vpow2.f32 %v1359_v58  ;;  %v3106_v58 = vld [vmem:[#allocation8 + $0xb4] sm:$0xf] }
 0x21c   : > { %v1356_v59 = vpop.xlane.xlu0 %1355 }
 0x21d   : > { %v1358_v60 = vsub.f32 %v1349_v52, %v1356_v59  ;;  %v2827_v52 = vor.u32 %v3108_v44, %v2824_v45  ;;  %v2816_v59 = vld [vmem:[#allocation8 + $0xb8] sm:$0xf0]  ;;  %v2795_v44 = vor.u32 %v3100_v42, %v2792_v43 }
 0x21e   : > { %v2819_v1 = vor.u32 %v3106_v58, %v2816_v59 }
 0x21f   : > { %v3876_v54 = vpop.eup %3274  ;;  %v1361_v61 = vmul.f32 1.442695, %v1358_v60  ;;  %v2751_v60 = vor.u32 %v3091_v50, %v2750_v49  ;;  %1662 = vmatpush.bf16.msra.mxu3 %v2827_v52 }
 0x220   : > { %v1363_v57 = vsel %vm1350_vm0, %v3876_v54, 0.0 }
 0x221   : > { %3276 = vpow2.f32 %v1361_v61  ;;  %1364 = vadd.xlane.f32.xlu1 %v1363_v57  ;;  %v2815_v57 = vor.u32 %v3107_v53, %v2814_v51  ;;  %1621 = vmatpush.bf16.msra.mxu0 %v2751_v60 }
 0x223   : > { %1635 = vmatpush.bf16.msra.mxu1 %v2815_v57  ;;  %1663 = vmatpush.bf16.msra.mxu3 %v2819_v1  ;;  %v3297_v1 = vld [vmem:[%s3845_s16 + $0x18] sm:$0xff] }
 0x225   : > { %1622 = vmatpush.bf16.msra.mxu0 %v2743_v13 }
 0x227   : > { %v3880_v62 = vpop.eup %3276 }
 0x228   : > { %v1366_v63 = vsel %vm1350_vm0, %v3880_v62, 0.0 }
 0x229   : > { %1367 = vadd.xlane.f32.xlu1 %v1366_v63  ;;  %v2755_v63 = vor.u32 %v3090_v55, %v2752_v56  ;;  %1623 = vmatpush.bf16.msra.mxu0 %v2735_v23 }
 0x22b   : > { %1649 = vmatpush.bf16.msra.mxu2 %v2755_v63  ;;  %v3296_v63 = vld [vmem:[%s3845_s16 + $0x10] sm:$0xff] }
 0x22f   : > { %1650 = vmatpush.bf16.msra.mxu2 %v2747_v17 }
 0x233   : > { %1651 = vmatpush.bf16.msra.mxu2 %v2739_v28 }
 0x237   : > { %1652 = vmatpush.bf16.msra.mxu2 %v2731_v41  ;;  %v2977_v41 = vor.u32 %v3147_v39, %v2976_v36  ;;  %v2898_v36 = vld [vmem:[#allocation13 + $0x58] sm:$0xf0] }
 0x294   : > { %v1365_v33 = vpop.xlane.xlu1 %1364 }
 0x295   : > { %3278 = vrcp.f32 %v1365_v33  ;;  %v3085_v33 = vld [vmem:[#allocation8 + $0x4] sm:$0xf0] }
 0x296   : > { %v2727_v35 = vor.u32 %v3085_v33, %v2726_v32 }
 0x298   : > { %1624 = vmatpush.bf16.msra.mxu0 %v2727_v35  ;;  %v3131_v35 = vld [vmem:[#allocation13 + $0x74] sm:$0xf0] }
 0x299   : > { %v2913_v37 = vor.u32 %v3131_v35, %v2912_v34  ;;  %v3126_v35 = vld [vmem:[#allocation13 + $0x54] sm:$0xf] }
 0x29a   : > { %v2901_v39 = vor.u32 %v3126_v35, %v2898_v36  ;;  %v3132_v36 = vld [vmem:[#allocation13 + $0x84] sm:$0xf] }
 0x29b   : > { %v3279_v0 = vpop.eup %3278 }
 0x29c   : > { %v1368_v61 = vpop.xlane.xlu1 %1367  ;;  %v1371_v2 = vmul.f32 %v3279_v0, %v3876_v54  ;;  %v3105_v54 = vld [vmem:[#allocation8 + $0xa4] sm:$0xf0] }
 0x29d   : > { %3280 = vrcp.f32 %v1368_v61  ;;  %v2807_v16 = vor.u32 %v3105_v54, %v2806_v12 }
 0x29e   : > { %v1373_v4 = vpack.c.bf16 %v1371_v2, %v1371_v2  ;;  %3282 = vrcp.f32 %v3634_v11  ;;  %v2914_v11 = vld [vmem:[#allocation13 + $0x78] sm:$0xf0] }
 0x29f   : > { %1636 = vmatpush.bf16.msra.mxu1 %v2807_v16 }
 0x2a0   : > { %v1379_v7 = vunpack.c.l.b16 %v1373_v4 }
 0x2a3   : > { %v3281_v3 = vpop.eup %3280  ;;  %1637 = vmatpush.bf16.msra.mxu1 %v2799_v27 }
 0x2a4   : > { %v1372_v5 = vmul.f32 %v3281_v3, %v3880_v62  ;;  %v2811_v62 = vor.u32 %v3104_v18, %v2808_v19  ;;  %v3283_v12 = vpop.eup %3282 }
 0x2a5   : > { %v1684_v13 = vmul.f32 256.0, %v3283_v12  ;;  %vm1688_vm1 = vweird.f32 %v3283_v12 }
 0x2a6   : > { %v1374_v6 = vpack.c.bf16 %v1372_v5, %v1372_v5  ;;  %1664 = vmatpush.bf16.msra.mxu3 %v2811_v62 }
 0x2a7   : > { %1638 = vmatpush.bf16.msra.mxu1 %v2791_v40  ;;  %v1685_v54 = vsub.f32 1.0, %v1684_v13  ;;  %v2978_v13 = vld [vmem:[#allocation13 + $0xf8] sm:$0xf0] }
 0x2a8   : > { %v1380_v8 = vunpack.c.l.b16 %v1374_v6  ;;  %v3298_v6 = vld [vmem:[%s3845_s16 + $0x8] sm:$0xff] }
 0x2a9   : > { %v1686_v14 = vmul.f32 %v3283_v12, %v1685_v54 }
 0x2aa   : > { %v1381_v9 = vpack.c.b16 %v1380_v8, %v1379_v7  ;;  %1665 = vmatpush.bf16.msra.mxu3 %v2803_v31  ;;  %v3299_v8 = vld [vmem:[%s3845_s16] sm:$0xff] }
 0x2ab   : > { %v1687_v15 = vadd.f32 %v3283_v12, %v1686_v14 }
 0x2ac   : > { %2722 = vmatmul.msk.bf16.vlgmr.msrb.gmra.mxu2 %vm1350_vm0, %v1381_v9  ;;  %2723 = vmatmul.msk.bf16.vlgmr.msrb.gmra.mxu3 %vm1350_vm0, %v1381_v9 }
 0x2ad   : > { %v1689_v16 = vsel %vm1688_vm1, %v3283_v12, %v1687_v15  ;;  %2022 = vmatpush.bf16.msrb.mxu2 %v2913_v37  ;;  %v3146_v12 = vld [vmem:[#allocation13 + $0xf4] sm:$0xf] }
 0x2ae   : > { %1666 = vmatpush.bf16.msra.mxu3 %v2795_v44  ;;  %v3142_v37 = vld [vmem:[#allocation13 + $0xd4] sm:$0xf] }
 0x2b2   : > { %2035 = vmatpush.bf16.msrb.mxu3 %v2977_v41  ;;  %v2888_v41 = vld [vmem:[#allocation13 + $0x40] sm:$0xf] }
 0x32f   : > { %v1404_v45 = vpop.f32.mrf.mxu2  ;;  %v1418_v46 = vpop.f32.mrf.mxu3 }
 0x337   : > { %v1406_v47 = vpop.f32.mrf.mxu2  ;;  %v1420_v48 = vpop.f32.mrf.mxu3 }
 0x338   : > { %v1423_v49 = vpack.c.bf16 %v1406_v47, %v1404_v45  ;;  %v1424_v50 = vpack.c.bf16 %v1420_v48, %v1418_v46 }
 0x33a   : > { %1625 = vmatmul.bf16.vlgmr.msra.gmra.mxu0 %v1423_v49  ;;  %1639 = vmatmul.bf16.vlgmr.msra.gmra.mxu1 %v1424_v50 }
 0x33b   : > { %1653 = vmatmul.bf16.vlgmr.msra.gmra.mxu2 %v1423_v49  ;;  %1667 = vmatmul.bf16.vlgmr.msra.gmra.mxu3 %v1424_v50  ;;  %v1734_v49 = vld [vmem:[#allocation10] sm:$0x3] }
 0x3b7   : > { %v1626_v51 = vpop.f32.mrf.mxu0  ;;  %v1640_v52 = vpop.f32.mrf.mxu1 }
 0x3b8   : > { %v1641_v5 = vadd.f32 %v1640_v52, %v1626_v51 }
 0x3ba   : > { %v1673_v9 = vadd.f32 %v3299_v8, %v1641_v5 }
 0x3be   : > { %v1654_v53 = vpop.f32.mrf.mxu2  ;;  %v1668_v55 = vpop.f32.mrf.mxu3 }
 0x3bf   : > { %v1628_v56 = vpop.f32.mrf.mxu0  ;;  %v1642_v58 = vpop.f32.mrf.mxu1  ;;  %v1669_v3 = vadd.f32 %v1668_v55, %v1654_v53  ;;  %v1744_v53 = vld [vmem:[#allocation11] sm:$0x3]  ;;  %v1736_v55 = vperm.slane %v1734_v49, 0 }
 0x3c0   : > { %v1643_v59 = vadd.f32 %v1642_v58, %v1628_v56  ;;  %v1737_v56 = vperm.slane %v1734_v49, 1  ;;  %v3140_v49 = vld [vmem:[#allocation13 + $0xc4] sm:$0xf] }
 0x3c1   : > { %v1674_v7 = vadd.f32 %v3298_v6, %v1669_v3 }
 0x3c2   : > { %v1675_v0 = vadd.f32 %v3296_v63, %v1643_v59  ;;  %v1747_v63 = vperm.slane %v1744_v53, 1 }
 0x3c3   : > { %v1677_v10 = vadd.f32 %v1674_v7, %v1673_v9 }
 0x3c6   : > { %v1656_v60 = vpop.f32.mrf.mxu2  ;;  %v1670_v61 = vpop.f32.mrf.mxu3 }
 0x3c7   : > { %v1671_v57 = vadd.f32 %v1670_v61, %v1656_v60 }
 0x3c9   : > { %v1676_v2 = vadd.f32 %v3297_v1, %v1671_v57  ;;  %v1746_v57 = vperm.slane %v1744_v53, 0  ;;  %v2880_v53 = vld [vmem:[#allocation13 + $0x30] sm:$0xf] }
 0x3cb   : > { %v1680_v4 = vadd.f32 %v1676_v2, %v1675_v0 }
 0x3cd   : > { %1681 = vadd.xlane.f32.xlu2 %v1680_v4 }
 0x3d5   : > { %1678 = vadd.xlane.f32.xlu2 %v1677_v10  ;;  %v3130_v10 = vld [vmem:[#allocation13 + $0x74] sm:$0xf] }
 0x3dd   : > { %1760 = vadd.xlane.f32.xlu2 %v1759_v30 }
 0x440   : > { %v1682_v17 = vpop.xlane.xlu2 %1681 }
 0x441   : > { %v1691_v18 = vmul.f32 %v1689_v16, %v1682_v17  ;;  %v2917_v17 = vor.u32 %v3130_v10, %v2914_v11  ;;  %v3136_v10 = vld [vmem:[#allocation13 + $0xa4] sm:$0xf]  ;;  %v2938_v11 = vld [vmem:[#allocation13 + $0xa8] sm:$0xf0] }
 0x443   : > { %v1694_v19 = vsub.f32 %v1675_v0, %v1691_v18  ;;  %v1695_v62 = vsub.f32 %v1676_v2, %v1691_v18  ;;  %v2981_v18 = vor.u32 %v3146_v12, %v2978_v13 }
 0x445   : > { %v1698_v20 = vmul.f32 %v1694_v19, %v1694_v19  ;;  %v1699_v21 = vmul.f32 %v1695_v62, %v1695_v62 }
 0x447   : > { %v1703_v22 = vadd.f32 %v1699_v21, %v1698_v20  ;;  %v2968_v20 = vld [vmem:[#allocation13 + $0xe0] sm:$0xf] }
 0x448   : > { %v1679_v23 = vpop.xlane.xlu2 %1678 }
 0x449   : > { %v1690_v24 = vmul.f32 %v1689_v16, %v1679_v23  ;;  %1704 = vadd.xlane.f32.xlu0 %v1703_v22  ;;  %v3145_v22 = vld [vmem:[#allocation13 + $0xe4] sm:$0xf0]  ;;  %v3128_v23 = vld [vmem:[#allocation13 + $0x64] sm:$0xf] }
 0x44b   : > { %v3892_v25 = vsub.f32 %v1673_v9, %v1690_v24  ;;  %v3894_v26 = vsub.f32 %v1674_v7, %v1690_v24  ;;  %v2906_v24 = vld [vmem:[#allocation13 + $0x68] sm:$0xf0] }
 0x44d   : > { %v1696_v27 = vmul.f32 %v3892_v25, %v3892_v25  ;;  %v1697_v28 = vmul.f32 %v3894_v26, %v3894_v26 }
 0x44f   : > { %v1700_v29 = vadd.f32 %v1697_v28, %v1696_v27  ;;  %v3144_v27 = vld [vmem:[#allocation13 + $0xe4] sm:$0xf]  ;;  %v2970_v28 = vld [vmem:[#allocation13 + $0xe8] sm:$0xf0] }
 0x450   : > { %v2973_v30 = vor.u32 %v3144_v27, %v2970_v28  ;;  %v2856_v28 = vld [vmem:[#allocation13] sm:$0xf] }
 0x451   : > { %1701 = vadd.xlane.f32.xlu1 %v1700_v29  ;;  %v2896_v29 = vld [vmem:[#allocation13 + $0x50] sm:$0xf] }
 0x4bc   : > { %v1705_v31 = vpop.xlane.xlu0 %1704 }
 0x4bd   : > { %v1707_v32 = vmul.f32 %v1705_v31, %v1689_v16  ;;  %v3127_v31 = vld [vmem:[#allocation13 + $0x54] sm:$0xf0] }
 0x4bf   : > { %v1709_v33 = vadd.f32 1e-05, %v1707_v32  ;;  %v2960_v32 = vld [vmem:[#allocation13 + $0xd0] sm:$0xf] }
 0x4c1   : > { %3284 = vrsqrt.f32 %v1709_v33  ;;  %vm1726_vm4 = vweird.f32 %v1709_v33 }
 0x4c4   : > { %v1702_v40 = vpop.xlane.xlu1 %1701 }
 0x4c5   : > { %v1706_v42 = vmul.f32 %v1702_v40, %v1689_v16  ;;  %v2962_v40 = vld [vmem:[#allocation13 + $0xd8] sm:$0xf0] }
 0x4c7   : > { %v3285_v43 = vpop.eup %3284  ;;  %v1708_v44 = vadd.f32 1e-05, %v1706_v42  ;;  %v3125_v42 = vld [vmem:[#allocation13 + $0x44] sm:$0xf0] }
 0x4c8   : > { %v1721_v45 = vmul.f32 %v3285_v43, %v1709_v33  ;;  %vm1727_vm3 = vweird.f32 %v3285_v43  ;;  %v3143_v33 = vld [vmem:[#allocation13 + $0xd4] sm:$0xf0] }
 0x4c9   : > { %3286 = vrsqrt.f32 %v1708_v44  ;;  %vm1728_vm5 = vmor %vm1726_vm4, %vm1727_vm3  ;;  %vm1716_vm7 = vweird.f32 %v1708_v44  ;;  %v2961_v34 = vor.u32 %v3143_v33, %v2960_v32  ;;  %v3133_v32 = vld [vmem:[#allocation13 + $0x84] sm:$0xf0]  ;;  %v3116_v33 = vld [vmem:[#allocation13 + $0x4] sm:$0xf] }
 0x4ca   : > { %v1722_v46 = vmul.f32 %v3285_v43, %v1721_v45  ;;  %v3141_v45 = vld [vmem:[#allocation13 + $0xc4] sm:$0xf0] }
 0x4cc   : > { %v1723_v47 = vmul.f32 0.5, %v1722_v46  ;;  %v3124_v46 = vld [vmem:[#allocation13 + $0x44] sm:$0xf] }
 0x4ce   : > { %v1724_v48 = vsub.f32 1.5, %v1723_v47  ;;  %v2889_v47 = vor.u32 %v3125_v42, %v2888_v41 }
 0x4cf   : > { %v3287_v50 = vpop.eup %3286 }
 0x4d0   : > { %v1725_v51 = vmul.f32 %v3285_v43, %v1724_v48  ;;  %v1711_v52 = vmul.f32 %v3287_v50, %v1708_v44  ;;  %vm1717_vm6 = vweird.f32 %v3287_v50  ;;  %v2952_v44 = vld [vmem:[#allocation13 + $0xc0] sm:$0xf]  ;;  %v2890_v48 = vld [vmem:[#allocation13 + $0x48] sm:$0xf0] }
 0x4d1   : > { %vm1718_vm8 = vmor %vm1716_vm7, %vm1717_vm6 }
 0x4d2   : > { %v1729_v58 = vsel %vm1728_vm5, %v3285_v43, %v1725_v51  ;;  %v1712_v59 = vmul.f32 %v3287_v50, %v1711_v52  ;;  %v2965_v43 = vor.u32 %v3142_v37, %v2962_v40  ;;  %v2953_v51 = vor.u32 %v3141_v45, %v2952_v44  ;;  %v2922_v37 = vld [vmem:[#allocation13 + $0x88] sm:$0xf0] }
 0x4d3   : > { %v1732_v60 = vmul.f32 %v1729_v58, %v1694_v19  ;;  %v1733_v61 = vmul.f32 %v1729_v58, %v1695_v62  ;;  %v2904_v19 = vld [vmem:[#allocation13 + $0x60] sm:$0xf]  ;;  %v3129_v62 = vld [vmem:[#allocation13 + $0x64] sm:$0xf0]  ;;  %v2893_v52 = vor.u32 %v3124_v46, %v2890_v48 }
 0x4d4   : > { %v1713_v0 = vmul.f32 0.5, %v1712_v59  ;;  %v2905_v21 = vor.u32 %v3129_v62, %v2904_v19  ;;  %v3139_v59 = vld [vmem:[#allocation13 + $0xb4] sm:$0xf0]  ;;  %v3118_v19 = vld [vmem:[#allocation13 + $0x14] sm:$0xf] }
 0x4d5   : > { %v1742_v1 = vmul.f32 %v1736_v55, %v1732_v60  ;;  %v1743_v2 = vmul.f32 %v1737_v56, %v1733_v61  ;;  %v3122_v60 = vld [vmem:[#allocation13 + $0x34] sm:$0xf]  ;;  %v2882_v61 = vld [vmem:[#allocation13 + $0x38] sm:$0xf0] }
 0x4d6   : > { %v1714_v3 = vsub.f32 1.5, %v1713_v0  ;;  %2023 = vmatpush.bf16.msrb.mxu2 %v2905_v21  ;;  %v2866_v62 = vld [vmem:[#allocation13 + $0x18] sm:$0xf0] }
 0x4d7   : > { %v1752_v4 = vadd.f32 %v1746_v57, %v1742_v1  ;;  %v1753_v5 = vadd.f32 %v1747_v63, %v1743_v2  ;;  %v2885_v2 = vor.u32 %v3122_v60, %v2882_v61  ;;  %v2930_v21 = vld [vmem:[#allocation13 + $0x98] sm:$0xf0] }
 0x4d8   : > { %v1715_v6 = vmul.f32 %v3287_v50, %v1714_v3  ;;  %v2872_v3 = vld [vmem:[#allocation13 + $0x20] sm:$0xf] }
 0x4d9   : > { %1756 = vst [vmem:[%s3904_s5 + $0x10] sm:$0xff] %v1752_v4  ;;  %1780 = vmatpush.msrb.mxu0 %v1752_v4  ;;  %1800 = vmatpush.msrb.mxu1 %v1753_v5  ;;  %v3121_v4 = vld [vmem:[#allocation13 + $0x24] sm:$0xf0] }
 0x4da   : > { %v1719_v7 = vsel %vm1718_vm8, %v3287_v50, %v1715_v6  ;;  %1757 = vst [vmem:[%s3904_s5 + $0x18] sm:$0xff] %v1753_v5  ;;  %v2954_v50 = vld [vmem:[#allocation13 + $0xc8] sm:$0xf0]  ;;  %v2936_v5 = vld [vmem:[#allocation13 + $0xa0] sm:$0xf]  ;;  %v2873_v12 = vor.u32 %v3121_v4, %v2872_v3 }
 0x4db   : > { %v1730_v8 = vmul.f32 %v1719_v7, %v3892_v25  ;;  %v1731_v9 = vmul.f32 %v1719_v7, %v3894_v26  ;;  %v2969_v25 = vor.u32 %v3145_v22, %v2968_v20  ;;  %v2909_v26 = vor.u32 %v3128_v23, %v2906_v24  ;;  %v3137_v7 = vld [vmem:[#allocation13 + $0xa4] sm:$0xf0]  ;;  %v3134_v20 = vld [vmem:[#allocation13 + $0x94] sm:$0xf] }
 0x4dc   : > { %v2957_v58 = vor.u32 %v3140_v49, %v2954_v50  ;;  %v2937_v13 = vor.u32 %v3137_v7, %v2936_v5  ;;  %v2869_v24 = vor.u32 %v3118_v19, %v2866_v62 }
 0x4dd   : > { %v1740_v54 = vmul.f32 %v1736_v55, %v1730_v8  ;;  %v1741_v14 = vmul.f32 %v1737_v56, %v1731_v9  ;;  %2036 = vmatpush.bf16.msrb.mxu3 %v2969_v25  ;;  %v3123_v55 = vld [vmem:[#allocation13 + $0x34] sm:$0xf0]  ;;  %v2944_v56 = vld [vmem:[#allocation13 + $0xb0] sm:$0xf]  ;;  %v3120_v8 = vld [vmem:[#allocation13 + $0x24] sm:$0xf]  ;;  %v2933_v25 = vor.u32 %v3134_v20, %v2930_v21 }
 0x4de   : > { %v2881_v0 = vor.u32 %v3123_v55, %v2880_v53  ;;  %v2945_v1 = vor.u32 %v3139_v59, %v2944_v56  ;;  %v2874_v9 = vld [vmem:[#allocation13 + $0x28] sm:$0xf0] }
 0x4df   : > { %v1750_v15 = vadd.f32 %v1746_v57, %v1740_v54  ;;  %v1751_v16 = vadd.f32 %v1747_v63, %v1741_v14  ;;  %v3138_v57 = vld [vmem:[#allocation13 + $0xb4] sm:$0xf]  ;;  %v2946_v63 = vld [vmem:[#allocation13 + $0xb8] sm:$0xf0]  ;;  %v2877_v54 = vor.u32 %v3120_v8, %v2874_v9  ;;  %v2864_v14 = vld [vmem:[#allocation13 + $0x10] sm:$0xf] }
 0x4e0   : > { %v2949_v6 = vor.u32 %v3138_v57, %v2946_v63 }
 0x4e1   : > { %1754 = vst [vmem:[%s3904_s5] sm:$0xff] %v1750_v15  ;;  %1781 = vmatpush.msrb.mxu0 %v1750_v15  ;;  %1801 = vmatpush.msrb.mxu1 %v1751_v16  ;;  %v3119_v15 = vld [vmem:[#allocation13 + $0x14] sm:$0xf0] }
 0x4e2   : > { %1755 = vst [vmem:[%s3904_s5 + $0x8] sm:$0xff] %v1751_v16  ;;  %2852 = vmatmul.msk.f32.vlgmr.msrb.gmra.mxu0 %vm1350_vm0, %v3871_v38  ;;  %2853 = vmatmul.msk.f32.vlgmr.msrb.gmra.mxu1 %vm1350_vm0, %v3871_v38  ;;  %v2897_v38 = vor.u32 %v3127_v31, %v2896_v29  ;;  %v2928_v16 = vld [vmem:[#allocation13 + $0x90] sm:$0xf]  ;;  %v2865_v22 = vor.u32 %v3119_v15, %v2864_v14  ;;  %v3117_v29 = vld [vmem:[#allocation13 + $0x4] sm:$0xf0] }
 0x4e3   : > { %2048 = vmatpush.bf16.msra.mxu0 %v2917_v17  ;;  %2061 = vmatpush.bf16.msra.mxu1 %v2981_v18  ;;  %v2941_v17 = vor.u32 %v3136_v10, %v2938_v11  ;;  %v3135_v18 = vld [vmem:[#allocation13 + $0x94] sm:$0xf0]  ;;  %v2857_v31 = vor.u32 %v3117_v29, %v2856_v28 }
 0x4e4   : > { %2024 = vmatpush.bf16.msrb.mxu2 %v2897_v38  ;;  %2037 = vmatpush.bf16.msrb.mxu3 %v2961_v34  ;;  %v2929_v23 = vor.u32 %v3135_v18, %v2928_v16  ;;  %v2858_v38 = vld [vmem:[#allocation13 + $0x8] sm:$0xf0] }
 0x4e5   : > { %v2861_v35 = vor.u32 %v3116_v33, %v2858_v38 }
 0x4e7   : > { %2049 = vmatpush.bf16.msra.mxu0 %v2909_v26  ;;  %2062 = vmatpush.bf16.msra.mxu1 %v2973_v30  ;;  %v1761_v26 = vpop.xlane.xlu2 %1760  ;;  %v2920_v30 = vld [vmem:[#allocation13 + $0x80] sm:$0xf] }
 0x4e8   : > { %2025 = vmatpush.bf16.msrb.mxu2 %v2889_v47  ;;  %2038 = vmatpush.bf16.msrb.mxu3 %v2953_v51  ;;  %v1762_v27 = vmax.f32 %v1761_v26, 1.0  ;;  %v2921_v34 = vor.u32 %v3133_v32, %v2920_v30 }
 0x4ea   : > { %3288 = vrcp.f32 %v1762_v27  ;;  %vm1811_vm9 = vweird.f32 %v1762_v27  ;;  %v1817_v44 = vand.u32 2147483648, %v1762_v27  ;;  %v1815_v46 = vand.u32 2147483647, %v1762_v27 }
 0x4eb   : > { %2050 = vmatpush.bf16.msra.mxu0 %v2901_v39  ;;  %2063 = vmatpush.bf16.msra.mxu1 %v2965_v43  ;;  %v2925_v39 = vor.u32 %v3132_v36, %v2922_v37 }
 0x4ec   : > { %2026 = vmatpush.bf16.msrb.mxu2 %v2881_v0  ;;  %2039 = vmatpush.bf16.msrb.mxu3 %v2945_v1  ;;  %v1818_v47 = vor.u32 1.1754944e-38, %v1817_v44  ;;  %vm1816_vm12 = vcmp.eq.f32.partialorder %v1815_v46, 8.507059e+37 }
 0x4ef   : > { %2051 = vmatpush.bf16.msra.mxu0 %v2893_v52  ;;  %2064 = vmatpush.bf16.msra.mxu1 %v2957_v58  ;;  %v1856_v58 = vld [vmem:[#allocation14] sm:$0x3] }
 0x4f0   : > { %2027 = vmatpush.bf16.msrb.mxu2 %v2873_v12  ;;  %2040 = vmatpush.bf16.msrb.mxu3 %v2937_v13  ;;  %v3289_v40 = vpop.eup %3288  ;;  %v2019_v59 = vperm.slane %v1856_v58, 1  ;;  %v2018_v63 = vperm.slane %v1856_v58, 0 }
 0x4f1   : > { %v1807_v41 = vmul.f32 %v3289_v40, %v1762_v27  ;;  %vm1812_vm10 = vweird.f32 %v3289_v40 }
 0x4f2   : > { %vm1813_vm11 = vmor %vm1811_vm9, %vm1812_vm10 }
 0x4f3   : > { %2052 = vmatpush.bf16.msra.mxu0 %v2885_v2  ;;  %2065 = vmatpush.bf16.msra.mxu1 %v2949_v6  ;;  %v1808_v42 = vsub.f32 1.0, %v1807_v41 }
 0x4f4   : > { %2028 = vmatpush.bf16.msrb.mxu2 %v2865_v22  ;;  %2041 = vmatpush.bf16.msrb.mxu3 %v2929_v23 }
 0x4f5   : > { %v1809_v43 = vmul.f32 %v3289_v40, %v1808_v42 }
 0x4f7   : > { %2053 = vmatpush.bf16.msra.mxu0 %v2877_v54  ;;  %2066 = vmatpush.bf16.msra.mxu1 %v2941_v17  ;;  %v1810_v45 = vadd.f32 %v3289_v40, %v1809_v43 }
 0x4f8   : > { %2029 = vmatpush.bf16.msrb.mxu2 %v2857_v31  ;;  %2042 = vmatpush.bf16.msrb.mxu3 %v2921_v34 }
 0x4f9   : > { %v1814_v48 = vsel %vm1813_vm11, %v3289_v40, %v1810_v45 }
 0x4fa   : > { %v1819_v50 = vsel %vm1816_vm12, %v1818_v47, %v1814_v48 }
 0x4fb   : > { %2054 = vmatpush.bf16.msra.mxu0 %v2869_v24  ;;  %2067 = vmatpush.bf16.msra.mxu1 %v2933_v25 }
 0x4ff   : > { %2055 = vmatpush.bf16.msra.mxu0 %v2861_v35  ;;  %2068 = vmatpush.bf16.msra.mxu1 %v2925_v39 }
 0x55f   : > { %v1783_v49 = vpop.f32.mrf.mxu0  ;;  %v1803_v51 = vpop.f32.mrf.mxu1 }
 0x560   : > { %v1820_v52 = vmul.f32 %v1819_v50, %v1783_v49  ;;  %v1821_v53 = vmul.f32 %v1819_v50, %v1803_v51 }
 0x562   : > { %v1822_v55 = vpack.c.bf16 %v1820_v52, %v1820_v52  ;;  %v1823_v56 = vpack.c.bf16 %v1821_v53, %v1821_v53 }
 0x564   : > { %2030 = vmatmul.bf16.vlgmr.msrb.gmra.mxu2 %v1822_v55  ;;  %2043 = vmatmul.bf16.vlgmr.msrb.gmra.mxu3 %v1823_v56 }
 0x565   : > { %2056 = vmatmul.bf16.vlgmr.msra.gmra.mxu0 %v1822_v55  ;;  %2069 = vmatmul.bf16.vlgmr.msra.gmra.mxu1 %v1823_v56 }
 0x5e2   : > { %v2057_v60 = vpop.f32.mrf.mxu0  ;;  %v2070_v61 = vpop.f32.mrf.mxu1 }
 0x5e3   : > { %v2058_v57 = vadd.f32 %v2057_v60, %v2019_v59 }
 0x5e5   : > { %v2071_v2 = vadd.f32 %v2070_v61, %v2058_v57 }
 0x5e7   : > { %v2031_v0 = vpop.f32.mrf.mxu2  ;;  %v2044_v1 = vpop.f32.mrf.mxu3  ;;  %v2076_v8 = vsel %vm2074_vm13, %v2071_v2, -inf }
 0x5e8   : > { %v2032_v3 = vadd.f32 %v2031_v0, %v2018_v63 }
 0x5ea   : > { %v2045_v4 = vadd.f32 %v2044_v1, %v2032_v3  ;;  %v2059_v5 = vpop.f32.mrf.mxu0  ;;  %v2072_v6 = vpop.f32.mrf.mxu1 }
 0x5ec   : > { %v2075_v7 = vsel %vm2074_vm13, %v2045_v4, -inf }
 0x5ed   : > { %v2077_v9 = vmax.f32 %v2075_v7, %v2076_v8 }
 0x5ef   : > { %v2033_v10 = vpop.f32.mrf.mxu2  ;;  %v2046_v11 = vpop.f32.mrf.mxu3  ;;  %2078 = vmax.xlane.f32.xlu0 %v2077_v9 }
 0x662   : > { %v2079_v12 = vpop.xlane.xlu0 %2078 }
 0x663   : > { %v2080_v13 = vsub.f32 %v2045_v4, %v2079_v12  ;;  %v2081_v54 = vsub.f32 %v2071_v2, %v2079_v12 }
 0x665   : > { %v2082_v14 = vmul.f32 1.442695, %v2080_v13  ;;  %v2084_v15 = vmul.f32 1.442695, %v2081_v54 }
 0x667   : > { %3290 = vpow2.f32 %v2082_v14 }
 0x668   : > { %3292 = vpow2.f32 %v2084_v15 }
 0x66d   : > { %v3291_v16 = vpop.eup %3290 }
 0x66e   : > { %v3293_v17 = vpop.eup %3292  ;;  %v2086_v18 = vsel %vm2074_vm13, %v3291_v16, 0.0 }
 0x66f   : > { %v2087_v19 = vsel %vm2074_vm13, %v3293_v17, 0.0 }
 0x670   : > { %v2088_v62 = vadd.f32 %v2087_v19, %v2086_v18 }
 0x672   : > { %2089 = vadd.xlane.f32.xlu1 %v2088_v62 }
 0x673   : > { %3567 = shalt.err (!%p3564_p8)
}
 0x674   : > { %s3635_s25 = smov 256   ;;  %s3636_s23 = smov 16   ;;  %v2112_v29 = vlaneseq }
 0x675   : > { %3181 = dma.vmem_to_hbm [thread:$0]  (%p3735_p5), %s2138_s14, 512, %s2140_s26, %s2122_s22, %s3635_s25, %s3635_s25, %s3636_s23  }
 0x676   : > { %s2337_s5 = sshll.u32 %s3839_s29, 1  ;;  %vm2114_vm2 = vcmp.lt.s32.totalorder %v2112_v29, 256 }
 0x677   : > { %s536_s19 = scalar_lea.vmem %s3969_s10, %s2337_s5 }
 0x6e5   : > { %v2090_v20 = vpop.xlane.xlu1 %2089 }
 0x6e6   : > { %3294 = vrcp.f32 %v2090_v20  ;;  %v2102_v24 = vand.u32 2147483648, %v2090_v20  ;;  %v2100_v26 = vand.u32 2147483647, %v2090_v20  ;;  %vm2096_vm15 = vweird.f32 %v2090_v20 }
 0x6e8   : > { %v2103_v28 = vor.u32 1.1754944e-38, %v2102_v24  ;;  %vm2101_vm1 = vcmp.eq.f32.partialorder %v2100_v26, 8.507059e+37 }
 0x6ec   : > { %v3295_v21 = vpop.eup %3294 }
 0x6ed   : > { %v2092_v22 = vmul.f32 %v3295_v21, %v2090_v20  ;;  %vm2097_vm14 = vweird.f32 %v3295_v21 }
 0x6ee   : > { %vm2098_vm0 = vmor %vm2096_vm15, %vm2097_vm14 }
 0x6ef   : > { %v2093_v23 = vsub.f32 1.0, %v2092_v22 }
 0x6f1   : > { %v2094_v25 = vmul.f32 %v3295_v21, %v2093_v23 }
 0x6f3   : > { %v2095_v27 = vadd.f32 %v3295_v21, %v2094_v25 }
 0x6f5   : > { %v2099_v30 = vsel %vm2098_vm0, %v3295_v21, %v2095_v27 }
 0x6f6   : > { %v2104_v31 = vsel %vm2101_vm1, %v2103_v28, %v2099_v30 }
 0x6f7   : > { %v2106_v32 = vmul.f32 %v3293_v17, %v2104_v31  ;;  %v2105_v33 = vmul.f32 %v3291_v16, %v2104_v31 }
 0x6f9   : > { %v2109_v38 = vrot.slane %v2106_v32, 7 }
 0x6fb   : > { %v2110_v34 = vsel %vm2074_vm13, %v2105_v33, %v2109_v38 }
 0x6fc   : > { %2116 = vst.msk [vmem:[%s536_s19] sm:$0x3] %vm2114_vm2, %v2110_v34 }
 0x6fd PF: > { %p3228_p5 = scmp.ge.s32.totalorder %s3622_s20, 2  ;;  %s2161_s15 = sand.u32 1, %s3610_s17  }
 0x6fe   : > { %s2162_s29 = scalar_lea.sflag [#allocation4], %s2161_s15 }
 0x6ff   : > { %p3209_p9 = pnand %p3228_p5, %p3739_p6 }
 0x701   : > { %p3210_p10 = pneg %p3209_p9 }
 0x703   : > { %3605 = dma.done.wait (%p3210_p10), %s2162_s29, 512  }
 0x704   : > { %3607 = vsyncadd (%p3210_p10), %s2162_s29, 4294966784  ;;  %s3990_s20 = sld [smem:[#allocation24_spill]]  ;;  %s3993_s17 = smov %s3614_s18 }
 0x705   : > { %s3991_s7 = sld [smem:[#allocation23_spill]] }
 0x706   : > { %s3992_s19 = sld [smem:[#allocation25_spill]] }
 0x70a   : > { %p27_p11 = scmp.ge.s32.totalorder %s3990_s20, 4  }
 0x70b   : > { %s3994_s18 = smov %s3991_s7 }
 0x70c   :  { %29 = sbr.rel (!%p27_p11) target bundleno = 12 (0xc), region = 143 }
 0x711   :  { %2168 = vsyncpa [#allocation3], 1 }
 0x712   :  { %2170 = vsyncpa [#allocation3 + $0x1], 1 }
 0x713   :  { %2171 = vsyncpa [#allocation6], 1 }
 0x714   :  { %2172 = vsyncpa [#allocation9], 1 }
 0x715   :  { %2173 = vsyncpa [#allocation12], 1 }
 0x716   :  { %2174 = vsyncpa [#allocation15], 1 }
 0x717   :  { %2175 = vsyncpa [#allocation4], 1 }
 0x718   :  { %2177 = vsyncpa [#allocation4 + $0x1], 1 }

// kernel: physical_ai_forward.6
= control target key start
LH: loop header
LB: loop body
LE: loop exit
PB: predicated region body
PF: predicated region fallthrough
CT: control target
= control target key end

     0   :  { %10 = vsyncpa [#allocation3], 0  ;;  %s5412_s0 = inlined_call_operand.vmem [shape: f32[16,768], index: 0, kind: input, shape index: {}]   ;;  %s5413_s1 = inlined_call_operand.hbm [shape: bf16[768,768], index: 1, kind: input, shape index: {}]   ;;  %s5414_s2 = inlined_call_operand.hbm [shape: f32[1,768], index: 2, kind: input, shape index: {}]   ;;  %s5415_s3 = inlined_call_operand.hbm [shape: bf16[768,256], index: 3, kind: input, shape index: {}]   ;;  %s5416_s4 = inlined_call_operand.hbm [shape: f32[1,256], index: 4, kind: input, shape index: {}]   ;;  %s5417_s5 = inlined_call_operand.vmem [shape: f32[16,256], index: 5, kind: output, shape index: {}]  }
   0x1   :  { %11 = vsyncpa [#allocation5], 0  ;;  %s33_s20 = sshll.u32 %s5414_s2, 4  ;;  %s34_s20 = int_to_ptr.hbm [resolvable:$true] %s33_s20 }
   0x2   :  { %12 = vsyncpa [#allocation8], 0  ;;  %s5153_s21 = smov [#allocation4]   ;;  %s19_s25 = sshll.u32 %s5413_s1, 4  ;;  %s20_s25 = int_to_ptr.hbm [resolvable:$true] %s19_s25 }
   0x3   :  { %s35_s22 = sshll.u32 %s5153_s21, 4  ;;  %s5154_s26 = smov [#allocation2]   ;;  %s36_s22 = int_to_ptr.vmem [resolvable:$true] %s35_s22 }
   0x4   :  { %38 = dma.hbm_to_vmem [thread:$0]  %s34_s20, 96, %s36_s22, [#allocation5]  }
   0x5   :  { %s21_s27 = sshll.u32 %s5154_s26, 4  ;;  %s5155_s28 = smov 384   ;;  %s22_s27 = int_to_ptr.vmem [resolvable:$true] %s21_s27 }
   0x6   :  { %s5156_s29 = smov 24   ;;  %s43_s2 = sshll.u32 %s5415_s3, 4  ;;  %s44_s2 = int_to_ptr.hbm [resolvable:$true] %s43_s2 }
   0x7   :  { %27 = dma.hbm_to_vmem [thread:$0]  %s20_s25, 36864, %s22_s27, [#allocation3], %s5155_s28, %s5155_s28, %s5156_s29  }
   0x8   :  { %s5157_s7 = smov [#allocation6]   ;;  %s57_s1 = sshll.u32 %s5416_s4, 4  ;;  %s58_s1 = int_to_ptr.hbm [resolvable:$true] %s57_s1 }
   0x9   :  { %s45_s8 = sshll.u32 %s5157_s7, 4  ;;  %s5158_s11 = smov 128   ;;  %s46_s8 = int_to_ptr.vmem [resolvable:$true] %s45_s8 }
   0xa   :  { %s5159_s12 = smov 8   ;;  %s5160_s13 = smov [#allocation7]  }
   0xb   :  { %51 = dma.hbm_to_vmem [thread:$0]  %s44_s2, 12288, %s46_s8, [#allocation5], %s5158_s11, %s5158_s11, %s5159_s12  }
   0xc   :  { %s59_s14 = sshll.u32 %s5160_s13, 4  ;;  %s60_s14 = int_to_ptr.vmem [resolvable:$true] %s59_s14 }
   0xd   :  { %62 = dma.hbm_to_vmem [thread:$0]  %s58_s1, 32, %s60_s14, [#allocation8]  }
   0xe   :  { %5147 = dma.done.wait [#allocation3], 36864  }
   0xf   :  { %5148 = vsyncadd [#allocation3], 4294930432 }
  0x10   :  { %5149 = dma.done.wait [#allocation5], 12384  }
  0x11   :  { %5150 = vsyncadd [#allocation5], 4294954912 }
  0x12   :  { %5151 = dma.done.wait [#allocation8], 32  }
  0x13   :  { %5152 = vsyncadd [#allocation8], 4294967264  ;;  %v3292_v0 = vld [vmem:[#allocation2 + $0x150] sm:$0xf]  ;;  %v4703_v1 = vld [vmem:[#allocation2 + $0x164] sm:$0xf0] }
  0x14   :  { %v3484_v2 = vld [vmem:[#allocation2 + $0x2d0] sm:$0xf]  ;;  %v3293_v3 = vor.u32 %v4703_v1, %v3292_v0  ;;  %v4751_v4 = vld [vmem:[#allocation2 + $0x2e4] sm:$0xf0]  ;;  %v3268_v11 = vld [vmem:[#allocation2 + $0x120] sm:$0xf] }
  0x15   :  { %v3676_v5 = vld [vmem:[#allocation2 + $0x450] sm:$0xf]  ;;  %v4799_v6 = vld [vmem:[#allocation2 + $0x464] sm:$0xf0]  ;;  %v3485_v7 = vor.u32 %v4751_v4, %v3484_v2  ;;  %v4697_v13 = vld [vmem:[#allocation2 + $0x134] sm:$0xf0] }
  0x16   :  { %v3677_v8 = vor.u32 %v4799_v6, %v3676_v5  ;;  %v3868_v9 = vld [vmem:[#allocation2 + $0x5d0] sm:$0xf]  ;;  %v4847_v10 = vld [vmem:[#allocation2 + $0x5e4] sm:$0xf0]  ;;  %1839 = vmatpush.bf16.msra.mxu0 %v3293_v3  ;;  %v3460_v14 = vld [vmem:[#allocation2 + $0x2a0] sm:$0xf]  ;;  %v3269_v16 = vor.u32 %v4697_v13, %v3268_v11 }
  0x17   :  { %v3869_v12 = vor.u32 %v4847_v10, %v3868_v9  ;;  %v4745_v15 = vld [vmem:[#allocation2 + $0x2b4] sm:$0xf0]  ;;  %1853 = vmatpush.bf16.msra.mxu1 %v3485_v7  ;;  %v3652_v18 = vld [vmem:[#allocation2 + $0x420] sm:$0xf]  ;;  %v3244_v23 = vld [vmem:[#allocation2 + $0xf0] sm:$0xf] }
  0x18   :  { %1867 = vmatpush.bf16.msra.mxu2 %v3677_v8  ;;  %v3461_v17 = vor.u32 %v4745_v15, %v3460_v14  ;;  %v4793_v19 = vld [vmem:[#allocation2 + $0x434] sm:$0xf0]  ;;  %v3844_v20 = vld [vmem:[#allocation2 + $0x5a0] sm:$0xf]  ;;  %v4691_v24 = vld [vmem:[#allocation2 + $0x104] sm:$0xf0] }
  0x19   :  { %1881 = vmatpush.bf16.msra.mxu3 %v3869_v12  ;;  %v3653_v21 = vor.u32 %v4793_v19, %v3652_v18  ;;  %v4841_v22 = vld [vmem:[#allocation2 + $0x5b4] sm:$0xf0]  ;;  %v3436_v26 = vld [vmem:[#allocation2 + $0x270] sm:$0xf]  ;;  %v4739_v27 = vld [vmem:[#allocation2 + $0x284] sm:$0xf0]  ;;  %v3245_v29 = vor.u32 %v4691_v24, %v3244_v23 }
  0x1a   :  { %v3845_v25 = vor.u32 %v4841_v22, %v3844_v20  ;;  %v3628_v28 = vld [vmem:[#allocation2 + $0x3f0] sm:$0xf]  ;;  %1840 = vmatpush.bf16.msra.mxu0 %v3269_v16  ;;  %v4787_v30 = vld [vmem:[#allocation2 + $0x404] sm:$0xf0]  ;;  %v3437_v33 = vor.u32 %v4739_v27, %v3436_v26  ;;  %v3220_v35 = vld [vmem:[#allocation2 + $0xc0] sm:$0xf] }
  0x1b   :  { %v3820_v31 = vld [vmem:[#allocation2 + $0x570] sm:$0xf]  ;;  %v4835_v32 = vld [vmem:[#allocation2 + $0x584] sm:$0xf0]  ;;  %1854 = vmatpush.bf16.msra.mxu1 %v3461_v17  ;;  %v3629_v34 = vor.u32 %v4787_v30, %v3628_v28  ;;  %v4685_v36 = vld [vmem:[#allocation2 + $0xd4] sm:$0xf0] }
  0x1c   :  { %1868 = vmatpush.bf16.msra.mxu2 %v3653_v21  ;;  %v3412_v37 = vld [vmem:[#allocation2 + $0x240] sm:$0xf]  ;;  %v3821_v38 = vor.u32 %v4835_v32, %v3820_v31  ;;  %v4733_v39 = vld [vmem:[#allocation2 + $0x254] sm:$0xf0]  ;;  %v3221_v44 = vor.u32 %v4685_v36, %v3220_v35  ;;  %v3196_v47 = vld [vmem:[#allocation2 + $0x90] sm:$0xf] }
  0x1d   :  { %1882 = vmatpush.bf16.msra.mxu3 %v3845_v25  ;;  %v3604_v40 = vld [vmem:[#allocation2 + $0x3c0] sm:$0xf]  ;;  %v4781_v41 = vld [vmem:[#allocation2 + $0x3d4] sm:$0xf0]  ;;  %v3413_v45 = vor.u32 %v4733_v39, %v3412_v37  ;;  %v4679_v48 = vld [vmem:[#allocation2 + $0xa4] sm:$0xf0] }
  0x1e   :  { %v3796_v42 = vld [vmem:[#allocation2 + $0x540] sm:$0xf]  ;;  %v4829_v43 = vld [vmem:[#allocation2 + $0x554] sm:$0xf0]  ;;  %1841 = vmatpush.bf16.msra.mxu0 %v3245_v29  ;;  %v3605_v46 = vor.u32 %v4781_v41, %v3604_v40  ;;  %v3388_v49 = vld [vmem:[#allocation2 + $0x210] sm:$0xf]  ;;  %v3197_v56 = vor.u32 %v4679_v48, %v3196_v47 }
  0x1f   :  { %1855 = vmatpush.bf16.msra.mxu1 %v3437_v33  ;;  %v3797_v50 = vor.u32 %v4829_v43, %v3796_v42  ;;  %v4727_v51 = vld [vmem:[#allocation2 + $0x224] sm:$0xf0]  ;;  %v3580_v52 = vld [vmem:[#allocation2 + $0x390] sm:$0xf]  ;;  %v3172_v59 = vld [vmem:[#allocation2 + $0x60] sm:$0xf] }
  0x20   :  { %1869 = vmatpush.bf16.msra.mxu2 %v3629_v34  ;;  %v4775_v53 = vld [vmem:[#allocation2 + $0x3a4] sm:$0xf0]  ;;  %v3772_v54 = vld [vmem:[#allocation2 + $0x510] sm:$0xf]  ;;  %v3389_v57 = vor.u32 %v4727_v51, %v3388_v49  ;;  %v4673_v60 = vld [vmem:[#allocation2 + $0x74] sm:$0xf0] }
  0x21   :  { %1883 = vmatpush.bf16.msra.mxu3 %v3821_v38  ;;  %v4823_v55 = vld [vmem:[#allocation2 + $0x524] sm:$0xf0]  ;;  %v3581_v58 = vor.u32 %v4775_v53, %v3580_v52  ;;  %v3364_v61 = vld [vmem:[#allocation2 + $0x1e0] sm:$0xf]  ;;  %v4721_v63 = vld [vmem:[#allocation2 + $0x1f4] sm:$0xf0]  ;;  %v3173_v4 = vor.u32 %v4673_v60, %v3172_v59 }
  0x22   :  { %1842 = vmatpush.bf16.msra.mxu0 %v3221_v44  ;;  %v3773_v62 = vor.u32 %v4823_v55, %v3772_v54  ;;  %v3556_v0 = vld [vmem:[#allocation2 + $0x360] sm:$0xf]  ;;  %v4769_v1 = vld [vmem:[#allocation2 + $0x374] sm:$0xf0]  ;;  %v3365_v5 = vor.u32 %v4721_v63, %v3364_v61  ;;  %v3148_v7 = vld [vmem:[#allocation2 + $0x30] sm:$0xf] }
  0x23   :  { %1856 = vmatpush.bf16.msra.mxu1 %v3413_v45  ;;  %v3748_v2 = vld [vmem:[#allocation2 + $0x4e0] sm:$0xf]  ;;  %v4817_v3 = vld [vmem:[#allocation2 + $0x4f4] sm:$0xf0]  ;;  %v3557_v6 = vor.u32 %v4769_v1, %v3556_v0  ;;  %v4667_v8 = vld [vmem:[#allocation2 + $0x44] sm:$0xf0] }
  0x24   :  { %1870 = vmatpush.bf16.msra.mxu2 %v3605_v46  ;;  %v3340_v9 = vld [vmem:[#allocation2 + $0x1b0] sm:$0xf]  ;;  %v3749_v10 = vor.u32 %v4817_v3, %v3748_v2  ;;  %v4715_v11 = vld [vmem:[#allocation2 + $0x1c4] sm:$0xf0]  ;;  %v3149_v16 = vor.u32 %v4667_v8, %v3148_v7  ;;  %v3124_v17 = vld [vmem:[#allocation2] sm:$0xf] }
  0x25   :  { %1884 = vmatpush.bf16.msra.mxu3 %v3797_v50  ;;  %v3532_v12 = vld [vmem:[#allocation2 + $0x330] sm:$0xf]  ;;  %v4763_v13 = vld [vmem:[#allocation2 + $0x344] sm:$0xf0]  ;;  %v4661_v18 = vld [vmem:[#allocation2 + $0x14] sm:$0xf0]  ;;  %v3341_v19 = vor.u32 %v4715_v11, %v3340_v9 }
  0x26   :  { %1843 = vmatpush.bf16.msra.mxu0 %v3197_v56  ;;  %v3724_v14 = vld [vmem:[#allocation2 + $0x4b0] sm:$0xf]  ;;  %v4811_v15 = vld [vmem:[#allocation2 + $0x4c4] sm:$0xf0]  ;;  %v3533_v20 = vor.u32 %v4763_v13, %v3532_v12  ;;  %v3316_v21 = vld [vmem:[#allocation2 + $0x180] sm:$0xf]  ;;  %v3125_v31 = vor.u32 %v4661_v18, %v3124_v17 }
  0x27   :  { %1857 = vmatpush.bf16.msra.mxu1 %v3389_v57  ;;  %v4709_v22 = vld [vmem:[#allocation2 + $0x194] sm:$0xf0]  ;;  %v3508_v23 = vld [vmem:[#allocation2 + $0x300] sm:$0xf]  ;;  %v3725_v24 = vor.u32 %v4811_v15, %v3724_v14  ;;  %v4060_v28 = vld [vmem:[#allocation2 + $0x750] sm:$0xf] }
  0x28   :  { %1871 = vmatpush.bf16.msra.mxu2 %v3581_v58  ;;  %v4757_v25 = vld [vmem:[#allocation2 + $0x314] sm:$0xf0]  ;;  %v3700_v26 = vld [vmem:[#allocation2 + $0x480] sm:$0xf]  ;;  %v4895_v29 = vld [vmem:[#allocation2 + $0x764] sm:$0xf0]  ;;  %v3317_v35 = vor.u32 %v4709_v22, %v3316_v21 }
  0x29   :  { %1885 = vmatpush.bf16.msra.mxu3 %v3773_v62  ;;  %v4805_v27 = vld [vmem:[#allocation2 + $0x494] sm:$0xf0]  ;;  %v4252_v30 = vld [vmem:[#allocation2 + $0x8d0] sm:$0xf]  ;;  %v4943_v32 = vld [vmem:[#allocation2 + $0x8e4] sm:$0xf0]  ;;  %v3509_v36 = vor.u32 %v4757_v25, %v3508_v23  ;;  %v4061_v40 = vor.u32 %v4895_v29, %v4060_v28 }
  0x2a   :  { %1844 = vmatpush.bf16.msra.mxu0 %v3173_v4  ;;  %v4700_v33 = vld [vmem:[#allocation2 + $0x154] sm:$0xf]  ;;  %v3294_v34 = vld [vmem:[#allocation2 + $0x168] sm:$0xf0]  ;;  %v3701_v39 = vor.u32 %v4805_v27, %v3700_v26  ;;  %v4036_v41 = vld [vmem:[#allocation2 + $0x720] sm:$0xf]  ;;  %v4253_v42 = vor.u32 %v4943_v32, %v4252_v30 }
  0x2b   :  { %1858 = vmatpush.bf16.msra.mxu1 %v3365_v5  ;;  %v4748_v37 = vld [vmem:[#allocation2 + $0x2d4] sm:$0xf]  ;;  %v3486_v38 = vld [vmem:[#allocation2 + $0x2e8] sm:$0xf0]  ;;  %v3297_v43 = vor.u32 %v4700_v33, %v3294_v34  ;;  %v4889_v44 = vld [vmem:[#allocation2 + $0x734] sm:$0xf0] }
  0x2c   :  { %1872 = vmatpush.bf16.msra.mxu2 %v3557_v6  ;;  %v4228_v45 = vld [vmem:[#allocation2 + $0x8a0] sm:$0xf]  ;;  %v4937_v46 = vld [vmem:[#allocation2 + $0x8b4] sm:$0xf0]  ;;  %v3489_v47 = vor.u32 %v4748_v37, %v3486_v38  ;;  %v4694_v48 = vld [vmem:[#allocation2 + $0x124] sm:$0xf]  ;;  %v4037_v54 = vor.u32 %v4889_v44, %v4036_v41 }
  0x2d   :  { %1886 = vmatpush.bf16.msra.mxu3 %v3749_v10  ;;  %v3270_v49 = vld [vmem:[#allocation2 + $0x138] sm:$0xf0]  ;;  %v4742_v50 = vld [vmem:[#allocation2 + $0x2a4] sm:$0xf]  ;;  %v85_v53 = vld [vmem:[%s5412_s0 + $0x30] sm:$0xff]  ;;  %v4229_v58 = vor.u32 %v4937_v46, %v4228_v45 }
  0x2e   :  { %1845 = vmatpush.bf16.msra.mxu0 %v3149_v16  ;;  %v3462_v51 = vld [vmem:[#allocation2 + $0x2b8] sm:$0xf0]  ;;  %v79_v52 = vld [vmem:[%s5412_s0] sm:$0xff]  ;;  %v4012_v55 = vld [vmem:[#allocation2 + $0x6f0] sm:$0xf]  ;;  %v3273_v59 = vor.u32 %v4694_v48, %v3270_v49 }
  0x2f   :  { %1859 = vmatpush.bf16.msra.mxu1 %v3341_v19  ;;  %v4883_v56 = vld [vmem:[#allocation2 + $0x704] sm:$0xf0]  ;;  %v5209_v57 = vpack.c.bf16 %v85_v53, %v79_v52  ;;  %v4204_v60 = vld [vmem:[#allocation2 + $0x870] sm:$0xf]  ;;  %v4688_v62 = vld [vmem:[#allocation2 + $0xf4] sm:$0xf]  ;;  %v3465_v63 = vor.u32 %v4742_v50, %v3462_v51 }
  0x30   :  { %1873 = vmatpush.bf16.msra.mxu2 %v3533_v20  ;;  %v4931_v61 = vld [vmem:[#allocation2 + $0x884] sm:$0xf0]  ;;  %v3246_v0 = vld [vmem:[#allocation2 + $0x108] sm:$0xf0]  ;;  %v86_v2 = vld [vmem:[%s5412_s0 + $0x38] sm:$0xff]  ;;  %v4013_v7 = vor.u32 %v4883_v56, %v4012_v55 }
  0x31   :  { %1887 = vmatpush.bf16.msra.mxu3 %v3725_v24  ;;  %v80_v1 = vld [vmem:[%s5412_s0 + $0x8] sm:$0xff]  ;;  %v4736_v3 = vld [vmem:[#allocation2 + $0x274] sm:$0xf]  ;;  %v3988_v5 = vld [vmem:[#allocation2 + $0x6c0] sm:$0xf]  ;;  %v4205_v11 = vor.u32 %v4931_v61, %v4204_v60  ;;  %v3249_v12 = vor.u32 %v4688_v62, %v3246_v0 }
  0x32   :  { %1846 = vmatpush.bf16.msra.mxu0 %v3125_v31  ;;  %v3438_v4 = vld [vmem:[#allocation2 + $0x288] sm:$0xf0]  ;;  %v5218_v6 = vpack.c.bf16 %v86_v2, %v80_v1  ;;  %v4877_v8 = vld [vmem:[#allocation2 + $0x6d4] sm:$0xf0]  ;;  %v4180_v9 = vld [vmem:[#allocation2 + $0x840] sm:$0xf] }
  0x33   :  { %1860 = vmatpush.bf16.msra.mxu1 %v3317_v35  ;;  %v4925_v10 = vld [vmem:[#allocation2 + $0x854] sm:$0xf0]  ;;  %v4682_v13 = vld [vmem:[#allocation2 + $0xc4] sm:$0xf]  ;;  %v3222_v14 = vld [vmem:[#allocation2 + $0xd8] sm:$0xf0]  ;;  %v3441_v16 = vor.u32 %v4736_v3, %v3438_v4  ;;  %v3989_v24 = vor.u32 %v4877_v8, %v3988_v5 }
  0x34   :  { %1874 = vmatpush.bf16.msra.mxu2 %v3509_v36  ;;  %v81_v15 = vld [vmem:[%s5412_s0 + $0x10] sm:$0xff]  ;;  %v87_v17 = vld [vmem:[%s5412_s0 + $0x40] sm:$0xff]  ;;  %v82_v18 = vld [vmem:[%s5412_s0 + $0x18] sm:$0xff]  ;;  %v4181_v25 = vor.u32 %v4925_v10, %v4180_v9  ;;  %v3225_v26 = vor.u32 %v4682_v13, %v3222_v14 }
  0x35   :  { %1888 = vmatpush.bf16.msra.mxu3 %v3701_v39  ;;  %1847 = vmatmul.bf16.vlgmr.msra.gmra.mxu0 %v5209_v57  ;;  %v88_v19 = vld [vmem:[%s5412_s0 + $0x48] sm:$0xff]  ;;  %v4730_v20 = vld [vmem:[#allocation2 + $0x244] sm:$0xf]  ;;  %v3414_v21 = vld [vmem:[#allocation2 + $0x258] sm:$0xf0]  ;;  %v5233_v22 = vpack.c.bf16 %v87_v17, %v81_v15 }
  0x36   :  { %1895 = vmatpush.bf16.msrb.mxu0 %v4061_v40  ;;  %1861 = vmatmul.bf16.vlgmr.msra.gmra.mxu1 %v5218_v6  ;;  %v5235_v23 = vpack.c.bf16 %v88_v19, %v82_v18  ;;  %v3964_v27 = vld [vmem:[#allocation2 + $0x690] sm:$0xf]  ;;  %v4871_v28 = vld [vmem:[#allocation2 + $0x6a4] sm:$0xf0]  ;;  %v3417_v30 = vor.u32 %v4730_v20, %v3414_v21  ;;  %v4676_v32 = vld [vmem:[#allocation2 + $0x94] sm:$0xf] }
  0x37   :  { %1909 = vmatpush.bf16.msrb.mxu1 %v4253_v42  ;;  %v4156_v29 = vld [vmem:[#allocation2 + $0x810] sm:$0xf]  ;;  %v4919_v31 = vld [vmem:[#allocation2 + $0x824] sm:$0xf0]  ;;  %v3198_v33 = vld [vmem:[#allocation2 + $0xa8] sm:$0xf0]  ;;  %1875 = vmatmul.bf16.vlgmr.msra.gmra.mxu2 %v5233_v22  ;;  %v3965_v36 = vor.u32 %v4871_v28, %v3964_v27 }
  0x38   :  { %1923 = vmatpush.bf16.msrb.mxu2 %v3297_v43  ;;  %v4724_v34 = vld [vmem:[#allocation2 + $0x214] sm:$0xf]  ;;  %v3390_v35 = vld [vmem:[#allocation2 + $0x228] sm:$0xf0]  ;;  %1889 = vmatmul.bf16.vlgmr.msra.gmra.mxu3 %v5235_v23  ;;  %v4157_v37 = vor.u32 %v4919_v31, %v4156_v29  ;;  %v3201_v38 = vor.u32 %v4676_v32, %v3198_v33  ;;  %v3940_v39 = vld [vmem:[#allocation2 + $0x660] sm:$0xf] }
  0x39   :  { %1937 = vmatpush.bf16.msrb.mxu3 %v3489_v47  ;;  %v4865_v40 = vld [vmem:[#allocation2 + $0x674] sm:$0xf0]  ;;  %v4132_v41 = vld [vmem:[#allocation2 + $0x7e0] sm:$0xf]  ;;  %v3393_v42 = vor.u32 %v4724_v34, %v3390_v35  ;;  %v4670_v44 = vld [vmem:[#allocation2 + $0x64] sm:$0xf] }
  0x3a   :  { %1896 = vmatpush.bf16.msrb.mxu0 %v4037_v54  ;;  %v4913_v43 = vld [vmem:[#allocation2 + $0x7f4] sm:$0xf0]  ;;  %v3174_v45 = vld [vmem:[#allocation2 + $0x78] sm:$0xf0]  ;;  %v4718_v46 = vld [vmem:[#allocation2 + $0x1e4] sm:$0xf]  ;;  %v3941_v48 = vor.u32 %v4865_v40, %v3940_v39 }
  0x3b   :  { %1910 = vmatpush.bf16.msrb.mxu1 %v4229_v58  ;;  %v3366_v47 = vld [vmem:[#allocation2 + $0x1f8] sm:$0xf0]  ;;  %v4133_v49 = vor.u32 %v4913_v43, %v4132_v41  ;;  %v3177_v50 = vor.u32 %v4670_v44, %v3174_v45  ;;  %v3916_v51 = vld [vmem:[#allocation2 + $0x630] sm:$0xf]  ;;  %v4859_v52 = vld [vmem:[#allocation2 + $0x644] sm:$0xf0] }
  0x3c   :  { %1924 = vmatpush.bf16.msrb.mxu2 %v3273_v59  ;;  %v4108_v53 = vld [vmem:[#allocation2 + $0x7b0] sm:$0xf]  ;;  %v3369_v54 = vor.u32 %v4718_v46, %v3366_v47  ;;  %v4907_v55 = vld [vmem:[#allocation2 + $0x7c4] sm:$0xf0]  ;;  %v4664_v56 = vld [vmem:[#allocation2 + $0x34] sm:$0xf]  ;;  %v3917_v61 = vor.u32 %v4859_v52, %v3916_v51 }
  0x3d   :  { %1938 = vmatpush.bf16.msrb.mxu3 %v3465_v63  ;;  %v3150_v58 = vld [vmem:[#allocation2 + $0x48] sm:$0xf0]  ;;  %v4712_v59 = vld [vmem:[#allocation2 + $0x1b4] sm:$0xf]  ;;  %v3892_v62 = vld [vmem:[#allocation2 + $0x600] sm:$0xf]  ;;  %v4109_v1 = vor.u32 %v4907_v55, %v4108_v53 }
  0x3e   :  { %1897 = vmatpush.bf16.msrb.mxu0 %v4013_v7  ;;  %v3342_v60 = vld [vmem:[#allocation2 + $0x1c8] sm:$0xf0]  ;;  %v4853_v63 = vld [vmem:[#allocation2 + $0x614] sm:$0xf0]  ;;  %v4084_v0 = vld [vmem:[#allocation2 + $0x780] sm:$0xf]  ;;  %v3153_v2 = vor.u32 %v4664_v56, %v3150_v58 }
  0x3f   :  { %1911 = vmatpush.bf16.msrb.mxu1 %v4205_v11  ;;  %v4901_v3 = vld [vmem:[#allocation2 + $0x794] sm:$0xf0]  ;;  %v4658_v4 = vld [vmem:[#allocation2 + $0x4] sm:$0xf]  ;;  %v3126_v5 = vld [vmem:[#allocation2 + $0x18] sm:$0xf0]  ;;  %v3345_v7 = vor.u32 %v4712_v59, %v3342_v60  ;;  %v3893_v14 = vor.u32 %v4853_v63, %v3892_v62 }
  0x40   :  { %1925 = vmatpush.bf16.msrb.mxu2 %v3249_v12  ;;  %v4706_v8 = vld [vmem:[#allocation2 + $0x184] sm:$0xf]  ;;  %v3318_v9 = vld [vmem:[#allocation2 + $0x198] sm:$0xf0]  ;;  %v4796_v10 = vld [vmem:[#allocation2 + $0x454] sm:$0xf]  ;;  %v4085_v18 = vor.u32 %v4901_v3, %v4084_v0  ;;  %v3129_v19 = vor.u32 %v4658_v4, %v3126_v5 }
  0x41   :  { %1939 = vmatpush.bf16.msrb.mxu3 %v3441_v16  ;;  %v3678_v11 = vld [vmem:[#allocation2 + $0x468] sm:$0xf0]  ;;  %v4844_v12 = vld [vmem:[#allocation2 + $0x5d4] sm:$0xf]  ;;  %v83_v21 = vld [vmem:[%s5412_s0 + $0x20] sm:$0xff] }
  0x42   :  { %1898 = vmatpush.bf16.msrb.mxu0 %v3989_v24  ;;  %v3870_v13 = vld [vmem:[#allocation2 + $0x5e8] sm:$0xf0]  ;;  %v4892_v15 = vld [vmem:[#allocation2 + $0x754] sm:$0xf]  ;;  %v90_v28 = vld [vmem:[%s5412_s0 + $0x58] sm:$0xff] }
  0x43   :  { %1912 = vmatpush.bf16.msrb.mxu1 %v4181_v25  ;;  %v4062_v16 = vld [vmem:[#allocation2 + $0x768] sm:$0xf0]  ;;  %v4940_v17 = vld [vmem:[#allocation2 + $0x8d4] sm:$0xf]  ;;  %v3321_v25 = vor.u32 %v4706_v8, %v3318_v9  ;;  %v3873_v29 = vor.u32 %v4844_v12, %v3870_v13  ;;  %v4790_v31 = vld [vmem:[#allocation2 + $0x424] sm:$0xf] }
  0x44   :  { %1926 = vmatpush.bf16.msrb.mxu2 %v3225_v26  ;;  %v4254_v20 = vld [vmem:[#allocation2 + $0x8e8] sm:$0xf0]  ;;  %v89_v24 = vld [vmem:[%s5412_s0 + $0x50] sm:$0xff]  ;;  %v3681_v26 = vor.u32 %v4796_v10, %v3678_v11  ;;  %v3654_v32 = vld [vmem:[#allocation2 + $0x438] sm:$0xf0] }
  0x45   :  { %1940 = vmatpush.bf16.msrb.mxu3 %v3417_v30  ;;  %v84_v27 = vld [vmem:[%s5412_s0 + $0x28] sm:$0xff]  ;;  %v4065_v30 = vor.u32 %v4892_v15, %v4062_v16  ;;  %v4838_v33 = vld [vmem:[#allocation2 + $0x5a4] sm:$0xf]  ;;  %v4257_v34 = vor.u32 %v4940_v17, %v4254_v20  ;;  %v5251_v35 = vpack.c.bf16 %v89_v24, %v83_v21  ;;  %v4230_v41 = vld [vmem:[#allocation2 + $0x8b8] sm:$0xf0] }
  0x46   :  { %1899 = vmatpush.bf16.msrb.mxu0 %v3965_v36  ;;  %v3846_v36 = vld [vmem:[#allocation2 + $0x5b8] sm:$0xf0]  ;;  %v5253_v39 = vpack.c.bf16 %v90_v28, %v84_v27  ;;  %v4934_v40 = vld [vmem:[#allocation2 + $0x8a4] sm:$0xf]  ;;  %v4784_v45 = vld [vmem:[#allocation2 + $0x3f4] sm:$0xf] }
  0x47   :  { %1913 = vmatpush.bf16.msrb.mxu1 %v4157_v37  ;;  %v4886_v37 = vld [vmem:[#allocation2 + $0x724] sm:$0xf]  ;;  %v3849_v43 = vor.u32 %v4838_v33, %v3846_v36  ;;  %v3630_v46 = vld [vmem:[#allocation2 + $0x408] sm:$0xf0]  ;;  %v4832_v47 = vld [vmem:[#allocation2 + $0x574] sm:$0xf] }
  0x48   :  { %1927 = vmatpush.bf16.msrb.mxu2 %v3201_v38  ;;  %v4038_v38 = vld [vmem:[#allocation2 + $0x738] sm:$0xf0]  ;;  %v4014_v51 = vld [vmem:[#allocation2 + $0x708] sm:$0xf0]  ;;  %v4928_v52 = vld [vmem:[#allocation2 + $0x874] sm:$0xf] }
  0x49   :  { %1941 = vmatpush.bf16.msrb.mxu3 %v3393_v42  ;;  %v3657_v42 = vor.u32 %v4790_v31, %v3654_v32  ;;  %v4041_v44 = vor.u32 %v4886_v37, %v4038_v38  ;;  %v4206_v53 = vld [vmem:[#allocation2 + $0x888] sm:$0xf0]  ;;  %v4778_v58 = vld [vmem:[#allocation2 + $0x3c4] sm:$0xf]  ;;  %v3606_v59 = vld [vmem:[#allocation2 + $0x3d8] sm:$0xf0] }
  0x4a   :  { %1900 = vmatpush.bf16.msrb.mxu0 %v3941_v48  ;;  %v4233_v48 = vor.u32 %v4934_v40, %v4230_v41  ;;  %v4826_v60 = vld [vmem:[#allocation2 + $0x544] sm:$0xf]  ;;  %v3798_v62 = vld [vmem:[#allocation2 + $0x558] sm:$0xf0]  ;;  %v3609_v3 = vor.u32 %v4778_v58, %v3606_v59  ;;  %v3582_v8 = vld [vmem:[#allocation2 + $0x3a8] sm:$0xf0] }
  0x4b   :  { %1914 = vmatpush.bf16.msrb.mxu1 %v4133_v49  ;;  %v3822_v49 = vld [vmem:[#allocation2 + $0x588] sm:$0xf0]  ;;  %v4874_v63 = vld [vmem:[#allocation2 + $0x6c4] sm:$0xf]  ;;  %v3990_v0 = vld [vmem:[#allocation2 + $0x6d8] sm:$0xf0]  ;;  %v3801_v4 = vor.u32 %v4826_v60, %v3798_v62 }
  0x4c   :  { %1928 = vmatpush.bf16.msrb.mxu2 %v3177_v50  ;;  %v4880_v50 = vld [vmem:[#allocation2 + $0x6f4] sm:$0xf]  ;;  %v3825_v55 = vor.u32 %v4832_v47, %v3822_v49  ;;  %v3993_v5 = vor.u32 %v4874_v63, %v3990_v0  ;;  %v3774_v11 = vld [vmem:[#allocation2 + $0x528] sm:$0xf0]  ;;  %v3558_v20 = vld [vmem:[#allocation2 + $0x378] sm:$0xf0] }
  0x4d   :  { %1942 = vmatpush.bf16.msrb.mxu3 %v3369_v54  ;;  %v3633_v54 = vor.u32 %v4784_v45, %v3630_v46  ;;  %v4017_v56 = vor.u32 %v4880_v50, %v4014_v51  ;;  %v4820_v9 = vld [vmem:[#allocation2 + $0x514] sm:$0xf]  ;;  %v3966_v13 = vld [vmem:[#allocation2 + $0x6a8] sm:$0xf0]  ;;  %v4814_v21 = vld [vmem:[#allocation2 + $0x4e4] sm:$0xf] }
  0x4e   :  { %1901 = vmatpush.bf16.msrb.mxu0 %v3917_v61  ;;  %v4209_v61 = vor.u32 %v4928_v52, %v4206_v53  ;;  %v4868_v12 = vld [vmem:[#allocation2 + $0x694] sm:$0xf]  ;;  %v4158_v15 = vld [vmem:[#allocation2 + $0x828] sm:$0xf0]  ;;  %v3777_v17 = vor.u32 %v4820_v9, %v3774_v11  ;;  %v3942_v27 = vld [vmem:[#allocation2 + $0x678] sm:$0xf0] }
  0x4f   :  { %1915 = vmatpush.bf16.msrb.mxu1 %v4109_v1  ;;  %v4922_v1 = vld [vmem:[#allocation2 + $0x844] sm:$0xf]  ;;  %v4760_v33 = vld [vmem:[#allocation2 + $0x334] sm:$0xf]  ;;  %v3726_v38 = vld [vmem:[#allocation2 + $0x4c8] sm:$0xf0] }
  0x50   :  { %1929 = vmatpush.bf16.msrb.mxu2 %v3153_v2  ;;  %v4182_v2 = vld [vmem:[#allocation2 + $0x858] sm:$0xf0]  ;;  %v4910_v28 = vld [vmem:[#allocation2 + $0x7e4] sm:$0xf]  ;;  %v4808_v36 = vld [vmem:[#allocation2 + $0x4b4] sm:$0xf] }
  0x51   :  { %1943 = vmatpush.bf16.msrb.mxu3 %v3345_v7  ;;  %v4772_v7 = vld [vmem:[#allocation2 + $0x394] sm:$0xf]  ;;  %v4185_v10 = vor.u32 %v4922_v1, %v4182_v2  ;;  %v3918_v41 = vld [vmem:[#allocation2 + $0x648] sm:$0xf0]  ;;  %v4754_v45 = vld [vmem:[#allocation2 + $0x304] sm:$0xf]  ;;  %v3729_v47 = vor.u32 %v4808_v36, %v3726_v38 }
  0x52   :  { %1902 = vmatpush.bf16.msrb.mxu0 %v3893_v14  ;;  %v4916_v14 = vld [vmem:[#allocation2 + $0x814] sm:$0xf]  ;;  %v3585_v16 = vor.u32 %v4772_v7, %v3582_v8  ;;  %v3510_v46 = vld [vmem:[#allocation2 + $0x318] sm:$0xf0]  ;;  %v4802_v49 = vld [vmem:[#allocation2 + $0x484] sm:$0xf] }
  0x53   :  { %1916 = vmatpush.bf16.msrb.mxu1 %v4085_v18  ;;  %v3969_v18 = vor.u32 %v4868_v12, %v3966_v13  ;;  %v4161_v24 = vor.u32 %v4916_v14, %v4158_v15  ;;  %v4856_v40 = vld [vmem:[#allocation2 + $0x634] sm:$0xf]  ;;  %v3702_v50 = vld [vmem:[#allocation2 + $0x498] sm:$0xf0]  ;;  %v4850_v51 = vld [vmem:[#allocation2 + $0x604] sm:$0xf]  ;;  %v3513_v60 = vor.u32 %v4754_v45, %v3510_v46 }
  0x54   :  { %1930 = vmatpush.bf16.msrb.mxu2 %v3129_v19  ;;  %v4766_v19 = vld [vmem:[#allocation2 + $0x364] sm:$0xf]  ;;  %v3894_v53 = vld [vmem:[#allocation2 + $0x618] sm:$0xf0]  ;;  %v4704_v58 = vld [vmem:[#allocation2 + $0x16c] sm:$0xf0]  ;;  %v3705_v0 = vor.u32 %v4802_v49, %v3702_v50 }
  0x55   :  { %1944 = vmatpush.bf16.msrb.mxu3 %v3321_v25  ;;  %1903 = vmatmul.bf16.vlgmr.msrb.gmra.mxu0 %v5251_v35  ;;  %v3750_v25 = vld [vmem:[#allocation2 + $0x4f8] sm:$0xf0]  ;;  %v3492_v59 = vld [vmem:[#allocation2 + $0x2d8] sm:$0xf]  ;;  %v4800_v63 = vld [vmem:[#allocation2 + $0x46c] sm:$0xf0]  ;;  %v3897_v1 = vor.u32 %v4850_v51, %v3894_v53 }
  0x56   :  { %1951 = vmatpush.bf16.msra.mxu0 %v3681_v26  ;;  %1917 = vmatmul.bf16.vlgmr.msrb.gmra.mxu1 %v5253_v39  ;;  %v4862_v26 = vld [vmem:[#allocation2 + $0x664] sm:$0xf]  ;;  %v3753_v31 = vor.u32 %v4814_v21, %v3750_v25  ;;  %v3684_v62 = vld [vmem:[#allocation2 + $0x458] sm:$0xf]  ;;  %v3276_v9 = vld [vmem:[#allocation2 + $0x128] sm:$0xf] }
  0x57   :  { %1965 = vmatpush.bf16.msra.mxu1 %v3873_v29  ;;  %1931 = vmatmul.bf16.vlgmr.msrb.gmra.mxu2 %v5209_v57  ;;  %v4134_v29 = vld [vmem:[#allocation2 + $0x7f8] sm:$0xf0]  ;;  %v3945_v32 = vor.u32 %v4862_v26, %v3942_v27  ;;  %v3876_v2 = vld [vmem:[#allocation2 + $0x5d8] sm:$0xf]  ;;  %v3685_v8 = vor.u32 %v4800_v63, %v3684_v62  ;;  %v3468_v11 = vld [vmem:[#allocation2 + $0x2a8] sm:$0xf] }
  0x58   :  { %1979 = vmatpush.bf16.msra.mxu2 %v4065_v30  ;;  %1945 = vmatmul.bf16.vlgmr.msrb.gmra.mxu3 %v5218_v6  ;;  %v3561_v30 = vor.u32 %v4766_v19, %v3558_v20  ;;  %v4137_v37 = vor.u32 %v4910_v28, %v4134_v29  ;;  %v4746_v13 = vld [vmem:[#allocation2 + $0x2bc] sm:$0xf0]  ;;  %v3660_v14 = vld [vmem:[#allocation2 + $0x428] sm:$0xf]  ;;  %v3252_v21 = vld [vmem:[#allocation2 + $0xf8] sm:$0xf] }
  0x59   :  { %1993 = vmatpush.bf16.msra.mxu3 %v4257_v34  ;;  %v3534_v34 = vld [vmem:[#allocation2 + $0x348] sm:$0xf0]  ;;  %v4794_v15 = vld [vmem:[#allocation2 + $0x43c] sm:$0xf0]  ;;  %v3469_v19 = vor.u32 %v4746_v13, %v3468_v11  ;;  %v3444_v25 = vld [vmem:[#allocation2 + $0x278] sm:$0xf] }
  0x5a   :  { %1952 = vmatpush.bf16.msra.mxu0 %v3657_v42  ;;  %v4904_v42 = vld [vmem:[#allocation2 + $0x7b4] sm:$0xf]  ;;  %v3661_v20 = vor.u32 %v4794_v15, %v3660_v14  ;;  %v4740_v27 = vld [vmem:[#allocation2 + $0x28c] sm:$0xf0]  ;;  %v3636_v28 = vld [vmem:[#allocation2 + $0x3f8] sm:$0xf] }
  0x5b   :  { %1966 = vmatpush.bf16.msra.mxu1 %v3849_v43  ;;  %v4110_v43 = vld [vmem:[#allocation2 + $0x7c8] sm:$0xf0]  ;;  %v4788_v29 = vld [vmem:[#allocation2 + $0x40c] sm:$0xf0]  ;;  %v3228_v36 = vld [vmem:[#allocation2 + $0xc8] sm:$0xf] }
  0x5c   :  { %1980 = vmatpush.bf16.msra.mxu2 %v4041_v44  ;;  %v3537_v44 = vor.u32 %v4760_v33, %v3534_v34  ;;  %v4113_v52 = vor.u32 %v4904_v42, %v4110_v43  ;;  %v3445_v33 = vor.u32 %v4740_v27, %v3444_v25  ;;  %v3637_v34 = vor.u32 %v4788_v29, %v3636_v28  ;;  %v3420_v38 = vld [vmem:[#allocation2 + $0x248] sm:$0xf]  ;;  %v4782_v43 = vld [vmem:[#allocation2 + $0x3dc] sm:$0xf0]  ;;  %v3204_v49 = vld [vmem:[#allocation2 + $0x98] sm:$0xf] }
  0x5d   :  { %1994 = vmatpush.bf16.msra.mxu3 %v4233_v48  ;;  %v3921_v48 = vor.u32 %v4856_v40, %v3918_v41  ;;  %v4734_v41 = vld [vmem:[#allocation2 + $0x25c] sm:$0xf0]  ;;  %v3612_v42 = vld [vmem:[#allocation2 + $0x3c8] sm:$0xf]  ;;  %v4680_v50 = vld [vmem:[#allocation2 + $0xac] sm:$0xf0] }
  0x5e   :  { %1953 = vmatpush.bf16.msra.mxu0 %v3633_v54  ;;  %v4898_v54 = vld [vmem:[#allocation2 + $0x784] sm:$0xf]  ;;  %v4830_v45 = vld [vmem:[#allocation2 + $0x55c] sm:$0xf0]  ;;  %v3396_v51 = vld [vmem:[#allocation2 + $0x218] sm:$0xf] }
  0x5f   :  { %1967 = vmatpush.bf16.msra.mxu1 %v3825_v55  ;;  %v4086_v55 = vld [vmem:[#allocation2 + $0x798] sm:$0xf0]  ;;  %v4728_v53 = vld [vmem:[#allocation2 + $0x22c] sm:$0xf0]  ;;  %v3180_v62 = vld [vmem:[#allocation2 + $0x68] sm:$0xf] }
  0x60   :  { %1981 = vmatpush.bf16.msra.mxu2 %v4017_v56  ;;  %v3300_v56 = vld [vmem:[#allocation2 + $0x158] sm:$0xf]  ;;  %v4674_v63 = vld [vmem:[#allocation2 + $0x7c] sm:$0xf0]  ;;  %v4716_v15 = vld [vmem:[#allocation2 + $0x1cc] sm:$0xf0] }
  0x61   :  { %1995 = vmatpush.bf16.msra.mxu3 %v4209_v61  ;;  %v4752_v61 = vld [vmem:[#allocation2 + $0x2ec] sm:$0xf0]  ;;  %v3156_v11 = vld [vmem:[#allocation2 + $0x38] sm:$0xf]  ;;  %v3324_v27 = vld [vmem:[#allocation2 + $0x188] sm:$0xf] }
  0x62   :  { %1954 = vmatpush.bf16.msra.mxu0 %v3609_v3  ;;  %v4848_v3 = vld [vmem:[#allocation2 + $0x5ec] sm:$0xf0]  ;;  %v3493_v7 = vor.u32 %v4752_v61, %v3492_v59  ;;  %v3205_v59 = vor.u32 %v4680_v50, %v3204_v49  ;;  %v3348_v13 = vld [vmem:[#allocation2 + $0x1b8] sm:$0xf]  ;;  %v4710_v28 = vld [vmem:[#allocation2 + $0x19c] sm:$0xf0] }
  0x63   :  { %1968 = vmatpush.bf16.msra.mxu1 %v3801_v4  ;;  %v4089_v4 = vor.u32 %v4898_v54, %v4086_v55  ;;  %v3877_v12 = vor.u32 %v4848_v3, %v3876_v2  ;;  %v3588_v54 = vld [vmem:[#allocation2 + $0x398] sm:$0xf]  ;;  %v4776_v55 = vld [vmem:[#allocation2 + $0x3ac] sm:$0xf0]  ;;  %v4722_v2 = vld [vmem:[#allocation2 + $0x1fc] sm:$0xf0]  ;;  %v3349_v25 = vor.u32 %v4716_v15, %v3348_v13 }
  0x64   :  { %1982 = vmatpush.bf16.msra.mxu2 %v3993_v5  ;;  %v3301_v5 = vor.u32 %v4704_v58, %v3300_v56  ;;  %v3780_v56 = vld [vmem:[#allocation2 + $0x518] sm:$0xf]  ;;  %v4824_v58 = vld [vmem:[#allocation2 + $0x52c] sm:$0xf0]  ;;  %v3589_v61 = vor.u32 %v4776_v55, %v3588_v54  ;;  %v3564_v3 = vld [vmem:[#allocation2 + $0x368] sm:$0xf] }
  0x65   :  { %1996 = vmatpush.bf16.msra.mxu3 %v4185_v10  ;;  %v4698_v10 = vld [vmem:[#allocation2 + $0x13c] sm:$0xf0]  ;;  %v3516_v29 = vld [vmem:[#allocation2 + $0x308] sm:$0xf] }
  0x66   :  { %1955 = vmatpush.bf16.msra.mxu0 %v3585_v16  ;;  %v3852_v16 = vld [vmem:[#allocation2 + $0x5a8] sm:$0xf]  ;;  %v4938_v55 = vld [vmem:[#allocation2 + $0x8bc] sm:$0xf0] }
  0x67   :  { %1969 = vmatpush.bf16.msra.mxu1 %v3777_v17  ;;  %v4842_v17 = vld [vmem:[#allocation2 + $0x5bc] sm:$0xf0]  ;;  %v3996_v13 = vld [vmem:[#allocation2 + $0x6c8] sm:$0xf] }
  0x68   :  { %1983 = vmatpush.bf16.msra.mxu2 %v3969_v18  ;;  %v3277_v18 = vor.u32 %v4698_v10, %v3276_v9  ;;  %v3853_v26 = vor.u32 %v4842_v17, %v3852_v16  ;;  %v3540_v16 = vld [vmem:[#allocation2 + $0x338] sm:$0xf]  ;;  %v4764_v17 = vld [vmem:[#allocation2 + $0x34c] sm:$0xf0]  ;;  %v4188_v15 = vld [vmem:[#allocation2 + $0x848] sm:$0xf] }
  0x69   :  { %1997 = vmatpush.bf16.msra.mxu3 %v4161_v24  ;;  %v4692_v24 = vld [vmem:[#allocation2 + $0x10c] sm:$0xf0] }
  0x6a   :  { %1956 = vmatpush.bf16.msra.mxu0 %v3561_v30  ;;  %v3828_v30 = vld [vmem:[#allocation2 + $0x578] sm:$0xf] }
  0x6b   :  { %1970 = vmatpush.bf16.msra.mxu1 %v3753_v31  ;;  %v4836_v31 = vld [vmem:[#allocation2 + $0x58c] sm:$0xf0] }
  0x6c   :  { %1984 = vmatpush.bf16.msra.mxu2 %v3945_v32  ;;  %v3253_v32 = vor.u32 %v4692_v24, %v3252_v21  ;;  %v3829_v40 = vor.u32 %v4836_v31, %v3828_v30  ;;  %v3132_v21 = vld [vmem:[#allocation2 + $0x8] sm:$0xf]  ;;  %v4662_v24 = vld [vmem:[#allocation2 + $0x1c] sm:$0xf0] }
  0x6d   :  { %1998 = vmatpush.bf16.msra.mxu3 %v4137_v37  ;;  %v4686_v37 = vld [vmem:[#allocation2 + $0xdc] sm:$0xf0] }
  0x6e   :  { %1957 = vmatpush.bf16.msra.mxu0 %v3537_v44  ;;  %v3804_v44 = vld [vmem:[#allocation2 + $0x548] sm:$0xf]  ;;  %v3229_v46 = vor.u32 %v4686_v37, %v3228_v36  ;;  %v4758_v31 = vld [vmem:[#allocation2 + $0x31c] sm:$0xf0]  ;;  %v4896_v36 = vld [vmem:[#allocation2 + $0x76c] sm:$0xf0] }
  0x6f   :  { %1971 = vmatpush.bf16.msra.mxu1 %v3729_v47  ;;  %v3421_v47 = vor.u32 %v4734_v41, %v3420_v38  ;;  %v4260_v37 = vld [vmem:[#allocation2 + $0x8d8] sm:$0xf]  ;;  %v3133_v38 = vor.u32 %v4662_v24, %v3132_v21  ;;  %v4701_v41 = vld [vmem:[#allocation2 + $0x15c] sm:$0xf]  ;;  %v3422_v21 = vld [vmem:[#allocation2 + $0x260] sm:$0xf0] }
  0x70   :  { %1985 = vmatpush.bf16.msra.mxu2 %v3921_v48  ;;  %v3613_v48 = vor.u32 %v4782_v43, %v3612_v42  ;;  %v3302_v42 = vld [vmem:[#allocation2 + $0x170] sm:$0xf0]  ;;  %v3325_v43 = vor.u32 %v4710_v28, %v3324_v27  ;;  %v3972_v27 = vld [vmem:[#allocation2 + $0x698] sm:$0xf]  ;;  %v4872_v28 = vld [vmem:[#allocation2 + $0x6ac] sm:$0xf0] }
  0x71   :  { %1999 = vmatpush.bf16.msra.mxu3 %v4113_v52  ;;  %v3805_v52 = vor.u32 %v4830_v45, %v3804_v44  ;;  %v3517_v44 = vor.u32 %v4758_v31, %v3516_v29  ;;  %v4749_v45 = vld [vmem:[#allocation2 + $0x2dc] sm:$0xf]  ;;  %v3305_v50 = vor.u32 %v4701_v41, %v3302_v42  ;;  %v4164_v29 = vld [vmem:[#allocation2 + $0x818] sm:$0xf]  ;;  %v4920_v31 = vld [vmem:[#allocation2 + $0x82c] sm:$0xf0] }
  0x72   :  { %1958 = vmatpush.bf16.msra.mxu0 %v3513_v60  ;;  %v3397_v60 = vor.u32 %v4728_v53, %v3396_v51  ;;  %v4044_v51 = vld [vmem:[#allocation2 + $0x728] sm:$0xf]  ;;  %v4866_v42 = vld [vmem:[#allocation2 + $0x67c] sm:$0xf0] }
  0x73   :  { %1972 = vmatpush.bf16.msra.mxu1 %v3705_v0  ;;  %v3372_v0 = vld [vmem:[#allocation2 + $0x1e8] sm:$0xf] }
  0x74   :  { %1986 = vmatpush.bf16.msra.mxu2 %v3897_v1  ;;  %v3781_v1 = vor.u32 %v4824_v58, %v3780_v56  ;;  %v3373_v9 = vor.u32 %v4722_v2, %v3372_v0  ;;  %v4236_v53 = vld [vmem:[#allocation2 + $0x8a8] sm:$0xf]  ;;  %v4695_v56 = vld [vmem:[#allocation2 + $0x12c] sm:$0xf]  ;;  %v3278_v58 = vld [vmem:[#allocation2 + $0x140] sm:$0xf0] }
  0x75   :  { %2000 = vmatpush.bf16.msra.mxu3 %v4089_v4  ;;  %1959 = vmatmul.bf16.vlgmr.msra.gmra.mxu0 %v5233_v22  ;;  %v4770_v4 = vld [vmem:[#allocation2 + $0x37c] sm:$0xf0]  ;;  %v4020_v0 = vld [vmem:[#allocation2 + $0x6f8] sm:$0xf]  ;;  %v3948_v41 = vld [vmem:[#allocation2 + $0x668] sm:$0xf] }
  0x76   :  { %2007 = vmatpush.bf16.msrb.mxu0 %v3301_v5  ;;  %1973 = vmatmul.bf16.vlgmr.msra.gmra.mxu1 %v5235_v23  ;;  %v3756_v5 = vld [vmem:[#allocation2 + $0x4e8] sm:$0xf]  ;;  %v3565_v10 = vor.u32 %v4770_v4, %v3564_v3  ;;  %v4212_v2 = vld [vmem:[#allocation2 + $0x878] sm:$0xf]  ;;  %v4932_v4 = vld [vmem:[#allocation2 + $0x88c] sm:$0xf0] }
  0x77   :  { %2021 = vmatpush.bf16.msrb.mxu1 %v3493_v7  ;;  %1987 = vmatmul.bf16.vlgmr.msra.gmra.mxu2 %v5251_v35  ;;  %v4818_v7 = vld [vmem:[#allocation2 + $0x4fc] sm:$0xf0] }
  0x78   :  { %2035 = vmatpush.bf16.msrb.mxu2 %v3685_v8  ;;  %2001 = vmatmul.bf16.vlgmr.msra.gmra.mxu3 %v5253_v39  ;;  %v3181_v8 = vor.u32 %v4674_v63, %v3180_v62  ;;  %v3757_v14 = vor.u32 %v4818_v7, %v3756_v5  ;;  %v4237_v62 = vor.u32 %v4938_v55, %v4236_v53  ;;  %v4689_v5 = vld [vmem:[#allocation2 + $0xfc] sm:$0xf]  ;;  %v3254_v7 = vld [vmem:[#allocation2 + $0x110] sm:$0xf0]  ;;  %v3924_v53 = vld [vmem:[#allocation2 + $0x638] sm:$0xf] }
  0x79   :  { %2049 = vmatpush.bf16.msrb.mxu3 %v3877_v12  ;;  %v4668_v12 = vld [vmem:[#allocation2 + $0x4c] sm:$0xf0]  ;;  %v3281_v63 = vor.u32 %v4695_v56, %v3278_v58  ;;  %v4116_v55 = vld [vmem:[#allocation2 + $0x7b8] sm:$0xf] }
  0x7a   :  { %2008 = vmatpush.bf16.msrb.mxu0 %v3277_v18  ;;  %v3732_v18 = vld [vmem:[#allocation2 + $0x4b8] sm:$0xf]  ;;  %v4908_v58 = vld [vmem:[#allocation2 + $0x7cc] sm:$0xf0] }
  0x7b   :  { %2022 = vmatpush.bf16.msrb.mxu1 %v3469_v19  ;;  %v4812_v19 = vld [vmem:[#allocation2 + $0x4cc] sm:$0xf0] }
  0x7c   :  { %2036 = vmatpush.bf16.msrb.mxu2 %v3661_v20  ;;  %v3157_v20 = vor.u32 %v4668_v12, %v3156_v11  ;;  %v3733_v30 = vor.u32 %v4812_v19, %v3732_v18  ;;  %v4213_v11 = vor.u32 %v4932_v4, %v4212_v2  ;;  %v3257_v12 = vor.u32 %v4689_v5, %v3254_v7  ;;  %v4683_v18 = vld [vmem:[#allocation2 + $0xcc] sm:$0xf]  ;;  %v3230_v19 = vld [vmem:[#allocation2 + $0xe0] sm:$0xf0]  ;;  %v4092_v4 = vld [vmem:[#allocation2 + $0x788] sm:$0xf] }
  0x7d   :  { %2050 = vmatpush.bf16.msrb.mxu3 %v3853_v26  ;;  %v3541_v26 = vor.u32 %v4764_v17, %v3540_v16  ;;  %v4926_v17 = vld [vmem:[#allocation2 + $0x85c] sm:$0xf0]  ;;  %v4117_v2 = vor.u32 %v4908_v58, %v4116_v55  ;;  %v4659_v7 = vld [vmem:[#allocation2 + $0xc] sm:$0xf] }
  0x7e   :  { %2009 = vmatpush.bf16.msrb.mxu0 %v3253_v32  ;;  %v3708_v32 = vld [vmem:[#allocation2 + $0x488] sm:$0xf]  ;;  %v4902_v5 = vld [vmem:[#allocation2 + $0x79c] sm:$0xf0]  ;;  %v4779_v55 = vld [vmem:[#allocation2 + $0x3cc] sm:$0xf] }
  0x7f   :  { %2023 = vmatpush.bf16.msrb.mxu1 %v3445_v33  ;;  %v4806_v33 = vld [vmem:[#allocation2 + $0x49c] sm:$0xf0]  ;;  %v4827_v58 = vld [vmem:[#allocation2 + $0x54c] sm:$0xf] }
  0x80   :  { %2037 = vmatpush.bf16.msrb.mxu2 %v3637_v34  ;;  %v4068_v34 = vld [vmem:[#allocation2 + $0x758] sm:$0xf] }
  0x81   :  { %2051 = vmatpush.bf16.msrb.mxu3 %v3829_v40  ;;  %v4944_v40 = vld [vmem:[#allocation2 + $0x8ec] sm:$0xf0] }
  0x82   :  { %2010 = vmatpush.bf16.msrb.mxu0 %v3229_v46  ;;  %v3494_v46 = vld [vmem:[#allocation2 + $0x2f0] sm:$0xf0]  ;;  %v4261_v49 = vor.u32 %v4944_v40, %v4260_v37  ;;  %v3973_v37 = vor.u32 %v4872_v28, %v3972_v27 }
  0x83   :  { %2024 = vmatpush.bf16.msrb.mxu1 %v3421_v47  ;;  %v3709_v47 = vor.u32 %v4806_v33, %v3708_v32  ;;  %v3497_v54 = vor.u32 %v4749_v45, %v3494_v46  ;;  %v4677_v32 = vld [vmem:[#allocation2 + $0x9c] sm:$0xf]  ;;  %v3206_v33 = vld [vmem:[#allocation2 + $0xb0] sm:$0xf0]  ;;  %v4914_v45 = vld [vmem:[#allocation2 + $0x7fc] sm:$0xf0] }
  0x84   :  { %2038 = vmatpush.bf16.msrb.mxu2 %v3613_v48  ;;  %v4069_v48 = vor.u32 %v4896_v36, %v4068_v34  ;;  %v4725_v34 = vld [vmem:[#allocation2 + $0x21c] sm:$0xf]  ;;  %v3398_v36 = vld [vmem:[#allocation2 + $0x230] sm:$0xf0]  ;;  %v3209_v40 = vor.u32 %v4677_v32, %v3206_v33  ;;  %v4671_v46 = vld [vmem:[#allocation2 + $0x6c] sm:$0xf] }
  0x85   :  { %2052 = vmatpush.bf16.msrb.mxu3 %v3805_v52  ;;  %v4890_v52 = vld [vmem:[#allocation2 + $0x73c] sm:$0xf0]  ;;  %v3854_v33 = vld [vmem:[#allocation2 + $0x5c0] sm:$0xf0] }
  0x86   :  { %2011 = vmatpush.bf16.msrb.mxu0 %v3205_v59  ;;  %v4743_v59 = vld [vmem:[#allocation2 + $0x2ac] sm:$0xf] }
  0x87   :  { %2025 = vmatpush.bf16.msrb.mxu1 %v3397_v60  ;;  %v3470_v60 = vld [vmem:[#allocation2 + $0x2c0] sm:$0xf0] }
  0x88   :  { %2039 = vmatpush.bf16.msrb.mxu2 %v3589_v61  ;;  %v4045_v61 = vor.u32 %v4890_v52, %v4044_v51  ;;  %v3473_v3 = vor.u32 %v4743_v59, %v3470_v60  ;;  %v4665_v59 = vld [vmem:[#allocation2 + $0x3c] sm:$0xf]  ;;  %v3158_v60 = vld [vmem:[#allocation2 + $0x50] sm:$0xf0] }
  0x89   :  { %2053 = vmatpush.bf16.msrb.mxu3 %v3781_v1  ;;  %v4884_v1 = vld [vmem:[#allocation2 + $0x70c] sm:$0xf0] }
  0x8a   :  { %2012 = vmatpush.bf16.msrb.mxu0 %v3181_v8  ;;  %v4737_v8 = vld [vmem:[#allocation2 + $0x27c] sm:$0xf] }
  0x8b   :  { %2026 = vmatpush.bf16.msrb.mxu1 %v3373_v9  ;;  %v3446_v9 = vld [vmem:[#allocation2 + $0x290] sm:$0xf0] }
  0x8c   :  { %2040 = vmatpush.bf16.msrb.mxu2 %v3565_v10  ;;  %v4021_v10 = vor.u32 %v4884_v1, %v4020_v0  ;;  %v3449_v16 = vor.u32 %v4737_v8, %v3446_v9  ;;  %v3900_v0 = vld [vmem:[#allocation2 + $0x608] sm:$0xf]  ;;  %v4854_v1 = vld [vmem:[#allocation2 + $0x61c] sm:$0xf0]  ;;  %v3134_v9 = vld [vmem:[#allocation2 + $0x20] sm:$0xf0] }
  0x8d   :  { %2054 = vmatpush.bf16.msrb.mxu3 %v3757_v14  ;;  %v4878_v14 = vld [vmem:[#allocation2 + $0x6dc] sm:$0xf0] }
  0x8e   :  { %2013 = vmatpush.bf16.msrb.mxu0 %v3157_v20  ;;  %v4731_v20 = vld [vmem:[#allocation2 + $0x24c] sm:$0xf]  ;;  %v3997_v24 = vor.u32 %v4878_v14, %v3996_v13  ;;  %v3686_v13 = vld [vmem:[#allocation2 + $0x470] sm:$0xf0]  ;;  %v4845_v14 = vld [vmem:[#allocation2 + $0x5dc] sm:$0xf] }
  0x8f   :  { %2027 = vmatpush.bf16.msrb.mxu1 %v3349_v25  ;;  %v4189_v25 = vor.u32 %v4926_v17, %v4188_v15  ;;  %v3901_v15 = vor.u32 %v4854_v1, %v3900_v0  ;;  %v4893_v17 = vld [vmem:[#allocation2 + $0x75c] sm:$0xf]  ;;  %v4190_v0 = vld [vmem:[#allocation2 + $0x860] sm:$0xf0] }
  0x90   :  { %2041 = vmatpush.bf16.msrb.mxu2 %v3541_v26  ;;  %v3233_v26 = vor.u32 %v4683_v18, %v3230_v19  ;;  %v4070_v18 = vld [vmem:[#allocation2 + $0x770] sm:$0xf0]  ;;  %v4093_v19 = vor.u32 %v4902_v5, %v4092_v4  ;;  %v4773_v4 = vld [vmem:[#allocation2 + $0x39c] sm:$0xf] }
  0x91   :  { %2055 = vmatpush.bf16.msrb.mxu3 %v3733_v30  ;;  %v3425_v30 = vor.u32 %v4731_v20, %v3422_v21  ;;  %v3137_v20 = vor.u32 %v4659_v7, %v3134_v9  ;;  %v4941_v21 = vld [vmem:[#allocation2 + $0x8dc] sm:$0xf]  ;;  %v4073_v28 = vor.u32 %v4893_v17, %v4070_v18  ;;  %v3590_v5 = vld [vmem:[#allocation2 + $0x3b0] sm:$0xf0]  ;;  %v4767_v17 = vld [vmem:[#allocation2 + $0x36c] sm:$0xf] }
  0x92   :  { %2014 = vmatpush.bf16.msrb.mxu0 %v3133_v38  ;;  %v4165_v38 = vor.u32 %v4920_v31, %v4164_v29  ;;  %v4791_v29 = vld [vmem:[#allocation2 + $0x42c] sm:$0xf]  ;;  %v4821_v7 = vld [vmem:[#allocation2 + $0x51c] sm:$0xf]  ;;  %v3782_v9 = vld [vmem:[#allocation2 + $0x530] sm:$0xf0] }
  0x93   :  { %2028 = vmatpush.bf16.msrb.mxu1 %v3325_v43  ;;  %v4140_v43 = vld [vmem:[#allocation2 + $0x7e8] sm:$0xf]  ;;  %v4839_v31 = vld [vmem:[#allocation2 + $0x5ac] sm:$0xf]  ;;  %v3566_v18 = vld [vmem:[#allocation2 + $0x380] sm:$0xf0] }
  0x94   :  { %2042 = vmatpush.bf16.msrb.mxu2 %v3517_v44  ;;  %v3401_v44 = vor.u32 %v4725_v34, %v3398_v36  ;;  %v4141_v51 = vor.u32 %v4914_v45, %v4140_v43  ;;  %v4887_v34 = vld [vmem:[#allocation2 + $0x72c] sm:$0xf]  ;;  %v4046_v36 = vld [vmem:[#allocation2 + $0x740] sm:$0xf0]  ;;  %v4785_v43 = vld [vmem:[#allocation2 + $0x3fc] sm:$0xf] }
  0x95   :  { %2056 = vmatpush.bf16.msrb.mxu3 %v3709_v47  ;;  %2015 = vmatmul.bf16.vlgmr.msrb.gmra.mxu0 %v5209_v57  ;;  %v3182_v47 = vld [vmem:[#allocation2 + $0x80] sm:$0xf0]  ;;  %v4833_v45 = vld [vmem:[#allocation2 + $0x57c] sm:$0xf] }
  0x96   :  { %2063 = vmatpush.bf16.msra.mxu0 %v4069_v48  ;;  %2029 = vmatmul.bf16.vlgmr.msrb.gmra.mxu1 %v5218_v6  ;;  %v4719_v48 = vld [vmem:[#allocation2 + $0x1ec] sm:$0xf]  ;;  %v3185_v52 = vor.u32 %v4671_v46, %v3182_v47  ;;  %v3830_v47 = vld [vmem:[#allocation2 + $0x590] sm:$0xf0] }
  0x97   :  { %2077 = vmatpush.bf16.msra.mxu1 %v4261_v49  ;;  %2043 = vmatmul.bf16.vlgmr.msrb.gmra.mxu2 %v5233_v22  ;;  %v3374_v49 = vld [vmem:[#allocation2 + $0x200] sm:$0xf0] }
  0x98   :  { %2091 = vmatpush.bf16.msra.mxu2 %v3305_v50  ;;  %2057 = vmatmul.bf16.vlgmr.msrb.gmra.mxu3 %v5235_v23  ;;  %v3949_v50 = vor.u32 %v4866_v42, %v3948_v41  ;;  %v3377_v56 = vor.u32 %v4719_v48, %v3374_v49  ;;  %v3857_v41 = vor.u32 %v4839_v31, %v3854_v33  ;;  %v4881_v48 = vld [vmem:[#allocation2 + $0x6fc] sm:$0xf]  ;;  %v4022_v49 = vld [vmem:[#allocation2 + $0x710] sm:$0xf0] }
  0x99   :  { %2105 = vmatpush.bf16.msra.mxu3 %v3497_v54  ;;  %v4860_v54 = vld [vmem:[#allocation2 + $0x64c] sm:$0xf0]  ;;  %v4049_v42 = vor.u32 %v4887_v34, %v4046_v36  ;;  %v4761_v31 = vld [vmem:[#allocation2 + $0x33c] sm:$0xf]  ;;  %v3734_v36 = vld [vmem:[#allocation2 + $0x4d0] sm:$0xf0] }
  0x9a   :  { %2064 = vmatpush.bf16.msra.mxu0 %v4045_v61  ;;  %v4713_v61 = vld [vmem:[#allocation2 + $0x1bc] sm:$0xf] }
  0x9b   :  { %2078 = vmatpush.bf16.msra.mxu1 %v4237_v62  ;;  %v3350_v62 = vld [vmem:[#allocation2 + $0x1d0] sm:$0xf0]  ;;  %v4809_v33 = vld [vmem:[#allocation2 + $0x4bc] sm:$0xf] }
  0x9c   :  { %2092 = vmatpush.bf16.msra.mxu2 %v3281_v63  ;;  %v3925_v63 = vor.u32 %v4860_v54, %v3924_v53  ;;  %v3353_v8 = vor.u32 %v4713_v61, %v3350_v62  ;;  %v3833_v53 = vor.u32 %v4833_v45, %v3830_v47  ;;  %v4025_v54 = vor.u32 %v4881_v48, %v4022_v49  ;;  %v4875_v61 = vld [vmem:[#allocation2 + $0x6cc] sm:$0xf]  ;;  %v3998_v62 = vld [vmem:[#allocation2 + $0x6e0] sm:$0xf0] }
  0x9d   :  { %2106 = vmatpush.bf16.msra.mxu3 %v3473_v3  ;;  %v3161_v3 = vor.u32 %v4665_v59, %v3158_v60  ;;  %v3806_v60 = vld [vmem:[#allocation2 + $0x560] sm:$0xf0]  ;;  %v3737_v45 = vor.u32 %v4809_v33, %v3734_v36  ;;  %v4803_v47 = vld [vmem:[#allocation2 + $0x48c] sm:$0xf]  ;;  %v3236_v33 = vld [vmem:[#allocation2 + $0xd0] sm:$0xf] }
  0x9e   :  { %2065 = vmatpush.bf16.msra.mxu0 %v4021_v10  ;;  %v4707_v10 = vld [vmem:[#allocation2 + $0x18c] sm:$0xf]  ;;  %v3710_v48 = vld [vmem:[#allocation2 + $0x4a0] sm:$0xf0]  ;;  %v3428_v36 = vld [vmem:[#allocation2 + $0x250] sm:$0xf] }
  0x9f   :  { %2079 = vmatpush.bf16.msra.mxu1 %v4213_v11  ;;  %v3326_v11 = vld [vmem:[#allocation2 + $0x1a0] sm:$0xf0]  ;;  %v4851_v49 = vld [vmem:[#allocation2 + $0x60c] sm:$0xf] }
  0xa0   :  { %2093 = vmatpush.bf16.msra.mxu2 %v3257_v12  ;;  %v4797_v12 = vld [vmem:[#allocation2 + $0x45c] sm:$0xf] }
  0xa1   :  { %2107 = vmatpush.bf16.msra.mxu3 %v3449_v16  ;;  %v3878_v16 = vld [vmem:[#allocation2 + $0x5f0] sm:$0xf0] }
  0xa2   :  { %2066 = vmatpush.bf16.msra.mxu0 %v3997_v24  ;;  %v4262_v24 = vld [vmem:[#allocation2 + $0x8f0] sm:$0xf0]  ;;  %v3881_v27 = vor.u32 %v4845_v14, %v3878_v16  ;;  %v3593_v14 = vor.u32 %v4773_v4, %v3590_v5 }
  0xa3   :  { %2080 = vmatpush.bf16.msra.mxu1 %v4189_v25  ;;  %v3329_v25 = vor.u32 %v4707_v10, %v3326_v11  ;;  %v4265_v32 = vor.u32 %v4941_v21, %v4262_v24  ;;  %v4869_v10 = vld [vmem:[#allocation2 + $0x69c] sm:$0xf]  ;;  %v3974_v11 = vld [vmem:[#allocation2 + $0x6b0] sm:$0xf0]  ;;  %v3758_v21 = vld [vmem:[#allocation2 + $0x500] sm:$0xf0] }
  0xa4   :  { %2094 = vmatpush.bf16.msra.mxu2 %v3233_v26  ;;  %v3689_v26 = vor.u32 %v4797_v12, %v3686_v13  ;;  %v4917_v12 = vld [vmem:[#allocation2 + $0x81c] sm:$0xf]  ;;  %v4166_v13 = vld [vmem:[#allocation2 + $0x830] sm:$0xf0]  ;;  %v3977_v16 = vor.u32 %v4869_v10, %v3974_v11  ;;  %v4863_v24 = vld [vmem:[#allocation2 + $0x66c] sm:$0xf] }
  0xa5   :  { %2108 = vmatpush.bf16.msra.mxu3 %v3425_v30  ;;  %v3662_v30 = vld [vmem:[#allocation2 + $0x440] sm:$0xf0]  ;;  %v4747_v11 = vld [vmem:[#allocation2 + $0x2c4] sm:$0xf0] }
  0xa6   :  { %2067 = vmatpush.bf16.msra.mxu0 %v3973_v37  ;;  %v4935_v37 = vld [vmem:[#allocation2 + $0x8ac] sm:$0xf] }
  0xa7   :  { %2081 = vmatpush.bf16.msra.mxu1 %v4165_v38  ;;  %v4238_v38 = vld [vmem:[#allocation2 + $0x8c0] sm:$0xf0] }
  0xa8   :  { %2095 = vmatpush.bf16.msra.mxu2 %v3209_v40  ;;  %v3665_v40 = vor.u32 %v4791_v29, %v3662_v30  ;;  %v4241_v46 = vor.u32 %v4935_v37, %v4238_v38  ;;  %v4857_v37 = vld [vmem:[#allocation2 + $0x63c] sm:$0xf]  ;;  %v3926_v38 = vld [vmem:[#allocation2 + $0x650] sm:$0xf0] }
  0xa9   :  { %2109 = vmatpush.bf16.msra.mxu3 %v3401_v44  ;;  %v3638_v44 = vld [vmem:[#allocation2 + $0x410] sm:$0xf0] }
  0xaa   :  { %2068 = vmatpush.bf16.msra.mxu0 %v3949_v50  ;;  %v4929_v50 = vld [vmem:[#allocation2 + $0x87c] sm:$0xf] }
  0xab   :  { %2082 = vmatpush.bf16.msra.mxu1 %v4141_v51  ;;  %v4214_v51 = vld [vmem:[#allocation2 + $0x890] sm:$0xf0] }
  0xac   :  { %2096 = vmatpush.bf16.msra.mxu2 %v3185_v52  ;;  %v3641_v52 = vor.u32 %v4785_v43, %v3638_v44  ;;  %v4217_v59 = vor.u32 %v4929_v50, %v4214_v51  ;;  %v4755_v43 = vld [vmem:[#allocation2 + $0x30c] sm:$0xf]  ;;  %v3518_v44 = vld [vmem:[#allocation2 + $0x320] sm:$0xf0] }
  0xad   :  { %2110 = vmatpush.bf16.msra.mxu3 %v3377_v56  ;;  %v3614_v56 = vld [vmem:[#allocation2 + $0x3e0] sm:$0xf0] }
  0xae   :  { %2069 = vmatpush.bf16.msra.mxu0 %v3925_v63  ;;  %v4923_v63 = vld [vmem:[#allocation2 + $0x84c] sm:$0xf]  ;;  %v3617_v1 = vor.u32 %v4779_v55, %v3614_v56  ;;  %v3902_v51 = vld [vmem:[#allocation2 + $0x620] sm:$0xf0]  ;;  %v4705_v55 = vld [vmem:[#allocation2 + $0x174] sm:$0xf0] }
  0xaf   :  { %2083 = vmatpush.bf16.msra.mxu1 %v4117_v2  ;;  %v3809_v2 = vor.u32 %v4827_v58, %v3806_v60  ;;  %v3500_v56 = vld [vmem:[#allocation2 + $0x2e0] sm:$0xf]  ;;  %v3521_v58 = vor.u32 %v4755_v43, %v3518_v44  ;;  %v4831_v43 = vld [vmem:[#allocation2 + $0x564] sm:$0xf0] }
  0xb0   :  { %2097 = vmatpush.bf16.msra.mxu2 %v3161_v3  ;;  %v4001_v3 = vor.u32 %v4875_v61, %v3998_v62  ;;  %v3692_v60 = vld [vmem:[#allocation2 + $0x460] sm:$0xf]  ;;  %v4801_v61 = vld [vmem:[#allocation2 + $0x474] sm:$0xf0]  ;;  %v3713_v62 = vor.u32 %v4803_v47, %v3710_v48 }
  0xb1   :  { %2111 = vmatpush.bf16.msra.mxu3 %v3353_v8  ;;  %v4193_v8 = vor.u32 %v4923_v63, %v4190_v0  ;;  %v3905_v63 = vor.u32 %v4851_v49, %v3902_v51  ;;  %v3884_v0 = vld [vmem:[#allocation2 + $0x5e0] sm:$0xf]  ;;  %v3693_v5 = vor.u32 %v4801_v61, %v3692_v60  ;;  %v4681_v48 = vld [vmem:[#allocation2 + $0xb4] sm:$0xf0]  ;;  %v3188_v60 = vld [vmem:[#allocation2 + $0x70] sm:$0xf] }
  0xb2   :  { %2070 = vmatpush.bf16.msra.mxu0 %v3901_v15  ;;  %v3785_v15 = vor.u32 %v4821_v7, %v3782_v9  ;;  %v3284_v7 = vld [vmem:[#allocation2 + $0x130] sm:$0xf]  ;;  %v3212_v47 = vld [vmem:[#allocation2 + $0xa0] sm:$0xf]  ;;  %v4729_v51 = vld [vmem:[#allocation2 + $0x234] sm:$0xf0] }
  0xb3   :  { %2084 = vmatpush.bf16.msra.mxu1 %v4093_v19  ;;  %v4815_v19 = vld [vmem:[#allocation2 + $0x4ec] sm:$0xf]  ;;  %v3476_v9 = vld [vmem:[#allocation2 + $0x2b0] sm:$0xf]  ;;  %v3404_v49 = vld [vmem:[#allocation2 + $0x220] sm:$0xf] }
  0xb4   :  { %2098 = vmatpush.bf16.msra.mxu2 %v3137_v20  ;;  %v4169_v20 = vor.u32 %v4917_v12, %v4166_v13  ;;  %v3761_v29 = vor.u32 %v4815_v19, %v3758_v21  ;;  %v3668_v12 = vld [vmem:[#allocation2 + $0x430] sm:$0xf]  ;;  %v4795_v13 = vld [vmem:[#allocation2 + $0x444] sm:$0xf0]  ;;  %v3260_v19 = vld [vmem:[#allocation2 + $0x100] sm:$0xf] }
  0xb5   :  { %2112 = vmatpush.bf16.msra.mxu3 %v3329_v25  ;;  %2071 = vmatmul.bf16.vlgmr.msra.gmra.mxu0 %v5251_v35  ;;  %v3950_v25 = vld [vmem:[#allocation2 + $0x680] sm:$0xf0]  ;;  %v3452_v21 = vld [vmem:[#allocation2 + $0x280] sm:$0xf]  ;;  %v4675_v61 = vld [vmem:[#allocation2 + $0x84] sm:$0xf0] }
  0xb6   :  { %2119 = vmatpush.bf16.msrb.mxu0 %v3689_v26  ;;  %2085 = vmatmul.bf16.vlgmr.msra.gmra.mxu1 %v5253_v39  ;;  %v4911_v26 = vld [vmem:[#allocation2 + $0x7ec] sm:$0xf]  ;;  %v3953_v30 = vor.u32 %v4863_v24, %v3950_v25  ;;  %v4741_v25 = vld [vmem:[#allocation2 + $0x294] sm:$0xf0] }
  0xb7   :  { %2133 = vmatpush.bf16.msrb.mxu1 %v3881_v27  ;;  %2099 = vmatmul.bf16.vlgmr.msra.gmra.mxu2 %v5209_v57  ;;  %v4142_v27 = vld [vmem:[#allocation2 + $0x800] sm:$0xf0] }
  0xb8   :  { %2147 = vmatpush.bf16.msrb.mxu2 %v4073_v28  ;;  %2113 = vmatmul.bf16.vlgmr.msra.gmra.mxu3 %v5218_v6  ;;  %v3569_v28 = vor.u32 %v4767_v17, %v3566_v18  ;;  %v4145_v34 = vor.u32 %v4911_v26, %v4142_v27  ;;  %v3477_v17 = vor.u32 %v4747_v11, %v3476_v9  ;;  %v3644_v26 = vld [vmem:[#allocation2 + $0x400] sm:$0xf]  ;;  %v4789_v27 = vld [vmem:[#allocation2 + $0x414] sm:$0xf0] }
  0xb9   :  { %2161 = vmatpush.bf16.msrb.mxu3 %v4265_v32  ;;  %v3542_v32 = vld [vmem:[#allocation2 + $0x350] sm:$0xf0]  ;;  %v3669_v18 = vor.u32 %v4795_v13, %v3668_v12  ;;  %v3164_v9 = vld [vmem:[#allocation2 + $0x40] sm:$0xf]  ;;  %v4717_v13 = vld [vmem:[#allocation2 + $0x1d4] sm:$0xf0] }
  0xba   :  { %2120 = vmatpush.bf16.msrb.mxu0 %v3665_v40  ;;  %v4905_v40 = vld [vmem:[#allocation2 + $0x7bc] sm:$0xf]  ;;  %v3356_v11 = vld [vmem:[#allocation2 + $0x1c0] sm:$0xf] }
  0xbb   :  { %2134 = vmatpush.bf16.msrb.mxu1 %v3857_v41  ;;  %v4118_v41 = vld [vmem:[#allocation2 + $0x7d0] sm:$0xf0] }
  0xbc   :  { %2148 = vmatpush.bf16.msrb.mxu2 %v4049_v42  ;;  %v3545_v42 = vor.u32 %v4761_v31, %v3542_v32  ;;  %v4121_v50 = vor.u32 %v4905_v40, %v4118_v41  ;;  %v3453_v31 = vor.u32 %v4741_v25, %v3452_v21  ;;  %v3645_v32 = vor.u32 %v4789_v27, %v3644_v26  ;;  %v3620_v40 = vld [vmem:[#allocation2 + $0x3d0] sm:$0xf]  ;;  %v4783_v41 = vld [vmem:[#allocation2 + $0x3e4] sm:$0xf0]  ;;  %v5275_v21 = vpop.f32.mrf.mxu0 }
  0xbd   :  { %2162 = vmatpush.bf16.msrb.mxu3 %v4241_v46  ;;  %v3929_v46 = vor.u32 %v4857_v37, %v3926_v38  ;;  %v4735_v38 = vld [vmem:[#allocation2 + $0x264] sm:$0xf0]  ;;  %v3332_v26 = vld [vmem:[#allocation2 + $0x190] sm:$0xf] }
  0xbe   :  { %2121 = vmatpush.bf16.msrb.mxu0 %v3641_v52  ;;  %v4899_v52 = vld [vmem:[#allocation2 + $0x78c] sm:$0xf]  ;;  %v4711_v27 = vld [vmem:[#allocation2 + $0x1a4] sm:$0xf0] }
  0xbf   :  { %2135 = vmatpush.bf16.msrb.mxu1 %v3833_v53  ;;  %v4094_v53 = vld [vmem:[#allocation2 + $0x7a0] sm:$0xf0] }
  0xc0   :  { %2149 = vmatpush.bf16.msrb.mxu2 %v4025_v54  ;;  %v3308_v54 = vld [vmem:[#allocation2 + $0x160] sm:$0xf] }
  0xc1   :  { %2163 = vmatpush.bf16.msrb.mxu3 %v4217_v59  ;;  %v4753_v59 = vld [vmem:[#allocation2 + $0x2f4] sm:$0xf0] }
  0xc2   :  { %2122 = vmatpush.bf16.msrb.mxu0 %v3617_v1  ;;  %v4849_v1 = vld [vmem:[#allocation2 + $0x5f4] sm:$0xf0]  ;;  %v3501_v4 = vor.u32 %v4753_v59, %v3500_v56  ;;  %v3213_v56 = vor.u32 %v4681_v48, %v3212_v47 }
  0xc3   :  { %2136 = vmatpush.bf16.msrb.mxu1 %v3809_v2  ;;  %v4097_v2 = vor.u32 %v4899_v52, %v4094_v53  ;;  %v3885_v10 = vor.u32 %v4849_v1, %v3884_v0  ;;  %v3596_v52 = vld [vmem:[#allocation2 + $0x3a0] sm:$0xf]  ;;  %v4777_v53 = vld [vmem:[#allocation2 + $0x3b4] sm:$0xf0]  ;;  %v4723_v0 = vld [vmem:[#allocation2 + $0x204] sm:$0xf0] }
  0xc4   :  { %2150 = vmatpush.bf16.msrb.mxu2 %v4001_v3  ;;  %v3309_v3 = vor.u32 %v4705_v55, %v3308_v54  ;;  %v3788_v54 = vld [vmem:[#allocation2 + $0x520] sm:$0xf]  ;;  %v4825_v55 = vld [vmem:[#allocation2 + $0x534] sm:$0xf0]  ;;  %v3597_v59 = vor.u32 %v4777_v53, %v3596_v52  ;;  %v3572_v1 = vld [vmem:[#allocation2 + $0x370] sm:$0xf] }
  0xc5   :  { %2164 = vmatpush.bf16.msrb.mxu3 %v4193_v8  ;;  %v4699_v8 = vld [vmem:[#allocation2 + $0x144] sm:$0xf0]  ;;  %v4244_v53 = vld [vmem:[#allocation2 + $0x8b0] sm:$0xf] }
  0xc6   :  { %2123 = vmatpush.bf16.msrb.mxu0 %v3593_v14  ;;  %v3860_v14 = vld [vmem:[#allocation2 + $0x5b0] sm:$0xf]  ;;  %v4891_v52 = vld [vmem:[#allocation2 + $0x744] sm:$0xf0] }
  0xc7   :  { %2137 = vmatpush.bf16.msrb.mxu1 %v3785_v15  ;;  %v4843_v15 = vld [vmem:[#allocation2 + $0x5c4] sm:$0xf0] }
  0xc8   :  { %2151 = vmatpush.bf16.msrb.mxu2 %v3977_v16  ;;  %v3285_v16 = vor.u32 %v4699_v8, %v3284_v7  ;;  %v3861_v24 = vor.u32 %v4843_v15, %v3860_v14  ;;  %v3548_v14 = vld [vmem:[#allocation2 + $0x340] sm:$0xf]  ;;  %v4765_v15 = vld [vmem:[#allocation2 + $0x354] sm:$0xf0] }
  0xc9   :  { %2165 = vmatpush.bf16.msrb.mxu3 %v4169_v20  ;;  %v4693_v20 = vld [vmem:[#allocation2 + $0x114] sm:$0xf0]  ;;  %v3549_v25 = vor.u32 %v4765_v15, %v3548_v14  ;;  %v5289_v14 = vpop.f32.mrf.mxu3 }
  0xca   :  { %2124 = vmatpush.bf16.msrb.mxu0 %v3569_v28  ;;  %v3836_v28 = vld [vmem:[#allocation2 + $0x580] sm:$0xf] }
  0xcb   :  { %2138 = vmatpush.bf16.msrb.mxu1 %v3761_v29  ;;  %v4837_v29 = vld [vmem:[#allocation2 + $0x594] sm:$0xf0] }
  0xcc   :  { %2152 = vmatpush.bf16.msrb.mxu2 %v3953_v30  ;;  %v3261_v30 = vor.u32 %v4693_v20, %v3260_v19  ;;  %v3837_v37 = vor.u32 %v4837_v29, %v3836_v28  ;;  %v3140_v19 = vld [vmem:[#allocation2 + $0x10] sm:$0xf]  ;;  %v4663_v20 = vld [vmem:[#allocation2 + $0x24] sm:$0xf0] }
  0xcd   :  { %2166 = vmatpush.bf16.msrb.mxu3 %v4145_v34  ;;  %v4687_v34 = vld [vmem:[#allocation2 + $0xe4] sm:$0xf0]  ;;  %v3524_v28 = vld [vmem:[#allocation2 + $0x310] sm:$0xf] }
  0xce   :  { %2125 = vmatpush.bf16.msrb.mxu0 %v3545_v42  ;;  %v3812_v42 = vld [vmem:[#allocation2 + $0x550] sm:$0xf]  ;;  %v3237_v44 = vor.u32 %v4687_v34, %v3236_v33  ;;  %v5277_v33 = vpop.f32.mrf.mxu1  ;;  %v4076_v34 = vld [vmem:[#allocation2 + $0x760] sm:$0xf] }
  0xcf   :  { %2139 = vmatpush.bf16.msrb.mxu1 %v3737_v45  ;;  %v3429_v45 = vor.u32 %v4735_v38, %v3428_v36  ;;  %v4897_v36 = vld [vmem:[#allocation2 + $0x774] sm:$0xf0]  ;;  %v3141_v38 = vor.u32 %v4663_v20, %v3140_v19  ;;  %v4196_v19 = vld [vmem:[#allocation2 + $0x850] sm:$0xf] }
  0xd0   :  { %2153 = vmatpush.bf16.msrb.mxu2 %v3929_v46  ;;  %v3621_v46 = vor.u32 %v4783_v41, %v3620_v40  ;;  %v4945_v40 = vld [vmem:[#allocation2 + $0x8f4] sm:$0xf0]  ;;  %v4702_v41 = vld [vmem:[#allocation2 + $0x164] sm:$0xf]  ;;  %v4077_v48 = vor.u32 %v4897_v36, %v4076_v34  ;;  %v4172_v36 = vld [vmem:[#allocation2 + $0x820] sm:$0xf] }
  0xd1   :  { %2167 = vmatpush.bf16.msrb.mxu3 %v4121_v50  ;;  %v3813_v50 = vor.u32 %v4831_v43, %v3812_v42  ;;  %v3310_v42 = vld [vmem:[#allocation2 + $0x178] sm:$0xf0]  ;;  %v3333_v43 = vor.u32 %v4711_v27, %v3332_v26  ;;  %v3238_v26 = vld [vmem:[#allocation2 + $0xe8] sm:$0xf0]  ;;  %v4732_v27 = vld [vmem:[#allocation2 + $0x254] sm:$0xf] }
  0xd2   :  { %2126 = vmatpush.bf16.msrb.mxu0 %v3521_v58  ;;  %v3405_v58 = vor.u32 %v4729_v51, %v3404_v49  ;;  %v4052_v51 = vld [vmem:[#allocation2 + $0x730] sm:$0xf]  ;;  %v4873_v34 = vld [vmem:[#allocation2 + $0x6b4] sm:$0xf0] }
  0xd3   :  { %2140 = vmatpush.bf16.msrb.mxu1 %v3713_v62  ;;  %v3380_v62 = vld [vmem:[#allocation2 + $0x1f0] sm:$0xf] }
  0xd4   :  { %2154 = vmatpush.bf16.msrb.mxu2 %v3905_v63  ;;  %v3789_v63 = vor.u32 %v4825_v55, %v3788_v54  ;;  %v3381_v7 = vor.u32 %v4723_v0, %v3380_v62  ;;  %v4939_v55 = vld [vmem:[#allocation2 + $0x8c4] sm:$0xf0]  ;;  %v5279_v62 = vpop.f32.mrf.mxu0 }
  0xd5   :  { %2168 = vmatpush.bf16.msrb.mxu3 %v4097_v2  ;;  %2127 = vmatmul.bf16.vlgmr.msrb.gmra.mxu0 %v5233_v22  ;;  %v4771_v2 = vld [vmem:[#allocation2 + $0x384] sm:$0xf0]  ;;  %v4245_v0 = vor.u32 %v4939_v55, %v4244_v53  ;;  %v4672_v55 = vld [vmem:[#allocation2 + $0x74] sm:$0xf] }
  0xd6   :  { %2175 = vmatpush.bf16.msra.mxu0 %v3309_v3  ;;  %2141 = vmatmul.bf16.vlgmr.msrb.gmra.mxu1 %v5235_v23  ;;  %v3764_v3 = vld [vmem:[#allocation2 + $0x4f0] sm:$0xf]  ;;  %v3573_v8 = vor.u32 %v4771_v2, %v3572_v1  ;;  %v4028_v2 = vld [vmem:[#allocation2 + $0x700] sm:$0xf] }
  0xd7   :  { %2189 = vmatpush.bf16.msra.mxu1 %v3501_v4  ;;  %2155 = vmatmul.bf16.vlgmr.msrb.gmra.mxu2 %v5251_v35  ;;  %v4819_v4 = vld [vmem:[#allocation2 + $0x504] sm:$0xf0] }
  0xd8   :  { %2203 = vmatpush.bf16.msra.mxu2 %v3693_v5  ;;  %2169 = vmatmul.bf16.vlgmr.msrb.gmra.mxu3 %v5253_v39  ;;  %v3189_v5 = vor.u32 %v4675_v61, %v3188_v60  ;;  %v3765_v12 = vor.u32 %v4819_v4, %v3764_v3  ;;  %v3478_v60 = vld [vmem:[#allocation2 + $0x2c8] sm:$0xf0]  ;;  %v4053_v61 = vor.u32 %v4891_v52, %v4052_v51  ;;  %v4885_v3 = vld [vmem:[#allocation2 + $0x714] sm:$0xf0]  ;;  %v4220_v4 = vld [vmem:[#allocation2 + $0x880] sm:$0xf] }
  0xd9   :  { %2217 = vmatpush.bf16.msra.mxu3 %v3885_v10  ;;  %v4669_v10 = vld [vmem:[#allocation2 + $0x54] sm:$0xf0]  ;;  %v4867_v51 = vld [vmem:[#allocation2 + $0x684] sm:$0xf0]  ;;  %v4148_v52 = vld [vmem:[#allocation2 + $0x7f0] sm:$0xf] }
  0xda   :  { %2176 = vmatpush.bf16.msra.mxu0 %v3285_v16  ;;  %v3740_v16 = vld [vmem:[#allocation2 + $0x4c0] sm:$0xf] }
  0xdb   :  { %2190 = vmatpush.bf16.msra.mxu1 %v3477_v17  ;;  %v4813_v17 = vld [vmem:[#allocation2 + $0x4d4] sm:$0xf0] }
  0xdc   :  { %2204 = vmatpush.bf16.msra.mxu2 %v3669_v18  ;;  %v3165_v18 = vor.u32 %v4669_v10, %v3164_v9  ;;  %v3741_v29 = vor.u32 %v4813_v17, %v3740_v16  ;;  %v3262_v9 = vld [vmem:[#allocation2 + $0x118] sm:$0xf0]  ;;  %v5284_v10 = vpop.f32.mrf.mxu1  ;;  %v4004_v17 = vld [vmem:[#allocation2 + $0x6d0] sm:$0xf] }
  0xdd   :  { %2218 = vmatpush.bf16.msra.mxu3 %v3861_v24  ;;  %v3357_v24 = vor.u32 %v4717_v13, %v3356_v11  ;;  %v4738_v11 = vld [vmem:[#allocation2 + $0x284] sm:$0xf]  ;;  %v4029_v13 = vor.u32 %v4885_v3, %v4028_v2  ;;  %v3932_v2 = vld [vmem:[#allocation2 + $0x640] sm:$0xf]  ;;  %v4861_v3 = vld [vmem:[#allocation2 + $0x654] sm:$0xf0] }
  0xde   :  { %2177 = vmatpush.bf16.msra.mxu0 %v3261_v30  ;;  %v4759_v30 = vld [vmem:[#allocation2 + $0x324] sm:$0xf0] }
  0xdf   :  { %2191 = vmatpush.bf16.msra.mxu1 %v3453_v31  ;;  %v3716_v31 = vld [vmem:[#allocation2 + $0x490] sm:$0xf] }
  0xe0   :  { %2205 = vmatpush.bf16.msra.mxu2 %v3645_v32  ;;  %v4807_v32 = vld [vmem:[#allocation2 + $0x4a4] sm:$0xf0] }
  0xe1   :  { %2219 = vmatpush.bf16.msra.mxu3 %v3837_v37  ;;  %v4268_v37 = vld [vmem:[#allocation2 + $0x8e0] sm:$0xf]  ;;  %v3717_v47 = vor.u32 %v4807_v32, %v3716_v31 }
  0xe2   :  { %2178 = vmatpush.bf16.msra.mxu0 %v3237_v44  ;;  %v3525_v44 = vor.u32 %v4759_v30, %v3524_v28  ;;  %v4269_v49 = vor.u32 %v4945_v40, %v4268_v37  ;;  %v3430_v28 = vld [vmem:[#allocation2 + $0x268] sm:$0xf0]  ;;  %v3980_v32 = vld [vmem:[#allocation2 + $0x6a0] sm:$0xf]  ;;  %v4678_v40 = vld [vmem:[#allocation2 + $0xa4] sm:$0xf] }
  0xe3   :  { %2192 = vmatpush.bf16.msra.mxu1 %v3429_v45  ;;  %v4750_v45 = vld [vmem:[#allocation2 + $0x2e4] sm:$0xf]  ;;  %v3433_v37 = vor.u32 %v4732_v27, %v3430_v28  ;;  %v3142_v28 = vld [vmem:[#allocation2 + $0x28] sm:$0xf0] }
  0xe4   :  { %2206 = vmatpush.bf16.msra.mxu2 %v3621_v46  ;;  %v3502_v46 = vld [vmem:[#allocation2 + $0x2f8] sm:$0xf0] }
  0xe5   :  { %2220 = vmatpush.bf16.msra.mxu3 %v3813_v50  ;;  %v3313_v50 = vor.u32 %v4702_v41, %v3310_v42  ;;  %v3505_v54 = vor.u32 %v4750_v45, %v3502_v46  ;;  %v3214_v41 = vld [vmem:[#allocation2 + $0xb8] sm:$0xf0]  ;;  %v5291_v42 = vpop.f32.mrf.mxu0  ;;  %v3981_v46 = vor.u32 %v4873_v34, %v3980_v32  ;;  %v4798_v34 = vld [vmem:[#allocation2 + $0x464] sm:$0xf] }
  0xe6   :  { %2179 = vmatpush.bf16.msra.mxu0 %v3213_v56  ;;  %v4696_v56 = vld [vmem:[#allocation2 + $0x134] sm:$0xf]  ;;  %v3406_v45 = vld [vmem:[#allocation2 + $0x238] sm:$0xf0] }
  0xe7   :  { %2193 = vmatpush.bf16.msra.mxu1 %v3405_v58  ;;  %v3286_v58 = vld [vmem:[#allocation2 + $0x148] sm:$0xf0] }
  0xe8   :  { %2207 = vmatpush.bf16.msra.mxu2 %v3597_v59  ;;  %v4744_v59 = vld [vmem:[#allocation2 + $0x2b4] sm:$0xf]  ;;  %v3289_v1 = vor.u32 %v4696_v56, %v3286_v58  ;;  %v3190_v56 = vld [vmem:[#allocation2 + $0x88] sm:$0xf0]  ;;  %v5297_v58 = vpop.f32.mrf.mxu3 }
  0xe9   :  { %2221 = vmatpush.bf16.msra.mxu3 %v3789_v63  ;;  %v5281_v63 = vpop.f32.mrf.mxu2 }
  0xea   :  { %2180 = vmatpush.bf16.msra.mxu0 %v3189_v5  ;;  %v3481_v5 = vor.u32 %v4744_v59, %v3478_v60  ;;  %v4720_v59 = vld [vmem:[#allocation2 + $0x1f4] sm:$0xf]  ;;  %v3382_v60 = vld [vmem:[#allocation2 + $0x208] sm:$0xf0] }
  0xeb   :  { %2194 = vmatpush.bf16.msra.mxu1 %v3381_v7  ;;  %v4933_v7 = vld [vmem:[#allocation2 + $0x894] sm:$0xf0] }
  0xec   :  { %2208 = vmatpush.bf16.msra.mxu2 %v3573_v8  ;;  %v4690_v8 = vld [vmem:[#allocation2 + $0x104] sm:$0xf]  ;;  %v4221_v15 = vor.u32 %v4933_v7, %v4220_v4  ;;  %v4124_v4 = vld [vmem:[#allocation2 + $0x7c0] sm:$0xf]  ;;  %v4909_v7 = vld [vmem:[#allocation2 + $0x7d4] sm:$0xf0] }
  0xed   :  { %2222 = vmatpush.bf16.msra.mxu3 %v3765_v12  ;;  %v3454_v12 = vld [vmem:[#allocation2 + $0x298] sm:$0xf0]  ;;  %v3265_v16 = vor.u32 %v4690_v8, %v3262_v9  ;;  %v4666_v8 = vld [vmem:[#allocation2 + $0x44] sm:$0xf] }
  0xee   :  { %2181 = vmatpush.bf16.msra.mxu0 %v3165_v18  ;;  %v4879_v18 = vld [vmem:[#allocation2 + $0x6e4] sm:$0xf0]  ;;  %v3457_v20 = vor.u32 %v4738_v11, %v3454_v12  ;;  %v3166_v9 = vld [vmem:[#allocation2 + $0x58] sm:$0xf0]  ;;  %v4714_v12 = vld [vmem:[#allocation2 + $0x1c4] sm:$0xf] }
  0xef   :  { %2195 = vmatpush.bf16.msra.mxu1 %v3357_v24  ;;  %v4927_v24 = vld [vmem:[#allocation2 + $0x864] sm:$0xf0] }
  0xf0   :  { %2209 = vmatpush.bf16.msra.mxu2 %v3549_v25  ;;  %v4684_v25 = vld [vmem:[#allocation2 + $0xd4] sm:$0xf]  ;;  %v4197_v30 = vor.u32 %v4927_v24, %v4196_v19  ;;  %v4125_v19 = vor.u32 %v4909_v7, %v4124_v4  ;;  %v4100_v24 = vld [vmem:[#allocation2 + $0x790] sm:$0xf]  ;;  %v5305_v32 = vpop.f32.mrf.mxu3  ;;  %v4246_v4 = vld [vmem:[#allocation2 + $0x8c8] sm:$0xf0] }
  0xf1   :  { %2223 = vmatpush.bf16.msra.mxu3 %v3741_v29  ;;  %v4005_v29 = vor.u32 %v4879_v18, %v4004_v17  ;;  %v3241_v31 = vor.u32 %v4684_v25, %v3238_v26  ;;  %v4855_v17 = vld [vmem:[#allocation2 + $0x624] sm:$0xf0]  ;;  %v5301_v18 = vpop.f32.mrf.mxu0  ;;  %v4660_v26 = vld [vmem:[#allocation2 + $0x14] sm:$0xf] }
  0xf2   :  { %2182 = vmatpush.bf16.msra.mxu0 %v3141_v38  ;;  %v4921_v38 = vld [vmem:[#allocation2 + $0x834] sm:$0xf0]  ;;  %v4903_v25 = vld [vmem:[#allocation2 + $0x7a4] sm:$0xf0] }
  0xf3   :  { %2196 = vmatpush.bf16.msra.mxu1 %v3333_v43  ;;  %v5293_v43 = vpop.f32.mrf.mxu2 }
  0xf4   :  { %2210 = vmatpush.bf16.msra.mxu2 %v3525_v44  ;;  %v4726_v44 = vld [vmem:[#allocation2 + $0x224] sm:$0xf] }
  0xf5   :  { %2224 = vmatpush.bf16.msra.mxu3 %v3717_v47  ;;  %2183 = vmatmul.bf16.vlgmr.msra.gmra.mxu0 %v5209_v57  ;;  %v5295_v47 = vpop.f32.mrf.mxu1  ;;  %v3409_v53 = vor.u32 %v4726_v44, %v3406_v45  ;;  %v4078_v44 = vld [vmem:[#allocation2 + $0x778] sm:$0xf0]  ;;  %v4101_v45 = vor.u32 %v4903_v25, %v4100_v24  ;;  %v4930_v25 = vld [vmem:[#allocation2 + $0x884] sm:$0xf] }
  0xf6   :  { %2231 = vmatpush.bf16.msrb.mxu0 %v4077_v48  ;;  %2197 = vmatmul.bf16.vlgmr.msra.gmra.mxu1 %v5218_v6  ;;  %v4173_v48 = vor.u32 %v4921_v38, %v4172_v36  ;;  %v3694_v36 = vld [vmem:[#allocation2 + $0x478] sm:$0xf0] }
  0xf7   :  { %2245 = vmatpush.bf16.msrb.mxu1 %v4269_v49  ;;  %2211 = vmatmul.bf16.vlgmr.msra.gmra.mxu2 %v5233_v22  ;;  %v3217_v49 = vor.u32 %v4678_v40, %v3214_v41  ;;  %v3886_v40 = vld [vmem:[#allocation2 + $0x5f8] sm:$0xf0]  ;;  %v4894_v41 = vld [vmem:[#allocation2 + $0x764] sm:$0xf] }
  0xf8   :  { %2259 = vmatpush.bf16.msrb.mxu2 %v3313_v50  ;;  %2225 = vmatmul.bf16.vlgmr.msra.gmra.mxu3 %v5235_v23  ;;  %v3956_v50 = vld [vmem:[#allocation2 + $0x670] sm:$0xf]  ;;  %v5314_v24 = vpop.f32.mrf.mxu3 }
  0xf9   :  { %2273 = vmatpush.bf16.msrb.mxu3 %v3505_v54  ;;  %v4915_v54 = vld [vmem:[#allocation2 + $0x804] sm:$0xf0] }
  0xfa   :  { %2232 = vmatpush.bf16.msrb.mxu0 %v4053_v61  ;;  %v3957_v61 = vor.u32 %v4867_v51, %v3956_v50  ;;  %v3697_v51 = vor.u32 %v4798_v34, %v3694_v36  ;;  %v3622_v34 = vld [vmem:[#allocation2 + $0x3e8] sm:$0xf0]  ;;  %v4828_v36 = vld [vmem:[#allocation2 + $0x554] sm:$0xf] }
  0xfb   :  { %2246 = vmatpush.bf16.msrb.mxu1 %v4245_v0  ;;  %v4149_v0 = vor.u32 %v4915_v54, %v4148_v52  ;;  %v5299_v11 = vpop.f32.mrf.mxu2  ;;  %v4792_v54 = vld [vmem:[#allocation2 + $0x434] sm:$0xf] }
  0xfc   :  { %2260 = vmatpush.bf16.msrb.mxu2 %v3289_v1  ;;  %v3193_v1 = vor.u32 %v4672_v55, %v3190_v56  ;;  %v3670_v55 = vld [vmem:[#allocation2 + $0x448] sm:$0xf0]  ;;  %v4840_v56 = vld [vmem:[#allocation2 + $0x5b4] sm:$0xf] }
  0xfd   :  { %2274 = vmatpush.bf16.msrb.mxu3 %v3481_v5  ;;  %v3385_v5 = vor.u32 %v4720_v59, %v3382_v60  ;;  %v3862_v60 = vld [vmem:[#allocation2 + $0x5c8] sm:$0xf0] }
  0xfe   :  { %2233 = vmatpush.bf16.msrb.mxu0 %v4029_v13  ;;  %v3358_v13 = vld [vmem:[#allocation2 + $0x1d8] sm:$0xf0] }
  0xff   :  { %2247 = vmatpush.bf16.msrb.mxu1 %v4221_v15  ;;  %v3933_v15 = vor.u32 %v4861_v3, %v3932_v2  ;;  %v3361_v27 = vor.u32 %v4714_v12, %v3358_v13  ;;  %v5309_v2 = vpop.f32.mrf.mxu0  ;;  %v4936_v3 = vld [vmem:[#allocation2 + $0x8b4] sm:$0xf]  ;;  %v4786_v12 = vld [vmem:[#allocation2 + $0x404] sm:$0xf]  ;;  %v3646_v13 = vld [vmem:[#allocation2 + $0x418] sm:$0xf0] }
 0x100   :  { %2261 = vmatpush.bf16.msrb.mxu2 %v3265_v16  ;;  %v3908_v16 = vld [vmem:[#allocation2 + $0x610] sm:$0xf] }
 0x101   :  { %2275 = vmatpush.bf16.msrb.mxu3 %v3457_v20  ;;  %v3169_v20 = vor.u32 %v4666_v8, %v3166_v9  ;;  %v3909_v38 = vor.u32 %v4855_v17, %v3908_v16  ;;  %v3865_v8 = vor.u32 %v4840_v56, %v3862_v60  ;;  %v4249_v16 = vor.u32 %v4936_v3, %v4246_v4  ;;  %v3838_v17 = vld [vmem:[#allocation2 + $0x598] sm:$0xf0]  ;;  %v4918_v60 = vld [vmem:[#allocation2 + $0x824] sm:$0xf]  ;;  %v5325_v3 = vpop.f32.mrf.mxu3 }
 0x102   :  { %2234 = vmatpush.bf16.msrb.mxu0 %v4005_v29  ;;  %v4708_v29 = vld [vmem:[#allocation2 + $0x194] sm:$0xf]  ;;  %v3982_v56 = vld [vmem:[#allocation2 + $0x6b8] sm:$0xf0] }
 0x103   :  { %2248 = vmatpush.bf16.msrb.mxu1 %v4197_v30  ;;  %v3334_v30 = vld [vmem:[#allocation2 + $0x1a8] sm:$0xf0] }
 0x104   :  { %2262 = vmatpush.bf16.msrb.mxu2 %v3241_v31  ;;  %v5303_v31 = vpop.f32.mrf.mxu1  ;;  %v3337_v50 = vor.u32 %v4708_v29, %v3334_v30  ;;  %v4780_v30 = vld [vmem:[#allocation2 + $0x3d4] sm:$0xf] }
 0x105   :  { %2276 = vmatpush.bf16.msrb.mxu3 %v3433_v37  ;;  %v4846_v37 = vld [vmem:[#allocation2 + $0x5e4] sm:$0xf] }
 0x106   :  { %2235 = vmatpush.bf16.msrb.mxu0 %v3981_v46  ;;  %v3145_v46 = vor.u32 %v4660_v26, %v3142_v28  ;;  %v3889_v52 = vor.u32 %v4846_v37, %v3886_v40  ;;  %v4222_v26 = vld [vmem:[#allocation2 + $0x898] sm:$0xf0]  ;;  %v4876_v40 = vld [vmem:[#allocation2 + $0x6d4] sm:$0xf] }
 0x107   :  { %2249 = vmatpush.bf16.msrb.mxu1 %v4173_v48  ;;  %v4942_v48 = vld [vmem:[#allocation2 + $0x8e4] sm:$0xf]  ;;  %v4225_v37 = vor.u32 %v4930_v25, %v4222_v26 }
 0x108   :  { %2263 = vmatpush.bf16.msrb.mxu2 %v3217_v49  ;;  %v4270_v49 = vld [vmem:[#allocation2 + $0x8f8] sm:$0xf0] }
 0x109   :  { %2277 = vmatpush.bf16.msrb.mxu3 %v3409_v53  ;;  %v4081_v53 = vor.u32 %v4894_v41, %v4078_v44  ;;  %v4273_v59 = vor.u32 %v4942_v48, %v4270_v49  ;;  %v4006_v41 = vld [vmem:[#allocation2 + $0x6e8] sm:$0xf0]  ;;  %v4924_v44 = vld [vmem:[#allocation2 + $0x854] sm:$0xf]  ;;  %v5321_v48 = vpop.f32.mrf.mxu0 }
 0x10a   :  { %2236 = vmatpush.bf16.msrb.mxu0 %v3957_v61  ;;  %v4888_v61 = vld [vmem:[#allocation2 + $0x734] sm:$0xf]  ;;  %v4009_v49 = vor.u32 %v4876_v40, %v4006_v41  ;;  %v3934_v40 = vld [vmem:[#allocation2 + $0x658] sm:$0xf0] }
 0x10b   :  { %2250 = vmatpush.bf16.msrb.mxu1 %v4149_v0  ;;  %v4054_v0 = vld [vmem:[#allocation2 + $0x748] sm:$0xf0] }
 0x10c   :  { %2264 = vmatpush.bf16.msrb.mxu2 %v3193_v1  ;;  %v5307_v1 = vpop.f32.mrf.mxu2  ;;  %v5311_v7 = vpop.f32.mrf.mxu1  ;;  %v4057_v9 = vor.u32 %v4888_v61, %v4054_v0  ;;  %v4174_v61 = vld [vmem:[#allocation2 + $0x838] sm:$0xf0] }
 0x10d   :  { %2278 = vmatpush.bf16.msrb.mxu3 %v3385_v5  ;;  %v3673_v5 = vor.u32 %v4792_v54, %v3670_v55  ;;  %v3790_v54 = vld [vmem:[#allocation2 + $0x538] sm:$0xf0]  ;;  %v4870_v55 = vld [vmem:[#allocation2 + $0x6a4] sm:$0xf] }
 0x10e   :  { %2237 = vmatpush.bf16.msrb.mxu0 %v3933_v15  ;;  %v4834_v15 = vld [vmem:[#allocation2 + $0x584] sm:$0xf] }
 0x10f   :  { %2251 = vmatpush.bf16.msrb.mxu1 %v4125_v19  ;;  %v4882_v19 = vld [vmem:[#allocation2 + $0x704] sm:$0xf]  ;;  %v3841_v28 = vor.u32 %v4834_v15, %v3838_v17  ;;  %v3766_v15 = vld [vmem:[#allocation2 + $0x508] sm:$0xf0] }
 0x110   :  { %2265 = vmatpush.bf16.msrb.mxu2 %v3169_v20  ;;  %v4030_v20 = vld [vmem:[#allocation2 + $0x718] sm:$0xf0]  ;;  %v3958_v17 = vld [vmem:[#allocation2 + $0x688] sm:$0xf0] }
 0x111   :  { %2279 = vmatpush.bf16.msrb.mxu3 %v3361_v27  ;;  %v3649_v27 = vor.u32 %v4786_v12, %v3646_v13  ;;  %v4033_v29 = vor.u32 %v4882_v19, %v4030_v20  ;;  %v4816_v12 = vld [vmem:[#allocation2 + $0x4f4] sm:$0xf]  ;;  %v4177_v13 = vor.u32 %v4918_v60, %v4174_v61  ;;  %v4150_v20 = vld [vmem:[#allocation2 + $0x808] sm:$0xf0] }
 0x112   :  { %2238 = vmatpush.bf16.msrb.mxu0 %v3909_v38  ;;  %v3814_v38 = vld [vmem:[#allocation2 + $0x568] sm:$0xf0]  ;;  %v4912_v19 = vld [vmem:[#allocation2 + $0x7f4] sm:$0xf]  ;;  %v3769_v26 = vor.u32 %v4816_v12, %v3766_v15  ;;  %v4977_v15 = vld [vmem:[#allocation6 + $0xf4] sm:$0xf0] }
 0x113   :  { %2252 = vmatpush.bf16.msrb.mxu1 %v4101_v45  ;;  %v3625_v45 = vor.u32 %v4780_v30, %v3622_v34  ;;  %v3550_v30 = vld [vmem:[#allocation2 + $0x358] sm:$0xf0]  ;;  %v4810_v34 = vld [vmem:[#allocation2 + $0x4c4] sm:$0xf]  ;;  %v3910_v61 = vld [vmem:[#allocation2 + $0x628] sm:$0xf0] }
 0x114   :  { %2266 = vmatpush.bf16.msrb.mxu2 %v3145_v46  ;;  %v5319_v46 = vpop.f32.mrf.mxu2  ;;  %v4396_v12 = vld [vmem:[#allocation6 + $0xf0] sm:$0xf] }
 0x115   :  { %2280 = vmatpush.bf16.msrb.mxu3 %v3337_v50  ;;  %2239 = vmatmul.bf16.vlgmr.msrb.gmra.mxu0 %v5251_v35  ;;  %v4774_v50 = vld [vmem:[#allocation2 + $0x3a4] sm:$0xf] }
 0x116   :  { %2287 = vmatpush.bf16.msra.mxu0 %v3697_v51  ;;  %2253 = vmatmul.bf16.vlgmr.msrb.gmra.mxu1 %v5253_v39  ;;  %v3598_v51 = vld [vmem:[#allocation2 + $0x3b8] sm:$0xf0] }
 0x117   :  { %2301 = vmatpush.bf16.msra.mxu1 %v3889_v52  ;;  %2267 = vmatmul.bf16.vlgmr.msrb.gmra.mxu2 %v5209_v57  ;;  %v4198_v57 = vld [vmem:[#allocation2 + $0x868] sm:$0xf0]  ;;  %v4822_v52 = vld [vmem:[#allocation2 + $0x524] sm:$0xf]  ;;  %v3601_v0 = vor.u32 %v4774_v50, %v3598_v51  ;;  %v4756_v50 = vld [vmem:[#allocation2 + $0x314] sm:$0xf] }
 0x118   :  { %2315 = vmatpush.bf16.msra.mxu2 %v4081_v53  ;;  %2281 = vmatmul.bf16.vlgmr.msrb.gmra.mxu3 %v5218_v6  ;;  %v3817_v6 = vor.u32 %v4828_v36, %v3814_v38  ;;  %v4201_v53 = vor.u32 %v4924_v44, %v4198_v57  ;;  %v3793_v4 = vor.u32 %v4822_v52, %v3790_v54  ;;  %v4858_v38 = vld [vmem:[#allocation2 + $0x644] sm:$0xf]  ;;  %v4126_v57 = vld [vmem:[#allocation2 + $0x7d8] sm:$0xf0]  ;;  %v3526_v51 = vld [vmem:[#allocation2 + $0x328] sm:$0xf0] }
 0x119   :  { %2329 = vmatpush.bf16.msra.mxu3 %v4273_v59  ;;  %v5323_v59 = vpop.f32.mrf.mxu1  ;;  %v4153_v36 = vor.u32 %v4912_v19, %v4150_v20  ;;  %v4906_v44 = vld [vmem:[#allocation2 + $0x7c4] sm:$0xf]  ;;  %v4804_v54 = vld [vmem:[#allocation2 + $0x494] sm:$0xf] }
 0x11a   :  { %2288 = vmatpush.bf16.msra.mxu0 %v3673_v5  ;;  %v3985_v5 = vor.u32 %v4870_v55, %v3982_v56  ;;  %v3718_v55 = vld [vmem:[#allocation2 + $0x4a8] sm:$0xf0]  ;;  %v4852_v56 = vld [vmem:[#allocation2 + $0x614] sm:$0xf]  ;;  %v4129_v60 = vor.u32 %v4906_v44, %v4126_v57 }
 0x11b   :  { %2302 = vmatpush.bf16.msra.mxu1 %v3865_v8  ;;  %v4768_v8 = vld [vmem:[#allocation2 + $0x374] sm:$0xf]  ;;  %v3721_v20 = vor.u32 %v4804_v54, %v3718_v55 }
 0x11c   :  { %2316 = vmatpush.bf16.msra.mxu2 %v4057_v9  ;;  %v3574_v9 = vld [vmem:[#allocation2 + $0x388] sm:$0xf0]  ;;  %v5329_v41 = vpop.f32.mrf.mxu2  ;;  %v4524_v57 = vld [vmem:[#allocation6 + $0x1f0] sm:$0xf] }
 0x11d   :  { %2330 = vmatpush.bf16.msra.mxu3 %v4249_v16  ;;  %v4864_v16 = vld [vmem:[#allocation2 + $0x674] sm:$0xf]  ;;  %v3577_v25 = vor.u32 %v4768_v8, %v3574_v9  ;;  %v4961_v9 = vld [vmem:[#allocation6 + $0x74] sm:$0xf0] }
 0x11e   :  { %2289 = vmatpush.bf16.msra.mxu0 %v3649_v27  ;;  %v3961_v27 = vor.u32 %v4864_v16, %v3958_v17  ;;  %v4332_v8 = vld [vmem:[#allocation6 + $0x70] sm:$0xf]  ;;  %v4993_v17 = vld [vmem:[#allocation6 + $0x174] sm:$0xf0] }
 0x11f   :  { %2303 = vmatpush.bf16.msra.mxu1 %v3841_v28  ;;  %v5327_v28 = vpop.f32.mrf.mxu0  ;;  %v4460_v16 = vld [vmem:[#allocation6 + $0x170] sm:$0xf] }
 0x120   :  { %2317 = vmatpush.bf16.msra.mxu2 %v4033_v29  ;;  %v4762_v29 = vld [vmem:[#allocation2 + $0x344] sm:$0xf] }
 0x121   :  { %2331 = vmatpush.bf16.msra.mxu3 %v4225_v37  ;;  %v3742_v37 = vld [vmem:[#allocation2 + $0x4d8] sm:$0xf0] }
 0x122   :  { %2290 = vmatpush.bf16.msra.mxu0 %v3625_v45  ;;  %v5331_v45 = vpop.f32.mrf.mxu1  ;;  %v3745_v52 = vor.u32 %v4810_v34, %v3742_v37  ;;  %v4959_v34 = vld [vmem:[#allocation6 + $0x64] sm:$0xf0]  ;;  %v4461_v37 = vor.u32 %v4993_v17, %v4460_v16  ;;  %v4973_v17 = vld [vmem:[#allocation6 + $0xd4] sm:$0xf0] }
 0x123   :  { %2304 = vmatpush.bf16.msra.mxu1 %v3817_v6  ;;  %v5333_v6 = vld [vmem:[#allocation4] sm:$0x3f] }
 0x124   :  { %2318 = vmatpush.bf16.msra.mxu2 %v4009_v49  ;;  %v3553_v49 = vor.u32 %v4762_v29, %v3550_v30  ;;  %v387_v19 = vperm.slane %v5333_v6, 0  ;;  %v4333_v29 = vor.u32 %v4961_v9, %v4332_v8  ;;  %v4324_v30 = vld [vmem:[#allocation6 + $0x60] sm:$0xf]  ;;  %v5339_v44 = vpop.f32.mrf.mxu2  ;;  %v388_v55 = vperm.slane %v5333_v6, 1 }
 0x125   :  { %2332 = vmatpush.bf16.msra.mxu3 %v4201_v53  ;;  %v3937_v53 = vor.u32 %v4858_v38, %v3934_v40  ;;  %v4388_v40 = vld [vmem:[#allocation6 + $0xe0] sm:$0xf] }
 0x126   :  { %2291 = vmatpush.bf16.msra.mxu0 %v3601_v0  ;;  %v4900_v0 = vld [vmem:[#allocation2 + $0x794] sm:$0xf]  ;;  %v1851_v54 = vadd.f32 %v5279_v62, %v387_v19  ;;  %v5007_v62 = vld [vmem:[#allocation6 + $0x1e4] sm:$0xf0] }
 0x127   :  { %2305 = vmatpush.bf16.msra.mxu1 %v3793_v4  ;;  %v4102_v4 = vld [vmem:[#allocation2 + $0x7a8] sm:$0xf0]  ;;  %v2018_v38 = vpop.f32.mrf.mxu0 }
 0x128   :  { %2319 = vmatpush.bf16.msra.mxu2 %v3985_v5  ;;  %v5335_v5 = vpop.f32.mrf.mxu3 }
 0x129   :  { %2333 = vmatpush.bf16.msra.mxu3 %v4177_v13  ;;  %v3529_v13 = vor.u32 %v4756_v50, %v3526_v51  ;;  %v4975_v50 = vld [vmem:[#allocation6 + $0xe4] sm:$0xf0]  ;;  %v4452_v51 = vld [vmem:[#allocation6 + $0x160] sm:$0xf] }
 0x12a   :  { %2292 = vmatpush.bf16.msra.mxu0 %v3577_v25  ;;  %v3913_v25 = vor.u32 %v4852_v56, %v3910_v61  ;;  %v2032_v56 = vpop.f32.mrf.mxu1  ;;  %v4316_v61 = vld [vmem:[#allocation6 + $0x50] sm:$0xf]  ;;  %v4389_v8 = vor.u32 %v4975_v50, %v4388_v40  ;;  %v4987_v40 = vld [vmem:[#allocation6 + $0x144] sm:$0xf0] }
 0x12b   :  { %2306 = vmatpush.bf16.msra.mxu1 %v3769_v26  ;;  %v389_v26 = vperm.slane %v5333_v6, 2 }
 0x12c   :  { %2320 = vmatpush.bf16.msra.mxu2 %v3961_v27  ;;  %v4105_v27 = vor.u32 %v4900_v0, %v4102_v4  ;;  %v4957_v0 = vld [vmem:[#allocation6 + $0x54] sm:$0xf0] }
 0x12d   :  { %2334 = vmatpush.bf16.msra.mxu3 %v4153_v36  ;;  %v4397_v36 = vor.u32 %v4977_v15, %v4396_v12  ;;  %v4380_v12 = vld [vmem:[#allocation6 + $0xd0] sm:$0xf]  ;;  %v2017_v15 = vadd.f32 %v5327_v28, %v389_v26  ;;  %v2019_v16 = vadd.f32 %v2018_v38, %v389_v26  ;;  %v1933_v28 = vadd.f32 %v5299_v11, %v388_v55  ;;  %v4971_v38 = vld [vmem:[#allocation6 + $0xc4] sm:$0xf0] }
 0x12e   :  { %2293 = vmatpush.bf16.msra.mxu0 %v3553_v49  ;;  %v5009_v49 = vld [vmem:[#allocation6 + $0x1f4] sm:$0xf0] }
 0x12f   :  { %2307 = vmatpush.bf16.msra.mxu1 %v3745_v52  ;;  %v4991_v52 = vld [vmem:[#allocation6 + $0x164] sm:$0xf0]  ;;  %v4525_v4 = vor.u32 %v5009_v49, %v4524_v57 }
 0x130   :  { %2321 = vmatpush.bf16.msra.mxu2 %v3937_v53  ;;  %v1849_v53 = vadd.f32 %v5275_v21, %v387_v19  ;;  %v4453_v9 = vor.u32 %v4991_v52, %v4452_v51  ;;  %v4516_v21 = vld [vmem:[#allocation6 + $0x1e0] sm:$0xf]  ;;  %v4444_v19 = vld [vmem:[#allocation6 + $0x150] sm:$0xf]  ;;  %v2046_v51 = vpop.f32.mrf.mxu2  ;;  %v1947_v52 = vadd.f32 %v5305_v32, %v1933_v28 }
 0x131   :  { %2335 = vmatpush.bf16.msra.mxu3 %v4129_v60  ;;  %v4325_v60 = vor.u32 %v4959_v34, %v4324_v30  ;;  %v4308_v30 = vld [vmem:[#allocation6 + $0x40] sm:$0xf]  ;;  %v4517_v26 = vor.u32 %v5007_v62, %v4516_v21  ;;  %v4381_v34 = vor.u32 %v4973_v17, %v4380_v12  ;;  %v4428_v32 = vld [vmem:[#allocation6 + $0x130] sm:$0xf] }
 0x132   :  { %2294 = vmatpush.bf16.msra.mxu0 %v3529_v13  ;;  %v5344_v13 = vpop.f32.mrf.mxu3  ;;  %v5359_v50 = vpop.f32.mrf.mxu0  ;;  %v4492_v28 = vld [vmem:[#allocation6 + $0x1b0] sm:$0xf] }
 0x133   :  { %2308 = vmatpush.bf16.msra.mxu1 %v3721_v20  ;;  %v4989_v20 = vld [vmem:[#allocation6 + $0x154] sm:$0xf0] }
 0x134   :  { %2322 = vmatpush.bf16.msra.mxu2 %v3913_v25  ;;  %v1863_v25 = vadd.f32 %v5277_v33, %v1849_v53  ;;  %v4445_v33 = vor.u32 %v4989_v20, %v4444_v19  ;;  %v4292_v19 = vld [vmem:[#allocation6 + $0x20] sm:$0xf]  ;;  %v4951_v20 = vld [vmem:[#allocation6 + $0x24] sm:$0xf0] }
 0x135   :  { %2336 = vmatpush.bf16.msra.mxu3 %v4105_v27  ;;  %2295 = vmatmul.bf16.vlgmr.msra.gmra.mxu0 %v5233_v22  ;;  %v1865_v27 = vadd.f32 %v5284_v10, %v1851_v54  ;;  %v4317_v22 = vor.u32 %v4957_v0, %v4316_v61  ;;  %v4508_v10 = vld [vmem:[#allocation6 + $0x1d0] sm:$0xf]  ;;  %v4500_v61 = vld [vmem:[#allocation6 + $0x1c0] sm:$0xf] }
 0x136   :  { %2943 = vmatpush.bf16.msrb.mxu0 %v4333_v29  ;;  %2309 = vmatmul.bf16.vlgmr.msra.gmra.mxu1 %v5235_v23  ;;  %v1935_v29 = vadd.f32 %v5307_v1, %v388_v55  ;;  %v4955_v23 = vld [vmem:[#allocation6 + $0x44] sm:$0xf0]  ;;  %v2031_v1 = vadd.f32 %v5331_v45, %v2017_v15  ;;  %v1877_v11 = vadd.f32 %v5281_v63, %v1863_v25  ;;  %v4300_v54 = vld [vmem:[#allocation6 + $0x30] sm:$0xf]  ;;  %v4953_v55 = vld [vmem:[#allocation6 + $0x34] sm:$0xf0]  ;;  %v5362_v63 = vpop.f32.mrf.mxu1 }
 0x137   :  { %2957 = vmatpush.bf16.msrb.mxu1 %v4397_v36  ;;  %2323 = vmatmul.bf16.vlgmr.msra.gmra.mxu2 %v5251_v35  ;;  %v4372_v36 = vld [vmem:[#allocation6 + $0xc0] sm:$0xf]  ;;  %v2033_v35 = vadd.f32 %v2032_v56, %v2019_v16  ;;  %v1879_v57 = vadd.f32 %v5293_v43, %v1865_v27  ;;  %v4309_v53 = vor.u32 %v4955_v23, %v4308_v30  ;;  %v4364_v43 = vld [vmem:[#allocation6 + $0xb0] sm:$0xf]  ;;  %v4983_v23 = vld [vmem:[#allocation6 + $0x124] sm:$0xf0] }
 0x138   :  { %2971 = vmatpush.bf16.msrb.mxu2 %v4461_v37  ;;  %2337 = vmatmul.bf16.vlgmr.msra.gmra.mxu3 %v5253_v39  ;;  %v5005_v37 = vld [vmem:[#allocation6 + $0x1d4] sm:$0xf0]  ;;  %v4436_v39 = vld [vmem:[#allocation6 + $0x140] sm:$0xf]  ;;  %v1949_v49 = vadd.f32 %v5314_v24, %v1935_v29  ;;  %v4373_v56 = vor.u32 %v4971_v38, %v4372_v36  ;;  %v5003_v24 = vld [vmem:[#allocation6 + $0x1c4] sm:$0xf0]  ;;  %v2045_v0 = vadd.f32 %v5339_v44, %v2031_v1 }
 0x139   :  { %2985 = vmatpush.bf16.msrb.mxu3 %v4525_v4  ;;  %v4509_v45 = vor.u32 %v5005_v37, %v4508_v10  ;;  %v2047_v4 = vadd.f32 %v2046_v51, %v2033_v35  ;;  %v1891_v12 = vadd.f32 %v5289_v14, %v1877_v11  ;;  %v1893_v21 = vadd.f32 %v5297_v58, %v1879_v57  ;;  %v4356_v29 = vld [vmem:[#allocation6 + $0xa0] sm:$0xf]  ;;  %v5001_v14 = vld [vmem:[#allocation6 + $0x1b4] sm:$0xf0]  ;;  %v4284_v37 = vld [vmem:[#allocation6 + $0x10] sm:$0xf] }
 0x13a   :  { %2944 = vmatpush.bf16.msrb.mxu0 %v4325_v60  ;;  %v4437_v60 = vor.u32 %v4987_v40, %v4436_v39  ;;  %v1963_v62 = vadd.f32 %v5321_v48, %v1949_v49  ;;  %v2060_v15 = vpop.f32.mrf.mxu3  ;;  %v1961_v16 = vadd.f32 %v5309_v2, %v1947_v52  ;;  %v4301_v17 = vor.u32 %v4953_v55, %v4300_v54  ;;  %v4967_v48 = vld [vmem:[#allocation6 + $0xa4] sm:$0xf0]  ;;  %v4420_v30 = vld [vmem:[#allocation6 + $0x120] sm:$0xf]  ;;  %v4949_v1 = vld [vmem:[#allocation6 + $0x14] sm:$0xf0] }
 0x13b   :  { %2958 = vmatpush.bf16.msrb.mxu1 %v4389_v8  ;;  %v4969_v8 = vld [vmem:[#allocation6 + $0xb4] sm:$0xf0]  ;;  %v4501_v25 = vor.u32 %v5003_v24, %v4500_v61  ;;  %v2059_v58 = vadd.f32 %v5344_v13, %v2045_v0  ;;  %v1905_v2 = vadd.f32 %v5291_v42, %v1891_v12  ;;  %v4293_v10 = vor.u32 %v4951_v20, %v4292_v19  ;;  %v4348_v42 = vld [vmem:[#allocation6 + $0x90] sm:$0xf]  ;;  %v4484_v40 = vld [vmem:[#allocation6 + $0x1a0] sm:$0xf] }
 0x13c   :  { %2972 = vmatpush.bf16.msrb.mxu2 %v4453_v9  ;;  %v4985_v9 = vld [vmem:[#allocation6 + $0x134] sm:$0xf0]  ;;  %v4365_v44 = vor.u32 %v4969_v8, %v4364_v43  ;;  %v1975_v36 = vadd.f32 %v5311_v7, %v1961_v16  ;;  %v4493_v35 = vor.u32 %v5001_v14, %v4492_v28  ;;  %v4357_v38 = vor.u32 %v4967_v48, %v4356_v29  ;;  %v4412_v7 = vld [vmem:[#allocation6 + $0x110] sm:$0xf]  ;;  %v4276_v55 = vld [vmem:[#allocation6] sm:$0xf] }
 0x13d   :  { %2986 = vmatpush.bf16.msrb.mxu3 %v4517_v26  ;;  %v4429_v27 = vor.u32 %v4985_v9, %v4428_v32  ;;  %v1907_v26 = vadd.f32 %v5301_v18, %v1893_v21  ;;  %v4421_v39 = vor.u32 %v4983_v23, %v4420_v30  ;;  %v4999_v18 = vld [vmem:[#allocation6 + $0x1a4] sm:$0xf0]  ;;  %v4965_v57 = vld [vmem:[#allocation6 + $0x94] sm:$0xf0]  ;;  %v1919_v51 = vadd.f32 %v5295_v47, %v1905_v2  ;;  %v4340_v61 = vld [vmem:[#allocation6 + $0x80] sm:$0xf] }
 0x13e   :  { %2945 = vmatpush.bf16.msrb.mxu0 %v4317_v22  ;;  %v2061_v22 = vadd.f32 %v2060_v15, %v2047_v4  ;;  %v4981_v49 = vld [vmem:[#allocation6 + $0x114] sm:$0xf0]  ;;  %v4285_v54 = vor.u32 %v4949_v1, %v4284_v37  ;;  %v4476_v24 = vld [vmem:[#allocation6 + $0x190] sm:$0xf]  ;;  %v4963_v4 = vld [vmem:[#allocation6 + $0x84] sm:$0xf0] }
 0x13f   :  { %2959 = vmatpush.bf16.msrb.mxu1 %v4381_v34  ;;  %v1977_v34 = vadd.f32 %v5323_v59, %v1963_v62  ;;  %v2073_v59 = vadd.f32 %v5359_v50, %v2059_v58  ;;  %v1921_v52 = vadd.f32 %v5303_v31, %v1907_v26  ;;  %v4349_v50 = vor.u32 %v4965_v57, %v4348_v42  ;;  %v4997_v47 = vld [vmem:[#allocation6 + $0x194] sm:$0xf0]  ;;  %v4979_v8 = vld [vmem:[#allocation6 + $0x104] sm:$0xf0]  ;;  %v4960_v32 = vld [vmem:[#allocation6 + $0x74] sm:$0xf]  ;;  %v2100_v62 = vpop.f32.mrf.mxu2 }
 0x140   :  { %2973 = vmatpush.bf16.msrb.mxu2 %v4445_v33  ;;  %v2074_v33 = vpop.f32.mrf.mxu0  ;;  %v4413_v43 = vor.u32 %v4981_v49, %v4412_v7  ;;  %v4334_v9 = vld [vmem:[#allocation6 + $0x78] sm:$0xf0]  ;;  %v2343_v12 = vmax.f32 %v1919_v51, 0.0  ;;  %v4477_v15 = vor.u32 %v4997_v47, %v4476_v24  ;;  %v4341_v19 = vor.u32 %v4963_v4, %v4340_v61  ;;  %v4468_v28 = vld [vmem:[#allocation6 + $0x180] sm:$0xf] }
 0x141   :  { %2987 = vmatpush.bf16.msrb.mxu3 %v4509_v45  ;;  %v1991_v13 = vadd.f32 %v5329_v41, %v1977_v34  ;;  %v2075_v11 = vadd.f32 %v2074_v33, %v2061_v22  ;;  %v1989_v41 = vadd.f32 %v5319_v46, %v1975_v36  ;;  %v4947_v45 = vld [vmem:[#allocation6 + $0x4] sm:$0xf0]  ;;  %v2087_v31 = vadd.f32 %v5362_v63, %v2073_v59  ;;  %v4404_v46 = vld [vmem:[#allocation6 + $0x100] sm:$0xf]  ;;  %v4326_v58 = vld [vmem:[#allocation6 + $0x68] sm:$0xf0] }
 0x142   :  { %2946 = vmatpush.bf16.msrb.mxu0 %v4309_v53  ;;  %v2088_v53 = vpop.f32.mrf.mxu1  ;;  %v2349_v16 = vmax.f32 %v1921_v52, 0.0  ;;  %v4405_v63 = vor.u32 %v4979_v8, %v4404_v46  ;;  %v2114_v20 = vpop.f32.mrf.mxu3  ;;  %v4337_v29 = vor.u32 %v4960_v32, %v4334_v9  ;;  %v4995_v14 = vld [vmem:[#allocation6 + $0x184] sm:$0xf0]  ;;  %v4398_v22 = vld [vmem:[#allocation6 + $0xf8] sm:$0xf0]  ;;  %v390_v23 = vperm.slane %v5333_v6, 3 }
 0x143   :  { %2960 = vmatpush.bf16.msrb.mxu1 %v4373_v56  ;;  %v4485_v56 = vor.u32 %v4999_v18, %v4484_v40  ;;  %v2089_v0 = vadd.f32 %v2088_v53, %v2075_v11  ;;  %v2003_v21 = vadd.f32 %v5325_v3, %v1989_v41  ;;  %v4976_v3 = vld [vmem:[#allocation6 + $0xf4] sm:$0xf]  ;;  %v4469_v26 = vor.u32 %v4995_v14, %v4468_v28  ;;  %v4588_v1 = vld [vmem:[#allocation6 + $0x270] sm:$0xf]  ;;  %v4580_v42 = vld [vmem:[#allocation6 + $0x260] sm:$0xf] }
 0x144   :  { %2974 = vmatpush.bf16.msrb.mxu2 %v4437_v60  ;;  %v2005_v60 = vadd.f32 %v5335_v5, %v1991_v13  ;;  %v4277_v5 = vor.u32 %v4947_v45, %v4276_v55  ;;  %v5382_v30 = vpack.c.bf16 %v2349_v16, %v2343_v12  ;;  %v4956_v2 = vld [vmem:[#allocation6 + $0x54] sm:$0xf]  ;;  %v4401_v37 = vor.u32 %v4976_v3, %v4398_v22  ;;  %v4974_v13 = vld [vmem:[#allocation6 + $0xe4] sm:$0xf]  ;;  %v5023_v40 = vld [vmem:[#allocation6 + $0x264] sm:$0xf0] }
 0x145   :  { %2988 = vmatpush.bf16.msrb.mxu3 %v4501_v25  ;;  %v4958_v25 = vld [vmem:[#allocation6 + $0x64] sm:$0xf]  ;;  %v2344_v48 = vmax.f32 %v2003_v21, 0.0  ;;  %v2101_v18 = vadd.f32 %v2100_v62, %v390_v23  ;;  %v4581_v59 = vor.u32 %v5023_v40, %v4580_v42  ;;  %v4572_v51 = vld [vmem:[#allocation6 + $0x250] sm:$0xf] }
 0x146   :  { %2947 = vmatpush.bf16.msrb.mxu0 %v4301_v17  ;;  %v2350_v17 = vmax.f32 %v2005_v60, 0.0  ;;  %v4329_v36 = vor.u32 %v4958_v25, %v4326_v58  ;;  %v4954_v7 = vld [vmem:[#allocation6 + $0x44] sm:$0xf]  ;;  %v5021_v52 = vld [vmem:[#allocation6 + $0x254] sm:$0xf0] }
 0x147   :  { %2961 = vmatpush.bf16.msrb.mxu1 %v4365_v44  ;;  %v2345_v44 = vmax.f32 %v2087_v31, 0.0  ;;  %v2102_v57 = vpop.f32.mrf.mxu2  ;;  %v4310_v41 = vld [vmem:[#allocation6 + $0x48] sm:$0xf0]  ;;  %v4382_v55 = vld [vmem:[#allocation6 + $0xd8] sm:$0xf0]  ;;  %v2115_v45 = vadd.f32 %v2114_v20, %v2101_v18  ;;  %v4573_v60 = vor.u32 %v5021_v52, %v4572_v51 }
 0x148   :  { %2975 = vmatpush.bf16.msrb.mxu2 %v4429_v27  ;;  %v2351_v27 = vmax.f32 %v2089_v0, 0.0  ;;  %v5385_v34 = vpack.c.bf16 %v2350_v17, %v2344_v48  ;;  %v4952_v61 = vld [vmem:[#allocation6 + $0x34] sm:$0xf]  ;;  %v2103_v47 = vadd.f32 %v2102_v57, %v390_v23  ;;  %v4302_v31 = vld [vmem:[#allocation6 + $0x38] sm:$0xf0] }
 0x149   :  { %2989 = vmatpush.bf16.msrb.mxu3 %v4493_v35  ;;  %v5025_v35 = vld [vmem:[#allocation6 + $0x274] sm:$0xf0]  ;;  %v4970_v0 = vld [vmem:[#allocation6 + $0xc4] sm:$0xf]  ;;  %v4374_v4 = vld [vmem:[#allocation6 + $0xc8] sm:$0xf0]  ;;  %v4305_v8 = vor.u32 %v4952_v61, %v4302_v31 }
 0x14a   :  { %2948 = vmatpush.bf16.msrb.mxu0 %v4293_v10  ;;  %v5387_v33 = vpack.c.bf16 %v2351_v27, %v2345_v44  ;;  %v4318_v10 = vld [vmem:[#allocation6 + $0x58] sm:$0xf0]  ;;  %v2116_v53 = vpop.f32.mrf.mxu3  ;;  %v4950_v32 = vld [vmem:[#allocation6 + $0x24] sm:$0xf]  ;;  %v4377_v9 = vor.u32 %v4970_v0, %v4374_v4  ;;  %v4294_v21 = vld [vmem:[#allocation6 + $0x28] sm:$0xf0] }
 0x14b   :  { %2962 = vmatpush.bf16.msrb.mxu1 %v4357_v38  ;;  %v4390_v38 = vld [vmem:[#allocation6 + $0xe8] sm:$0xf0]  ;;  %v4321_v11 = vor.u32 %v4956_v2, %v4318_v10  ;;  %v2117_v12 = vadd.f32 %v2116_v53, %v2103_v47  ;;  %v4366_v62 = vld [vmem:[#allocation6 + $0xb8] sm:$0xf0]  ;;  %v5019_v20 = vld [vmem:[#allocation6 + $0x244] sm:$0xf0]  ;;  %v4297_v25 = vor.u32 %v4950_v32, %v4294_v21 }
 0x14c   :  { %2976 = vmatpush.bf16.msrb.mxu2 %v4421_v39  ;;  %v4589_v39 = vor.u32 %v5025_v35, %v4588_v1  ;;  %v4393_v49 = vor.u32 %v4974_v13, %v4390_v38  ;;  %v4948_v44 = vld [vmem:[#allocation6 + $0x14] sm:$0xf]  ;;  %v4286_v27 = vld [vmem:[#allocation6 + $0x18] sm:$0xf0]  ;;  %v4556_v14 = vld [vmem:[#allocation6 + $0x230] sm:$0xf] }
 0x14d   :  { %2990 = vmatpush.bf16.msrb.mxu3 %v4485_v56  ;;  %v4966_v3 = vld [vmem:[#allocation6 + $0xa4] sm:$0xf]  ;;  %v4358_v22 = vld [vmem:[#allocation6 + $0xa8] sm:$0xf0]  ;;  %v5017_v48 = vld [vmem:[#allocation6 + $0x234] sm:$0xf0] }
 0x14e   :  { %2949 = vmatpush.bf16.msrb.mxu0 %v4285_v54  ;;  %v4972_v54 = vld [vmem:[#allocation6 + $0xd4] sm:$0xf]  ;;  %v4557_v2 = vor.u32 %v5017_v48, %v4556_v14  ;;  %v5015_v10 = vld [vmem:[#allocation6 + $0x224] sm:$0xf0]  ;;  %v4946_v1 = vld [vmem:[#allocation6 + $0x4] sm:$0xf]  ;;  %v4361_v35 = vor.u32 %v4966_v3, %v4358_v22 }
 0x14f   :  { %2963 = vmatpush.bf16.msrb.mxu1 %v4349_v50  ;;  %v4313_v50 = vor.u32 %v4954_v7, %v4310_v41  ;;  %v4385_v24 = vor.u32 %v4972_v54, %v4382_v55  ;;  %v4278_v38 = vld [vmem:[#allocation6 + $0x8] sm:$0xf0]  ;;  %v4350_v42 = vld [vmem:[#allocation6 + $0x98] sm:$0xf0]  ;;  %v5024_v18 = vld [vmem:[#allocation6 + $0x274] sm:$0xf] }
 0x150   :  { %2977 = vmatpush.bf16.msrb.mxu2 %v4413_v43  ;;  %v4540_v51 = vld [vmem:[#allocation6 + $0x210] sm:$0xf]  ;;  %v5013_v52 = vld [vmem:[#allocation6 + $0x214] sm:$0xf0]  ;;  %v4281_v53 = vor.u32 %v4946_v1, %v4278_v38  ;;  %v4962_v55 = vld [vmem:[#allocation6 + $0x84] sm:$0xf] }
 0x151   :  { %2991 = vmatpush.bf16.msrb.mxu3 %v4477_v15  ;;  %v5020_v4 = vld [vmem:[#allocation6 + $0x254] sm:$0xf]  ;;  %v5018_v32 = vld [vmem:[#allocation6 + $0x244] sm:$0xf]  ;;  %v5011_v21 = vld [vmem:[#allocation6 + $0x204] sm:$0xf0] }
 0x152   :  { %2950 = vmatpush.bf16.msrb.mxu0 %v4277_v5  ;;  %v2128_v56 = vpop.f32.mrf.mxu0  ;;  %v4968_v5 = vld [vmem:[#allocation6 + $0xb4] sm:$0xf]  ;;  %v5041_v14 = vld [vmem:[#allocation6 + $0x2f4] sm:$0xf0]  ;;  %v4446_v22 = vld [vmem:[#allocation6 + $0x158] sm:$0xf0] }
 0x153   :  { %2964 = vmatpush.bf16.msrb.mxu1 %v4341_v19  ;;  %v2142_v43 = vpop.f32.mrf.mxu1  ;;  %v2129_v46 = vadd.f32 %v2128_v56, %v2115_v45  ;;  %v4342_v45 = vld [vmem:[#allocation6 + $0x88] sm:$0xf0]  ;;  %v4988_v3 = vld [vmem:[#allocation6 + $0x154] sm:$0xf] }
 0x154   :  { %2978 = vmatpush.bf16.msrb.mxu2 %v4405_v63  ;;  %v4564_v63 = vld [vmem:[#allocation6 + $0x240] sm:$0xf]  ;;  %v4345_v47 = vor.u32 %v4962_v55, %v4342_v45  ;;  %v4438_v38 = vld [vmem:[#allocation6 + $0x148] sm:$0xf0] }
 0x155   :  { %2951 = vmatmul.bf16.vlgmr.msrb.gmra.mxu0 %v5382_v30  ;;  %2992 = vmatpush.bf16.msrb.mxu3 %v4469_v26  ;;  %v2143_v16 = vadd.f32 %v2142_v43, %v2129_v46  ;;  %v4565_v28 = vor.u32 %v5019_v20, %v4564_v63  ;;  %v4541_v43 = vor.u32 %v5013_v52, %v4540_v51  ;;  %v4574_v46 = vld [vmem:[#allocation6 + $0x258] sm:$0xf0]  ;;  %v4454_v20 = vld [vmem:[#allocation6 + $0x168] sm:$0xf0]  ;;  %v4628_v51 = vld [vmem:[#allocation6 + $0x2c0] sm:$0xf] }
 0x156   :  { %2965 = vmatmul.bf16.vlgmr.msrb.gmra.mxu1 %v5385_v34  ;;  %2999 = vmatpush.bf16.msra.mxu0 %v4589_v39  ;;  %v4964_v39 = vld [vmem:[#allocation6 + $0x94] sm:$0xf]  ;;  %v4558_v63 = vld [vmem:[#allocation6 + $0x238] sm:$0xf0] }
 0x157   :  { %2979 = vmatmul.bf16.vlgmr.msrb.gmra.mxu2 %v5387_v33  ;;  %v4353_v41 = vor.u32 %v4964_v39, %v4350_v42  ;;  %v391_v39 = vperm.slane %v5333_v6, 4  ;;  %v4654_v6 = vld [vmem:[#allocation6 + $0x2f8] sm:$0xf0] }
 0x158   :  { %3027 = vmatpush.bf16.msra.mxu2 %v4337_v29  ;;  %v4369_v29 = vor.u32 %v4968_v5, %v4366_v62  ;;  %v4992_v62 = vld [vmem:[#allocation6 + $0x174] sm:$0xf] }
 0x159   :  { %3041 = vmatpush.bf16.msra.mxu3 %v4401_v37  ;;  %v4289_v37 = vor.u32 %v4948_v44, %v4286_v27  ;;  %v5014_v27 = vld [vmem:[#allocation6 + $0x224] sm:$0xf] }
 0x15a   :  { %3000 = vmatpush.bf16.msra.mxu0 %v4581_v59  ;;  %v2156_v15 = vpop.f32.mrf.mxu2  ;;  %v2130_v17 = vpop.f32.mrf.mxu0  ;;  %v4590_v59 = vld [vmem:[#allocation6 + $0x278] sm:$0xf0] }
 0x15b   :  { %v2170_v19 = vpop.f32.mrf.mxu3  ;;  %v2131_v58 = vadd.f32 %v2130_v17, %v2117_v12  ;;  %v2144_v23 = vpop.f32.mrf.mxu1  ;;  %v2157_v26 = vadd.f32 %v2156_v15, %v2143_v16  ;;  %v4593_v56 = vor.u32 %v5024_v18, %v4590_v59  ;;  %v4532_v12 = vld [vmem:[#allocation6 + $0x200] sm:$0xf]  ;;  %v4462_v15 = vld [vmem:[#allocation6 + $0x178] sm:$0xf0]  ;;  %v5010_v18 = vld [vmem:[#allocation6 + $0x204] sm:$0xf] }
 0x15c   :  { %3028 = vmatpush.bf16.msra.mxu2 %v4329_v36  ;;  %v4548_v36 = vld [vmem:[#allocation6 + $0x220] sm:$0xf]  ;;  %v4533_v5 = vor.u32 %v5011_v21, %v4532_v12  ;;  %v4465_v17 = vor.u32 %v4992_v62, %v4462_v15  ;;  %v4534_v59 = vld [vmem:[#allocation6 + $0x208] sm:$0xf0]  ;;  %v5031_v15 = vld [vmem:[#allocation6 + $0x2a4] sm:$0xf0] }
 0x15d   :  { %3042 = vmatpush.bf16.msra.mxu3 %v4393_v49  ;;  %v2145_v13 = vadd.f32 %v2144_v23, %v2131_v58  ;;  %v2171_v57 = vadd.f32 %v2170_v19, %v2157_v26  ;;  %v5016_v19 = vld [vmem:[#allocation6 + $0x234] sm:$0xf]  ;;  %v4449_v23 = vor.u32 %v4988_v3, %v4446_v22  ;;  %v4542_v26 = vld [vmem:[#allocation6 + $0x218] sm:$0xf0]  ;;  %v4537_v52 = vor.u32 %v5010_v18, %v4534_v59  ;;  %v4612_v62 = vld [vmem:[#allocation6 + $0x2a0] sm:$0xf] }
 0x15e   :  { %3001 = vmatpush.bf16.msra.mxu0 %v4573_v60  ;;  %v5022_v60 = vld [vmem:[#allocation6 + $0x264] sm:$0xf]  ;;  %v4604_v22 = vld [vmem:[#allocation6 + $0x290] sm:$0xf]  ;;  %v4526_v18 = vld [vmem:[#allocation6 + $0x1f8] sm:$0xf0] }
 0x15f   :  { %v2346_v61 = vmax.f32 %v2171_v57, 0.0  ;;  %v5037_v57 = vld [vmem:[#allocation6 + $0x2d4] sm:$0xf0]  ;;  %v5032_v59 = vld [vmem:[#allocation6 + $0x2b4] sm:$0xf] }
 0x160   :  { %3029 = vmatpush.bf16.msra.mxu2 %v4321_v11  ;;  %v4549_v11 = vor.u32 %v5015_v10, %v4548_v36  ;;  %v4644_v36 = vld [vmem:[#allocation6 + $0x2e0] sm:$0xf]  ;;  %v5039_v10 = vld [vmem:[#allocation6 + $0x2e4] sm:$0xf0] }
 0x161   :  { %3043 = vmatpush.bf16.msra.mxu3 %v4385_v24  ;;  %v4645_v1 = vor.u32 %v5039_v10, %v4644_v36  ;;  %v4630_v36 = vld [vmem:[#allocation6 + $0x2c8] sm:$0xf0] }
 0x162   :  { %3002 = vmatpush.bf16.msra.mxu0 %v4565_v28  ;;  %v2158_v40 = vpop.f32.mrf.mxu2  ;;  %v4652_v28 = vld [vmem:[#allocation6 + $0x2f0] sm:$0xf] }
 0x163   :  { %v2159_v7 = vadd.f32 %v2158_v40, %v2145_v13  ;;  %v2172_v49 = vpop.f32.mrf.mxu3  ;;  %v4653_v58 = vor.u32 %v5041_v14, %v4652_v28  ;;  %v4986_v13 = vld [vmem:[#allocation6 + $0x144] sm:$0xf]  ;;  %v4406_v28 = vld [vmem:[#allocation6 + $0x108] sm:$0xf0] }
 0x164   :  { %3030 = vmatpush.bf16.msra.mxu2 %v4313_v50  ;;  %v4582_v50 = vld [vmem:[#allocation6 + $0x268] sm:$0xf0]  ;;  %v4441_v40 = vor.u32 %v4986_v13, %v4438_v38  ;;  %v4596_v38 = vld [vmem:[#allocation6 + $0x280] sm:$0xf] }
 0x165   :  { %3044 = vmatpush.bf16.msra.mxu3 %v4377_v9  ;;  %v2173_v54 = vadd.f32 %v2172_v49, %v2159_v7  ;;  %v4585_v0 = vor.u32 %v5022_v60, %v4582_v50  ;;  %v4566_v9 = vld [vmem:[#allocation6 + $0x248] sm:$0xf0]  ;;  %3013 = vmatpush.bf16.msra.mxu1 %v4653_v58  ;;  %v4984_v49 = vld [vmem:[#allocation6 + $0x134] sm:$0xf]  ;;  %v4982_v60 = vld [vmem:[#allocation6 + $0x124] sm:$0xf] }
 0x166   :  { %3003 = vmatpush.bf16.msra.mxu0 %v4557_v2  ;;  %v4569_v16 = vor.u32 %v5018_v32, %v4566_v9  ;;  %v5012_v2 = vld [vmem:[#allocation6 + $0x214] sm:$0xf]  ;;  %v4422_v50 = vld [vmem:[#allocation6 + $0x128] sm:$0xf0]  ;;  %v4414_v32 = vld [vmem:[#allocation6 + $0x118] sm:$0xf0] }
 0x167   :  { %v2352_v24 = vmax.f32 %v2173_v54, 0.0  ;;  %v4545_v42 = vor.u32 %v5012_v2, %v4542_v26  ;;  %v5040_v54 = vld [vmem:[#allocation6 + $0x2f4] sm:$0xf]  ;;  %v5034_v26 = vld [vmem:[#allocation6 + $0x2c4] sm:$0xf] }
 0x168   :  { %3031 = vmatpush.bf16.msra.mxu2 %v4305_v8  ;;  %v4577_v8 = vor.u32 %v5020_v4, %v4574_v46  ;;  %v4646_v4 = vld [vmem:[#allocation6 + $0x2e8] sm:$0xf0] }
 0x169   :  { %3045 = vmatpush.bf16.msra.mxu3 %v4369_v29  ;;  %v5392_v31 = vpack.c.bf16 %v2352_v24, %v2346_v61  ;;  %v4550_v29 = vld [vmem:[#allocation6 + $0x228] sm:$0xf0]  ;;  %3014 = vmatpush.bf16.msra.mxu1 %v4645_v1  ;;  %v4425_v24 = vor.u32 %v4982_v60, %v4422_v50  ;;  %v4633_v1 = vor.u32 %v5034_v26, %v4630_v36 }
 0x16a   :  { %3004 = vmatpush.bf16.msra.mxu0 %v4549_v11  ;;  %v4553_v48 = vor.u32 %v5014_v27, %v4550_v29  ;;  %v4636_v11 = vld [vmem:[#allocation6 + $0x2d0] sm:$0xf]  ;;  %v4978_v29 = vld [vmem:[#allocation6 + $0x104] sm:$0xf] }
 0x16b   :  { %2993 = vmatmul.bf16.vlgmr.msrb.gmra.mxu3 %v5392_v31  ;;  %v4637_v7 = vor.u32 %v5037_v57, %v4636_v11  ;;  %v4409_v58 = vor.u32 %v4978_v29, %v4406_v28  ;;  %v4996_v29 = vld [vmem:[#allocation6 + $0x194] sm:$0xf]  ;;  %v4478_v28 = vld [vmem:[#allocation6 + $0x198] sm:$0xf0] }
 0x16c   :  { %3032 = vmatpush.bf16.msra.mxu2 %v4297_v25  ;;  %v4561_v25 = vor.u32 %v5016_v19, %v4558_v63  ;;  %v4613_v63 = vor.u32 %v5031_v15, %v4612_v62 }
 0x16d   :  { %3046 = vmatpush.bf16.msra.mxu3 %v4361_v35  ;;  %3015 = vmatpush.bf16.msra.mxu1 %v4637_v7  ;;  %v4622_v7 = vld [vmem:[#allocation6 + $0x2b8] sm:$0xf0] }
 0x16e   :  { %3005 = vmatpush.bf16.msra.mxu0 %v4541_v43  ;;  %v4620_v43 = vld [vmem:[#allocation6 + $0x2b0] sm:$0xf] }
 0x170   :  { %3033 = vmatpush.bf16.msra.mxu2 %v4289_v37 }
 0x171   :  { %3047 = vmatpush.bf16.msra.mxu3 %v4353_v41  ;;  %v5035_v41 = vld [vmem:[#allocation6 + $0x2c4] sm:$0xf0] }
 0x172   :  { %3006 = vmatpush.bf16.msra.mxu0 %v4533_v5  ;;  %v2184_v37 = vpop.f32.mrf.mxu0  ;;  %v4629_v45 = vor.u32 %v5035_v41, %v4628_v51  ;;  %v5030_v41 = vld [vmem:[#allocation6 + $0x2a4] sm:$0xf] }
 0x173   :  { %v2198_v35 = vpop.f32.mrf.mxu1  ;;  %v2185_v55 = vadd.f32 %v2184_v37, %v391_v39 }
 0x174   :  { %3034 = vmatpush.bf16.msra.mxu2 %v4281_v53  ;;  %3016 = vmatpush.bf16.msra.mxu1 %v4629_v45  ;;  %v4614_v45 = vld [vmem:[#allocation6 + $0x2a8] sm:$0xf0] }
 0x175   :  { %3048 = vmatpush.bf16.msra.mxu3 %v4345_v47  ;;  %v5033_v47 = vld [vmem:[#allocation6 + $0x2b4] sm:$0xf0]  ;;  %v2199_v21 = vadd.f32 %v2198_v35, %v2185_v55 }
 0x176   :  { %3055 = vmatpush.bf16.msrb.mxu0 %v4465_v17  ;;  %v4621_v12 = vor.u32 %v5033_v47, %v4620_v43  ;;  %v5004_v43 = vld [vmem:[#allocation6 + $0x1d4] sm:$0xf] }
 0x177   :  { %3035 = vmatmul.bf16.vlgmr.msra.gmra.mxu2 %v5382_v30  ;;  %v4990_v30 = vld [vmem:[#allocation6 + $0x164] sm:$0xf] }
 0x178   :  { %3083 = vmatpush.bf16.msrb.mxu2 %v4593_v56  ;;  %v4457_v44 = vor.u32 %v4990_v30, %v4454_v20  ;;  %v4657_v56 = vor.u32 %v5040_v54, %v4654_v6  ;;  %3017 = vmatpush.bf16.msra.mxu1 %v4621_v12  ;;  %v5036_v20 = vld [vmem:[#allocation6 + $0x2d4] sm:$0xf]  ;;  %v5026_v12 = vld [vmem:[#allocation6 + $0x284] sm:$0xf] }
 0x17a   :  { %3056 = vmatpush.bf16.msrb.mxu0 %v4457_v44  ;;  %v2212_v61 = vpop.f32.mrf.mxu2  ;;  %3097 = vmatpush.bf16.msrb.mxu3 %v4657_v56  ;;  %v2186_v9 = vpop.f32.mrf.mxu0  ;;  %v4617_v56 = vor.u32 %v5030_v41, %v4614_v45 }
 0x17b   :  { %3049 = vmatmul.bf16.vlgmr.msra.gmra.mxu3 %v5385_v34  ;;  %v4430_v34 = vld [vmem:[#allocation6 + $0x138] sm:$0xf0]  ;;  %v2200_v5 = vpop.f32.mrf.mxu1  ;;  %v2187_v19 = vadd.f32 %v2186_v9, %v391_v39  ;;  %v2213_v30 = vadd.f32 %v2212_v61, %v2199_v21  ;;  %v5027_v39 = vld [vmem:[#allocation6 + $0x284] sm:$0xf0]  ;;  %v4502_v9 = vld [vmem:[#allocation6 + $0x1c8] sm:$0xf0] }
 0x17c   :  { %3084 = vmatpush.bf16.msrb.mxu2 %v4585_v0  ;;  %v4433_v53 = vor.u32 %v4984_v49, %v4430_v34  ;;  %v5038_v0 = vld [vmem:[#allocation6 + $0x2e4] sm:$0xf]  ;;  %3018 = vmatpush.bf16.msra.mxu1 %v4613_v63  ;;  %v4625_v49 = vor.u32 %v5032_v59, %v4622_v7  ;;  %v4510_v61 = vld [vmem:[#allocation6 + $0x1d8] sm:$0xf0] }
 0x17d   :  { %v4649_v46 = vor.u32 %v5038_v0, %v4646_v4  ;;  %v2201_v44 = vadd.f32 %v2200_v5, %v2187_v19  ;;  %v4513_v0 = vor.u32 %v5004_v43, %v4510_v61  ;;  %v4606_v4 = vld [vmem:[#allocation6 + $0x298] sm:$0xf0]  ;;  %v4598_v5 = vld [vmem:[#allocation6 + $0x288] sm:$0xf0] }
 0x17e   :  { %3057 = vmatpush.bf16.msrb.mxu0 %v4449_v23  ;;  %v4601_v62 = vor.u32 %v5026_v12, %v4598_v5  ;;  %v4494_v19 = vld [vmem:[#allocation6 + $0x1b8] sm:$0xf0] }
 0x17f   :  { %3098 = vmatpush.bf16.msrb.mxu3 %v4649_v46 }
 0x180   :  { %3085 = vmatpush.bf16.msrb.mxu2 %v4577_v8  ;;  %v4980_v8 = vld [vmem:[#allocation6 + $0x114] sm:$0xf] }
 0x181   :  { %v4417_v17 = vor.u32 %v4980_v8, %v4414_v32  ;;  %v5002_v32 = vld [vmem:[#allocation6 + $0x1c4] sm:$0xf] }
 0x182   :  { %3058 = vmatpush.bf16.msrb.mxu0 %v4441_v40  ;;  %v2214_v14 = vpop.f32.mrf.mxu2  ;;  %v5008_v40 = vld [vmem:[#allocation6 + $0x1f4] sm:$0xf]  ;;  %v4505_v21 = vor.u32 %v5002_v32, %v4502_v9 }
 0x183   :  { %v2215_v37 = vadd.f32 %v2214_v14, %v2201_v44  ;;  %v4529_v57 = vor.u32 %v5008_v40, %v4526_v18  ;;  %v5050_v44 = vld [vmem:[#allocation4] sm:$0x3f] }
 0x184   :  { %3086 = vmatpush.bf16.msrb.mxu2 %v4569_v16  ;;  %v2226_v16 = vpop.f32.mrf.mxu3 }
 0x185   :  { %v2227_v3 = vadd.f32 %v2226_v16, %v2213_v30  ;;  %v4998_v30 = vld [vmem:[#allocation6 + $0x1a4] sm:$0xf] }
 0x186   :  { %3059 = vmatpush.bf16.msrb.mxu0 %v4433_v53  ;;  %v4518_v53 = vld [vmem:[#allocation6 + $0x1e8] sm:$0xf0] }
 0x188   :  { %3087 = vmatpush.bf16.msrb.mxu2 %v4561_v25  ;;  %v4638_v25 = vld [vmem:[#allocation6 + $0x2d8] sm:$0xf0] }
 0x189   :  { %v4641_v27 = vor.u32 %v5036_v20, %v4638_v25  ;;  %v4486_v20 = vld [vmem:[#allocation6 + $0x1a8] sm:$0xf0] }
 0x18a   :  { %3060 = vmatpush.bf16.msrb.mxu0 %v4425_v24  ;;  %v5028_v24 = vld [vmem:[#allocation6 + $0x294] sm:$0xf]  ;;  %v4489_v25 = vor.u32 %v4998_v30, %v4486_v20 }
 0x18b   :  { %3099 = vmatpush.bf16.msrb.mxu3 %v4641_v27  ;;  %v4609_v46 = vor.u32 %v5028_v24, %v4606_v4  ;;  %v392_v27 = vperm.slane %v5050_v44, 5 }
 0x18c   :  { %3088 = vmatpush.bf16.msrb.mxu2 %v4553_v48  ;;  %v5029_v48 = vld [vmem:[#allocation6 + $0x294] sm:$0xf0]  ;;  %v2228_v35 = vpop.f32.mrf.mxu3 }
 0x18d   :  { %v4605_v2 = vor.u32 %v5029_v48, %v4604_v22  ;;  %v2229_v11 = vadd.f32 %v2228_v35, %v2215_v37 }
 0x18e   :  { %3061 = vmatpush.bf16.msrb.mxu0 %v4417_v17  ;;  %v5000_v17 = vld [vmem:[#allocation6 + $0x1b4] sm:$0xf] }
 0x18f   :  { %3019 = vmatpush.bf16.msra.mxu1 %v4605_v2  ;;  %3100 = vmatpush.bf16.msrb.mxu3 %v4633_v1  ;;  %v4497_v63 = vor.u32 %v5000_v17, %v4494_v19  ;;  %v4470_v2 = vld [vmem:[#allocation6 + $0x188] sm:$0xf0] }
 0x190   :  { %3089 = vmatpush.bf16.msrb.mxu2 %v4545_v42  ;;  %v4597_v42 = vor.u32 %v5027_v39, %v4596_v38 }
 0x192   :  { %v2240_v23 = vpop.f32.mrf.mxu0  ;;  %3062 = vmatpush.bf16.msrb.mxu0 %v4409_v58 }
 0x193   :  { %v2254_v10 = vpop.f32.mrf.mxu1  ;;  %v2241_v13 = vadd.f32 %v2240_v23, %v2227_v3  ;;  %3020 = vmatpush.bf16.msra.mxu1 %v4597_v42  ;;  %3101 = vmatpush.bf16.msrb.mxu3 %v4625_v49  ;;  %v4481_v3 = vor.u32 %v4996_v29, %v4478_v28  ;;  %v4994_v23 = vld [vmem:[#allocation6 + $0x184] sm:$0xf] }
 0x194   :  { %3090 = vmatpush.bf16.msrb.mxu2 %v4537_v52  ;;  %v5006_v52 = vld [vmem:[#allocation6 + $0x1e4] sm:$0xf]  ;;  %v4473_v36 = vor.u32 %v4994_v23, %v4470_v2 }
 0x195   :  { %v2255_v34 = vadd.f32 %v2254_v10, %v2241_v13  ;;  %v4521_v55 = vor.u32 %v5006_v52, %v4518_v53 }
 0x197   :  { %3069 = vmatpush.bf16.msrb.mxu1 %v4529_v57  ;;  %v2347_v60 = vmax.f32 %v2255_v34, 0.0  ;;  %3102 = vmatpush.bf16.msrb.mxu3 %v4617_v56 }
 0x19a   :  { %v2242_v51 = vpop.f32.mrf.mxu0  ;;  %v2268_v15 = vpop.f32.mrf.mxu2 }
 0x19b   :  { %v2243_v54 = vadd.f32 %v2242_v51, %v2229_v11  ;;  %v2256_v6 = vpop.f32.mrf.mxu1  ;;  %3070 = vmatpush.bf16.msrb.mxu1 %v4521_v55  ;;  %3103 = vmatpush.bf16.msrb.mxu3 %v4609_v46  ;;  %v2282_v16 = vpop.f32.mrf.mxu3  ;;  %v2269_v22 = vadd.f32 %v2268_v15, %v392_v27  ;;  %v2457_v55 = vld [vmem:[#allocation7] sm:$0x3] }
 0x19c   :  { %v2460_v17 = vperm.slane %v2457_v55, 1 }
 0x19d   :  { %v2257_v50 = vadd.f32 %v2256_v6, %v2243_v54  ;;  %v2283_v10 = vadd.f32 %v2282_v16, %v2269_v22 }
 0x19f   :  { %v2353_v47 = vmax.f32 %v2257_v50, 0.0  ;;  %3071 = vmatpush.bf16.msrb.mxu1 %v4513_v0  ;;  %3104 = vmatpush.bf16.msrb.mxu3 %v4601_v62 }
 0x1a1   :  { %v2359_v8 = vpack.c.bf16 %v2353_v47, %v2347_v60  ;;  %v2459_v60 = vperm.slane %v2457_v55, 0 }
 0x1a2   :  { %v2270_v14 = vpop.f32.mrf.mxu2 }
 0x1a3   :  { %3007 = vmatmul.bf16.vlgmr.msra.gmra.mxu0 %v2359_v8  ;;  %3091 = vmatmul.bf16.vlgmr.msrb.gmra.mxu2 %v2359_v8  ;;  %v2284_v58 = vpop.f32.mrf.mxu3  ;;  %v2271_v37 = vadd.f32 %v2270_v14, %v392_v27 }
 0x1a4   :  { %3072 = vmatpush.bf16.msrb.mxu1 %v4505_v21 }
 0x1a5   :  { %v2285_v38 = vadd.f32 %v2284_v58, %v2271_v37 }
 0x1a8   :  { %3073 = vmatpush.bf16.msrb.mxu1 %v4497_v63 }
 0x1ac   :  { %3074 = vmatpush.bf16.msrb.mxu1 %v4489_v25 }
 0x1b0   :  { %3075 = vmatpush.bf16.msrb.mxu1 %v4481_v3 }
 0x1b2   :  { %v2296_v48 = vpop.f32.mrf.mxu0 }
 0x1b3   :  { %v2310_v26 = vpop.f32.mrf.mxu1  ;;  %3063 = vmatmul.bf16.vlgmr.msrb.gmra.mxu0 %v5387_v33  ;;  %v2297_v1 = vadd.f32 %v2296_v48, %v2283_v10 }
 0x1b4   :  { %3076 = vmatpush.bf16.msrb.mxu1 %v4473_v36 }
 0x1b5   :  { %v2311_v42 = vadd.f32 %v2310_v26, %v2297_v1 }
 0x1ba   :  { %v2324_v35 = vpop.f32.mrf.mxu2  ;;  %v2298_v39 = vpop.f32.mrf.mxu0 }
 0x1bb   :  { %v2338_v13 = vpop.f32.mrf.mxu3  ;;  %v2299_v40 = vadd.f32 %v2298_v39, %v2285_v38  ;;  %v2325_v18 = vadd.f32 %v2324_v35, %v2311_v42  ;;  %v2312_v59 = vpop.f32.mrf.mxu1 }
 0x1bd   :  { %v2313_v11 = vadd.f32 %v2312_v59, %v2299_v40  ;;  %v2339_v7 = vadd.f32 %v2338_v13, %v2325_v18 }
 0x1bf   :  { %v2348_v33 = vmax.f32 %v2339_v7, 0.0 }
 0x1c2   :  { %v2326_v57 = vpop.f32.mrf.mxu2 }
 0x1c3   :  { %v2327_v49 = vadd.f32 %v2326_v57, %v2313_v11  ;;  %v2340_v34 = vpop.f32.mrf.mxu3 }
 0x1c5   :  { %v2341_v51 = vadd.f32 %v2340_v34, %v2327_v49 }
 0x1c7   :  { %v2354_v52 = vmax.f32 %v2341_v51, 0.0 }
 0x1c9   :  { %v2360_v53 = vpack.c.bf16 %v2354_v52, %v2348_v33 }
 0x1cb   :  { %3021 = vmatmul.bf16.vlgmr.msra.gmra.mxu1 %v2360_v53  ;;  %3105 = vmatmul.bf16.vlgmr.msrb.gmra.mxu3 %v2360_v53 }
 0x1d2   :  { %v2952_v41 = vpop.f32.mrf.mxu0 }
 0x1d3   :  { %v2966_v45 = vpop.f32.mrf.mxu1  ;;  %v2953_v50 = vadd.f32 %v2952_v41, %v2459_v60 }
 0x1d5   :  { %v2967_v0 = vadd.f32 %v2966_v45, %v2953_v50 }
 0x1da   :  { %v2980_v6 = vpop.f32.mrf.mxu2  ;;  %v2954_v56 = vpop.f32.mrf.mxu0 }
 0x1db   :  { %3077 = vmatmul.bf16.vlgmr.msrb.gmra.mxu1 %v5392_v31  ;;  %v2968_v47 = vpop.f32.mrf.mxu1  ;;  %v2981_v4 = vadd.f32 %v2980_v6, %v2967_v0  ;;  %v2955_v46 = vadd.f32 %v2954_v56, %v2459_v60 }
 0x1dd   :  { %v2969_v5 = vadd.f32 %v2968_v47, %v2955_v46 }
 0x1e2   :  { %v2982_v61 = vpop.f32.mrf.mxu2 }
 0x1e3   :  { %v2983_v15 = vadd.f32 %v2982_v61, %v2969_v5 }
 0x1ee   :  { %v2994_v54 = vpop.f32.mrf.mxu3 }
 0x1ef   :  { %v2995_v8 = vadd.f32 %v2994_v54, %v2981_v4 }
 0x1f6   :  { %v2996_v43 = vpop.f32.mrf.mxu3 }
 0x1f7   :  { %v2997_v16 = vadd.f32 %v2996_v43, %v2983_v15 }
 0x1fa   :  { %v3036_v32 = vpop.f32.mrf.mxu2 }
 0x1fb   :  { %v3037_v27 = vadd.f32 %v3036_v32, %v2460_v17 }
 0x1fe   :  { %v3050_v9 = vpop.f32.mrf.mxu3 }
 0x1ff   :  { %v3051_v29 = vadd.f32 %v3050_v9, %v3037_v27 }
 0x202   :  { %v3038_v63 = vpop.f32.mrf.mxu2 }
 0x203   :  { %v3039_v48 = vadd.f32 %v3038_v63, %v2460_v17 }
 0x206   :  { %v3052_v25 = vpop.f32.mrf.mxu3 }
 0x207   :  { %v3053_v26 = vadd.f32 %v3052_v25, %v3039_v48 }
 0x220   :  { %v3008_v24 = vpop.f32.mrf.mxu0 }
 0x221   :  { %v3009_v12 = vadd.f32 %v3008_v24, %v2995_v8 }
 0x226   :  { %v3092_v14 = vpop.f32.mrf.mxu2 }
 0x228   :  { %v3010_v31 = vpop.f32.mrf.mxu0 }
 0x229   :  { %v3011_v19 = vadd.f32 %v3010_v31, %v2997_v16 }
 0x22e   :  { %v3094_v35 = vpop.f32.mrf.mxu2 }
 0x230   :  { %v3064_v44 = vpop.f32.mrf.mxu0 }
 0x231   :  { %v3065_v28 = vadd.f32 %v3064_v44, %v3051_v29 }
 0x238   :  { %v3066_v2 = vpop.f32.mrf.mxu0 }
 0x239   :  { %v3067_v10 = vadd.f32 %v3066_v2, %v3053_v26 }
 0x248   :  { %v3022_v21 = vpop.f32.mrf.mxu1 }
 0x249   :  { %v3023_v62 = vadd.f32 %v3022_v21, %v3009_v12 }
 0x24b   :  { %3111 = vst [vmem:[%s5417_s5] sm:$0xff] %v3023_v62 }
 0x24e   :  { %v3106_v22 = vpop.f32.mrf.mxu3 }
 0x250   :  { %v3024_v30 = vpop.f32.mrf.mxu1 }
 0x251   :  { %v3025_v20 = vadd.f32 %v3024_v30, %v3011_v19 }
 0x253   :  { %3113 = vst [vmem:[%s5417_s5 + $0x10] sm:$0xff] %v3025_v20 }
 0x256   :  { %v3108_v38 = vpop.f32.mrf.mxu3 }
 0x258   :  { %v3078_v58 = vpop.f32.mrf.mxu1 }
 0x259   :  { %v3079_v3 = vadd.f32 %v3078_v58, %v3065_v28 }
 0x25b   :  { %v3093_v23 = vadd.f32 %v3092_v14, %v3079_v3 }
 0x25d   :  { %v3107_v36 = vadd.f32 %v3106_v22, %v3093_v23 }
 0x25f   :  { %3112 = vst [vmem:[%s5417_s5 + $0x8] sm:$0xff] %v3107_v36 }
 0x260   :  { %v3080_v37 = vpop.f32.mrf.mxu1 }
 0x261   :  { %v3081_v1 = vadd.f32 %v3080_v37, %v3067_v10 }
 0x263   :  { %v3095_v13 = vadd.f32 %v3094_v35, %v3081_v1 }
 0x265   :  { %v3109_v39 = vadd.f32 %v3108_v38, %v3095_v13 }
 0x267   :  { %3114 = vst [vmem:[%s5417_s5 + $0x18] sm:$0xff] %v3109_v39 }
 0x268   :  { %3119 = vsyncpa [#allocation3], 1 }
 0x269   :  { %3120 = vsyncpa [#allocation5], 1 }
 0x26a   :  { %3121 = vsyncpa [#allocation8], 1 }

// kernel: physical_ai_forward.5
= control target key start
LH: loop header
LB: loop body
LE: loop exit
PB: predicated region body
PF: predicated region fallthrough
CT: control target
= control target key end

     0   :  { %s10246_s0 = inlined_call_operand.vmem [shape: f32[2,128], index: 0, kind: input, shape index: {}]   ;;  %s10247_s1 = inlined_call_operand.hbm [shape: bf16[128,2048], index: 1, kind: input, shape index: {}]   ;;  %s10248_s2 = inlined_call_operand.hbm [shape: f32[1,2048], index: 2, kind: input, shape index: {}]   ;;  %s10249_s3 = inlined_call_operand.hbm [shape: bf16[2048,2048], index: 3, kind: input, shape index: {}]   ;;  %s10250_s4 = inlined_call_operand.hbm [shape: f32[1,2048], index: 4, kind: input, shape index: {}]   ;;  %s10251_s5 = inlined_call_operand.vmem [shape: f32[2,2048], index: 5, kind: output, shape index: {}]  }
   0x1   :  { %10252 = sst [smem:[#allocation12_spill]] %s10247_s1 }
   0x2   :  { %10253 = sst [smem:[#allocation13_spill]] %s10249_s3 }
   0x3   :  { %10 = vsyncpa [#allocation3], 0 }
   0x4   :  { %11 = vsyncpa [#allocation5], 0  ;;  %s8888_s18 = smov 0   ;;  %s8890_s19 = smov 0  }
   0x5   :  { %s8892_s20 = smov 0   ;;  %s8894_s21 = smov 0  }
   0x6 LB: > { %s8907_s22 = sadd.s32 4294967295, %s8850_s21   ;;  %s8910_s23 = sadd.s32 1, %s8850_s21   ;;  %s8850_s21 = sphi %s8894_s21, %s10266_s21   ;;  %s8846_s20 = sphi %s8892_s20, %s10265_s20   ;;  %s8842_s19 = sphi %s8890_s19, %s10264_s19   ;;  %s8838_s18 = sphi %s8888_s18, %s10263_s18  }
   0x7   : > { %s84_s24 = ssub.s32 %s8850_s21, %s8910_s23  ;;  %s87_s25 = sadd.s32 1, %s8846_s20 }
   0x8   : > { %p85_p0 = scmp.eq.s32.totalorder %s84_s24, 0  ;;  %p94_p1 = scmp.ne.s32.totalorder %s8846_s20, %s8842_s19 }
   0x9   : > { %p95_p2 = scmp.eq.s32.totalorder %s8850_s21, 0  ;;  %p100_p3 = scmp.ne.s32.totalorder %s8842_s19, %s8838_s18 }
   0xa   : > { %s8920_s26 = scalar_select %p85_p0, %s8846_s20, %s87_s25  }
   0xb   : > { %p8922_p4 = por %p95_p2, %p94_p1  ;;  %p101_p5 = scmp.eq.s32.totalorder %s8907_s22, 0 }
   0xc   : > { %10254 = sst [smem:[#allocation11_spill]] %s8920_s26  ;;  %p5398_p6 = scmp.ge.s32.totalorder %s8850_s21, 1 }
   0xd   : > { %p163_p7 = scmp.lt.s32.totalorder %s8850_s21, 5  ;;  %p8931_p8 = por %p101_p5, %p100_p3 }
   0xe   : > { %s10258_s1 = sld [smem:[#allocation12_spill]]  ;;  %s8852_s8 = smov [#allocation2]  }
   0xf   : > { %p8935_p9 = pnand %p5398_p6, %p163_p7  ;;  %s179_s9 = sshll.u32 %s8852_s8, 4  ;;  %s180_s9 = int_to_ptr.vmem [resolvable:$true] %s179_s9 }
  0x10   : > { %p8645_p12 = scmp.lt.s32.totalorder %s8850_s21, 4  ;;  %s205_s11 = sand.u32 1, %s8850_s21  }
  0x11   : > { %p8629_p10 = pneg %p8935_p9  ;;  %s8853_s12 = smov 1024  }
  0x12   : > { %s8854_s13 = smov 64   ;;  %p8958_p13 = pnand %p8645_p12, %p8922_p4 }
  0x13   : > { %p8946_p11 = pnand %p8629_p10, %p101_p5  ;;  %s207_s15 = sand.u32 1, %s8846_s20  }
  0x14   : > { %s177_s7 = sshll.u32 %s10258_s1, 4  ;;  %s7976_s16 = sshll.u32 %s8850_s21, 4  ;;  %s178_s7 = int_to_ptr.hbm [resolvable:$true] %s177_s7 }
  0x15   : > { %8632 = dma.hbm_to_vmem [thread:$0]  (!%p8946_p11), %s178_s7, 16384, %s180_s9, [#allocation3], %s8853_s12, %s8853_s12, %s8854_s13  }
  0x16   : > { %s5402_s17 = sshll.u32 %s207_s15, 12  ;;  %s10261_s3 = sld [smem:[#allocation13_spill]] }
  0x17   : > { %s209_s6 = scalar_lea.vmem [#allocation6], %s5402_s17  ;;  %s8969_s27 = scalar_lea.sflag [#allocation3], %s205_s11 }
  0x18   : > { %s217_s8 = sshll.u32 %s209_s6, 4  ;;  %p8722_p1 = pneg %p8958_p13  ;;  %s218_s8 = int_to_ptr.vmem [resolvable:$true] %s217_s8 }
  0x1c   : > { %s214_s25 = scalar_lea.hbm %s10261_s3, %s7976_s16  ;;  %s8725_s16 = scalar_lea.hbm %s10261_s3, 16384 }
  0x1d   : > { %s215_s30 = sshll.u32 %s214_s25, 4  ;;  %s216_s30 = int_to_ptr.hbm [resolvable:$true] %s215_s30 }
  0x1e   : > { %s8718_s7 = sshra.s32 %s216_s30, 4  ;;  %s8719_s7 = int_to_ptr.hbm [resolvable:$true] %s8718_s7 }
  0x1f   : > { %s8720_s9 = scalar_lea.hbm %s8719_s7, 4096  ;;  %p8726_p4 = scmp.lt.s32.totalorder %s8719_s7, %s10261_s3 }
  0x20   : > { %p8721_p0 = scmp.ne.s32.totalorder %s8719_s7, %s8720_s9  ;;  %p8727_p6 = scmp.lt.s32.totalorder %s8725_s16, %s8720_s9 }
  0x22   : > { %p8723_p2 = pnand %p8722_p1, %p8721_p0  ;;  %p8728_p7 = por %p8727_p6, %p8726_p4 }
  0x24   : > { %p8724_p3 = pneg %p8723_p2 }
  0x26   : > { %p8729_p10 = pnand %p8728_p7, %p8724_p3 }
  0x28   : > { %8732 = shalt.err (!%p8729_p10)
}
  0x29   : > { %s8855_s11 = smov 256   ;;  %s8856_s25 = smov 16  }
  0x2a   : > { %8639 = dma.hbm_to_vmem [thread:$0]  (!%p8958_p13), %s216_s30, 65536, %s218_s8, %s8969_s27, %s8853_s12, %s8855_s11, %s8856_s25  }
  0x2b   : > { %s192_s18 = sshll.u32 %s10248_s2, 4  ;;  %s8857_s7 = smov [#allocation4]   ;;  %s193_s18 = int_to_ptr.hbm [resolvable:$true] %s192_s18 }
  0x2c   : > { %s194_s9 = sshll.u32 %s8857_s7, 4  ;;  %s5405_s16 = sshll.u32 %s207_s15, 2  ;;  %s195_s9 = int_to_ptr.vmem [resolvable:$true] %s194_s9 }
  0x2d   : > { %8635 = dma.hbm_to_vmem [thread:$0]  (!%p8946_p11), %s193_s18, 256, %s195_s9, [#allocation5]  }
  0x2e   : > { %s5406_s17 = sshll.u32 %s8850_s21, 2  ;;  %s231_s26 = scalar_lea.vmem [#allocation7], %s5405_s16 }
  0x2f   : > { %s235_s3 = scalar_lea.hbm %s10250_s4, %s5406_s17  ;;  %s239_s12 = sshll.u32 %s231_s26, 4  ;;  %s240_s12 = int_to_ptr.vmem [resolvable:$true] %s239_s12 }
  0x30   : > { %s237_s30 = sshll.u32 %s235_s3, 4  ;;  %s8785_s21 = scalar_lea.hbm %s10250_s4, 16  ;;  %s238_s30 = int_to_ptr.hbm [resolvable:$true] %s237_s30 }
  0x31   : > { %s8778_s8 = sshra.s32 %s238_s30, 4  ;;  %s8779_s8 = int_to_ptr.hbm [resolvable:$true] %s8778_s8 }
  0x32   : > { %s8780_s11 = scalar_lea.hbm %s8779_s8, 4  ;;  %p8786_p11 = scmp.lt.s32.totalorder %s8779_s8, %s10250_s4 }
  0x33   : > { %p8781_p12 = scmp.ne.s32.totalorder %s8779_s8, %s8780_s11  ;;  %p8787_p3 = scmp.lt.s32.totalorder %s8785_s21, %s8780_s11 }
  0x35   : > { %p8783_p0 = pnand %p8781_p12, %p8722_p1  ;;  %p8788_p4 = por %p8787_p3, %p8786_p11 }
  0x37   : > { %p8784_p2 = pneg %p8783_p0 }
  0x39   : > { %p8789_p6 = pnand %p8788_p4, %p8784_p2 }
  0x3b   : > { %8792 = shalt.err (!%p8789_p6)
}
  0x3c   : > { %8642 = dma.hbm_to_vmem [thread:$0]  (!%p8958_p13), %s238_s30, 64, %s240_s12, %s8969_s27  }
  0x3d   : > { %248 = sbr.rel (%p8935_p9) target bundleno = 858 (0x35a), region = 40 }
  0x42   : > { %8825 = dma.done.wait (%p101_p5), [#allocation3], 16384  }
  0x43   : > { %8827 = vsyncadd (%p101_p5), [#allocation3], 4294950912 }
  0x44   : > { %8829 = dma.done.wait (%p101_p5), [#allocation5], 256  }
  0x45   : > { %8831 = vsyncadd (%p101_p5), [#allocation5], 4294967040  ;;  %s260_s3 = sand.u32 1, %s8907_s22   ;;  %s262_s26 = sand.u32 1, %s8842_s19  }
  0x46   : > { %s5410_s29 = sshll.u32 %s262_s26, 12  ;;  %s261_s14 = scalar_lea.sflag [#allocation3], %s260_s3 }
  0x47   : > { %s9023_s27 = scalar_lea.vmem [#allocation6], %s5410_s29 }
  0x48   : > { %8833 = dma.done.wait (%p8931_p8), %s261_s14, 65600  }
  0x49   : > { %8835 = vsyncadd (%p8931_p8), %s261_s14, 4294901696  ;;  %v5864_v0 = vld [vmem:[#allocation2 + $0x380] sm:$0xf]  ;;  %v8089_v2 = vld [vmem:[#allocation2 + $0x384] sm:$0xf]  ;;  %s9475_s13 = sshll.u32 %s262_s26, 2 }
  0x4a   : > { %v8097_v1 = vld [vmem:[#allocation2 + $0x3bc] sm:$0xf0]  ;;  %v5866_v4 = vld [vmem:[#allocation2 + $0x3c0] sm:$0xf0]  ;;  %v5872_v5 = vld [vmem:[#allocation2 + $0x388] sm:$0xf] }
  0x4b   : > { %v5865_v3 = vor.u32 %v8097_v1, %v5864_v0  ;;  %v8098_v6 = vld [vmem:[#allocation2 + $0x3c4] sm:$0xf0]  ;;  %v5869_v7 = vor.u32 %v8089_v2, %v5866_v4  ;;  %v8090_v9 = vld [vmem:[#allocation2 + $0x38c] sm:$0xf]  ;;  %v5800_v11 = vld [vmem:[#allocation2 + $0x300] sm:$0xf] }
  0x4c   : > { %v5873_v8 = vor.u32 %v8098_v6, %v5872_v5  ;;  %v5874_v10 = vld [vmem:[#allocation2 + $0x3c8] sm:$0xf0]  ;;  %v8081_v13 = vld [vmem:[#allocation2 + $0x33c] sm:$0xf0]  ;;  %v8073_v14 = vld [vmem:[#allocation2 + $0x304] sm:$0xf] }
  0x4d   : > { %1121 = vmatpush.bf16.msra.mxu0 %v5865_v3  ;;  %v5877_v12 = vor.u32 %v8090_v9, %v5874_v10  ;;  %v5802_v15 = vld [vmem:[#allocation2 + $0x340] sm:$0xf0]  ;;  %1134 = vmatpush.bf16.msra.mxu1 %v5869_v7  ;;  %v5801_v16 = vor.u32 %v8081_v13, %v5800_v11  ;;  %v5808_v18 = vld [vmem:[#allocation2 + $0x308] sm:$0xf]  ;;  %v8074_v20 = vld [vmem:[#allocation2 + $0x30c] sm:$0xf] }
  0x4e   : > { %1147 = vmatpush.bf16.msra.mxu2 %v5873_v8  ;;  %v5805_v17 = vor.u32 %v8073_v14, %v5802_v15  ;;  %v8082_v19 = vld [vmem:[#allocation2 + $0x344] sm:$0xf0]  ;;  %v5810_v22 = vld [vmem:[#allocation2 + $0x348] sm:$0xf0]  ;;  %v5736_v23 = vld [vmem:[#allocation2 + $0x280] sm:$0xf] }
  0x4f   : > { %1160 = vmatpush.bf16.msra.mxu3 %v5877_v12  ;;  %v5809_v21 = vor.u32 %v8082_v19, %v5808_v18  ;;  %v8065_v24 = vld [vmem:[#allocation2 + $0x2bc] sm:$0xf0]  ;;  %v5813_v25 = vor.u32 %v8074_v20, %v5810_v22  ;;  %v8057_v26 = vld [vmem:[#allocation2 + $0x284] sm:$0xf]  ;;  %v5744_v28 = vld [vmem:[#allocation2 + $0x288] sm:$0xf] }
  0x50   : > { %v5738_v27 = vld [vmem:[#allocation2 + $0x2c0] sm:$0xf0]  ;;  %v5737_v29 = vor.u32 %v8065_v24, %v5736_v23  ;;  %v8066_v30 = vld [vmem:[#allocation2 + $0x2c4] sm:$0xf0]  ;;  %v8058_v31 = vld [vmem:[#allocation2 + $0x28c] sm:$0xf] }
  0x51   : > { %1122 = vmatpush.bf16.msra.mxu0 %v5801_v16  ;;  %v5746_v32 = vld [vmem:[#allocation2 + $0x2c8] sm:$0xf0]  ;;  %1135 = vmatpush.bf16.msra.mxu1 %v5805_v17  ;;  %v5741_v33 = vor.u32 %v8057_v26, %v5738_v27  ;;  %v5745_v34 = vor.u32 %v8066_v30, %v5744_v28  ;;  %v5672_v35 = vld [vmem:[#allocation2 + $0x200] sm:$0xf]  ;;  %v8041_v37 = vld [vmem:[#allocation2 + $0x204] sm:$0xf] }
  0x52   : > { %1148 = vmatpush.bf16.msra.mxu2 %v5809_v21  ;;  %v8049_v36 = vld [vmem:[#allocation2 + $0x23c] sm:$0xf0]  ;;  %v5749_v38 = vor.u32 %v8058_v31, %v5746_v32  ;;  %v5674_v39 = vld [vmem:[#allocation2 + $0x240] sm:$0xf0]  ;;  %v5680_v40 = vld [vmem:[#allocation2 + $0x208] sm:$0xf] }
  0x53   : > { %1161 = vmatpush.bf16.msra.mxu3 %v5813_v25  ;;  %v8050_v41 = vld [vmem:[#allocation2 + $0x244] sm:$0xf0]  ;;  %v8042_v42 = vld [vmem:[#allocation2 + $0x20c] sm:$0xf]  ;;  %v5673_v44 = vor.u32 %v8049_v36, %v5672_v35  ;;  %v5677_v45 = vor.u32 %v8041_v37, %v5674_v39  ;;  %v5608_v47 = vld [vmem:[#allocation2 + $0x180] sm:$0xf] }
  0x54   : > { %v5682_v43 = vld [vmem:[#allocation2 + $0x248] sm:$0xf0]  ;;  %v5681_v46 = vor.u32 %v8050_v41, %v5680_v40  ;;  %v8033_v48 = vld [vmem:[#allocation2 + $0x1bc] sm:$0xf0]  ;;  %v8025_v49 = vld [vmem:[#allocation2 + $0x184] sm:$0xf] }
  0x55   : > { %1123 = vmatpush.bf16.msra.mxu0 %v5737_v29  ;;  %1136 = vmatpush.bf16.msra.mxu1 %v5741_v33  ;;  %v5685_v50 = vor.u32 %v8042_v42, %v5682_v43  ;;  %v5610_v51 = vld [vmem:[#allocation2 + $0x1c0] sm:$0xf0]  ;;  %v5616_v52 = vld [vmem:[#allocation2 + $0x188] sm:$0xf]  ;;  %v8026_v54 = vld [vmem:[#allocation2 + $0x18c] sm:$0xf]  ;;  %v5609_v56 = vor.u32 %v8033_v48, %v5608_v47 }
  0x56   : > { %1149 = vmatpush.bf16.msra.mxu2 %v5745_v34  ;;  %v8034_v53 = vld [vmem:[#allocation2 + $0x1c4] sm:$0xf0]  ;;  %v5618_v55 = vld [vmem:[#allocation2 + $0x1c8] sm:$0xf0]  ;;  %v5613_v57 = vor.u32 %v8025_v49, %v5610_v51  ;;  %v5544_v59 = vld [vmem:[#allocation2 + $0x100] sm:$0xf] }
  0x57   : > { %1162 = vmatpush.bf16.msra.mxu3 %v5749_v38  ;;  %v5617_v58 = vor.u32 %v8034_v53, %v5616_v52  ;;  %v8017_v60 = vld [vmem:[#allocation2 + $0x13c] sm:$0xf0]  ;;  %v8009_v61 = vld [vmem:[#allocation2 + $0x104] sm:$0xf]  ;;  %v5621_v62 = vor.u32 %v8026_v54, %v5618_v55  ;;  %v5552_v0 = vld [vmem:[#allocation2 + $0x108] sm:$0xf] }
  0x58   : > { %v5546_v63 = vld [vmem:[#allocation2 + $0x140] sm:$0xf0]  ;;  %v8018_v1 = vld [vmem:[#allocation2 + $0x144] sm:$0xf0]  ;;  %v8010_v2 = vld [vmem:[#allocation2 + $0x10c] sm:$0xf]  ;;  %v5545_v4 = vor.u32 %v8017_v60, %v5544_v59 }
  0x59   : > { %1124 = vmatpush.bf16.msra.mxu0 %v5673_v44  ;;  %1137 = vmatpush.bf16.msra.mxu1 %v5677_v45  ;;  %v5554_v3 = vld [vmem:[#allocation2 + $0x148] sm:$0xf0]  ;;  %v5549_v5 = vor.u32 %v8009_v61, %v5546_v63  ;;  %v5553_v6 = vor.u32 %v8018_v1, %v5552_v0  ;;  %v5480_v7 = vld [vmem:[#allocation2 + $0x80] sm:$0xf]  ;;  %v7993_v9 = vld [vmem:[#allocation2 + $0x84] sm:$0xf] }
  0x5a   : > { %1150 = vmatpush.bf16.msra.mxu2 %v5681_v46  ;;  %v8001_v8 = vld [vmem:[#allocation2 + $0xbc] sm:$0xf0]  ;;  %v5557_v10 = vor.u32 %v8010_v2, %v5554_v3  ;;  %v5482_v11 = vld [vmem:[#allocation2 + $0xc0] sm:$0xf0]  ;;  %v5488_v12 = vld [vmem:[#allocation2 + $0x88] sm:$0xf] }
  0x5b   : > { %1163 = vmatpush.bf16.msra.mxu3 %v5685_v50  ;;  %v8002_v13 = vld [vmem:[#allocation2 + $0xc4] sm:$0xf0]  ;;  %v7994_v14 = vld [vmem:[#allocation2 + $0x8c] sm:$0xf]  ;;  %v5481_v16 = vor.u32 %v8001_v8, %v5480_v7  ;;  %v5416_v17 = vld [vmem:[#allocation2] sm:$0xf]  ;;  %v5485_v19 = vor.u32 %v7993_v9, %v5482_v11 }
  0x5c   : > { %v5490_v15 = vld [vmem:[#allocation2 + $0xc8] sm:$0xf0]  ;;  %v7985_v18 = vld [vmem:[#allocation2 + $0x3c] sm:$0xf0]  ;;  %v5489_v20 = vor.u32 %v8002_v13, %v5488_v12  ;;  %v7977_v21 = vld [vmem:[#allocation2 + $0x4] sm:$0xf] }
  0x5d   : > { %1125 = vmatpush.bf16.msra.mxu0 %v5609_v56  ;;  %1138 = vmatpush.bf16.msra.mxu1 %v5613_v57  ;;  %v5418_v22 = vld [vmem:[#allocation2 + $0x40] sm:$0xf0]  ;;  %v5424_v23 = vld [vmem:[#allocation2 + $0x8] sm:$0xf]  ;;  %v5493_v24 = vor.u32 %v7994_v14, %v5490_v15  ;;  %v7978_v26 = vld [vmem:[#allocation2 + $0xc] sm:$0xf]  ;;  %v5417_v31 = vor.u32 %v7985_v18, %v5416_v17 }
  0x5e   : > { %1151 = vmatpush.bf16.msra.mxu2 %v5617_v58  ;;  %v7986_v25 = vld [vmem:[#allocation2 + $0x44] sm:$0xf0]  ;;  %v5426_v27 = vld [vmem:[#allocation2 + $0x48] sm:$0xf0]  ;;  %v5880_v28 = vld [vmem:[#allocation2 + $0x390] sm:$0xf]  ;;  %v5421_v35 = vor.u32 %v7977_v21, %v5418_v22 }
  0x5f   : > { %1164 = vmatpush.bf16.msra.mxu3 %v5621_v62  ;;  %v8099_v29 = vld [vmem:[#allocation2 + $0x3cc] sm:$0xf0]  ;;  %v8091_v30 = vld [vmem:[#allocation2 + $0x394] sm:$0xf]  ;;  %v5888_v33 = vld [vmem:[#allocation2 + $0x398] sm:$0xf]  ;;  %v5425_v36 = vor.u32 %v7986_v25, %v5424_v23  ;;  %v5429_v40 = vor.u32 %v7978_v26, %v5426_v27 }
  0x60   : > { %v5882_v32 = vld [vmem:[#allocation2 + $0x3d0] sm:$0xf0]  ;;  %v8100_v34 = vld [vmem:[#allocation2 + $0x3d4] sm:$0xf0]  ;;  %v8092_v37 = vld [vmem:[#allocation2 + $0x39c] sm:$0xf]  ;;  %v5881_v41 = vor.u32 %v8099_v29, %v5880_v28 }
  0x61   : > { %1126 = vmatpush.bf16.msra.mxu0 %v5545_v4  ;;  %1139 = vmatpush.bf16.msra.mxu1 %v5549_v5  ;;  %v5890_v38 = vld [vmem:[#allocation2 + $0x3d8] sm:$0xf0]  ;;  %v315_v39 = vld [vmem:[%s10246_s0] sm:$0x3]  ;;  %v5885_v42 = vor.u32 %v8091_v30, %v5882_v32  ;;  %v5889_v43 = vor.u32 %v8100_v34, %v5888_v33  ;;  %v5816_v44 = vld [vmem:[#allocation2 + $0x310] sm:$0xf] }
  0x62   : > { %1152 = vmatpush.bf16.msra.mxu2 %v5553_v6  ;;  %v8083_v45 = vld [vmem:[#allocation2 + $0x34c] sm:$0xf0]  ;;  %v8075_v46 = vld [vmem:[#allocation2 + $0x314] sm:$0xf]  ;;  %v5893_v47 = vor.u32 %v8092_v37, %v5890_v38  ;;  %v9032_v48 = vpack.c.bf16 %v315_v39, %v315_v39  ;;  %v5824_v50 = vld [vmem:[#allocation2 + $0x318] sm:$0xf] }
  0x63   : > { %1165 = vmatpush.bf16.msra.mxu3 %v5557_v10  ;;  %v5818_v49 = vld [vmem:[#allocation2 + $0x350] sm:$0xf0]  ;;  %v8084_v51 = vld [vmem:[#allocation2 + $0x354] sm:$0xf0]  ;;  %v8076_v52 = vld [vmem:[#allocation2 + $0x31c] sm:$0xf]  ;;  %v5817_v54 = vor.u32 %v8083_v45, %v5816_v44 }
  0x64   : > { %v5826_v53 = vld [vmem:[#allocation2 + $0x358] sm:$0xf0]  ;;  %v5821_v55 = vor.u32 %v8075_v46, %v5818_v49  ;;  %v5825_v56 = vor.u32 %v8084_v51, %v5824_v50  ;;  %v5752_v57 = vld [vmem:[#allocation2 + $0x290] sm:$0xf]  ;;  %v8059_v59 = vld [vmem:[#allocation2 + $0x294] sm:$0xf] }
  0x65   : > { %1127 = vmatpush.bf16.msra.mxu0 %v5481_v16  ;;  %1140 = vmatpush.bf16.msra.mxu1 %v5485_v19  ;;  %v8067_v58 = vld [vmem:[#allocation2 + $0x2cc] sm:$0xf0]  ;;  %v5829_v60 = vor.u32 %v8076_v52, %v5826_v53  ;;  %v5754_v61 = vld [vmem:[#allocation2 + $0x2d0] sm:$0xf0]  ;;  %v5760_v62 = vld [vmem:[#allocation2 + $0x298] sm:$0xf] }
  0x66   : > { %1153 = vmatpush.bf16.msra.mxu2 %v5489_v20  ;;  %v8068_v63 = vld [vmem:[#allocation2 + $0x2d4] sm:$0xf0]  ;;  %v8060_v0 = vld [vmem:[#allocation2 + $0x29c] sm:$0xf]  ;;  %v5753_v2 = vor.u32 %v8067_v58, %v5752_v57  ;;  %v5757_v3 = vor.u32 %v8059_v59, %v5754_v61  ;;  %v5688_v5 = vld [vmem:[#allocation2 + $0x210] sm:$0xf] }
  0x67   : > { %1166 = vmatpush.bf16.msra.mxu3 %v5493_v24  ;;  %v5762_v1 = vld [vmem:[#allocation2 + $0x2d8] sm:$0xf0]  ;;  %v5761_v4 = vor.u32 %v8068_v63, %v5760_v62  ;;  %v8051_v6 = vld [vmem:[#allocation2 + $0x24c] sm:$0xf0]  ;;  %v8043_v7 = vld [vmem:[#allocation2 + $0x214] sm:$0xf] }
  0x68   : > { %v5765_v8 = vor.u32 %v8060_v0, %v5762_v1  ;;  %v5690_v9 = vld [vmem:[#allocation2 + $0x250] sm:$0xf0]  ;;  %v5696_v10 = vld [vmem:[#allocation2 + $0x218] sm:$0xf]  ;;  %v8044_v12 = vld [vmem:[#allocation2 + $0x21c] sm:$0xf]  ;;  %v5689_v14 = vor.u32 %v8051_v6, %v5688_v5 }
  0x69   : > { %1128 = vmatpush.bf16.msra.mxu0 %v5417_v31  ;;  %1141 = vmatpush.bf16.msra.mxu1 %v5421_v35  ;;  %v8052_v11 = vld [vmem:[#allocation2 + $0x254] sm:$0xf0]  ;;  %v5698_v13 = vld [vmem:[#allocation2 + $0x258] sm:$0xf0]  ;;  %v5693_v15 = vor.u32 %v8043_v7, %v5690_v9  ;;  %v5624_v17 = vld [vmem:[#allocation2 + $0x190] sm:$0xf] }
  0x6a   : > { %1154 = vmatpush.bf16.msra.mxu2 %v5425_v36  ;;  %v5697_v16 = vor.u32 %v8052_v11, %v5696_v10  ;;  %v8035_v18 = vld [vmem:[#allocation2 + $0x1cc] sm:$0xf0]  ;;  %v8027_v19 = vld [vmem:[#allocation2 + $0x194] sm:$0xf]  ;;  %v5701_v20 = vor.u32 %v8044_v12, %v5698_v13  ;;  %v5632_v22 = vld [vmem:[#allocation2 + $0x198] sm:$0xf] }
  0x6b   : > { %1167 = vmatpush.bf16.msra.mxu3 %v5429_v40  ;;  %v5626_v21 = vld [vmem:[#allocation2 + $0x1d0] sm:$0xf0]  ;;  %v8036_v23 = vld [vmem:[#allocation2 + $0x1d4] sm:$0xf0]  ;;  %v8028_v24 = vld [vmem:[#allocation2 + $0x19c] sm:$0xf]  ;;  %v5625_v26 = vor.u32 %v8035_v18, %v5624_v17 }
  0x6c   : > { %1129 = vmatmul.bf16.vlgmr.msra.gmra.mxu0 %v9032_v48  ;;  %1142 = vmatmul.bf16.vlgmr.msra.gmra.mxu1 %v9032_v48  ;;  %v5634_v25 = vld [vmem:[#allocation2 + $0x1d8] sm:$0xf0]  ;;  %v5629_v27 = vor.u32 %v8027_v19, %v5626_v21  ;;  %v5633_v28 = vor.u32 %v8036_v23, %v5632_v22  ;;  %v5560_v29 = vld [vmem:[#allocation2 + $0x110] sm:$0xf]  ;;  %v8011_v31 = vld [vmem:[#allocation2 + $0x114] sm:$0xf] }
  0x6d   : > { %1173 = vmatpush.bf16.msrb.mxu0 %v5881_v41  ;;  %1186 = vmatpush.bf16.msrb.mxu1 %v5885_v42  ;;  %v8019_v30 = vld [vmem:[#allocation2 + $0x14c] sm:$0xf0]  ;;  %v5637_v32 = vor.u32 %v8028_v24, %v5634_v25  ;;  %v5562_v33 = vld [vmem:[#allocation2 + $0x150] sm:$0xf0]  ;;  %v5568_v34 = vld [vmem:[#allocation2 + $0x118] sm:$0xf] }
  0x6e   : > { %1199 = vmatpush.bf16.msrb.mxu2 %v5889_v43  ;;  %1168 = vmatmul.bf16.vlgmr.msra.gmra.mxu3 %v9032_v48  ;;  %v8020_v35 = vld [vmem:[#allocation2 + $0x154] sm:$0xf0]  ;;  %v8012_v36 = vld [vmem:[#allocation2 + $0x11c] sm:$0xf]  ;;  %v5561_v38 = vor.u32 %v8019_v30, %v5560_v29  ;;  %v5565_v39 = vor.u32 %v8011_v31, %v5562_v33  ;;  %v5496_v41 = vld [vmem:[#allocation2 + $0x90] sm:$0xf] }
  0x6f   : > { %1212 = vmatpush.bf16.msrb.mxu3 %v5893_v47  ;;  %1155 = vmatmul.bf16.vlgmr.msra.gmra.mxu2 %v9032_v48  ;;  %v5570_v37 = vld [vmem:[#allocation2 + $0x158] sm:$0xf0]  ;;  %v5569_v40 = vor.u32 %v8020_v35, %v5568_v34  ;;  %v8003_v42 = vld [vmem:[#allocation2 + $0xcc] sm:$0xf0]  ;;  %v7995_v43 = vld [vmem:[#allocation2 + $0x94] sm:$0xf] }
  0x70   : > { %v5573_v44 = vor.u32 %v8012_v36, %v5570_v37  ;;  %v5498_v45 = vld [vmem:[#allocation2 + $0xd0] sm:$0xf0]  ;;  %v5504_v46 = vld [vmem:[#allocation2 + $0x98] sm:$0xf]  ;;  %v7996_v49 = vld [vmem:[#allocation2 + $0x9c] sm:$0xf]  ;;  %v5497_v51 = vor.u32 %v8003_v42, %v5496_v41 }
  0x71   : > { %1174 = vmatpush.bf16.msrb.mxu0 %v5817_v54  ;;  %1187 = vmatpush.bf16.msrb.mxu1 %v5821_v55  ;;  %v8004_v47 = vld [vmem:[#allocation2 + $0xd4] sm:$0xf0]  ;;  %v5506_v50 = vld [vmem:[#allocation2 + $0xd8] sm:$0xf0]  ;;  %v5432_v52 = vld [vmem:[#allocation2 + $0x10] sm:$0xf]  ;;  %v5501_v54 = vor.u32 %v7995_v43, %v5498_v45 }
  0x72   : > { %1200 = vmatpush.bf16.msrb.mxu2 %v5825_v56  ;;  %v7987_v53 = vld [vmem:[#allocation2 + $0x4c] sm:$0xf0]  ;;  %v5505_v55 = vor.u32 %v8004_v47, %v5504_v46  ;;  %v7979_v56 = vld [vmem:[#allocation2 + $0x14] sm:$0xf]  ;;  %v5440_v58 = vld [vmem:[#allocation2 + $0x18] sm:$0xf]  ;;  %v5509_v59 = vor.u32 %v7996_v49, %v5506_v50 }
  0x73   : > { %1213 = vmatpush.bf16.msrb.mxu3 %v5829_v60  ;;  %v5434_v57 = vld [vmem:[#allocation2 + $0x50] sm:$0xf0]  ;;  %v7988_v60 = vld [vmem:[#allocation2 + $0x54] sm:$0xf0]  ;;  %v7980_v61 = vld [vmem:[#allocation2 + $0x1c] sm:$0xf] }
  0x74   : > { %v5442_v62 = vld [vmem:[#allocation2 + $0x58] sm:$0xf0]  ;;  %v5896_v63 = vld [vmem:[#allocation2 + $0x3a0] sm:$0xf]  ;;  %v8093_v1 = vld [vmem:[#allocation2 + $0x3a4] sm:$0xf]  ;;  %v5437_v6 = vor.u32 %v7979_v56, %v5434_v57  ;;  %v5441_v7 = vor.u32 %v7988_v60, %v5440_v58 }
  0x75   : > { %1175 = vmatpush.bf16.msrb.mxu0 %v5753_v2  ;;  %1188 = vmatpush.bf16.msrb.mxu1 %v5757_v3  ;;  %v8101_v0 = vld [vmem:[#allocation2 + $0x3dc] sm:$0xf0]  ;;  %v5433_v2 = vor.u32 %v7987_v53, %v5432_v52  ;;  %v5898_v3 = vld [vmem:[#allocation2 + $0x3e0] sm:$0xf0]  ;;  %v8102_v5 = vld [vmem:[#allocation2 + $0x3e4] sm:$0xf0]  ;;  %v5445_v10 = vor.u32 %v7980_v61, %v5442_v62 }
  0x76   : > { %1201 = vmatpush.bf16.msrb.mxu2 %v5761_v4  ;;  %v5904_v4 = vld [vmem:[#allocation2 + $0x3a8] sm:$0xf]  ;;  %v5906_v9 = vld [vmem:[#allocation2 + $0x3e8] sm:$0xf0]  ;;  %v5897_v11 = vor.u32 %v8101_v0, %v5896_v63  ;;  %v5901_v12 = vor.u32 %v8093_v1, %v5898_v3  ;;  %v5834_v18 = vld [vmem:[#allocation2 + $0x360] sm:$0xf0] }
  0x77   : > { %1214 = vmatpush.bf16.msrb.mxu3 %v5765_v8  ;;  %v8094_v8 = vld [vmem:[#allocation2 + $0x3ac] sm:$0xf]  ;;  %v5905_v13 = vor.u32 %v8102_v5, %v5904_v4  ;;  %v5840_v19 = vld [vmem:[#allocation2 + $0x328] sm:$0xf]  ;;  %v5770_v30 = vld [vmem:[#allocation2 + $0x2e0] sm:$0xf0] }
  0x78   : > { %v5909_v17 = vor.u32 %v8094_v8, %v5906_v9  ;;  %v8078_v21 = vld [vmem:[#allocation2 + $0x32c] sm:$0xf]  ;;  %v5776_v31 = vld [vmem:[#allocation2 + $0x2a8] sm:$0xf]  ;;  %v5706_v42 = vld [vmem:[#allocation2 + $0x260] sm:$0xf0] }
  0x79   : > { %1176 = vmatpush.bf16.msrb.mxu0 %v5689_v14  ;;  %1189 = vmatpush.bf16.msrb.mxu1 %v5693_v15  ;;  %v5832_v14 = vld [vmem:[#allocation2 + $0x320] sm:$0xf]  ;;  %v5842_v22 = vld [vmem:[#allocation2 + $0x368] sm:$0xf0]  ;;  %v5712_v43 = vld [vmem:[#allocation2 + $0x228] sm:$0xf] }
  0x7a   : > { %1202 = vmatpush.bf16.msrb.mxu2 %v5697_v16  ;;  %v8085_v15 = vld [vmem:[#allocation2 + $0x35c] sm:$0xf0]  ;;  %v8077_v16 = vld [vmem:[#allocation2 + $0x324] sm:$0xf]  ;;  %v5845_v29 = vor.u32 %v8078_v21, %v5842_v22  ;;  %v8062_v33 = vld [vmem:[#allocation2 + $0x2ac] sm:$0xf] }
  0x7b   : > { %1215 = vmatpush.bf16.msrb.mxu3 %v5701_v20  ;;  %v8086_v20 = vld [vmem:[#allocation2 + $0x364] sm:$0xf0]  ;;  %v5833_v23 = vor.u32 %v8085_v15, %v5832_v14  ;;  %v5837_v24 = vor.u32 %v8077_v16, %v5834_v18  ;;  %v5778_v34 = vld [vmem:[#allocation2 + $0x2e8] sm:$0xf0]  ;;  %v8037_v52 = vld [vmem:[#allocation2 + $0x1dc] sm:$0xf0] }
  0x7c   : > { %v5841_v25 = vor.u32 %v8086_v20, %v5840_v19  ;;  %v5781_v41 = vor.u32 %v8062_v33, %v5778_v34  ;;  %v8046_v45 = vld [vmem:[#allocation2 + $0x22c] sm:$0xf]  ;;  %v8029_v53 = vld [vmem:[#allocation2 + $0x1a4] sm:$0xf]  ;;  %v5648_v56 = vld [vmem:[#allocation2 + $0x1a8] sm:$0xf] }
  0x7d   : > { %1177 = vmatpush.bf16.msrb.mxu0 %v5625_v26  ;;  %1190 = vmatpush.bf16.msrb.mxu1 %v5629_v27  ;;  %v5768_v26 = vld [vmem:[#allocation2 + $0x2a0] sm:$0xf]  ;;  %v5714_v46 = vld [vmem:[#allocation2 + $0x268] sm:$0xf0]  ;;  %v8038_v57 = vld [vmem:[#allocation2 + $0x1e4] sm:$0xf0] }
  0x7e   : > { %1203 = vmatpush.bf16.msrb.mxu2 %v5633_v28  ;;  %v8069_v27 = vld [vmem:[#allocation2 + $0x2dc] sm:$0xf0]  ;;  %v8061_v28 = vld [vmem:[#allocation2 + $0x2a4] sm:$0xf]  ;;  %v8030_v58 = vld [vmem:[#allocation2 + $0x1ac] sm:$0xf]  ;;  %v5649_v62 = vor.u32 %v8038_v57, %v5648_v56 }
  0x7f   : > { %1216 = vmatpush.bf16.msrb.mxu3 %v5637_v32  ;;  %v8070_v32 = vld [vmem:[#allocation2 + $0x2e4] sm:$0xf0]  ;;  %v5769_v35 = vor.u32 %v8069_v27, %v5768_v26  ;;  %v5773_v36 = vor.u32 %v8061_v28, %v5770_v30  ;;  %v5576_v63 = vld [vmem:[#allocation2 + $0x120] sm:$0xf]  ;;  %v8013_v1 = vld [vmem:[#allocation2 + $0x124] sm:$0xf] }
  0x80   : > { %v5777_v37 = vor.u32 %v8070_v32, %v5776_v31  ;;  %v8021_v0 = vld [vmem:[#allocation2 + $0x15c] sm:$0xf0]  ;;  %v5578_v3 = vld [vmem:[#allocation2 + $0x160] sm:$0xf0]  ;;  %v5584_v4 = vld [vmem:[#allocation2 + $0x128] sm:$0xf] }
  0x81   : > { %1178 = vmatpush.bf16.msrb.mxu0 %v5561_v38  ;;  %1191 = vmatpush.bf16.msrb.mxu1 %v5565_v39  ;;  %v5704_v38 = vld [vmem:[#allocation2 + $0x220] sm:$0xf]  ;;  %v8022_v5 = vld [vmem:[#allocation2 + $0x164] sm:$0xf0]  ;;  %v5577_v8 = vor.u32 %v8021_v0, %v5576_v63  ;;  %v5581_v9 = vor.u32 %v8013_v1, %v5578_v3  ;;  %v5514_v15 = vld [vmem:[#allocation2 + $0xe0] sm:$0xf0] }
  0x82   : > { %1204 = vmatpush.bf16.msrb.mxu2 %v5569_v40  ;;  %v8053_v39 = vld [vmem:[#allocation2 + $0x25c] sm:$0xf0]  ;;  %v8045_v40 = vld [vmem:[#allocation2 + $0x224] sm:$0xf]  ;;  %v5520_v16 = vld [vmem:[#allocation2 + $0xa8] sm:$0xf] }
  0x83   : > { %1217 = vmatpush.bf16.msrb.mxu3 %v5573_v44  ;;  %v8054_v44 = vld [vmem:[#allocation2 + $0x264] sm:$0xf0]  ;;  %v5705_v47 = vor.u32 %v8053_v39, %v5704_v38  ;;  %v5709_v49 = vor.u32 %v8045_v40, %v5706_v42  ;;  %v7998_v18 = vld [vmem:[#allocation2 + $0xac] sm:$0xf]  ;;  %v5448_v21 = vld [vmem:[#allocation2 + $0x20] sm:$0xf] }
  0x84   : > { %v5713_v50 = vor.u32 %v8054_v44, %v5712_v43  ;;  %v5522_v19 = vld [vmem:[#allocation2 + $0xe8] sm:$0xf0]  ;;  %v7989_v22 = vld [vmem:[#allocation2 + $0x5c] sm:$0xf0]  ;;  %v5450_v26 = vld [vmem:[#allocation2 + $0x60] sm:$0xf0] }
  0x85   : > { %1179 = vmatpush.bf16.msrb.mxu0 %v5497_v51  ;;  %1192 = vmatpush.bf16.msrb.mxu1 %v5501_v54  ;;  %v5640_v51 = vld [vmem:[#allocation2 + $0x1a0] sm:$0xf]  ;;  %v5717_v54 = vor.u32 %v8046_v45, %v5714_v46  ;;  %v5456_v27 = vld [vmem:[#allocation2 + $0x28] sm:$0xf]  ;;  %v5525_v28 = vor.u32 %v7998_v18, %v5522_v19  ;;  %v7982_v30 = vld [vmem:[#allocation2 + $0x2c] sm:$0xf] }
  0x86   : > { %1205 = vmatpush.bf16.msrb.mxu2 %v5505_v55  ;;  %v5642_v55 = vld [vmem:[#allocation2 + $0x1e0] sm:$0xf0]  ;;  %v5641_v60 = vor.u32 %v8037_v52, %v5640_v51  ;;  %v5458_v31 = vld [vmem:[#allocation2 + $0x68] sm:$0xf0]  ;;  %v5912_v32 = vld [vmem:[#allocation2 + $0x3b0] sm:$0xf] }
  0x87   : > { %1218 = vmatpush.bf16.msrb.mxu3 %v5509_v59  ;;  %v5650_v59 = vld [vmem:[#allocation2 + $0x1e8] sm:$0xf0]  ;;  %v5645_v61 = vor.u32 %v8029_v53, %v5642_v55  ;;  %v8103_v33 = vld [vmem:[#allocation2 + $0x3ec] sm:$0xf0]  ;;  %v8095_v34 = vld [vmem:[#allocation2 + $0x3b4] sm:$0xf]  ;;  %v5461_v43 = vor.u32 %v7982_v30, %v5458_v31 }
  0x88   : > { %v8104_v38 = vld [vmem:[#allocation2 + $0x3f4] sm:$0xf0]  ;;  %v5922_v42 = vld [vmem:[#allocation2 + $0x3f8] sm:$0xf0]  ;;  %v5913_v44 = vor.u32 %v8103_v33, %v5912_v32  ;;  %v5850_v52 = vld [vmem:[#allocation2 + $0x370] sm:$0xf0] }
  0x89   : > { %1180 = vmatpush.bf16.msrb.mxu0 %v5433_v2  ;;  %1193 = vmatpush.bf16.msrb.mxu1 %v5437_v6  ;;  %v5653_v2 = vor.u32 %v8030_v58, %v5650_v59  ;;  %v8014_v6 = vld [vmem:[#allocation2 + $0x12c] sm:$0xf]  ;;  %v5856_v53 = vld [vmem:[#allocation2 + $0x338] sm:$0xf]  ;;  %v8080_v55 = vld [vmem:[#allocation2 + $0x33c] sm:$0xf] }
  0x8a   : > { %1206 = vmatpush.bf16.msrb.mxu2 %v5441_v7  ;;  %v5586_v7 = vld [vmem:[#allocation2 + $0x168] sm:$0xf0]  ;;  %v5858_v56 = vld [vmem:[#allocation2 + $0x378] sm:$0xf0]  ;;  %v5786_v0 = vld [vmem:[#allocation2 + $0x2f0] sm:$0xf0] }
  0x8b   : > { %1219 = vmatpush.bf16.msrb.mxu3 %v5445_v10  ;;  %v5585_v10 = vor.u32 %v8022_v5, %v5584_v4  ;;  %v5589_v14 = vor.u32 %v8014_v6, %v5586_v7  ;;  %v5861_v63 = vor.u32 %v8080_v55, %v5858_v56  ;;  %v5792_v1 = vld [vmem:[#allocation2 + $0x2b8] sm:$0xf]  ;;  %v8064_v3 = vld [vmem:[#allocation2 + $0x2bc] sm:$0xf]  ;;  %v5592_v32 = vld [vmem:[#allocation2 + $0x130] sm:$0xf] }
  0x8c   : > { %1181 = vmatmul.bf16.vlgmr.msrb.gmra.mxu0 %v9032_v48  ;;  %1194 = vmatmul.bf16.vlgmr.msrb.gmra.mxu1 %v9032_v48  ;;  %v5794_v4 = vld [vmem:[#allocation2 + $0x2f8] sm:$0xf0]  ;;  %v8023_v33 = vld [vmem:[#allocation2 + $0x16c] sm:$0xf0]  ;;  %s9493_s18 = scalar_lea.vmem [#allocation7], %s9475_s13  ;;  %vm5282_vm0 = vcmask 1041408  }
  0x8d   : > { %1225 = vmatpush.bf16.msra.mxu0 %v5897_v11  ;;  %1238 = vmatpush.bf16.msra.mxu1 %v5901_v12  ;;  %v5512_v11 = vld [vmem:[#allocation2 + $0xa0] sm:$0xf]  ;;  %v5464_v55 = vld [vmem:[#allocation2 + $0x30] sm:$0xf]  ;;  %s5412_s7 = sshll.u32 %s8907_s22, 2  ;;  %vm5284_vm1 = vcmask 1045508  }
  0x8e   : > { %1251 = vmatpush.bf16.msra.mxu2 %v5905_v13  ;;  %1220 = vmatmul.bf16.vlgmr.msrb.gmra.mxu3 %v9032_v48  ;;  %v8005_v12 = vld [vmem:[#allocation2 + $0xdc] sm:$0xf0]  ;;  %v7997_v13 = vld [vmem:[#allocation2 + $0xa4] sm:$0xf]  ;;  %v7991_v56 = vld [vmem:[#allocation2 + $0x6c] sm:$0xf0] }
  0x8f   : > { %1264 = vmatpush.bf16.msra.mxu3 %v5909_v17  ;;  %1207 = vmatmul.bf16.vlgmr.msrb.gmra.mxu2 %v9032_v48  ;;  %v8006_v17 = vld [vmem:[#allocation2 + $0xe4] sm:$0xf0]  ;;  %v5513_v20 = vor.u32 %v8005_v12, %v5512_v11  ;;  %v5797_v11 = vor.u32 %v8064_v3, %v5794_v4  ;;  %v5722_v12 = vld [vmem:[#allocation2 + $0x270] sm:$0xf0]  ;;  %v8135_v3 = vld [vmem:[%s9023_s27 + $0xec] sm:$0xf0] }
  0x90   : > { %v6168_v4 = vld [vmem:[%s9023_s27 + $0x1e0] sm:$0xf]  ;;  %p310_p5 = scmp.lt.s32.totalorder %s5412_s7, 15  ;;  %vm5286_vm2 = vcmask 1043456  }
  0x91   : > { %1226 = vmatpush.bf16.msra.mxu0 %v5833_v23  ;;  %1239 = vmatpush.bf16.msra.mxu1 %v5837_v24  ;;  %v5517_v23 = vor.u32 %v7997_v13, %v5514_v15  ;;  %v5521_v24 = vor.u32 %v8006_v17, %v5520_v16  ;;  %v5728_v13 = vld [vmem:[#allocation2 + $0x238] sm:$0xf]  ;;  %v8048_v15 = vld [vmem:[#allocation2 + $0x23c] sm:$0xf] }
  0x92   : > { %1252 = vmatpush.bf16.msra.mxu2 %v5841_v25  ;;  %v7981_v25 = vld [vmem:[#allocation2 + $0x24] sm:$0xf]  ;;  %v5730_v16 = vld [vmem:[#allocation2 + $0x278] sm:$0xf0]  ;;  %s10268_s7 = smov (!%p310_p5, %s5412_s7), 15 }
  0x93   : > { %1265 = vmatpush.bf16.msra.mxu3 %v5845_v29  ;;  %v7990_v29 = vld [vmem:[#allocation2 + $0x64] sm:$0xf0]  ;;  %v5453_v39 = vor.u32 %v7981_v25, %v5450_v26  ;;  %v5664_v25 = vld [vmem:[#allocation2 + $0x1b8] sm:$0xf]  ;;  %s5413_s9 = sshll.u32 %s10268_s7, 1 }
  0x94   : > { %v5457_v40 = vor.u32 %v7990_v29, %v5456_v27  ;;  %v8040_v26 = vld [vmem:[#allocation2 + $0x1f4] sm:$0xf0]  ;;  %v8032_v27 = vld [vmem:[#allocation2 + $0x1bc] sm:$0xf]  ;;  %s313_s17 = scalar_lea.vmem %s10251_s5, %s5413_s9 }
  0x95   : > { %1227 = vmatpush.bf16.msra.mxu0 %v5769_v35  ;;  %1240 = vmatpush.bf16.msra.mxu1 %v5773_v36  ;;  %v5449_v35 = vor.u32 %v7989_v22, %v5448_v21  ;;  %v5914_v36 = vld [vmem:[#allocation2 + $0x3f0] sm:$0xf0]  ;;  %v8039_v21 = vld [vmem:[#allocation2 + $0x1ec] sm:$0xf0]  ;;  %v5665_v31 = vor.u32 %v8040_v26, %v5664_v25  ;;  %v8227_v25 = vld [vmem:[%s9023_s27 + $0x3cc] sm:$0xf0] }
  0x96   : > { %1253 = vmatpush.bf16.msra.mxu2 %v5777_v37  ;;  %v5920_v37 = vld [vmem:[#allocation2 + $0x3b8] sm:$0xf]  ;;  %v5917_v45 = vor.u32 %v8095_v34, %v5914_v36  ;;  %v8031_v22 = vld [vmem:[#allocation2 + $0x1b4] sm:$0xf] }
  0x97   : > { %1266 = vmatpush.bf16.msra.mxu3 %v5781_v41  ;;  %v8096_v41 = vld [vmem:[#allocation2 + $0x3bc] sm:$0xf]  ;;  %v5921_v46 = vor.u32 %v8104_v38, %v5920_v37  ;;  %v8015_v34 = vld [vmem:[#allocation2 + $0x134] sm:$0xf]  ;;  %v5600_v37 = vld [vmem:[#allocation2 + $0x138] sm:$0xf] }
  0x98   : > { %v5925_v51 = vor.u32 %v8096_v41, %v5922_v42  ;;  %v5594_v36 = vld [vmem:[#allocation2 + $0x170] sm:$0xf0]  ;;  %v8024_v38 = vld [vmem:[#allocation2 + $0x174] sm:$0xf0]  ;;  %v5593_v41 = vor.u32 %v8023_v33, %v5592_v32  ;;  %v8159_v33 = vld [vmem:[%s9023_s27 + $0x1ac] sm:$0xf0] }
  0x99   : > { %1228 = vmatpush.bf16.msra.mxu0 %v5705_v47  ;;  %1241 = vmatpush.bf16.msra.mxu1 %v5709_v49  ;;  %v5848_v47 = vld [vmem:[#allocation2 + $0x330] sm:$0xf]  ;;  %v5597_v42 = vor.u32 %v8015_v34, %v5594_v36 }
  0x9a   : > { %1254 = vmatpush.bf16.msra.mxu2 %v5713_v50  ;;  %v8087_v49 = vld [vmem:[#allocation2 + $0x36c] sm:$0xf0]  ;;  %v8079_v50 = vld [vmem:[#allocation2 + $0x334] sm:$0xf] }
  0x9b   : > { %1267 = vmatpush.bf16.msra.mxu3 %v5717_v54  ;;  %v8088_v54 = vld [vmem:[#allocation2 + $0x374] sm:$0xf0]  ;;  %v5849_v57 = vor.u32 %v8087_v49, %v5848_v47  ;;  %v5853_v58 = vor.u32 %v8079_v50, %v5850_v52  ;;  %v5530_v49 = vld [vmem:[#allocation2 + $0xf0] sm:$0xf0]  ;;  %v8000_v52 = vld [vmem:[#allocation2 + $0xbc] sm:$0xf] }
  0x9c   : > { %v5857_v59 = vor.u32 %v8088_v54, %v5856_v53  ;;  %v5536_v50 = vld [vmem:[#allocation2 + $0xb8] sm:$0xf]  ;;  %v5538_v53 = vld [vmem:[#allocation2 + $0xf8] sm:$0xf0]  ;;  %v6264_v34 = vld [vmem:[%s9023_s27 + $0x2a0] sm:$0xf] }
  0x9d   : > { %1229 = vmatpush.bf16.msra.mxu0 %v5641_v60  ;;  %1242 = vmatpush.bf16.msra.mxu1 %v5645_v61  ;;  %v5784_v60 = vld [vmem:[#allocation2 + $0x2b0] sm:$0xf] }
  0x9e   : > { %1255 = vmatpush.bf16.msra.mxu2 %v5649_v62  ;;  %v8071_v61 = vld [vmem:[#allocation2 + $0x2ec] sm:$0xf0]  ;;  %v8063_v62 = vld [vmem:[#allocation2 + $0x2b4] sm:$0xf] }
  0x9f   : > { %1268 = vmatpush.bf16.msra.mxu3 %v5653_v2  ;;  %v8072_v2 = vld [vmem:[#allocation2 + $0x2f4] sm:$0xf0]  ;;  %v5785_v5 = vor.u32 %v8071_v61, %v5784_v60  ;;  %v5789_v6 = vor.u32 %v8063_v62, %v5786_v0  ;;  %v5466_v60 = vld [vmem:[#allocation2 + $0x70] sm:$0xf0]  ;;  %v5541_v62 = vor.u32 %v8000_v52, %v5538_v53  ;;  %v7984_v0 = vld [vmem:[#allocation2 + $0x3c] sm:$0xf] }
  0xa0   : > { %v5793_v7 = vor.u32 %v8072_v2, %v5792_v1  ;;  %v5472_v61 = vld [vmem:[#allocation2 + $0x38] sm:$0xf]  ;;  %v5474_v1 = vld [vmem:[#allocation2 + $0x78] sm:$0xf0]  ;;  %v6040_v2 = vld [vmem:[%s9023_s27 + $0xe0] sm:$0xf] }
  0xa1   : > { %1230 = vmatpush.bf16.msra.mxu0 %v5577_v8  ;;  %1243 = vmatpush.bf16.msra.mxu1 %v5581_v9  ;;  %v5720_v8 = vld [vmem:[#allocation2 + $0x230] sm:$0xf] }
  0xa2   : > { %1256 = vmatpush.bf16.msra.mxu2 %v5585_v10  ;;  %v8055_v9 = vld [vmem:[#allocation2 + $0x26c] sm:$0xf0]  ;;  %v8047_v10 = vld [vmem:[#allocation2 + $0x234] sm:$0xf] }
  0xa3   : > { %1269 = vmatpush.bf16.msra.mxu3 %v5589_v14  ;;  %v8056_v14 = vld [vmem:[#allocation2 + $0x274] sm:$0xf0]  ;;  %v5721_v17 = vor.u32 %v8055_v9, %v5720_v8  ;;  %v5725_v18 = vor.u32 %v8047_v10, %v5722_v12  ;;  %v8199_v8 = vld [vmem:[%s9023_s27 + $0x2ec] sm:$0xf0]  ;;  %v6392_v36 = vld [vmem:[%s9023_s27 + $0x3a0] sm:$0xf] }
  0xa4   : > { %v5729_v19 = vor.u32 %v8056_v14, %v5728_v13  ;;  %v8231_v12 = vld [vmem:[%s9023_s27 + $0x3ec] sm:$0xf0]  ;;  %v5477_v13 = vor.u32 %v7984_v0, %v5474_v1  ;;  %v6041_v14 = vor.u32 %v8135_v3, %v6040_v2  ;;  %v5976_v53 = vld [vmem:[%s9023_s27 + $0x60] sm:$0xf] }
  0xa5   : > { %1231 = vmatpush.bf16.msra.mxu0 %v5513_v20  ;;  %1244 = vmatpush.bf16.msra.mxu1 %v5517_v23  ;;  %v5656_v20 = vld [vmem:[#allocation2 + $0x1b0] sm:$0xf]  ;;  %v5733_v23 = vor.u32 %v8048_v15, %v5730_v16  ;;  %v8115_v2 = vld [vmem:[%s9023_s27 + $0x4c] sm:$0xf0] }
  0xa6   : > { %1257 = vmatpush.bf16.msra.mxu2 %v5521_v24  ;;  %v5658_v24 = vld [vmem:[#allocation2 + $0x1f0] sm:$0xf0]  ;;  %v5657_v29 = vor.u32 %v8039_v21, %v5656_v20  ;;  %v8163_v21 = vld [vmem:[%s9023_s27 + $0x1cc] sm:$0xf0]  ;;  %v5960_v1 = vld [vmem:[%s9023_s27 + $0x40] sm:$0xf] }
  0xa7   : > { %1270 = vmatpush.bf16.msra.mxu3 %v5525_v28  ;;  %v5666_v28 = vld [vmem:[#allocation2 + $0x1f8] sm:$0xf0]  ;;  %v5661_v30 = vor.u32 %v8031_v22, %v5658_v24  ;;  %v6280_v22 = vld [vmem:[%s9023_s27 + $0x2c0] sm:$0xf] }
  0xa8   : > { %v6408_v24 = vld [vmem:[%s9023_s27 + $0x3c0] sm:$0xf] }
  0xa9   : > { %1232 = vmatpush.bf16.msra.mxu0 %v5449_v35  ;;  %1245 = vmatpush.bf16.msra.mxu1 %v5453_v39  ;;  %v5669_v35 = vor.u32 %v8032_v27, %v5666_v28  ;;  %v8016_v39 = vld [vmem:[#allocation2 + $0x13c] sm:$0xf]  ;;  %v6409_v32 = vor.u32 %v8227_v25, %v6408_v24  ;;  %v6088_v3 = vld [vmem:[%s9023_s27 + $0x140] sm:$0xf]  ;;  %v8107_v24 = vld [vmem:[%s9023_s27 + $0xc] sm:$0xf0] }
  0xaa   : > { %1258 = vmatpush.bf16.msra.mxu2 %v5457_v40  ;;  %v5602_v40 = vld [vmem:[#allocation2 + $0x178] sm:$0xf0] }
  0xab   : > { %1271 = vmatpush.bf16.msra.mxu3 %v5461_v43  ;;  %v5601_v43 = vor.u32 %v8024_v38, %v5600_v37  ;;  %v5605_v47 = vor.u32 %v8016_v39, %v5602_v40  ;;  %v8223_v37 = vld [vmem:[%s9023_s27 + $0x3ac] sm:$0xf0] }
  0xac   : > { %1233 = vmatmul.bf16.vlgmr.msra.gmra.mxu0 %v9032_v48  ;;  %1246 = vmatmul.bf16.vlgmr.msra.gmra.mxu1 %v9032_v48 }
  0xad   : > { %1277 = vmatpush.bf16.msrb.mxu0 %v5913_v44  ;;  %1290 = vmatpush.bf16.msrb.mxu1 %v5917_v45  ;;  %v5528_v44 = vld [vmem:[#allocation2 + $0xb0] sm:$0xf] }
  0xae   : > { %1303 = vmatpush.bf16.msrb.mxu2 %v5921_v46  ;;  %1272 = vmatmul.bf16.vlgmr.msra.gmra.mxu3 %v9032_v48  ;;  %v8007_v45 = vld [vmem:[#allocation2 + $0xec] sm:$0xf0]  ;;  %v7999_v46 = vld [vmem:[#allocation2 + $0xb4] sm:$0xf] }
  0xaf   : > { %1316 = vmatpush.bf16.msrb.mxu3 %v5925_v51  ;;  %1259 = vmatmul.bf16.vlgmr.msra.gmra.mxu2 %v9032_v48  ;;  %v8008_v51 = vld [vmem:[#allocation2 + $0xf4] sm:$0xf0]  ;;  %v5529_v54 = vor.u32 %v8007_v45, %v5528_v44  ;;  %v6393_v44 = vor.u32 %v8223_v37, %v6392_v36  ;;  %v8155_v45 = vld [vmem:[%s9023_s27 + $0x18c] sm:$0xf0]  ;;  %v6680_v36 = vld [vmem:[%s9023_s27 + $0x5e0] sm:$0xf] }
  0xb1   : > { %1278 = vmatpush.bf16.msrb.mxu0 %v5849_v57  ;;  %1291 = vmatpush.bf16.msrb.mxu1 %v5853_v58  ;;  %v5533_v57 = vor.u32 %v7999_v46, %v5530_v49  ;;  %v5537_v58 = vor.u32 %v8008_v51, %v5536_v50  ;;  %v6248_v46 = vld [vmem:[%s9023_s27 + $0x280] sm:$0xf]  ;;  %v8219_v49 = vld [vmem:[%s9023_s27 + $0x38c] sm:$0xf0] }
  0xb2   : > { %1304 = vmatpush.bf16.msrb.mxu2 %v5857_v59  ;;  %v7983_v59 = vld [vmem:[#allocation2 + $0x34] sm:$0xf] }
  0xb3   : > { %1317 = vmatpush.bf16.msrb.mxu3 %v5861_v63  ;;  %v7992_v63 = vld [vmem:[#allocation2 + $0x74] sm:$0xf0]  ;;  %v5469_v9 = vor.u32 %v7983_v59, %v5466_v60  ;;  %v8183_v59 = vld [vmem:[%s9023_s27 + $0x26c] sm:$0xf0]  ;;  %v6360_v60 = vld [vmem:[%s9023_s27 + $0x360] sm:$0xf] }
  0xb4   : > { %v5473_v10 = vor.u32 %v7992_v63, %v5472_v61  ;;  %v8215_v61 = vld [vmem:[%s9023_s27 + $0x36c] sm:$0xf0] }
  0xb5   : > { %1279 = vmatpush.bf16.msrb.mxu0 %v5785_v5  ;;  %1292 = vmatpush.bf16.msrb.mxu1 %v5789_v6  ;;  %v5465_v5 = vor.u32 %v7991_v56, %v5464_v55  ;;  %v8167_v6 = vld [vmem:[%s9023_s27 + $0x1ec] sm:$0xf0]  ;;  %v6104_v55 = vld [vmem:[%s9023_s27 + $0x160] sm:$0xf] }
  0xb6   : > { %1305 = vmatpush.bf16.msrb.mxu2 %v5793_v7  ;;  %v6296_v7 = vld [vmem:[%s9023_s27 + $0x2e0] sm:$0xf]  ;;  %v6169_v15 = vor.u32 %v8167_v6, %v6168_v4  ;;  %v6361_v4 = vor.u32 %v8215_v61, %v6360_v60 }
  0xb7   : > { %1318 = vmatpush.bf16.msrb.mxu3 %v5797_v11  ;;  %v6424_v11 = vld [vmem:[%s9023_s27 + $0x3e0] sm:$0xf]  ;;  %v6297_v16 = vor.u32 %v8199_v8, %v6296_v7  ;;  %v8179_v7 = vld [vmem:[%s9023_s27 + $0x24c] sm:$0xf0] }
  0xb8   : > { %v6425_v20 = vor.u32 %v8231_v12, %v6424_v11  ;;  %v6216_v6 = vld [vmem:[%s9023_s27 + $0x240] sm:$0xf] }
  0xb9   : > { %1280 = vmatpush.bf16.msrb.mxu0 %v5721_v17  ;;  %1293 = vmatpush.bf16.msrb.mxu1 %v5725_v18  ;;  %v6024_v17 = vld [vmem:[%s9023_s27 + $0xc0] sm:$0xf]  ;;  %v8131_v18 = vld [vmem:[%s9023_s27 + $0xcc] sm:$0xf0]  ;;  %v6217_v12 = vor.u32 %v8179_v7, %v6216_v6 }
  0xba   : > { %1306 = vmatpush.bf16.msrb.mxu2 %v5729_v19  ;;  %v6152_v19 = vld [vmem:[%s9023_s27 + $0x1c0] sm:$0xf]  ;;  %v6025_v26 = vor.u32 %v8131_v18, %v6024_v17  ;;  %v8143_v17 = vld [vmem:[%s9023_s27 + $0x12c] sm:$0xf0] }
  0xbb   : > { %1319 = vmatpush.bf16.msrb.mxu3 %v5733_v23  ;;  %v8195_v23 = vld [vmem:[%s9023_s27 + $0x2cc] sm:$0xf0]  ;;  %v6153_v27 = vor.u32 %v8163_v21, %v6152_v19  ;;  %v6344_v8 = vld [vmem:[%s9023_s27 + $0x340] sm:$0xf] }
  0xbc   : > { %v6281_v28 = vor.u32 %v8195_v23, %v6280_v22  ;;  %v6200_v18 = vld [vmem:[%s9023_s27 + $0x220] sm:$0xf]  ;;  %v8175_v19 = vld [vmem:[%s9023_s27 + $0x22c] sm:$0xf0] }
  0xbd   : > { %1281 = vmatpush.bf16.msrb.mxu0 %v5657_v29  ;;  %1294 = vmatpush.bf16.msrb.mxu1 %v5661_v30  ;;  %v6008_v29 = vld [vmem:[%s9023_s27 + $0xa0] sm:$0xf]  ;;  %v8127_v30 = vld [vmem:[%s9023_s27 + $0xac] sm:$0xf0] }
  0xbe   : > { %1307 = vmatpush.bf16.msrb.mxu2 %v5665_v31  ;;  %v6136_v31 = vld [vmem:[%s9023_s27 + $0x1a0] sm:$0xf]  ;;  %v6009_v38 = vor.u32 %v8127_v30, %v6008_v29  ;;  %v8207_v21 = vld [vmem:[%s9023_s27 + $0x32c] sm:$0xf0] }
  0xbf   : > { %1320 = vmatpush.bf16.msrb.mxu3 %v5669_v35  ;;  %v8191_v35 = vld [vmem:[%s9023_s27 + $0x2ac] sm:$0xf0]  ;;  %v6137_v39 = vor.u32 %v8159_v33, %v6136_v31  ;;  %v5928_v23 = vld [vmem:[%s9023_s27] sm:$0xf] }
  0xc0   : > { %v6265_v40 = vor.u32 %v8191_v35, %v6264_v34  ;;  %v6184_v29 = vld [vmem:[%s9023_s27 + $0x200] sm:$0xf]  ;;  %v8171_v31 = vld [vmem:[%s9023_s27 + $0x20c] sm:$0xf0]  ;;  %v5929_v37 = vor.u32 %v8107_v24, %v5928_v23 }
  0xc1   : > { %1282 = vmatpush.bf16.msrb.mxu0 %v5593_v41  ;;  %1295 = vmatpush.bf16.msrb.mxu1 %v5597_v42  ;;  %v5992_v41 = vld [vmem:[%s9023_s27 + $0x80] sm:$0xf]  ;;  %v8123_v42 = vld [vmem:[%s9023_s27 + $0x8c] sm:$0xf0] }
  0xc2   : > { %1308 = vmatpush.bf16.msrb.mxu2 %v5601_v43  ;;  %v6120_v43 = vld [vmem:[%s9023_s27 + $0x180] sm:$0xf]  ;;  %v5993_v50 = vor.u32 %v8123_v42, %v5992_v41  ;;  %v8203_v33 = vld [vmem:[%s9023_s27 + $0x30c] sm:$0xf0]  ;;  %v6185_v42 = vor.u32 %v8171_v31, %v6184_v29 }
  0xc3   : > { %1321 = vmatpush.bf16.msrb.mxu3 %v5605_v47  ;;  %v6376_v47 = vld [vmem:[%s9023_s27 + $0x380] sm:$0xf]  ;;  %v6121_v51 = vor.u32 %v8155_v45, %v6120_v43  ;;  %v8263_v35 = vld [vmem:[%s9023_s27 + $0x4ec] sm:$0xf0] }
  0xc4   : > { %v6377_v56 = vor.u32 %v8219_v49, %v6376_v47  ;;  %v6552_v34 = vld [vmem:[%s9023_s27 + $0x4e0] sm:$0xf]  ;;  %v8351_v6 = vld [vmem:[%s9023_s27 + $0x7ac] sm:$0xf0] }
  0xc5   : > { %1283 = vmatpush.bf16.msrb.mxu0 %v5529_v54  ;;  %1296 = vmatpush.bf16.msrb.mxu1 %v5533_v57  ;;  %v8119_v54 = vld [vmem:[%s9023_s27 + $0x6c] sm:$0xf0]  ;;  %v6936_v43 = vld [vmem:[%s9023_s27 + $0x7e0] sm:$0xf] }
  0xc6   : > { %1309 = vmatpush.bf16.msrb.mxu2 %v5537_v58  ;;  %v8151_v57 = vld [vmem:[%s9023_s27 + $0x16c] sm:$0xf0]  ;;  %v6232_v58 = vld [vmem:[%s9023_s27 + $0x260] sm:$0xf] }
  0xc7   : > { %1322 = vmatpush.bf16.msrb.mxu3 %v5541_v62  ;;  %v5977_v62 = vor.u32 %v8119_v54, %v5976_v53  ;;  %v6105_v63 = vor.u32 %v8151_v57, %v6104_v55  ;;  %v6233_v0 = vor.u32 %v8183_v59, %v6232_v58  ;;  %v6536_v49 = vld [vmem:[%s9023_s27 + $0x4c0] sm:$0xf]  ;;  %v8291_v53 = vld [vmem:[%s9023_s27 + $0x5cc] sm:$0xf0] }
  0xc8   : > { %v6792_v54 = vld [vmem:[%s9023_s27 + $0x6c0] sm:$0xf]  ;;  %v8323_v55 = vld [vmem:[%s9023_s27 + $0x6cc] sm:$0xf0] }
  0xc9   : > { %1284 = vmatpush.bf16.msrb.mxu0 %v5465_v5  ;;  %1297 = vmatpush.bf16.msrb.mxu1 %v5469_v9  ;;  %v8147_v5 = vld [vmem:[%s9023_s27 + $0x14c] sm:$0xf0]  ;;  %v6520_v59 = vld [vmem:[%s9023_s27 + $0x4a0] sm:$0xf]  ;;  %v6793_v61 = vor.u32 %v8323_v55, %v6792_v54 }
  0xca   : > { %1310 = vmatpush.bf16.msrb.mxu2 %v5473_v10  ;;  %v8211_v9 = vld [vmem:[%s9023_s27 + $0x34c] sm:$0xf0]  ;;  %v5961_v10 = vor.u32 %v8115_v2, %v5960_v1  ;;  %v6089_v11 = vor.u32 %v8147_v5, %v6088_v3  ;;  %v6776_v2 = vld [vmem:[%s9023_s27 + $0x6a0] sm:$0xf] }
  0xcb   : > { %1323 = vmatpush.bf16.msrb.mxu3 %v5477_v13  ;;  %v5944_v13 = vld [vmem:[%s9023_s27 + $0x20] sm:$0xf]  ;;  %v8355_v57 = vld [vmem:[%s9023_s27 + $0x7cc] sm:$0xf0] }
  0xcc   : > { %1285 = vmatmul.bf16.vlgmr.msrb.gmra.mxu0 %v9032_v48  ;;  %1298 = vmatmul.bf16.vlgmr.msrb.gmra.mxu1 %v9032_v48  ;;  %v8319_v3 = vld [vmem:[%s9023_s27 + $0x6ac] sm:$0xf0]  ;;  %v6904_v5 = vld [vmem:[%s9023_s27 + $0x7a0] sm:$0xf] }
  0xcd   : > { %4443 = vmatpush.bf16.msra.mxu0 %v6041_v14  ;;  %4456 = vmatpush.bf16.msra.mxu1 %v6169_v15  ;;  %v8111_v14 = vld [vmem:[%s9023_s27 + $0x2c] sm:$0xf0]  ;;  %v6072_v15 = vld [vmem:[%s9023_s27 + $0x120] sm:$0xf] }
  0xce   : > { %4469 = vmatpush.bf16.msra.mxu2 %v6297_v16  ;;  %1324 = vmatmul.bf16.vlgmr.msrb.gmra.mxu3 %v9032_v48  ;;  %v6345_v16 = vor.u32 %v8211_v9, %v6344_v8  ;;  %v5945_v22 = vor.u32 %v8111_v14, %v5944_v13  ;;  %v6073_v25 = vor.u32 %v8143_v17, %v6072_v15  ;;  %v6504_v8 = vld [vmem:[%s9023_s27 + $0x480] sm:$0xf]  ;;  %v8251_v9 = vld [vmem:[%s9023_s27 + $0x48c] sm:$0xf0] }
  0xcf   : > { %4482 = vmatpush.bf16.msra.mxu3 %v6425_v20  ;;  %1311 = vmatmul.bf16.vlgmr.msrb.gmra.mxu2 %v9032_v48  ;;  %v8187_v48 = vld [vmem:[%s9023_s27 + $0x28c] sm:$0xf0]  ;;  %v6328_v20 = vld [vmem:[%s9023_s27 + $0x320] sm:$0xf]  ;;  %v6905_v15 = vor.u32 %v8351_v6, %v6904_v5 }
  0xd0   : > { %v6249_v52 = vor.u32 %v8187_v48, %v6248_v46  ;;  %v6329_v30 = vor.u32 %v8207_v21, %v6328_v20  ;;  %v6553_v46 = vor.u32 %v8263_v35, %v6552_v34  ;;  %v8283_v13 = vld [vmem:[%s9023_s27 + $0x58c] sm:$0xf0]  ;;  %v6505_v21 = vor.u32 %v8251_v9, %v6504_v8  ;;  %v6488_v23 = vld [vmem:[%s9023_s27 + $0x460] sm:$0xf] }
  0xd1   : > { %4444 = vmatpush.bf16.msra.mxu0 %v6025_v26  ;;  %4457 = vmatpush.bf16.msra.mxu1 %v6153_v27  ;;  %v6201_v26 = vor.u32 %v8175_v19, %v6200_v18  ;;  %v6056_v27 = vld [vmem:[%s9023_s27 + $0x100] sm:$0xf]  ;;  %v8315_v17 = vld [vmem:[%s9023_s27 + $0x68c] sm:$0xf0] }
  0xd2   : > { %4470 = vmatpush.bf16.msra.mxu2 %v6281_v28  ;;  %v8139_v28 = vld [vmem:[%s9023_s27 + $0x10c] sm:$0xf0]  ;;  %v6888_v19 = vld [vmem:[%s9023_s27 + $0x780] sm:$0xf] }
  0xd3   : > { %4483 = vmatpush.bf16.msra.mxu3 %v6409_v32  ;;  %v6312_v32 = vld [vmem:[%s9023_s27 + $0x300] sm:$0xf]  ;;  %v6057_v41 = vor.u32 %v8139_v28, %v6056_v27  ;;  %v8347_v20 = vld [vmem:[%s9023_s27 + $0x78c] sm:$0xf0] }
  0xd4   : > { %v6313_v45 = vor.u32 %v8203_v33, %v6312_v32  ;;  %v8247_v27 = vld [vmem:[%s9023_s27 + $0x46c] sm:$0xf0]  ;;  %v6616_v28 = vld [vmem:[%s9023_s27 + $0x560] sm:$0xf]  ;;  %v6889_v31 = vor.u32 %v8347_v20, %v6888_v19 }
  0xd5   : > { %4445 = vmatpush.bf16.msra.mxu0 %v6009_v38  ;;  %4458 = vmatpush.bf16.msra.mxu1 %v6137_v39  ;;  %v8295_v38 = vld [vmem:[%s9023_s27 + $0x5ec] sm:$0xf0]  ;;  %v6808_v39 = vld [vmem:[%s9023_s27 + $0x6e0] sm:$0xf] }
  0xd6   : > { %4471 = vmatpush.bf16.msra.mxu2 %v6265_v40  ;;  %v8327_v40 = vld [vmem:[%s9023_s27 + $0x6ec] sm:$0xf0]  ;;  %v6681_v48 = vor.u32 %v8295_v38, %v6680_v36  ;;  %v6744_v32 = vld [vmem:[%s9023_s27 + $0x660] sm:$0xf] }
  0xd7   : > { %4484 = vmatpush.bf16.msra.mxu3 %v6393_v44  ;;  %v8359_v44 = vld [vmem:[%s9023_s27 + $0x7ec] sm:$0xf0]  ;;  %v6809_v47 = vor.u32 %v8327_v40, %v6808_v39  ;;  %v6489_v40 = vor.u32 %v8247_v27, %v6488_v23  ;;  %v6728_v54 = vld [vmem:[%s9023_s27 + $0x640] sm:$0xf] }
  0xd8   : > { %v8279_v29 = vld [vmem:[%s9023_s27 + $0x56c] sm:$0xf0]  ;;  %v6712_v9 = vld [vmem:[%s9023_s27 + $0x620] sm:$0xf] }
  0xd9   : > { %4446 = vmatpush.bf16.msra.mxu0 %v5993_v50  ;;  %4459 = vmatpush.bf16.msra.mxu1 %v6121_v51  ;;  %v8259_v50 = vld [vmem:[%s9023_s27 + $0x4cc] sm:$0xf0]  ;;  %v6664_v51 = vld [vmem:[%s9023_s27 + $0x5c0] sm:$0xf] }
  0xda   : > { %4472 = vmatpush.bf16.msra.mxu2 %v6249_v52  ;;  %v6937_v52 = vor.u32 %v8359_v44, %v6936_v43  ;;  %v6537_v58 = vor.u32 %v8259_v50, %v6536_v49  ;;  %v6665_v60 = vor.u32 %v8291_v53, %v6664_v51  ;;  %v8311_v33 = vld [vmem:[%s9023_s27 + $0x66c] sm:$0xf0]  ;;  %v6617_v43 = vor.u32 %v8279_v29, %v6616_v28  ;;  %v6568_v20 = vld [vmem:[%s9023_s27 + $0x500] sm:$0xf] }
  0xdb   : > { %4485 = vmatpush.bf16.msra.mxu3 %v6377_v56  ;;  %v6920_v56 = vld [vmem:[%s9023_s27 + $0x7c0] sm:$0xf]  ;;  %v8343_v38 = vld [vmem:[%s9023_s27 + $0x76c] sm:$0xf0]  ;;  %v6745_v44 = vor.u32 %v8311_v33, %v6744_v32 }
  0xdc   : > { %v6921_v1 = vor.u32 %v8355_v57, %v6920_v56  ;;  %v8275_v53 = vld [vmem:[%s9023_s27 + $0x54c] sm:$0xf0]  ;;  %v6856_v57 = vld [vmem:[%s9023_s27 + $0x740] sm:$0xf] }
  0xdd   : > { %4447 = vmatpush.bf16.msra.mxu0 %v5977_v62  ;;  %4460 = vmatpush.bf16.msra.mxu1 %v6105_v63  ;;  %v8255_v62 = vld [vmem:[%s9023_s27 + $0x4ac] sm:$0xf0]  ;;  %v6648_v63 = vld [vmem:[%s9023_s27 + $0x5a0] sm:$0xf] }
  0xde   : > { %4473 = vmatpush.bf16.msra.mxu2 %v6233_v0  ;;  %v8287_v0 = vld [vmem:[%s9023_s27 + $0x5ac] sm:$0xf0]  ;;  %v6521_v7 = vor.u32 %v8255_v62, %v6520_v59  ;;  %v6456_v62 = vld [vmem:[%s9023_s27 + $0x420] sm:$0xf] }
  0xdf   : > { %4486 = vmatpush.bf16.msra.mxu3 %v6361_v4  ;;  %v9136_v4 = vld [vmem:[#allocation4] sm:$0xff]  ;;  %v7064_v28 = vld [vmem:[%s9023_s27 + $0x8e0] sm:$0xf] }
  0xe0   : > { %v449_v14 = vperm.slane %v9136_v4, 0  ;;  %v450_v18 = vperm.slane %v9136_v4, 1  ;;  %v451_v34 = vperm.slane %v9136_v4, 2  ;;  %v452_v39 = vperm.slane %v9136_v4, 3  ;;  %v8307_v55 = vld [vmem:[%s9023_s27 + $0x64c] sm:$0xf0] }
  0xe1   : > { %4448 = vmatpush.bf16.msra.mxu0 %v5961_v10  ;;  %4461 = vmatpush.bf16.msra.mxu1 %v6089_v11  ;;  %v6649_v10 = vor.u32 %v8287_v0, %v6648_v63  ;;  %v6777_v11 = vor.u32 %v8319_v3, %v6776_v2  ;;  %v8239_v2 = vld [vmem:[%s9023_s27 + $0x42c] sm:$0xf0]  ;;  %v6584_v3 = vld [vmem:[%s9023_s27 + $0x520] sm:$0xf] }
  0xe2   : > { %4474 = vmatpush.bf16.msra.mxu2 %v6217_v12  ;;  %v6632_v12 = vld [vmem:[%s9023_s27 + $0x580] sm:$0xf]  ;;  %v8271_v8 = vld [vmem:[%s9023_s27 + $0x52c] sm:$0xf0] }
  0xe3   : > { %4487 = vmatpush.bf16.msra.mxu3 %v6345_v16  ;;  %v6760_v16 = vld [vmem:[%s9023_s27 + $0x680] sm:$0xf]  ;;  %v6633_v24 = vor.u32 %v8283_v13, %v6632_v12  ;;  %v8335_v13 = vld [vmem:[%s9023_s27 + $0x72c] sm:$0xf0] }
  0xe4   : > { %v6840_v12 = vld [vmem:[%s9023_s27 + $0x720] sm:$0xf]  ;;  %v8331_v27 = vld [vmem:[%s9023_s27 + $0x70c] sm:$0xf0] }
  0xe5   : > { %4449 = vmatpush.bf16.msra.mxu0 %v5945_v22  ;;  %4462 = vmatpush.bf16.msra.mxu1 %v6073_v25  ;;  %v6761_v25 = vor.u32 %v8315_v17, %v6760_v16  ;;  %v8235_v16 = vld [vmem:[%s9023_s27 + $0x40c] sm:$0xf0]  ;;  %v6585_v17 = vor.u32 %v8271_v8, %v6584_v3  ;;  %v6841_v23 = vor.u32 %v8335_v13, %v6840_v12  ;;  %v7320_v33 = vld [vmem:[%s9023_s27 + $0xae0] sm:$0xf]  ;;  %v453_v3 = vperm.slane %v9136_v4, 4 }
  0xe6   : > { %4475 = vmatpush.bf16.msra.mxu2 %v6201_v26  ;;  %v8391_v29 = vld [vmem:[%s9023_s27 + $0x8ec] sm:$0xf0] }
  0xe7   : > { %4488 = vmatpush.bf16.msra.mxu3 %v6329_v30  ;;  %v8423_v32 = vld [vmem:[%s9023_s27 + $0x9ec] sm:$0xf0] }
  0xe8   : > { %v8411_v12 = vld [vmem:[%s9023_s27 + $0x98c] sm:$0xf0] }
  0xe9   : > { %4450 = vmatpush.bf16.msra.mxu0 %v5929_v37  ;;  %4463 = vmatpush.bf16.msra.mxu1 %v6057_v41  ;;  %v1130_v22 = vpop.f32.mrf.mxu0  ;;  %v1143_v30 = vpop.f32.mrf.mxu1  ;;  %v6872_v37 = vld [vmem:[%s9023_s27 + $0x760] sm:$0xf] }
  0xea   : > { %4476 = vmatpush.bf16.msra.mxu2 %v6185_v42  ;;  %v1131_v26 = vadd.f32 %v1130_v22, %v449_v14  ;;  %v1144_v35 = vadd.f32 %v1143_v30, %v450_v18  ;;  %v6873_v49 = vor.u32 %v8343_v38, %v6872_v37  ;;  %v6457_v14 = vor.u32 %v8239_v2, %v6456_v62  ;;  %v6696_v22 = vld [vmem:[%s9023_s27 + $0x600] sm:$0xf]  ;;  %v8487_v38 = vld [vmem:[%s9023_s27 + $0xbec] sm:$0xf0] }
  0xeb   : > { %4489 = vmatpush.bf16.msra.mxu3 %v6313_v45  ;;  %v7192_v30 = vld [vmem:[%s9023_s27 + $0x9e0] sm:$0xf] }
  0xec   : > { %v1329_v36 = vmax.f32 %v1131_v26, 0.0  ;;  %v1330_v41 = vmax.f32 %v1144_v35, 0.0  ;;  %v6824_v26 = vld [vmem:[%s9023_s27 + $0x700] sm:$0xf] }
  0xed   : > { %4495 = vmatpush.bf16.msrb.mxu0 %v6553_v46  ;;  %4508 = vmatpush.bf16.msrb.mxu1 %v6681_v48  ;;  %v6472_v46 = vld [vmem:[%s9023_s27 + $0x440] sm:$0xf]  ;;  %v8243_v48 = vld [vmem:[%s9023_s27 + $0x44c] sm:$0xf0] }
  0xee   : > { %4521 = vmatpush.bf16.msrb.mxu2 %v6809_v47  ;;  %v9160_v42 = vpack.c.bf16 %v1329_v36, %v1329_v36  ;;  %v6600_v47 = vld [vmem:[%s9023_s27 + $0x540] sm:$0xf] }
  0xef   : > { %4534 = vmatpush.bf16.msrb.mxu3 %v6937_v52  ;;  %v9165_v52 = vpack.c.bf16 %v1330_v41, %v1330_v41  ;;  %v6601_v0 = vor.u32 %v8275_v53, %v6600_v47  ;;  %v7448_v37 = vld [vmem:[%s9023_s27 + $0xbe0] sm:$0xf]  ;;  %v7193_v41 = vor.u32 %v8423_v32, %v7192_v30  ;;  %v8419_v47 = vld [vmem:[%s9023_s27 + $0x9cc] sm:$0xf0] }
  0xf0   : > { %4451 = vmatmul.bf16.vlgmr.msra.gmra.mxu0 %v9160_v42  ;;  %v8483_v53 = vld [vmem:[%s9023_s27 + $0xbcc] sm:$0xf0]  ;;  %v7288_v62 = vld [vmem:[%s9023_s27 + $0xaa0] sm:$0xf] }
  0xf1   : > { %4496 = vmatpush.bf16.msrb.mxu0 %v6537_v58  ;;  %4509 = vmatpush.bf16.msrb.mxu1 %v6665_v60  ;;  %v1169_v51 = vpop.f32.mrf.mxu3  ;;  %v8339_v58 = vld [vmem:[%s9023_s27 + $0x74c] sm:$0xf0]  ;;  %v6473_v60 = vor.u32 %v8243_v48, %v6472_v46  ;;  %v1145_v5 = vpop.f32.mrf.mxu1  ;;  %v7176_v46 = vld [vmem:[%s9023_s27 + $0x9c0] sm:$0xf]  ;;  %v7449_v48 = vor.u32 %v8487_v38, %v7448_v37  ;;  %v456_v37 = vperm.slane %v9136_v4, 7 }
  0xf2   : > { %4522 = vmatpush.bf16.msrb.mxu2 %v6793_v61  ;;  %v1156_v45 = vpop.f32.mrf.mxu2  ;;  %v1170_v56 = vadd.f32 %v1169_v51, %v452_v39  ;;  %v1132_v61 = vpop.f32.mrf.mxu0  ;;  %4464 = vmatmul.bf16.vlgmr.msra.gmra.mxu1 %v9165_v52  ;;  %v6825_v39 = vor.u32 %v8331_v27, %v6824_v26  ;;  %v7432_v51 = vld [vmem:[%s9023_s27 + $0xbc0] sm:$0xf]  ;;  %v8375_v26 = vld [vmem:[%s9023_s27 + $0x86c] sm:$0xf0] }
  0xf3   : > { %4535 = vmatpush.bf16.msrb.mxu3 %v6921_v1  ;;  %v1157_v50 = vadd.f32 %v1156_v45, %v451_v34  ;;  %v6729_v1 = vor.u32 %v8307_v55, %v6728_v54  ;;  %v8455_v34 = vld [vmem:[%s9023_s27 + $0xaec] sm:$0xf0]  ;;  %v7177_v55 = vor.u32 %v8419_v47, %v7176_v46  ;;  %v7016_v5 = vld [vmem:[%s9023_s27 + $0x880] sm:$0xf] }
  0xf4   : > { %v1332_v63 = vmax.f32 %v1170_v56, 0.0  ;;  %v8387_v45 = vld [vmem:[%s9023_s27 + $0x8cc] sm:$0xf0]  ;;  %v7128_v27 = vld [vmem:[%s9023_s27 + $0x960] sm:$0xf] }
  0xf5   : > { %4497 = vmatpush.bf16.msrb.mxu0 %v6521_v7  ;;  %4510 = vmatpush.bf16.msrb.mxu1 %v6649_v10  ;;  %v1331_v59 = vmax.f32 %v1157_v50, 0.0  ;;  %v6857_v7 = vor.u32 %v8339_v58, %v6856_v57  ;;  %v8303_v10 = vld [vmem:[%s9023_s27 + $0x62c] sm:$0xf0]  ;;  %v7032_v57 = vld [vmem:[%s9023_s27 + $0x8a0] sm:$0xf] }
  0xf6   : > { %4523 = vmatpush.bf16.msrb.mxu2 %v6777_v11  ;;  %v9182_v11 = vpack.c.bf16 %v1332_v63, %v1332_v63  ;;  %v6713_v18 = vor.u32 %v8303_v10, %v6712_v9  ;;  %v8451_v50 = vld [vmem:[%s9023_s27 + $0xacc] sm:$0xf0]  ;;  %v7144_v10 = vld [vmem:[%s9023_s27 + $0x980] sm:$0xf] }
  0xf7   : > { %4536 = vmatpush.bf16.msrb.mxu3 %v6905_v15  ;;  %v9177_v6 = vpack.c.bf16 %v1331_v59, %v1331_v59  ;;  %v6440_v15 = vld [vmem:[%s9023_s27 + $0x400] sm:$0xf]  ;;  %v8383_v58 = vld [vmem:[%s9023_s27 + $0x8ac] sm:$0xf0] }
  0xf8   : > { %4490 = vmatmul.bf16.vlgmr.msra.gmra.mxu3 %v9182_v11  ;;  %v7160_v59 = vld [vmem:[%s9023_s27 + $0x9a0] sm:$0xf]  ;;  %v8415_v61 = vld [vmem:[%s9023_s27 + $0x9ac] sm:$0xf0]  ;;  %v7033_v2 = vor.u32 %v8383_v58, %v7032_v57 }
  0xf9   : > { %4498 = vmatpush.bf16.msrb.mxu0 %v6505_v21  ;;  %4511 = vmatpush.bf16.msrb.mxu1 %v6633_v24  ;;  %v8267_v21 = vld [vmem:[%s9023_s27 + $0x50c] sm:$0xf0]  ;;  %v1171_v24 = vpop.f32.mrf.mxu3  ;;  %v7256_v32 = vld [vmem:[%s9023_s27 + $0xa60] sm:$0xf] }
  0xfa   : > { %4524 = vmatpush.bf16.msrb.mxu2 %v6761_v25  ;;  %v1158_v19 = vpop.f32.mrf.mxu2  ;;  %v8299_v25 = vld [vmem:[%s9023_s27 + $0x60c] sm:$0xf0]  ;;  %v6569_v35 = vor.u32 %v8267_v21, %v6568_v20  ;;  %v7112_v46 = vld [vmem:[%s9023_s27 + $0x940] sm:$0xf] }
  0xfb   : > { %4537 = vmatpush.bf16.msrb.mxu3 %v6889_v31  ;;  %4477 = vmatmul.bf16.vlgmr.msra.gmra.mxu2 %v9177_v6  ;;  %v6441_v31 = vor.u32 %v8235_v16, %v6440_v15  ;;  %v6697_v36 = vor.u32 %v8299_v25, %v6696_v22  ;;  %v8447_v63 = vld [vmem:[%s9023_s27 + $0xaac] sm:$0xf0]  ;;  %v454_v16 = vperm.slane %v9136_v4, 5  ;;  %v7000_v22 = vld [vmem:[%s9023_s27 + $0x860] sm:$0xf] }
  0xfc   : > { %v7289_v8 = vor.u32 %v8447_v63, %v7288_v62  ;;  %v8379_v9 = vld [vmem:[%s9023_s27 + $0x88c] sm:$0xf0] }
  0xfd   : > { %4499 = vmatpush.bf16.msrb.mxu0 %v6489_v40  ;;  %4512 = vmatpush.bf16.msrb.mxu1 %v6617_v43  ;;  %v7065_v40 = vor.u32 %v8391_v29, %v7064_v28  ;;  %v7321_v43 = vor.u32 %v8455_v34, %v7320_v33  ;;  %v8443_v15 = vld [vmem:[%s9023_s27 + $0xa8c] sm:$0xf0]  ;;  %v7017_v21 = vor.u32 %v8379_v9, %v7016_v5  ;;  %v7384_v34 = vld [vmem:[%s9023_s27 + $0xb60] sm:$0xf] }
  0xfe   : > { %4525 = vmatpush.bf16.msrb.mxu2 %v6745_v44  ;;  %v7048_v44 = vld [vmem:[%s9023_s27 + $0x8c0] sm:$0xf]  ;;  %v8475_v19 = vld [vmem:[%s9023_s27 + $0xb8c] sm:$0xf0] }
  0xff   : > { %4538 = vmatpush.bf16.msrb.mxu3 %v6873_v49  ;;  %v7304_v49 = vld [vmem:[%s9023_s27 + $0xac0] sm:$0xf]  ;;  %v7049_v54 = vor.u32 %v8387_v45, %v7048_v44  ;;  %v8407_v28 = vld [vmem:[%s9023_s27 + $0x96c] sm:$0xf0] }
 0x100   : > { %v7305_v56 = vor.u32 %v8451_v50, %v7304_v49  ;;  %v8439_v33 = vld [vmem:[%s9023_s27 + $0xa6c] sm:$0xf0]  ;;  %v6984_v44 = vld [vmem:[%s9023_s27 + $0x840] sm:$0xf] }
 0x101   : > { %4500 = vmatpush.bf16.msrb.mxu0 %v6473_v60  ;;  %4513 = vmatpush.bf16.msrb.mxu1 %v6601_v0  ;;  %v7433_v60 = vor.u32 %v8483_v53, %v7432_v51  ;;  %v7416_v0 = vld [vmem:[%s9023_s27 + $0xba0] sm:$0xf]  ;;  %v8371_v45 = vld [vmem:[%s9023_s27 + $0x84c] sm:$0xf0] }
 0x102   : > { %4526 = vmatpush.bf16.msrb.mxu2 %v6729_v1  ;;  %v8479_v1 = vld [vmem:[%s9023_s27 + $0xbac] sm:$0xf0]  ;;  %v7240_v51 = vld [vmem:[%s9023_s27 + $0xa40] sm:$0xf] }
 0x103   : > { %4539 = vmatpush.bf16.msrb.mxu3 %v6857_v7  ;;  %v7161_v7 = vor.u32 %v8415_v61, %v7160_v59  ;;  %v7417_v13 = vor.u32 %v8479_v1, %v7416_v0  ;;  %v8403_v50 = vld [vmem:[%s9023_s27 + $0x94c] sm:$0xf0]  ;;  %v6985_v59 = vor.u32 %v8371_v45, %v6984_v44 }
 0x104   : > { %v8435_v53 = vld [vmem:[%s9023_s27 + $0xa4c] sm:$0xf0]  ;;  %v7113_v63 = vor.u32 %v8403_v50, %v7112_v46  ;;  %v7560_v46 = vld [vmem:[%s9023_s27 + $0xcc0] sm:$0xf] }
 0x105   : > { %4501 = vmatpush.bf16.msrb.mxu0 %v6457_v14  ;;  %4514 = vmatpush.bf16.msrb.mxu1 %v6585_v17  ;;  %v7272_v14 = vld [vmem:[%s9023_s27 + $0xa80] sm:$0xf]  ;;  %v8467_v57 = vld [vmem:[%s9023_s27 + $0xb4c] sm:$0xf0]  ;;  %v7241_v0 = vor.u32 %v8435_v53, %v7240_v51 }
 0x106   : > { %4527 = vmatpush.bf16.msrb.mxu2 %v6713_v18  ;;  %v7400_v18 = vld [vmem:[%s9023_s27 + $0xb80] sm:$0xf]  ;;  %v7273_v24 = vor.u32 %v8443_v15, %v7272_v14  ;;  %v8367_v1 = vld [vmem:[%s9023_s27 + $0x82c] sm:$0xf0] }
 0x107   : > { %4540 = vmatpush.bf16.msrb.mxu3 %v6841_v23  ;;  %v7145_v23 = vor.u32 %v8411_v12, %v7144_v10  ;;  %v7401_v30 = vor.u32 %v8475_v19, %v7400_v18  ;;  %v8431_v9 = vld [vmem:[%s9023_s27 + $0xa2c] sm:$0xf0]  ;;  %v7816_v51 = vld [vmem:[%s9023_s27 + $0xec0] sm:$0xf] }
 0x108   : > { %v8463_v14 = vld [vmem:[%s9023_s27 + $0xb2c] sm:$0xf0] }
 0x109   : > { %4502 = vmatpush.bf16.msrb.mxu0 %v6441_v31  ;;  %4515 = vmatpush.bf16.msrb.mxu1 %v6569_v35  ;;  %v1182_v17 = vpop.f32.mrf.mxu0  ;;  %v1195_v25 = vpop.f32.mrf.mxu1  ;;  %v8471_v35 = vld [vmem:[%s9023_s27 + $0xb6c] sm:$0xf0] }
 0x10a   : > { %4528 = vmatpush.bf16.msrb.mxu2 %v6697_v36  ;;  %v1183_v20 = vadd.f32 %v1182_v17, %v453_v3  ;;  %v1196_v31 = vadd.f32 %v1195_v25, %v454_v16  ;;  %v455_v36 = vperm.slane %v9136_v4, 6  ;;  %v7385_v4 = vor.u32 %v8471_v35, %v7384_v34  ;;  %v6952_v16 = vld [vmem:[%s9023_s27 + $0x800] sm:$0xf]  ;;  %v8363_v17 = vld [vmem:[%s9023_s27 + $0x80c] sm:$0xf0] }
 0x10b   : > { %4541 = vmatpush.bf16.msrb.mxu3 %v6825_v39  ;;  %v7832_v34 = vld [vmem:[%s9023_s27 + $0xee0] sm:$0xf]  ;;  %v8583_v35 = vld [vmem:[%s9023_s27 + $0xeec] sm:$0xf0] }
 0x10c   : > { %v1333_v29 = vmax.f32 %v1183_v20, 0.0  ;;  %v1334_v39 = vmax.f32 %v1196_v31, 0.0  ;;  %v7080_v20 = vld [vmem:[%s9023_s27 + $0x900] sm:$0xf]  ;;  %v7833_v45 = vor.u32 %v8583_v35, %v7832_v34  ;;  %v8547_v50 = vld [vmem:[%s9023_s27 + $0xdcc] sm:$0xf0] }
 0x10d   : > { %4547 = vmatpush.bf16.msra.mxu0 %v7065_v40  ;;  %4560 = vmatpush.bf16.msra.mxu1 %v7193_v41  ;;  %v7001_v40 = vor.u32 %v8375_v26, %v7000_v22  ;;  %v7129_v41 = vor.u32 %v8407_v28, %v7128_v27  ;;  %v7208_v22 = vld [vmem:[%s9023_s27 + $0xa00] sm:$0xf]  ;;  %v8427_v26 = vld [vmem:[%s9023_s27 + $0xa0c] sm:$0xf0] }
 0x10e   : > { %4573 = vmatpush.bf16.msra.mxu2 %v7321_v43  ;;  %v9240_v38 = vpack.c.bf16 %v1333_v29, %v1333_v29  ;;  %v7257_v43 = vor.u32 %v8439_v33, %v7256_v32  ;;  %v7336_v27 = vld [vmem:[%s9023_s27 + $0xb00] sm:$0xf]  ;;  %v8459_v28 = vld [vmem:[%s9023_s27 + $0xb0c] sm:$0xf0]  ;;  %v6953_v32 = vor.u32 %v8363_v17, %v6952_v16 }
 0x10f   : > { %4586 = vmatpush.bf16.msra.mxu3 %v7449_v48  ;;  %v9245_v48 = vpack.c.bf16 %v1334_v39, %v1334_v39  ;;  %v7576_v29 = vld [vmem:[%s9023_s27 + $0xce0] sm:$0xf]  ;;  %v8551_v33 = vld [vmem:[%s9023_s27 + $0xdec] sm:$0xf0] }
 0x110   : > { %4503 = vmatmul.bf16.vlgmr.msrb.gmra.mxu0 %v9240_v38  ;;  %v7704_v31 = vld [vmem:[%s9023_s27 + $0xde0] sm:$0xf]  ;;  %v8579_v53 = vld [vmem:[%s9023_s27 + $0xecc] sm:$0xf0] }
 0x111   : > { %4548 = vmatpush.bf16.msra.mxu0 %v7049_v54  ;;  %4561 = vmatpush.bf16.msra.mxu1 %v7177_v55  ;;  %v1221_v49 = vpop.f32.mrf.mxu3  ;;  %v1184_v58 = vpop.f32.mrf.mxu0  ;;  %v7960_v39 = vld [vmem:[%s9023_s27 + $0xfe0] sm:$0xf]  ;;  %v7705_v44 = vor.u32 %v8551_v33, %v7704_v31  ;;  %v8539_v17 = vld [vmem:[%s9023_s27 + $0xd8c] sm:$0xf0] }
 0x112   : > { %4574 = vmatpush.bf16.msra.mxu2 %v7305_v56  ;;  %v1208_v47 = vpop.f32.mrf.mxu2  ;;  %v1222_v55 = vadd.f32 %v1221_v49, %v456_v37  ;;  %v7368_v56 = vld [vmem:[%s9023_s27 + $0xb40] sm:$0xf]  ;;  %4516 = vmatmul.bf16.vlgmr.msrb.gmra.mxu1 %v9245_v48  ;;  %v1197_v3 = vpop.f32.mrf.mxu1  ;;  %v7209_v37 = vor.u32 %v8427_v26, %v7208_v22  ;;  %v8503_v31 = vld [vmem:[%s9023_s27 + $0xc6c] sm:$0xf0] }
 0x113   : > { %4587 = vmatpush.bf16.msra.mxu3 %v7433_v60  ;;  %v1209_v54 = vadd.f32 %v1208_v47, %v455_v36  ;;  %v6968_v60 = vld [vmem:[%s9023_s27 + $0x820] sm:$0xf]  ;;  %v7369_v5 = vor.u32 %v8467_v57, %v7368_v56  ;;  %v8535_v33 = vld [vmem:[%s9023_s27 + $0xd6c] sm:$0xf0] }
 0x114   : > { %v1336_v62 = vmax.f32 %v1222_v55, 0.0  ;;  %v6969_v15 = vor.u32 %v8367_v1, %v6968_v60  ;;  %v7688_v47 = vld [vmem:[%s9023_s27 + $0xdc0] sm:$0xf]  ;;  %v8611_v55 = vld [vmem:[%s9023_s27 + $0xfcc] sm:$0xf0] }
 0x115   : > { %4549 = vmatpush.bf16.msra.mxu0 %v7033_v2  ;;  %4562 = vmatpush.bf16.msra.mxu1 %v7161_v7  ;;  %v1335_v61 = vmax.f32 %v1209_v54, 0.0  ;;  %v7096_v2 = vld [vmem:[%s9023_s27 + $0x920] sm:$0xf]  ;;  %v8399_v7 = vld [vmem:[%s9023_s27 + $0x92c] sm:$0xf0]  ;;  %v7689_v58 = vor.u32 %v8547_v50, %v7688_v47 }
 0x116   : > { %4575 = vmatpush.bf16.msra.mxu2 %v7289_v8  ;;  %v7224_v8 = vld [vmem:[%s9023_s27 + $0xa20] sm:$0xf]  ;;  %v9262_v12 = vpack.c.bf16 %v1336_v62, %v1336_v62  ;;  %v7097_v18 = vor.u32 %v8399_v7, %v7096_v2  ;;  %v8511_v60 = vld [vmem:[%s9023_s27 + $0xcac] sm:$0xf0]  ;;  %v9295_v62 = vld [vmem:[#allocation4 + $0x8] sm:$0xff] }
 0x117   : > { %4588 = vmatpush.bf16.msra.mxu3 %v7417_v13  ;;  %v9260_v10 = vpack.c.bf16 %v1335_v61, %v1335_v61  ;;  %v7352_v13 = vld [vmem:[%s9023_s27 + $0xb20] sm:$0xf]  ;;  %v7225_v19 = vor.u32 %v8431_v9, %v7224_v8  ;;  %v8575_v2 = vld [vmem:[%s9023_s27 + $0xeac] sm:$0xf0]  ;;  %v457_v8 = vperm.slane %v9295_v62, 0 }
 0x118   : > { %4542 = vmatmul.bf16.vlgmr.msrb.gmra.mxu3 %v9262_v12  ;;  %v7944_v54 = vld [vmem:[%s9023_s27 + $0xfc0] sm:$0xf] }
 0x119   : > { %4550 = vmatpush.bf16.msra.mxu0 %v7017_v21  ;;  %4563 = vmatpush.bf16.msra.mxu1 %v7145_v23  ;;  %v8395_v21 = vld [vmem:[%s9023_s27 + $0x90c] sm:$0xf0]  ;;  %v7353_v23 = vor.u32 %v8463_v14, %v7352_v13  ;;  %v1223_v25 = vpop.f32.mrf.mxu3  ;;  %v7544_v57 = vld [vmem:[%s9023_s27 + $0xca0] sm:$0xf] }
 0x11a   : > { %4576 = vmatpush.bf16.msra.mxu2 %v7273_v24  ;;  %v1210_v24 = vpop.f32.mrf.mxu2  ;;  %v7081_v36 = vor.u32 %v8395_v21, %v7080_v20  ;;  %v7672_v61 = vld [vmem:[%s9023_s27 + $0xda0] sm:$0xf]  ;;  %v7545_v7 = vor.u32 %v8511_v60, %v7544_v57  ;;  %v8571_v20 = vld [vmem:[%s9023_s27 + $0xe8c] sm:$0xf0]  ;;  %v458_v21 = vperm.slane %v9295_v62, 1 }
 0x11b   : > { %4589 = vmatpush.bf16.msra.mxu3 %v7401_v30  ;;  %4529 = vmatmul.bf16.vlgmr.msrb.gmra.mxu2 %v9260_v10  ;;  %v8519_v30 = vld [vmem:[%s9023_s27 + $0xcec] sm:$0xf0]  ;;  %v7800_v1 = vld [vmem:[%s9023_s27 + $0xea0] sm:$0xf] }
 0x11c   : > { %v7928_v3 = vld [vmem:[%s9023_s27 + $0xfa0] sm:$0xf]  ;;  %v7801_v14 = vor.u32 %v8575_v2, %v7800_v1  ;;  %v8603_v24 = vld [vmem:[%s9023_s27 + $0xf8c] sm:$0xf0] }
 0x11d   : > { %4551 = vmatpush.bf16.msra.mxu0 %v7001_v40  ;;  %4564 = vmatpush.bf16.msra.mxu1 %v7129_v41  ;;  %v8615_v40 = vld [vmem:[%s9023_s27 + $0xfec] sm:$0xf0]  ;;  %v7337_v41 = vor.u32 %v8459_v28, %v7336_v27  ;;  %v7528_v9 = vld [vmem:[%s9023_s27 + $0xc80] sm:$0xf] }
 0x11e   : > { %4577 = vmatpush.bf16.msra.mxu2 %v7257_v43  ;;  %v7577_v43 = vor.u32 %v8519_v30, %v7576_v29  ;;  %v7961_v49 = vor.u32 %v8615_v40, %v7960_v39  ;;  %v7656_v16 = vld [vmem:[%s9023_s27 + $0xd80] sm:$0xf]  ;;  %v8567_v39 = vld [vmem:[%s9023_s27 + $0xe6c] sm:$0xf0] }
 0x11f   : > { %4590 = vmatpush.bf16.msra.mxu3 %v7385_v4  ;;  %v8515_v4 = vld [vmem:[%s9023_s27 + $0xccc] sm:$0xf0]  ;;  %v7512_v27 = vld [vmem:[%s9023_s27 + $0xc60] sm:$0xf]  ;;  %v7657_v28 = vor.u32 %v8539_v17, %v7656_v16 }
 0x120   : > { %v7561_v56 = vor.u32 %v8515_v4, %v7560_v46  ;;  %v7896_v40 = vld [vmem:[%s9023_s27 + $0xf60] sm:$0xf]  ;;  %v7513_v4 = vor.u32 %v8503_v31, %v7512_v27  ;;  %v8563_v60 = vld [vmem:[%s9023_s27 + $0xe4c] sm:$0xf0] }
 0x121   : > { %4552 = vmatpush.bf16.msra.mxu0 %v6985_v59  ;;  %4565 = vmatpush.bf16.msra.mxu1 %v7113_v63  ;;  %v7817_v59 = vor.u32 %v8579_v53, %v7816_v51  ;;  %v7945_v63 = vor.u32 %v8611_v55, %v7944_v54  ;;  %v7496_v50 = vld [vmem:[%s9023_s27 + $0xc40] sm:$0xf]  ;;  %v8499_v51 = vld [vmem:[%s9023_s27 + $0xc4c] sm:$0xf0] }
 0x122   : > { %4578 = vmatpush.bf16.msra.mxu2 %v7241_v0  ;;  %v8543_v0 = vld [vmem:[%s9023_s27 + $0xdac] sm:$0xf0]  ;;  %v7624_v53 = vld [vmem:[%s9023_s27 + $0xd40] sm:$0xf] }
 0x123   : > { %4591 = vmatpush.bf16.msra.mxu3 %v7369_v5  ;;  %v8607_v5 = vld [vmem:[%s9023_s27 + $0xfac] sm:$0xf0]  ;;  %v7673_v13 = vor.u32 %v8543_v0, %v7672_v61  ;;  %v7880_v0 = vld [vmem:[%s9023_s27 + $0xf40] sm:$0xf] }
 0x124   : > { %v8595_v1 = vld [vmem:[%s9023_s27 + $0xf4c] sm:$0xf0] }
 0x125   : > { %4553 = vmatpush.bf16.msra.mxu0 %v6969_v15  ;;  %4566 = vmatpush.bf16.msra.mxu1 %v7097_v18  ;;  %v8507_v15 = vld [vmem:[%s9023_s27 + $0xc8c] sm:$0xf0]  ;;  %v7929_v18 = vor.u32 %v8607_v5, %v7928_v3  ;;  %v7497_v3 = vor.u32 %v8499_v51, %v7496_v50  ;;  %v7480_v5 = vld [vmem:[%s9023_s27 + $0xc20] sm:$0xf]  ;;  %v7881_v17 = vor.u32 %v8595_v1, %v7880_v0  ;;  %v8229_v51 = vld [vmem:[%s9023_s27 + $0x3e4] sm:$0xf] }
 0x126   : > { %4579 = vmatpush.bf16.msra.mxu2 %v7225_v19  ;;  %v7784_v19 = vld [vmem:[%s9023_s27 + $0xe80] sm:$0xf]  ;;  %v7529_v26 = vor.u32 %v8507_v15, %v7528_v9  ;;  %v8491_v27 = vld [vmem:[%s9023_s27 + $0xc0c] sm:$0xf0]  ;;  %v6154_v0 = vld [vmem:[%s9023_s27 + $0x1d0] sm:$0xf0] }
 0x127   : > { %4592 = vmatpush.bf16.msra.mxu3 %v7353_v23  ;;  %v7912_v23 = vld [vmem:[%s9023_s27 + $0xf80] sm:$0xf]  ;;  %v7785_v29 = vor.u32 %v8571_v20, %v7784_v19  ;;  %v8559_v20 = vld [vmem:[%s9023_s27 + $0xe2c] sm:$0xf0]  ;;  %v8193_v1 = vld [vmem:[%s9023_s27 + $0x2c4] sm:$0xf] }
 0x128   : > { %v7913_v35 = vor.u32 %v8603_v24, %v7912_v23  ;;  %v7608_v15 = vld [vmem:[%s9023_s27 + $0xd20] sm:$0xf]  ;;  %v8591_v24 = vld [vmem:[%s9023_s27 + $0xf2c] sm:$0xf0] }
 0x129   : > { %4554 = vmatpush.bf16.msra.mxu0 %v6953_v32  ;;  %4567 = vmatpush.bf16.msra.mxu1 %v7081_v36  ;;  %v1234_v22 = vpop.f32.mrf.mxu0  ;;  %v1247_v30 = vpop.f32.mrf.mxu1  ;;  %v7640_v32 = vld [vmem:[%s9023_s27 + $0xd60] sm:$0xf]  ;;  %v8523_v31 = vld [vmem:[%s9023_s27 + $0xd0c] sm:$0xf0] }
 0x12a   : > { %4580 = vmatpush.bf16.msra.mxu2 %v7209_v37  ;;  %v1235_v25 = vadd.f32 %v1234_v22, %v457_v8  ;;  %v1248_v36 = vadd.f32 %v1247_v30, %v458_v21  ;;  %v7768_v37 = vld [vmem:[%s9023_s27 + $0xe60] sm:$0xf]  ;;  %v7641_v47 = vor.u32 %v8535_v33, %v7640_v32 }
 0x12b   : > { %4593 = vmatpush.bf16.msra.mxu3 %v7337_v41  ;;  %v8599_v41 = vld [vmem:[%s9023_s27 + $0xf6c] sm:$0xf0]  ;;  %v7736_v19 = vld [vmem:[%s9023_s27 + $0xe20] sm:$0xf] }
 0x12c   : > { %v1337_v34 = vmax.f32 %v1235_v25, 0.0  ;;  %v1338_v46 = vmax.f32 %v1248_v36, 0.0  ;;  %v7897_v55 = vor.u32 %v8599_v41, %v7896_v40  ;;  %v7864_v23 = vld [vmem:[%s9023_s27 + $0xf20] sm:$0xf]  ;;  %v8555_v36 = vld [vmem:[%s9023_s27 + $0xe0c] sm:$0xf0] }
 0x12d   : > { %4599 = vmatpush.bf16.msrb.mxu0 %v7577_v43  ;;  %4612 = vmatpush.bf16.msrb.mxu1 %v7705_v44  ;;  %v459_v43 = vperm.slane %v9295_v62, 2  ;;  %v460_v44 = vperm.slane %v9295_v62, 3  ;;  %v7592_v30 = vld [vmem:[%s9023_s27 + $0xd00] sm:$0xf]  ;;  %v7865_v33 = vor.u32 %v8591_v24, %v7864_v23  ;;  %v8133_v40 = vld [vmem:[%s9023_s27 + $0xe4] sm:$0xf] }
 0x12e   : > { %4625 = vmatpush.bf16.msrb.mxu2 %v7833_v45  ;;  %v9322_v45 = vpack.c.bf16 %v1337_v34, %v1337_v34  ;;  %v9327_v54 = vpack.c.bf16 %v1338_v46, %v1338_v46  ;;  %v7720_v32 = vld [vmem:[%s9023_s27 + $0xe00] sm:$0xf]  ;;  %v6042_v41 = vld [vmem:[%s9023_s27 + $0xf0] sm:$0xf0] }
 0x12f   : > { %4638 = vmatpush.bf16.msrb.mxu3 %v7961_v49  ;;  %v7769_v49 = vor.u32 %v8567_v39, %v7768_v37  ;;  %v7848_v37 = vld [vmem:[%s9023_s27 + $0xf00] sm:$0xf]  ;;  %v8587_v39 = vld [vmem:[%s9023_s27 + $0xf0c] sm:$0xf0]  ;;  %v6170_v46 = vld [vmem:[%s9023_s27 + $0x1f0] sm:$0xf0]  ;;  %v7721_v50 = vor.u32 %v8555_v36, %v7720_v32 }
 0x130   : > { %4555 = vmatmul.bf16.vlgmr.msra.gmra.mxu0 %v9322_v45  ;;  %4568 = vmatmul.bf16.vlgmr.msra.gmra.mxu1 %v9327_v54  ;;  %v6394_v23 = vld [vmem:[%s9023_s27 + $0x3b0] sm:$0xf0] }
 0x131   : > { %4600 = vmatpush.bf16.msrb.mxu0 %v7561_v56  ;;  %4613 = vmatpush.bf16.msrb.mxu1 %v7689_v58  ;;  %v1273_v57 = vpop.f32.mrf.mxu3  ;;  %v8531_v58 = vld [vmem:[%s9023_s27 + $0xd4c] sm:$0xf0]  ;;  %v1236_v2 = vpop.f32.mrf.mxu0 }
 0x132   : > { %4626 = vmatpush.bf16.msrb.mxu2 %v7817_v59  ;;  %v1260_v56 = vpop.f32.mrf.mxu2  ;;  %v7752_v59 = vld [vmem:[%s9023_s27 + $0xe40] sm:$0xf]  ;;  %v7625_v9 = vor.u32 %v8531_v58, %v7624_v53  ;;  %v1249_v16 = vpop.f32.mrf.mxu1  ;;  %v6426_v53 = vld [vmem:[%s9023_s27 + $0x3f0] sm:$0xf0] }
 0x133   : > { %4639 = vmatpush.bf16.msrb.mxu3 %v7945_v63  ;;  %v1261_v61 = vadd.f32 %v1260_v56, %v459_v43  ;;  %v1274_v63 = vadd.f32 %v1273_v57, %v460_v44  ;;  %v8165_v43 = vld [vmem:[%s9023_s27 + $0x1e4] sm:$0xf]  ;;  %v6045_v56 = vor.u32 %v8133_v40, %v6042_v41  ;;  %v6282_v2 = vld [vmem:[%s9023_s27 + $0x2d0] sm:$0xf0] }
 0x134   : > { %v6173_v57 = vor.u32 %v8165_v43, %v6170_v46 }
 0x135   : > { %4601 = vmatpush.bf16.msrb.mxu0 %v7545_v7  ;;  %4614 = vmatpush.bf16.msrb.mxu1 %v7673_v13  ;;  %v1339_v7 = vmax.f32 %v1261_v61, 0.0  ;;  %v1340_v8 = vmax.f32 %v1274_v63, 0.0  ;;  %v7753_v13 = vor.u32 %v8563_v60, %v7752_v59  ;;  %v8129_v59 = vld [vmem:[%s9023_s27 + $0xc4] sm:$0xf]  ;;  %v6026_v60 = vld [vmem:[%s9023_s27 + $0xd0] sm:$0xf0]  ;;  %v6429_v63 = vor.u32 %v8229_v51, %v6426_v53 }
 0x136   : > { %4627 = vmatpush.bf16.msrb.mxu2 %v7801_v14  ;;  %v8495_v14 = vld [vmem:[%s9023_s27 + $0xc2c] sm:$0xf0]  ;;  %v8161_v61 = vld [vmem:[%s9023_s27 + $0x1c4] sm:$0xf]  ;;  %v6106_v51 = vld [vmem:[%s9023_s27 + $0x170] sm:$0xf0] }
 0x137   : > { %4640 = vmatpush.bf16.msrb.mxu3 %v7929_v18  ;;  %v8527_v18 = vld [vmem:[%s9023_s27 + $0xd2c] sm:$0xf0]  ;;  %v9342_v21 = vpack.c.bf16 %v1339_v7, %v1339_v7  ;;  %v9344_v22 = vpack.c.bf16 %v1340_v8, %v1340_v8  ;;  %v7481_v25 = vor.u32 %v8495_v14, %v7480_v5  ;;  %v6410_v5 = vld [vmem:[%s9023_s27 + $0x3d0] sm:$0xf0]  ;;  %v6029_v7 = vor.u32 %v8129_v59, %v6026_v60  ;;  %v8213_v59 = vld [vmem:[%s9023_s27 + $0x364] sm:$0xf] }
 0x138   : > { %v6157_v8 = vor.u32 %v8161_v61, %v6154_v0  ;;  %v6010_v14 = vld [vmem:[%s9023_s27 + $0xb0] sm:$0xf0]  ;;  %v463_v61 = vperm.slane %v9295_v62, 6 }
 0x139   : > { %4602 = vmatpush.bf16.msrb.mxu0 %v7529_v26  ;;  %4615 = vmatpush.bf16.msrb.mxu1 %v7657_v28  ;;  %v7464_v26 = vld [vmem:[%s9023_s27 + $0xc00] sm:$0xf]  ;;  %v7609_v28 = vor.u32 %v8527_v18, %v7608_v15  ;;  %v8157_v15 = vld [vmem:[%s9023_s27 + $0x1a4] sm:$0xf]  ;;  %v6362_v60 = vld [vmem:[%s9023_s27 + $0x370] sm:$0xf0] }
 0x13a   : > { %4628 = vmatpush.bf16.msrb.mxu2 %v7785_v29  ;;  %v7737_v29 = vor.u32 %v8559_v20, %v7736_v19  ;;  %v1262_v34 = vpop.f32.mrf.mxu2  ;;  %4594 = vmatmul.bf16.vlgmr.msra.gmra.mxu3 %v9344_v22  ;;  %v7465_v44 = vor.u32 %v8491_v27, %v7464_v26  ;;  %v8189_v18 = vld [vmem:[%s9023_s27 + $0x2a4] sm:$0xf]  ;;  %v6266_v19 = vld [vmem:[%s9023_s27 + $0x2b0] sm:$0xf0] }
 0x13b   : > { %4641 = vmatpush.bf16.msrb.mxu3 %v7913_v35  ;;  %4581 = vmatmul.bf16.vlgmr.msra.gmra.mxu2 %v9342_v21  ;;  %v1275_v35 = vpop.f32.mrf.mxu3  ;;  %v8221_v20 = vld [vmem:[%s9023_s27 + $0x3a4] sm:$0xf] }
 0x13c   : > { %v8121_v26 = vld [vmem:[%s9023_s27 + $0x84] sm:$0xf]  ;;  %v6397_v32 = vor.u32 %v8221_v20, %v6394_v23  ;;  %v6250_v35 = vld [vmem:[%s9023_s27 + $0x290] sm:$0xf0] }
 0x13d   : > { %4603 = vmatpush.bf16.msrb.mxu0 %v7513_v4  ;;  %4616 = vmatpush.bf16.msrb.mxu1 %v7641_v47  ;;  %v8197_v4 = vld [vmem:[%s9023_s27 + $0x2e4] sm:$0xf]  ;;  %v6298_v47 = vld [vmem:[%s9023_s27 + $0x2f0] sm:$0xf0] }
 0x13e   : > { %4629 = vmatpush.bf16.msrb.mxu2 %v7769_v49  ;;  %v7593_v49 = vor.u32 %v8523_v31, %v7592_v30  ;;  %v6301_v58 = vor.u32 %v8197_v4, %v6298_v47  ;;  %v5994_v30 = vld [vmem:[%s9023_s27 + $0x90] sm:$0xf0]  ;;  %v8153_v31 = vld [vmem:[%s9023_s27 + $0x184] sm:$0xf] }
 0x13f   : > { %4642 = vmatpush.bf16.msrb.mxu3 %v7897_v55  ;;  %v7849_v55 = vor.u32 %v8587_v39, %v7848_v37  ;;  %v8185_v34 = vld [vmem:[%s9023_s27 + $0x284] sm:$0xf]  ;;  %v6378_v39 = vld [vmem:[%s9023_s27 + $0x390] sm:$0xf0]  ;;  %v5997_v43 = vor.u32 %v8121_v26, %v5994_v30 }
 0x140   : > { %v8217_v37 = vld [vmem:[%s9023_s27 + $0x384] sm:$0xf]  ;;  %v6253_v47 = vor.u32 %v8185_v34, %v6250_v35  ;;  %v6346_v20 = vld [vmem:[%s9023_s27 + $0x350] sm:$0xf0] }
 0x141   : > { %4604 = vmatpush.bf16.msrb.mxu0 %v7497_v3  ;;  %4617 = vmatpush.bf16.msrb.mxu1 %v7625_v9  ;;  %v8225_v3 = vld [vmem:[%s9023_s27 + $0x3c4] sm:$0xf]  ;;  %v6285_v9 = vor.u32 %v8193_v1, %v6282_v2  ;;  %v464_v1 = vperm.slane %v9295_v62, 7 }
 0x142   : > { %4630 = vmatpush.bf16.msrb.mxu2 %v7753_v13  ;;  %v8125_v13 = vld [vmem:[%s9023_s27 + $0xa4] sm:$0xf]  ;;  %v6413_v16 = vor.u32 %v8225_v3, %v6410_v5 }
 0x143   : > { %4643 = vmatpush.bf16.msrb.mxu3 %v7881_v17  ;;  %v6138_v17 = vld [vmem:[%s9023_s27 + $0x1b0] sm:$0xf0]  ;;  %v6013_v24 = vor.u32 %v8125_v13, %v6010_v14  ;;  %v6365_v13 = vor.u32 %v8213_v59, %v6362_v60  ;;  %v8109_v26 = vld [vmem:[%s9023_s27 + $0x24] sm:$0xf] }
 0x144   : > { %v6141_v27 = vor.u32 %v8157_v15, %v6138_v17  ;;  %v6090_v15 = vld [vmem:[%s9023_s27 + $0x150] sm:$0xf0] }
 0x145   : > { %4605 = vmatpush.bf16.msrb.mxu0 %v7481_v25  ;;  %4618 = vmatpush.bf16.msrb.mxu1 %v7609_v28  ;;  %v461_v25 = vperm.slane %v9295_v62, 4  ;;  %v6269_v28 = vor.u32 %v8189_v18, %v6266_v19  ;;  %v8209_v19 = vld [vmem:[%s9023_s27 + $0x344] sm:$0xf]  ;;  %v6314_v59 = vld [vmem:[%s9023_s27 + $0x310] sm:$0xf0] }
 0x146   : > { %4631 = vmatpush.bf16.msrb.mxu2 %v7737_v29  ;;  %v462_v29 = vperm.slane %v9295_v62, 5  ;;  %v8177_v62 = vld [vmem:[%s9023_s27 + $0x244] sm:$0xf]  ;;  %v6349_v35 = vor.u32 %v8209_v19, %v6346_v20  ;;  %v6538_v20 = vld [vmem:[%s9023_s27 + $0x4d0] sm:$0xf0] }
 0x147   : > { %4644 = vmatpush.bf16.msrb.mxu3 %v7865_v33  ;;  %v6122_v33 = vld [vmem:[%s9023_s27 + $0x190] sm:$0xf0]  ;;  %v8257_v19 = vld [vmem:[%s9023_s27 + $0x4c4] sm:$0xf] }
 0x148   : > { %v6125_v4 = vor.u32 %v8153_v31, %v6122_v33  ;;  %v6074_v33 = vld [vmem:[%s9023_s27 + $0x130] sm:$0xf0] }
 0x149   : > { %4606 = vmatpush.bf16.msrb.mxu0 %v7465_v44  ;;  %4619 = vmatpush.bf16.msrb.mxu1 %v7593_v49  ;;  %v1286_v36 = vpop.f32.mrf.mxu0  ;;  %v1299_v41 = vpop.f32.mrf.mxu1  ;;  %v8117_v44 = vld [vmem:[%s9023_s27 + $0x64] sm:$0xf]  ;;  %v5978_v49 = vld [vmem:[%s9023_s27 + $0x70] sm:$0xf0] }
 0x14a   : > { %4632 = vmatpush.bf16.msrb.mxu2 %v7721_v50  ;;  %v1287_v40 = vadd.f32 %v1286_v36, %v461_v25  ;;  %v1300_v46 = vadd.f32 %v1299_v41, %v462_v29  ;;  %v8149_v50 = vld [vmem:[%s9023_s27 + $0x164] sm:$0xf]  ;;  %v5981_v0 = vor.u32 %v8117_v44, %v5978_v49  ;;  %v6330_v41 = vld [vmem:[%s9023_s27 + $0x330] sm:$0xf0] }
 0x14b   : > { %4645 = vmatpush.bf16.msrb.mxu3 %v7849_v55  ;;  %v6381_v55 = vor.u32 %v8217_v37, %v6378_v39  ;;  %v6109_v3 = vor.u32 %v8149_v50, %v6106_v51  ;;  %v8173_v36 = vld [vmem:[%s9023_s27 + $0x224] sm:$0xf]  ;;  %v6202_v37 = vld [vmem:[%s9023_s27 + $0x230] sm:$0xf0] }
 0x14c   : > { %v1341_v53 = vmax.f32 %v1287_v40, 0.0  ;;  %v8205_v40 = vld [vmem:[%s9023_s27 + $0x324] sm:$0xf]  ;;  %v6205_v49 = vor.u32 %v8173_v36, %v6202_v37  ;;  %v6058_v51 = vld [vmem:[%s9023_s27 + $0x110] sm:$0xf0] }
 0x14d   : > { %4651 = vmatpush.bf16.msra.mxu0 %v6045_v56  ;;  %4664 = vmatpush.bf16.msra.mxu1 %v6173_v57  ;;  %v8181_v56 = vld [vmem:[%s9023_s27 + $0x264] sm:$0xf]  ;;  %v6234_v57 = vld [vmem:[%s9023_s27 + $0x270] sm:$0xf0] }
 0x14e   : > { %4677 = vmatpush.bf16.msra.mxu2 %v6301_v58  ;;  %v1342_v58 = vmax.f32 %v1300_v46, 0.0  ;;  %v6237_v5 = vor.u32 %v8181_v56, %v6234_v57  ;;  %v8105_v46 = vld [vmem:[%s9023_s27 + $0x4] sm:$0xf]  ;;  %v6186_v57 = vld [vmem:[%s9023_s27 + $0x210] sm:$0xf0] }
 0x14f   : > { %4690 = vmatpush.bf16.msra.mxu3 %v6429_v63  ;;  %v9401_v63 = vpack.c.bf16 %v1341_v53, %v1341_v53  ;;  %v8137_v50 = vld [vmem:[%s9023_s27 + $0x104] sm:$0xf]  ;;  %v6650_v37 = vld [vmem:[%s9023_s27 + $0x5b0] sm:$0xf0] }
 0x150   : > { %v9404_v2 = vpack.c.bf16 %v1342_v58, %v1342_v58  ;;  %v8169_v53 = vld [vmem:[%s9023_s27 + $0x204] sm:$0xf] }
 0x151   : > { %4652 = vmatpush.bf16.msra.mxu0 %v6029_v7  ;;  %4665 = vmatpush.bf16.msra.mxu1 %v6157_v8  ;;  %v8113_v7 = vld [vmem:[%s9023_s27 + $0x44] sm:$0xf]  ;;  %v5962_v8 = vld [vmem:[%s9023_s27 + $0x50] sm:$0xf0]  ;;  %v1325_v18 = vpop.f32.mrf.mxu3  ;;  %v1288_v23 = vpop.f32.mrf.mxu0 }
 0x152   : > { %4678 = vmatpush.bf16.msra.mxu2 %v6285_v9  ;;  %v8145_v9 = vld [vmem:[%s9023_s27 + $0x144] sm:$0xf]  ;;  %v1312_v14 = vpop.f32.mrf.mxu2  ;;  %4607 = vmatmul.bf16.vlgmr.msrb.gmra.mxu0 %v9401_v63  ;;  %v5965_v25 = vor.u32 %v8113_v7, %v5962_v8  ;;  %v6810_v8 = vld [vmem:[%s9023_s27 + $0x6f0] sm:$0xf0] }
 0x153   : > { %4691 = vmatpush.bf16.msra.mxu3 %v6413_v16  ;;  %v6218_v16 = vld [vmem:[%s9023_s27 + $0x250] sm:$0xf0]  ;;  %v1313_v17 = vadd.f32 %v1312_v14, %v463_v61  ;;  %4620 = vmatmul.bf16.vlgmr.msrb.gmra.mxu1 %v9404_v2  ;;  %v6093_v30 = vor.u32 %v8145_v9, %v6090_v15  ;;  %v8201_v58 = vld [vmem:[%s9023_s27 + $0x304] sm:$0xf]  ;;  %v6061_v9 = vor.u32 %v8137_v50, %v6058_v51 }
 0x154   : > { %v6221_v31 = vor.u32 %v8177_v62, %v6218_v16  ;;  %v8261_v61 = vld [vmem:[%s9023_s27 + $0x4e4] sm:$0xf]  ;;  %v6938_v15 = vld [vmem:[%s9023_s27 + $0x7f0] sm:$0xf0]  ;;  %v6317_v62 = vor.u32 %v8201_v58, %v6314_v59 }
 0x155   : > { %4653 = vmatpush.bf16.msra.mxu0 %v6013_v24  ;;  %4666 = vmatpush.bf16.msra.mxu1 %v6141_v27  ;;  %v1326_v24 = vadd.f32 %v1325_v18, %v464_v1  ;;  %v5946_v27 = vld [vmem:[%s9023_s27 + $0x30] sm:$0xf0]  ;;  %v1343_v29 = vmax.f32 %v1313_v17, 0.0  ;;  %v8293_v1 = vld [vmem:[%s9023_s27 + $0x5e4] sm:$0xf] }
 0x156   : > { %4679 = vmatpush.bf16.msra.mxu2 %v6269_v28  ;;  %v1301_v28 = vpop.f32.mrf.mxu1  ;;  %v5949_v44 = vor.u32 %v8109_v26, %v5946_v27  ;;  %v8325_v7 = vld [vmem:[%s9023_s27 + $0x6e4] sm:$0xf]  ;;  %v6794_v27 = vld [vmem:[%s9023_s27 + $0x6d0] sm:$0xf0] }
 0x157   : > { %4692 = vmatpush.bf16.msra.mxu3 %v6397_v32  ;;  %v8141_v32 = vld [vmem:[%s9023_s27 + $0x124] sm:$0xf]  ;;  %v1344_v34 = vmax.f32 %v1326_v24, 0.0  ;;  %v9422_v39 = vpack.c.bf16 %v1343_v29, %v1343_v29  ;;  %v6813_v18 = vor.u32 %v8325_v7, %v6810_v8  ;;  %v6922_v29 = vld [vmem:[%s9023_s27 + $0x7d0] sm:$0xf0] }
 0x158   : > { %v8357_v14 = vld [vmem:[%s9023_s27 + $0x7e4] sm:$0xf]  ;;  %v6506_v51 = vld [vmem:[%s9023_s27 + $0x490] sm:$0xf0] }
 0x159   : > { %4654 = vmatpush.bf16.msra.mxu0 %v5997_v43  ;;  %4667 = vmatpush.bf16.msra.mxu1 %v6125_v4  ;;  %v9426_v43 = vpack.c.bf16 %v1344_v34, %v1344_v34  ;;  %v5930_v4 = vld [vmem:[%s9023_s27 + $0x10] sm:$0xf0]  ;;  %v1327_v60 = vpop.f32.mrf.mxu3  ;;  %v8289_v23 = vld [vmem:[%s9023_s27 + $0x5c4] sm:$0xf]  ;;  %v6941_v24 = vor.u32 %v8357_v14, %v6938_v15 }
 0x15a   : > { %4680 = vmatpush.bf16.msra.mxu2 %v6253_v47  ;;  %v6077_v47 = vor.u32 %v8141_v32, %v6074_v33  ;;  %v1314_v56 = vpop.f32.mrf.mxu2  ;;  %v8321_v26 = vld [vmem:[%s9023_s27 + $0x6c4] sm:$0xf]  ;;  %v6522_v34 = vld [vmem:[%s9023_s27 + $0x4b0] sm:$0xf0] }
 0x15b   : > { %4693 = vmatpush.bf16.msra.mxu3 %v6381_v55  ;;  %4633 = vmatmul.bf16.vlgmr.msrb.gmra.mxu2 %v9422_v39  ;;  %v6333_v55 = vor.u32 %v8205_v40, %v6330_v41  ;;  %v8353_v28 = vld [vmem:[%s9023_s27 + $0x7c4] sm:$0xf]  ;;  %v6797_v32 = vor.u32 %v8321_v26, %v6794_v27  ;;  %v6778_v41 = vld [vmem:[%s9023_s27 + $0x6b0] sm:$0xf0] }
 0x15c   : > { %4646 = vmatmul.bf16.vlgmr.msrb.gmra.mxu3 %v9426_v43  ;;  %v8253_v33 = vld [vmem:[%s9023_s27 + $0x4a4] sm:$0xf]  ;;  %v6925_v36 = vor.u32 %v8353_v28, %v6922_v29  ;;  %v6634_v56 = vld [vmem:[%s9023_s27 + $0x590] sm:$0xf0] }
 0x15d   : > { %4655 = vmatpush.bf16.msra.mxu0 %v5981_v0  ;;  %4668 = vmatpush.bf16.msra.mxu1 %v6109_v3  ;;  %v6554_v0 = vld [vmem:[%s9023_s27 + $0x4f0] sm:$0xf0]  ;;  %v5933_v3 = vor.u32 %v8105_v46, %v5930_v4  ;;  %v8317_v40 = vld [vmem:[%s9023_s27 + $0x6a4] sm:$0xf]  ;;  %v6525_v4 = vor.u32 %v8253_v33, %v6522_v34 }
 0x15e   : > { %4681 = vmatpush.bf16.msra.mxu2 %v6237_v5  ;;  %v6682_v5 = vld [vmem:[%s9023_s27 + $0x5f0] sm:$0xf0]  ;;  %v6557_v16 = vor.u32 %v8261_v61, %v6554_v0  ;;  %v8249_v50 = vld [vmem:[%s9023_s27 + $0x484] sm:$0xf] }
 0x15f   : > { %4694 = vmatpush.bf16.msra.mxu3 %v6365_v13  ;;  %v6189_v13 = vor.u32 %v8169_v53, %v6186_v57  ;;  %v6685_v17 = vor.u32 %v8293_v1, %v6682_v5  ;;  %v6906_v46 = vld [vmem:[%s9023_s27 + $0x7b0] sm:$0xf0]  ;;  %v8281_v53 = vld [vmem:[%s9023_s27 + $0x584] sm:$0xf]  ;;  %v6509_v61 = vor.u32 %v8249_v50, %v6506_v51 }
 0x160   : > { %v8313_v57 = vld [vmem:[%s9023_s27 + $0x684] sm:$0xf]  ;;  %v6762_v58 = vld [vmem:[%s9023_s27 + $0x690] sm:$0xf0]  ;;  %v6637_v0 = vor.u32 %v8281_v53, %v6634_v56 }
 0x161   : > { %4656 = vmatpush.bf16.msra.mxu0 %v5965_v25  ;;  %4669 = vmatpush.bf16.msra.mxu1 %v6093_v30  ;;  %v6666_v25 = vld [vmem:[%s9023_s27 + $0x5d0] sm:$0xf0]  ;;  %v6541_v30 = vor.u32 %v8257_v19, %v6538_v20  ;;  %v8345_v59 = vld [vmem:[%s9023_s27 + $0x784] sm:$0xf]  ;;  %v6765_v1 = vor.u32 %v8313_v57, %v6762_v58 }
 0x162   : > { %4682 = vmatpush.bf16.msra.mxu2 %v6221_v31  ;;  %v6669_v31 = vor.u32 %v8289_v23, %v6666_v25  ;;  %v6890_v60 = vld [vmem:[%s9023_s27 + $0x790] sm:$0xf0]  ;;  %v8277_v7 = vld [vmem:[%s9023_s27 + $0x564] sm:$0xf] }
 0x163   : > { %4695 = vmatpush.bf16.msra.mxu3 %v6349_v35  ;;  %v8285_v35 = vld [vmem:[%s9023_s27 + $0x5a4] sm:$0xf]  ;;  %v6490_v5 = vld [vmem:[%s9023_s27 + $0x470] sm:$0xf0]  ;;  %v6893_v8 = vor.u32 %v8345_v59, %v6890_v60 }
 0x164   : > { %v6746_v14 = vld [vmem:[%s9023_s27 + $0x670] sm:$0xf0]  ;;  %v8341_v15 = vld [vmem:[%s9023_s27 + $0x764] sm:$0xf] }
 0x165   : > { %4657 = vmatpush.bf16.msra.mxu0 %v5949_v44  ;;  %4670 = vmatpush.bf16.msra.mxu1 %v6077_v47  ;;  %v8349_v44 = vld [vmem:[%s9023_s27 + $0x7a4] sm:$0xf]  ;;  %v6653_v47 = vor.u32 %v8285_v35, %v6650_v37  ;;  %v6474_v20 = vld [vmem:[%s9023_s27 + $0x450] sm:$0xf0] }
 0x166   : > { %4683 = vmatpush.bf16.msra.mxu2 %v6205_v49  ;;  %v6781_v49 = vor.u32 %v8317_v40, %v6778_v41  ;;  %v8273_v23 = vld [vmem:[%s9023_s27 + $0x544] sm:$0xf]  ;;  %v6730_v27 = vld [vmem:[%s9023_s27 + $0x650] sm:$0xf0] }
 0x167   : > { %4696 = vmatpush.bf16.msra.mxu3 %v6333_v55  ;;  %v6909_v55 = vor.u32 %v8349_v44, %v6906_v46  ;;  %v8305_v26 = vld [vmem:[%s9023_s27 + $0x644] sm:$0xf]  ;;  %v6458_v35 = vld [vmem:[%s9023_s27 + $0x430] sm:$0xf0] }
 0x168   : > { %v1873_v28 = vld [vmem:[%s9493_s18] sm:$0xf]  ;;  %v6733_v34 = vor.u32 %v8305_v26, %v6730_v27  ;;  %v6586_v41 = vld [vmem:[%s9023_s27 + $0x530] sm:$0xf0] }
 0x169   : > { %4658 = vmatpush.bf16.msra.mxu0 %v5933_v3  ;;  %4671 = vmatpush.bf16.msra.mxu1 %v6061_v9  ;;  %v8245_v3 = vld [vmem:[%s9023_s27 + $0x464] sm:$0xf]  ;;  %v6618_v9 = vld [vmem:[%s9023_s27 + $0x570] sm:$0xf0]  ;;  %v1875_v37 = vperm.slane %v1873_v28, 0 }
 0x16a   : > { %4684 = vmatpush.bf16.msra.mxu2 %v6189_v13  ;;  %v8309_v13 = vld [vmem:[%s9023_s27 + $0x664] sm:$0xf]  ;;  %v6714_v46 = vld [vmem:[%s9023_s27 + $0x630] sm:$0xf0] }
 0x16b   : > { %4697 = vmatpush.bf16.msra.mxu3 %v6317_v62  ;;  %v6874_v62 = vld [vmem:[%s9023_s27 + $0x770] sm:$0xf0]  ;;  %v6749_v19 = vor.u32 %v8309_v13, %v6746_v14  ;;  %v8337_v29 = vld [vmem:[%s9023_s27 + $0x744] sm:$0xf] }
 0x16c   : > { %4659 = vmatmul.bf16.vlgmr.msra.gmra.mxu0 %v9160_v42  ;;  %4672 = vmatmul.bf16.vlgmr.msra.gmra.mxu1 %v9165_v52  ;;  %v6877_v25 = vor.u32 %v8341_v15, %v6874_v62  ;;  %v8301_v44 = vld [vmem:[%s9023_s27 + $0x624] sm:$0xf]  ;;  %v6442_v51 = vld [vmem:[%s9023_s27 + $0x410] sm:$0xf0] }
 0x16d   : > { %4703 = vmatpush.bf16.msrb.mxu0 %v6557_v16  ;;  %4716 = vmatpush.bf16.msrb.mxu1 %v6685_v17  ;;  %v6493_v16 = vor.u32 %v8245_v3, %v6490_v5  ;;  %v8241_v17 = vld [vmem:[%s9023_s27 + $0x444] sm:$0xf]  ;;  %v4452_v53 = vpop.f32.mrf.mxu0  ;;  %v6717_v56 = vor.u32 %v8301_v44, %v6714_v46  ;;  %v6570_v58 = vld [vmem:[%s9023_s27 + $0x510] sm:$0xf0] }
 0x16e   : > { %4729 = vmatpush.bf16.msrb.mxu2 %v6813_v18  ;;  %4698 = vmatmul.bf16.vlgmr.msra.gmra.mxu3 %v9182_v11  ;;  %v6621_v18 = vor.u32 %v8277_v7, %v6618_v9  ;;  %v8233_v50 = vld [vmem:[%s9023_s27 + $0x404] sm:$0xf]  ;;  %v4453_v60 = vadd.f32 %v4452_v53, %v1875_v37  ;;  %v6826_v5 = vld [vmem:[%s9023_s27 + $0x710] sm:$0xf0] }
 0x16f   : > { %4742 = vmatpush.bf16.msrb.mxu3 %v6941_v24  ;;  %4685 = vmatmul.bf16.vlgmr.msra.gmra.mxu2 %v9177_v6  ;;  %v6602_v24 = vld [vmem:[%s9023_s27 + $0x550] sm:$0xf0]  ;;  %v8265_v57 = vld [vmem:[%s9023_s27 + $0x504] sm:$0xf]  ;;  %v6445_v14 = vor.u32 %v8233_v50, %v6442_v51 }
 0x170   : > { %v6605_v33 = vor.u32 %v8273_v23, %v6602_v24  ;;  %v8297_v59 = vld [vmem:[%s9023_s27 + $0x604] sm:$0xf]  ;;  %v7194_v15 = vld [vmem:[%s9023_s27 + $0x9f0] sm:$0xf0] }
 0x171   : > { %4704 = vmatpush.bf16.msrb.mxu0 %v6541_v30  ;;  %4717 = vmatpush.bf16.msrb.mxu1 %v6669_v31  ;;  %v6858_v30 = vld [vmem:[%s9023_s27 + $0x750] sm:$0xf0]  ;;  %v6477_v31 = vor.u32 %v8241_v17, %v6474_v20  ;;  %v8329_v3 = vld [vmem:[%s9023_s27 + $0x704] sm:$0xf]  ;;  %v6573_v17 = vor.u32 %v8265_v57, %v6570_v58 }
 0x172   : > { %4730 = vmatpush.bf16.msrb.mxu2 %v6797_v32  ;;  %v8237_v32 = vld [vmem:[%s9023_s27 + $0x424] sm:$0xf]  ;;  %v6861_v40 = vor.u32 %v8337_v29, %v6858_v30  ;;  %v7450_v20 = vld [vmem:[%s9023_s27 + $0xbf0] sm:$0xf0]  ;;  %v6829_v23 = vor.u32 %v8329_v3, %v6826_v5 }
 0x173   : > { %4743 = vmatpush.bf16.msrb.mxu3 %v6925_v36  ;;  %v8269_v36 = vld [vmem:[%s9023_s27 + $0x524] sm:$0xf]  ;;  %v7050_v28 = vld [vmem:[%s9023_s27 + $0x8d0] sm:$0xf0] }
 0x174   : > { %v8389_v7 = vld [vmem:[%s9023_s27 + $0x8e4] sm:$0xf]  ;;  %v7162_v51 = vld [vmem:[%s9023_s27 + $0x9b0] sm:$0xf0] }
 0x175   : > { %4705 = vmatpush.bf16.msrb.mxu0 %v6525_v4  ;;  %4718 = vmatpush.bf16.msrb.mxu1 %v6653_v47  ;;  %v8333_v4 = vld [vmem:[%s9023_s27 + $0x724] sm:$0xf]  ;;  %v6842_v47 = vld [vmem:[%s9023_s27 + $0x730] sm:$0xf0] }
 0x176   : > { %4731 = vmatpush.bf16.msrb.mxu2 %v6781_v49  ;;  %v6461_v49 = vor.u32 %v8237_v32, %v6458_v35  ;;  %v8421_v9 = vld [vmem:[%s9023_s27 + $0x9e4] sm:$0xf]  ;;  %v7418_v58 = vld [vmem:[%s9023_s27 + $0xbb0] sm:$0xf0] }
 0x177   : > { %4744 = vmatpush.bf16.msrb.mxu3 %v6909_v55  ;;  %v6589_v55 = vor.u32 %v8269_v36, %v6586_v41  ;;  %v8453_v62 = vld [vmem:[%s9023_s27 + $0xae4] sm:$0xf]  ;;  %v7434_v36 = vld [vmem:[%s9023_s27 + $0xbd0] sm:$0xf0] }
 0x178   : > { %v8385_v27 = vld [vmem:[%s9023_s27 + $0x8c4] sm:$0xf]  ;;  %v7018_v5 = vld [vmem:[%s9023_s27 + $0x890] sm:$0xf0] }
 0x179   : > { %4706 = vmatpush.bf16.msrb.mxu0 %v6509_v61  ;;  %4719 = vmatpush.bf16.msrb.mxu1 %v6637_v0  ;;  %v4465_v61 = vpop.f32.mrf.mxu1  ;;  %v6845_v0 = vor.u32 %v8333_v4, %v6842_v47  ;;  %v8417_v29 = vld [vmem:[%s9023_s27 + $0x9c4] sm:$0xf]  ;;  %v7034_v4 = vld [vmem:[%s9023_s27 + $0x8b0] sm:$0xf0] }
 0x17a   : > { %4732 = vmatpush.bf16.msrb.mxu2 %v6765_v1  ;;  %v6698_v1 = vld [vmem:[%s9023_s27 + $0x610] sm:$0xf0]  ;;  %v4466_v13 = vadd.f32 %v4465_v61, %v4453_v60  ;;  %v8449_v32 = vld [vmem:[%s9023_s27 + $0xac4] sm:$0xf] }
 0x17b   : > { %4745 = vmatpush.bf16.msrb.mxu3 %v6893_v8  ;;  %v7066_v8 = vld [vmem:[%s9023_s27 + $0x8f0] sm:$0xf0]  ;;  %v8481_v35 = vld [vmem:[%s9023_s27 + $0xbc4] sm:$0xf]  ;;  %v4491_v60 = vpop.f32.mrf.mxu3 }
 0x17c   : > { %v7069_v24 = vor.u32 %v8389_v7, %v7066_v8  ;;  %v8381_v46 = vld [vmem:[%s9023_s27 + $0x8a4] sm:$0xf]  ;;  %v7437_v50 = vor.u32 %v8481_v35, %v7434_v36  ;;  %v6986_v36 = vld [vmem:[%s9023_s27 + $0x850] sm:$0xf0] }
 0x17d   : > { %4707 = vmatpush.bf16.msrb.mxu0 %v6493_v16  ;;  %4720 = vmatpush.bf16.msrb.mxu1 %v6621_v18  ;;  %v7322_v16 = vld [vmem:[%s9023_s27 + $0xaf0] sm:$0xf0]  ;;  %v6701_v18 = vor.u32 %v8297_v59, %v6698_v1  ;;  %v8413_v47 = vld [vmem:[%s9023_s27 + $0x9a4] sm:$0xf]  ;;  %v7037_v59 = vor.u32 %v8381_v46, %v7034_v4 }
 0x17e   : > { %4733 = vmatpush.bf16.msrb.mxu2 %v6749_v19  ;;  %v8485_v19 = vld [vmem:[%s9023_s27 + $0xbe4] sm:$0xf]  ;;  %v7325_v26 = vor.u32 %v8453_v62, %v7322_v16  ;;  %v7165_v61 = vor.u32 %v8413_v47, %v7162_v51  ;;  %v7402_v62 = vld [vmem:[%s9023_s27 + $0xb90] sm:$0xf0] }
 0x17f   : > { %4746 = vmatpush.bf16.msrb.mxu3 %v6877_v25  ;;  %v7197_v25 = vor.u32 %v8421_v9, %v7194_v15  ;;  %v7453_v30 = vor.u32 %v8485_v19, %v7450_v20  ;;  %v8445_v53 = vld [vmem:[%s9023_s27 + $0xaa4] sm:$0xf]  ;;  %v7146_v9 = vld [vmem:[%s9023_s27 + $0x990] sm:$0xf0] }
 0x180   : > { %v8477_v57 = vld [vmem:[%s9023_s27 + $0xba4] sm:$0xf]  ;;  %v7002_v20 = vld [vmem:[%s9023_s27 + $0x870] sm:$0xf0] }
 0x181   : > { %4708 = vmatpush.bf16.msrb.mxu0 %v6477_v31  ;;  %4721 = vmatpush.bf16.msrb.mxu1 %v6605_v33  ;;  %v7178_v31 = vld [vmem:[%s9023_s27 + $0x9d0] sm:$0xf0]  ;;  %v4467_v37 = vpop.f32.mrf.mxu1  ;;  %v8377_v3 = vld [vmem:[%s9023_s27 + $0x884] sm:$0xf]  ;;  %v7421_v8 = vor.u32 %v8477_v57, %v7418_v58 }
 0x182   : > { %4734 = vmatpush.bf16.msrb.mxu2 %v6733_v34  ;;  %v7306_v33 = vld [vmem:[%s9023_s27 + $0xad0] sm:$0xf0]  ;;  %v4454_v34 = vpop.f32.mrf.mxu0  ;;  %v7181_v41 = vor.u32 %v8417_v29, %v7178_v31  ;;  %v8409_v7 = vld [vmem:[%s9023_s27 + $0x984] sm:$0xf]  ;;  %v7021_v16 = vor.u32 %v8377_v3, %v7018_v5 }
 0x183   : > { %4747 = vmatpush.bf16.msrb.mxu3 %v6861_v40  ;;  %v7053_v40 = vor.u32 %v8385_v27, %v7050_v28  ;;  %v7309_v44 = vor.u32 %v8449_v32, %v7306_v33  ;;  %v8473_v15 = vld [vmem:[%s9023_s27 + $0xb84] sm:$0xf]  ;;  %v7258_v28 = vld [vmem:[%s9023_s27 + $0xa70] sm:$0xf0]  ;;  %v4493_v32 = vpop.f32.mrf.mxu3 }
 0x184   : > { %v8373_v19 = vld [vmem:[%s9023_s27 + $0x864] sm:$0xf]  ;;  %v7242_v46 = vld [vmem:[%s9023_s27 + $0xa50] sm:$0xf0] }
 0x185   : > { %4709 = vmatpush.bf16.msrb.mxu0 %v6461_v49  ;;  %4722 = vmatpush.bf16.msrb.mxu1 %v6589_v55  ;;  %v4478_v49 = vpop.f32.mrf.mxu2  ;;  %v7290_v55 = vld [vmem:[%s9023_s27 + $0xab0] sm:$0xf0]  ;;  %v8437_v27 = vld [vmem:[%s9023_s27 + $0xa64] sm:$0xf]  ;;  %v7005_v31 = vor.u32 %v8373_v19, %v7002_v20 }
 0x186   : > { %4735 = vmatpush.bf16.msrb.mxu2 %v6717_v56  ;;  %v4479_v56 = vadd.f32 %v4478_v49, %v4466_v13  ;;  %v8441_v13 = vld [vmem:[%s9023_s27 + $0xa84] sm:$0xf]  ;;  %v7261_v34 = vor.u32 %v8437_v27, %v7258_v28  ;;  %v7370_v47 = vld [vmem:[%s9023_s27 + $0xb50] sm:$0xf0] }
 0x187   : > { %4748 = vmatpush.bf16.msrb.mxu3 %v6845_v0  ;;  %v7293_v0 = vor.u32 %v8445_v53, %v7290_v55  ;;  %v8469_v29 = vld [vmem:[%s9023_s27 + $0xb64] sm:$0xf]  ;;  %v6970_v55 = vld [vmem:[%s9023_s27 + $0x830] sm:$0xf0] }
 0x188   : > { %v9542_v1 = vadd.f32 %v4491_v60, %v4479_v56  ;;  %v8369_v35 = vld [vmem:[%s9023_s27 + $0x844] sm:$0xf]  ;;  %v7098_v58 = vld [vmem:[%s9023_s27 + $0x930] sm:$0xf0] }
 0x189   : > { %4710 = vmatpush.bf16.msrb.mxu0 %v6445_v14  ;;  %4723 = vmatpush.bf16.msrb.mxu1 %v6573_v17  ;;  %v7274_v14 = vld [vmem:[%s9023_s27 + $0xa90] sm:$0xf0]  ;;  %v7149_v17 = vor.u32 %v8409_v7, %v7146_v9  ;;  %v8401_v37 = vld [vmem:[%s9023_s27 + $0x944] sm:$0xf]  ;;  %v6989_v49 = vor.u32 %v8369_v35, %v6986_v36 }
 0x18a   : > { %4736 = vmatpush.bf16.msrb.mxu2 %v6701_v18  ;;  %v7277_v18 = vor.u32 %v8441_v13, %v7274_v14  ;;  %v8465_v4 = vld [vmem:[%s9023_s27 + $0xb44] sm:$0xf]  ;;  %v7226_v60 = vld [vmem:[%s9023_s27 + $0xa30] sm:$0xf0] }
 0x18b   : > { %4749 = vmatpush.bf16.msrb.mxu3 %v6829_v23  ;;  %v8405_v23 = vld [vmem:[%s9023_s27 + $0x964] sm:$0xf]  ;;  %v7373_v57 = vor.u32 %v8465_v4, %v7370_v47  ;;  %v6954_v9 = vld [vmem:[%s9023_s27 + $0x810] sm:$0xf0] }
 0x18c   : > { %4711 = vmatmul.bf16.vlgmr.msrb.gmra.mxu0 %v9240_v38  ;;  %4724 = vmatmul.bf16.vlgmr.msrb.gmra.mxu1 %v9245_v48  ;;  %v8365_v53 = vld [vmem:[%s9023_s27 + $0x824] sm:$0xf]  ;;  %v7210_v19 = vld [vmem:[%s9023_s27 + $0xa10] sm:$0xf0] }
 0x18d   : > { %4755 = vmatpush.bf16.msra.mxu0 %v7069_v24  ;;  %4768 = vmatpush.bf16.msra.mxu1 %v7197_v25  ;;  %v4480_v24 = vpop.f32.mrf.mxu2  ;;  %v7405_v25 = vor.u32 %v8473_v15, %v7402_v62  ;;  %v8397_v56 = vld [vmem:[%s9023_s27 + $0x924] sm:$0xf]  ;;  %v4504_v3 = vpop.f32.mrf.mxu0  ;;  %v6973_v5 = vor.u32 %v8365_v53, %v6970_v55  ;;  %v7082_v62 = vld [vmem:[%s9023_s27 + $0x910] sm:$0xf0] }
 0x18e   : > { %4781 = vmatpush.bf16.msra.mxu2 %v7325_v26  ;;  %4750 = vmatmul.bf16.vlgmr.msrb.gmra.mxu3 %v9262_v12  ;;  %v7130_v26 = vld [vmem:[%s9023_s27 + $0x970] sm:$0xf0]  ;;  %v4505_v7 = vadd.f32 %v4504_v3, %v9542_v1  ;;  %v7101_v13 = vor.u32 %v8397_v56, %v7098_v58  ;;  %v8393_v15 = vld [vmem:[%s9023_s27 + $0x904] sm:$0xf] }
 0x18f   : > { %4794 = vmatpush.bf16.msra.mxu3 %v7453_v30  ;;  %4737 = vmatmul.bf16.vlgmr.msrb.gmra.mxu2 %v9260_v10  ;;  %v7386_v30 = vld [vmem:[%s9023_s27 + $0xb70] sm:$0xf0]  ;;  %v7133_v33 = vor.u32 %v8405_v23, %v7130_v26  ;;  %v8457_v1 = vld [vmem:[%s9023_s27 + $0xb04] sm:$0xf] }
 0x190   : > { %v7338_v20 = vld [vmem:[%s9023_s27 + $0xb10] sm:$0xf0]  ;;  %v8517_v24 = vld [vmem:[%s9023_s27 + $0xce4] sm:$0xf] }
 0x191   : > { %4756 = vmatpush.bf16.msra.mxu0 %v7053_v40  ;;  %4769 = vmatpush.bf16.msra.mxu1 %v7181_v41  ;;  %v7389_v40 = vor.u32 %v8469_v29, %v7386_v30  ;;  %v7114_v41 = vld [vmem:[%s9023_s27 + $0x950] sm:$0xf0]  ;;  %v8549_v26 = vld [vmem:[%s9023_s27 + $0xde4] sm:$0xf]  ;;  %v7341_v35 = vor.u32 %v8457_v1, %v7338_v20 }
 0x192   : > { %4782 = vmatpush.bf16.msra.mxu2 %v7309_v44  ;;  %v8433_v44 = vld [vmem:[%s9023_s27 + $0xa44] sm:$0xf]  ;;  %v7706_v28 = vld [vmem:[%s9023_s27 + $0xdf0] sm:$0xf0] }
 0x193   : > { %4795 = vmatpush.bf16.msra.mxu3 %v7437_v50  ;;  %v7117_v50 = vor.u32 %v8401_v37, %v7114_v41  ;;  %v7245_v51 = vor.u32 %v8433_v44, %v7242_v46  ;;  %v8581_v29 = vld [vmem:[%s9023_s27 + $0xee4] sm:$0xf]  ;;  %v7834_v30 = vld [vmem:[%s9023_s27 + $0xef0] sm:$0xf0]  ;;  %v7709_v37 = vor.u32 %v8549_v26, %v7706_v28 }
 0x194   : > { %v8513_v41 = vld [vmem:[%s9023_s27 + $0xcc4] sm:$0xf]  ;;  %v7562_v44 = vld [vmem:[%s9023_s27 + $0xcd0] sm:$0xf0] }
 0x195   : > { %4757 = vmatpush.bf16.msra.mxu0 %v7037_v59  ;;  %4770 = vmatpush.bf16.msra.mxu1 %v7165_v61  ;;  %v8429_v59 = vld [vmem:[%s9023_s27 + $0xa24] sm:$0xf]  ;;  %v4506_v4 = vpop.f32.mrf.mxu0  ;;  %v7946_v55 = vld [vmem:[%s9023_s27 + $0xfd0] sm:$0xf0] }
 0x196   : > { %4783 = vmatpush.bf16.msra.mxu2 %v7293_v0  ;;  %v8461_v61 = vld [vmem:[%s9023_s27 + $0xb24] sm:$0xf]  ;;  %v7354_v0 = vld [vmem:[%s9023_s27 + $0xb30] sm:$0xf0]  ;;  %v7229_v14 = vor.u32 %v8429_v59, %v7226_v60 }
 0x197   : > { %4796 = vmatpush.bf16.msra.mxu3 %v7421_v8  ;;  %v8361_v8 = vld [vmem:[%s9023_s27 + $0x804] sm:$0xf]  ;;  %v7530_v1 = vld [vmem:[%s9023_s27 + $0xc90] sm:$0xf0] }
 0x198   : > { %v6957_v27 = vor.u32 %v8361_v8, %v6954_v9  ;;  %v8545_v46 = vld [vmem:[%s9023_s27 + $0xdc4] sm:$0xf]  ;;  %v7802_v8 = vld [vmem:[%s9023_s27 + $0xeb0] sm:$0xf0] }
 0x199   : > { %4758 = vmatpush.bf16.msra.mxu0 %v7021_v16  ;;  %4771 = vmatpush.bf16.msra.mxu1 %v7149_v17  ;;  %v8425_v16 = vld [vmem:[%s9023_s27 + $0xa04] sm:$0xf]  ;;  %v4517_v17 = vpop.f32.mrf.mxu1  ;;  %v7658_v26 = vld [vmem:[%s9023_s27 + $0xd90] sm:$0xf0] }
 0x19a   : > { %4784 = vmatpush.bf16.msra.mxu2 %v7277_v18  ;;  %v7357_v18 = vor.u32 %v8461_v61, %v7354_v0  ;;  %v4518_v23 = vadd.f32 %v4517_v17, %v4505_v7  ;;  %v7213_v32 = vor.u32 %v8425_v16, %v7210_v19  ;;  %v8609_v53 = vld [vmem:[%s9023_s27 + $0xfc4] sm:$0xf]  ;;  %v7546_v61 = vld [vmem:[%s9023_s27 + $0xcb0] sm:$0xf0] }
 0x19b   : > { %4797 = vmatpush.bf16.msra.mxu3 %v7405_v25  ;;  %v7578_v25 = vld [vmem:[%s9023_s27 + $0xcf0] sm:$0xf0]  ;;  %v8509_v60 = vld [vmem:[%s9023_s27 + $0xca4] sm:$0xf]  ;;  %v7949_v3 = vor.u32 %v8609_v53, %v7946_v55  ;;  %v4543_v16 = vpop.f32.mrf.mxu3 }
 0x19c   : > { %v7581_v36 = vor.u32 %v8517_v24, %v7578_v25  ;;  %v8541_v0 = vld [vmem:[%s9023_s27 + $0xda4] sm:$0xf]  ;;  %v7498_v55 = vld [vmem:[%s9023_s27 + $0xc50] sm:$0xf0] }
 0x19d   : > { %4759 = vmatpush.bf16.msra.mxu0 %v7005_v31  ;;  %4772 = vmatpush.bf16.msra.mxu1 %v7133_v33  ;;  %v7085_v31 = vor.u32 %v8393_v15, %v7082_v62  ;;  %v8613_v33 = vld [vmem:[%s9023_s27 + $0xfe4] sm:$0xf]  ;;  %v7549_v15 = vor.u32 %v8509_v60, %v7546_v61  ;;  %v7754_v60 = vld [vmem:[%s9023_s27 + $0xe50] sm:$0xf0] }
 0x19e   : > { %4785 = vmatpush.bf16.msra.mxu2 %v7261_v34  ;;  %v7962_v34 = vld [vmem:[%s9023_s27 + $0xff0] sm:$0xf0]  ;;  %v8573_v7 = vld [vmem:[%s9023_s27 + $0xea4] sm:$0xf] }
 0x19f   : > { %4798 = vmatpush.bf16.msra.mxu3 %v7389_v40  ;;  %v7837_v40 = vor.u32 %v8581_v29, %v7834_v30  ;;  %v7965_v47 = vor.u32 %v8613_v33, %v7962_v34  ;;  %v8605_v9 = vld [vmem:[%s9023_s27 + $0xfa4] sm:$0xf]  ;;  %v7914_v29 = vld [vmem:[%s9023_s27 + $0xf90] sm:$0xf0] }
 0x1a0   : > { %v8505_v19 = vld [vmem:[%s9023_s27 + $0xc84] sm:$0xf]  ;;  %v7514_v34 = vld [vmem:[%s9023_s27 + $0xc70] sm:$0xf0] }
 0x1a1   : > { %4760 = vmatpush.bf16.msra.mxu0 %v6989_v49  ;;  %4773 = vmatpush.bf16.msra.mxu1 %v7117_v50  ;;  %v7690_v49 = vld [vmem:[%s9023_s27 + $0xdd0] sm:$0xf0]  ;;  %v8577_v50 = vld [vmem:[%s9023_s27 + $0xec4] sm:$0xf]  ;;  %v4519_v56 = vpop.f32.mrf.mxu1  ;;  %v7533_v30 = vor.u32 %v8505_v19, %v7530_v1 }
 0x1a2   : > { %4786 = vmatpush.bf16.msra.mxu2 %v7245_v51  ;;  %v7818_v51 = vld [vmem:[%s9023_s27 + $0xed0] sm:$0xf0]  ;;  %v7693_v58 = vor.u32 %v8545_v46, %v7690_v49  ;;  %v8537_v20 = vld [vmem:[%s9023_s27 + $0xd84] sm:$0xf] }
 0x1a3   : > { %4799 = vmatpush.bf16.msra.mxu3 %v7373_v57  ;;  %v7565_v57 = vor.u32 %v8513_v41, %v7562_v44  ;;  %v7821_v59 = vor.u32 %v8577_v50, %v7818_v51  ;;  %v8601_v28 = vld [vmem:[%s9023_s27 + $0xf84] sm:$0xf]  ;;  %v7770_v41 = vld [vmem:[%s9023_s27 + $0xe70] sm:$0xf0]  ;;  %v4545_v49 = vpop.f32.mrf.mxu3 }
 0x1a4   : > { %v8501_v33 = vld [vmem:[%s9023_s27 + $0xc64] sm:$0xf]  ;;  %v7898_v46 = vld [vmem:[%s9023_s27 + $0xf70] sm:$0xf0] }
 0x1a5   : > { %4761 = vmatpush.bf16.msra.mxu0 %v6973_v5  ;;  %4774 = vmatpush.bf16.msra.mxu1 %v7101_v13  ;;  %v7674_v5 = vld [vmem:[%s9023_s27 + $0xdb0] sm:$0xf0]  ;;  %v8597_v44 = vld [vmem:[%s9023_s27 + $0xf64] sm:$0xf] }
 0x1a6   : > { %4787 = vmatpush.bf16.msra.mxu2 %v7229_v14  ;;  %v7930_v13 = vld [vmem:[%s9023_s27 + $0xfb0] sm:$0xf0]  ;;  %v4530_v14 = vpop.f32.mrf.mxu2  ;;  %v7677_v17 = vor.u32 %v8541_v0, %v7674_v5  ;;  %v8497_v53 = vld [vmem:[%s9023_s27 + $0xc44] sm:$0xf] }
 0x1a7   : > { %4800 = vmatpush.bf16.msra.mxu3 %v7357_v18  ;;  %v4531_v62 = vadd.f32 %v4530_v14, %v4518_v23  ;;  %v7805_v18 = vor.u32 %v8573_v7, %v7802_v8  ;;  %v7933_v24 = vor.u32 %v8605_v9, %v7930_v13  ;;  %v7786_v23 = vld [vmem:[%s9023_s27 + $0xe90] sm:$0xf0]  ;;  %v8529_v56 = vld [vmem:[%s9023_s27 + $0xd44] sm:$0xf] }
 0x1a8   : > { %v8593_v61 = vld [vmem:[%s9023_s27 + $0xf44] sm:$0xf]  ;;  %v7882_v0 = vld [vmem:[%s9023_s27 + $0xf50] sm:$0xf0] }
 0x1a9   : > { %4762 = vmatpush.bf16.msra.mxu0 %v6957_v27  ;;  %4775 = vmatpush.bf16.msra.mxu1 %v7085_v31  ;;  %v4544_v25 = vadd.f32 %v4543_v16, %v4531_v62  ;;  %v8569_v27 = vld [vmem:[%s9023_s27 + $0xe84] sm:$0xf]  ;;  %v7661_v31 = vor.u32 %v8537_v20, %v7658_v26  ;;  %v7482_v9 = vld [vmem:[%s9023_s27 + $0xc30] sm:$0xf0]  ;;  %v7885_v14 = vor.u32 %v8593_v61, %v7882_v0 }
 0x1aa   : > { %4788 = vmatpush.bf16.msra.mxu2 %v7213_v32  ;;  %v7789_v32 = vor.u32 %v8569_v27, %v7786_v23  ;;  %v8493_v8 = vld [vmem:[%s9023_s27 + $0xc24] sm:$0xf]  ;;  %v7738_v16 = vld [vmem:[%s9023_s27 + $0xe30] sm:$0xf0] }
 0x1ab   : > { %4801 = vmatpush.bf16.msra.mxu3 %v7341_v35  ;;  %v8533_v35 = vld [vmem:[%s9023_s27 + $0xd64] sm:$0xf]  ;;  %v7485_v1 = vor.u32 %v8493_v8, %v7482_v9  ;;  %v7466_v26 = vld [vmem:[%s9023_s27 + $0xc10] sm:$0xf0]  ;;  %v6416_v8 = vld [vmem:[%s9023_s27 + $0x3c8] sm:$0xf] }
 0x1ac   : > { %4763 = vmatmul.bf16.vlgmr.msra.gmra.mxu0 %v9322_v45  ;;  %4776 = vmatmul.bf16.vlgmr.msra.gmra.mxu1 %v9327_v54  ;;  %v8525_v13 = vld [vmem:[%s9023_s27 + $0xd24] sm:$0xf]  ;;  %v8228_v9 = vld [vmem:[%s9023_s27 + $0x3d4] sm:$0xf0] }
 0x1ad   : > { %4807 = vmatpush.bf16.msrb.mxu0 %v7581_v36  ;;  %4820 = vmatpush.bf16.msrb.mxu1 %v7709_v37  ;;  %v7917_v36 = vor.u32 %v8601_v28, %v7914_v29  ;;  %v7642_v37 = vld [vmem:[%s9023_s27 + $0xd70] sm:$0xf0]  ;;  %v8557_v62 = vld [vmem:[%s9023_s27 + $0xe24] sm:$0xf]  ;;  %v4556_v19 = vpop.f32.mrf.mxu0 }
 0x1ae   : > { %4833 = vmatpush.bf16.msrb.mxu2 %v7837_v40  ;;  %4802 = vmatmul.bf16.vlgmr.msra.gmra.mxu3 %v9344_v22  ;;  %v8565_v40 = vld [vmem:[%s9023_s27 + $0xe64] sm:$0xf]  ;;  %v4532_v4 = vpop.f32.mrf.mxu2  ;;  %v7645_v50 = vor.u32 %v8533_v35, %v7642_v37  ;;  %v4557_v20 = vadd.f32 %v4556_v19, %v4544_v25  ;;  %v7741_v23 = vor.u32 %v8557_v62, %v7738_v16  ;;  %v7594_v29 = vld [vmem:[%s9023_s27 + $0xd10] sm:$0xf0]  ;;  %v8136_v37 = vld [vmem:[%s9023_s27 + $0xf4] sm:$0xf0] }
 0x1af   : > { %4846 = vmatpush.bf16.msrb.mxu3 %v7965_v47  ;;  %4789 = vmatmul.bf16.vlgmr.msra.gmra.mxu2 %v9342_v21  ;;  %v7517_v47 = vor.u32 %v8501_v33, %v7514_v34  ;;  %v7773_v51 = vor.u32 %v8565_v40, %v7770_v41  ;;  %v8521_v28 = vld [vmem:[%s9023_s27 + $0xd04] sm:$0xf]  ;;  %v7722_v33 = vld [vmem:[%s9023_s27 + $0xe10] sm:$0xf0]  ;;  %v6176_v40 = vld [vmem:[%s9023_s27 + $0x1e8] sm:$0xf]  ;;  %v6417_v19 = vor.u32 %v8228_v9, %v6416_v8 }
 0x1b0   : > { %v8585_v25 = vld [vmem:[%s9023_s27 + $0xf04] sm:$0xf]  ;;  %v7850_v34 = vld [vmem:[%s9023_s27 + $0xf10] sm:$0xf0]  ;;  %v8200_v4 = vld [vmem:[%s9023_s27 + $0x2f4] sm:$0xf0] }
 0x1b1   : > { %4808 = vmatpush.bf16.msrb.mxu0 %v7565_v57  ;;  %4821 = vmatpush.bf16.msrb.mxu1 %v7693_v58  ;;  %v7901_v57 = vor.u32 %v8597_v44, %v7898_v46  ;;  %v7626_v58 = vld [vmem:[%s9023_s27 + $0xd50] sm:$0xf0]  ;;  %v8168_v44 = vld [vmem:[%s9023_s27 + $0x1f4] sm:$0xf0]  ;;  %v6304_v46 = vld [vmem:[%s9023_s27 + $0x2e8] sm:$0xf] }
 0x1b2   : > { %4834 = vmatpush.bf16.msrb.mxu2 %v7821_v59  ;;  %v8561_v59 = vld [vmem:[%s9023_s27 + $0xe44] sm:$0xf]  ;;  %v7629_v5 = vor.u32 %v8529_v56, %v7626_v58  ;;  %v6177_v56 = vor.u32 %v8168_v44, %v6176_v40  ;;  %v6032_v58 = vld [vmem:[%s9023_s27 + $0xc8] sm:$0xf]  ;;  %v8156_v40 = vld [vmem:[%s9023_s27 + $0x194] sm:$0xf0] }
 0x1b3   : > { %4847 = vmatpush.bf16.msrb.mxu3 %v7949_v3  ;;  %v7501_v3 = vor.u32 %v8497_v53, %v7498_v55  ;;  %v7757_v7 = vor.u32 %v8561_v59, %v7754_v60  ;;  %v7853_v53 = vor.u32 %v8585_v25, %v7850_v34  ;;  %v8132_v59 = vld [vmem:[%s9023_s27 + $0xd4] sm:$0xf0]  ;;  %v6160_v60 = vld [vmem:[%s9023_s27 + $0x1c8] sm:$0xf] }
 0x1b4   : > { %v6016_v16 = vld [vmem:[%s9023_s27 + $0xa8] sm:$0xf]  ;;  %v8124_v25 = vld [vmem:[%s9023_s27 + $0x94] sm:$0xf0] }
 0x1b5   : > { %4809 = vmatpush.bf16.msrb.mxu0 %v7549_v15  ;;  %4822 = vmatpush.bf16.msrb.mxu1 %v7677_v17  ;;  %v7610_v15 = vld [vmem:[%s9023_s27 + $0xd30] sm:$0xf0]  ;;  %v8589_v17 = vld [vmem:[%s9023_s27 + $0xf24] sm:$0xf]  ;;  %v4558_v61 = vpop.f32.mrf.mxu0  ;;  %v6128_v34 = vld [vmem:[%s9023_s27 + $0x188] sm:$0xf] }
 0x1b6   : > { %4835 = vmatpush.bf16.msrb.mxu2 %v7805_v18  ;;  %v7866_v18 = vld [vmem:[%s9023_s27 + $0xf30] sm:$0xf0]  ;;  %v7613_v27 = vor.u32 %v8525_v13, %v7610_v15  ;;  %v6384_v44 = vld [vmem:[%s9023_s27 + $0x388] sm:$0xf]  ;;  %v8116_v9 = vld [vmem:[%s9023_s27 + $0x54] sm:$0xf0] }
 0x1b7   : > { %4848 = vmatpush.bf16.msrb.mxu3 %v7933_v24  ;;  %v8489_v24 = vld [vmem:[%s9023_s27 + $0xc04] sm:$0xf]  ;;  %v5968_v8 = vld [vmem:[%s9023_s27 + $0x48] sm:$0xf] }
 0x1b8   : > { %v7469_v41 = vor.u32 %v8489_v24, %v7466_v26  ;;  %v8192_v24 = vld [vmem:[%s9023_s27 + $0x2b4] sm:$0xf0]  ;;  %v6400_v26 = vld [vmem:[%s9023_s27 + $0x3a8] sm:$0xf] }
 0x1b9   : > { %4810 = vmatpush.bf16.msrb.mxu0 %v7533_v30  ;;  %4823 = vmatpush.bf16.msrb.mxu1 %v7661_v31  ;;  %v8553_v30 = vld [vmem:[%s9023_s27 + $0xe04] sm:$0xf]  ;;  %v4569_v31 = vpop.f32.mrf.mxu1 }
 0x1ba   : > { %4836 = vmatpush.bf16.msrb.mxu2 %v7789_v32  ;;  %v7869_v32 = vor.u32 %v8589_v17, %v7866_v18  ;;  %v4570_v35 = vadd.f32 %v4569_v31, %v4557_v20  ;;  %v7725_v49 = vor.u32 %v8553_v30, %v7722_v33  ;;  %v8128_v17 = vld [vmem:[%s9023_s27 + $0xb4] sm:$0xf0]  ;;  %v6144_v18 = vld [vmem:[%s9023_s27 + $0x1a8] sm:$0xf] }
 0x1bb   : > { %4849 = vmatpush.bf16.msrb.mxu3 %v7917_v36  ;;  %v6048_v36 = vld [vmem:[%s9023_s27 + $0xe8] sm:$0xf] }
 0x1bc   : > { %v6049_v55 = vor.u32 %v8136_v37, %v6048_v36  ;;  %v6272_v20 = vld [vmem:[%s9023_s27 + $0x2a8] sm:$0xf] }
 0x1bd   : > { %4811 = vmatpush.bf16.msrb.mxu0 %v7517_v47  ;;  %4824 = vmatpush.bf16.msrb.mxu1 %v7645_v50  ;;  %v7597_v47 = vor.u32 %v8521_v28, %v7594_v29  ;;  %v6432_v50 = vld [vmem:[%s9023_s27 + $0x3e8] sm:$0xf]  ;;  %v6017_v28 = vor.u32 %v8128_v17, %v6016_v16  ;;  %v4595_v30 = vpop.f32.mrf.mxu3  ;;  %v8180_v16 = vld [vmem:[%s9023_s27 + $0x254] sm:$0xf0] }
 0x1be   : > { %4837 = vmatpush.bf16.msrb.mxu2 %v7773_v51  ;;  %v8232_v51 = vld [vmem:[%s9023_s27 + $0x3f4] sm:$0xf0]  ;;  %v6000_v33 = vld [vmem:[%s9023_s27 + $0x88] sm:$0xf] }
 0x1bf   : > { %4850 = vmatpush.bf16.msrb.mxu3 %v7901_v57  ;;  %v6305_v57 = vor.u32 %v8200_v4, %v6304_v46  ;;  %v6433_v0 = vor.u32 %v8232_v51, %v6432_v50  ;;  %v8220_v46 = vld [vmem:[%s9023_s27 + $0x394] sm:$0xf0]  ;;  %v6001_v4 = vor.u32 %v8124_v25, %v6000_v33  ;;  %v5984_v50 = vld [vmem:[%s9023_s27 + $0x68] sm:$0xf] }
 0x1c0   : > { %v8120_v51 = vld [vmem:[%s9023_s27 + $0x74] sm:$0xf0]  ;;  %v6352_v17 = vld [vmem:[%s9023_s27 + $0x348] sm:$0xf] }
 0x1c1   : > { %4812 = vmatpush.bf16.msrb.mxu0 %v7501_v3  ;;  %4825 = vmatpush.bf16.msrb.mxu1 %v7629_v5  ;;  %v8164_v3 = vld [vmem:[%s9023_s27 + $0x1d4] sm:$0xf0]  ;;  %v6288_v5 = vld [vmem:[%s9023_s27 + $0x2c8] sm:$0xf]  ;;  %v4571_v13 = vpop.f32.mrf.mxu1 }
 0x1c2   : > { %4838 = vmatpush.bf16.msrb.mxu2 %v7757_v7  ;;  %v8196_v7 = vld [vmem:[%s9023_s27 + $0x2d4] sm:$0xf0]  ;;  %v6161_v15 = vor.u32 %v8164_v3, %v6160_v60  ;;  %v6096_v13 = vld [vmem:[%s9023_s27 + $0x148] sm:$0xf] }
 0x1c3   : > { %4851 = vmatpush.bf16.msrb.mxu3 %v7885_v14  ;;  %v6033_v14 = vor.u32 %v8132_v59, %v6032_v58  ;;  %v6289_v62 = vor.u32 %v8196_v7, %v6288_v5  ;;  %v8184_v58 = vld [vmem:[%s9023_s27 + $0x274] sm:$0xf0]  ;;  %v6368_v59 = vld [vmem:[%s9023_s27 + $0x368] sm:$0xf] }
 0x1c4   : > { %v8216_v60 = vld [vmem:[%s9023_s27 + $0x374] sm:$0xf0] }
 0x1c5   : > { %4813 = vmatpush.bf16.msrb.mxu0 %v7485_v1  ;;  %4826 = vmatpush.bf16.msrb.mxu1 %v7613_v27  ;;  %v8160_v1 = vld [vmem:[%s9023_s27 + $0x1b4] sm:$0xf0]  ;;  %v4597_v3 = vpop.f32.mrf.mxu3 }
 0x1c6   : > { %4839 = vmatpush.bf16.msrb.mxu2 %v7741_v23  ;;  %v8224_v27 = vld [vmem:[%s9023_s27 + $0x3b4] sm:$0xf0]  ;;  %v4582_v23 = vpop.f32.mrf.mxu2  ;;  %v6145_v31 = vor.u32 %v8160_v1, %v6144_v18 }
 0x1c7   : > { %4852 = vmatpush.bf16.msrb.mxu3 %v7869_v32  ;;  %v4583_v29 = vadd.f32 %v4582_v23, %v4570_v35  ;;  %v6273_v32 = vor.u32 %v8192_v24, %v6272_v20  ;;  %v6401_v36 = vor.u32 %v8224_v27, %v6400_v26  ;;  %v8188_v35 = vld [vmem:[%s9023_s27 + $0x294] sm:$0xf0]  ;;  %v5952_v24 = vld [vmem:[%s9023_s27 + $0x28] sm:$0xf] }
 0x1c8   : > { %v8212_v18 = vld [vmem:[%s9023_s27 + $0x354] sm:$0xf0]  ;;  %v6080_v27 = vld [vmem:[%s9023_s27 + $0x128] sm:$0xf] }
 0x1c9   : > { %4814 = vmatpush.bf16.msrb.mxu0 %v7469_v41  ;;  %4827 = vmatpush.bf16.msrb.mxu1 %v7597_v47  ;;  %v4596_v37 = vadd.f32 %v4595_v30, %v4583_v29  ;;  %v6256_v41 = vld [vmem:[%s9023_s27 + $0x288] sm:$0xf]  ;;  %v6129_v47 = vor.u32 %v8156_v40, %v6128_v34  ;;  %v8112_v26 = vld [vmem:[%s9023_s27 + $0x34] sm:$0xf0]  ;;  %v6353_v23 = vor.u32 %v8212_v18, %v6352_v17 }
 0x1ca   : > { %4840 = vmatpush.bf16.msrb.mxu2 %v7725_v49  ;;  %v6257_v49 = vor.u32 %v8188_v35, %v6256_v41  ;;  %v6208_v29 = vld [vmem:[%s9023_s27 + $0x228] sm:$0xf]  ;;  %v8176_v30 = vld [vmem:[%s9023_s27 + $0x234] sm:$0xf0]  ;;  %v5953_v25 = vor.u32 %v8112_v26, %v5952_v24 }
 0x1cb   : > { %4853 = vmatpush.bf16.msrb.mxu3 %v7853_v53  ;;  %v6112_v53 = vld [vmem:[%s9023_s27 + $0x168] sm:$0xf]  ;;  %v8108_v41 = vld [vmem:[%s9023_s27 + $0x14] sm:$0xf0] }
 0x1cc   : > { %4815 = vmatmul.bf16.vlgmr.msrb.gmra.mxu0 %v9401_v63  ;;  %4828 = vmatmul.bf16.vlgmr.msrb.gmra.mxu1 %v9404_v2  ;;  %v5936_v40 = vld [vmem:[%s9023_s27 + $0x8] sm:$0xf] }
 0x1cd   : > { %4859 = vmatpush.bf16.msra.mxu0 %v6049_v55  ;;  %4872 = vmatpush.bf16.msra.mxu1 %v6177_v56  ;;  %v6385_v55 = vor.u32 %v8220_v46, %v6384_v44  ;;  %v8152_v56 = vld [vmem:[%s9023_s27 + $0x174] sm:$0xf0]  ;;  %v6209_v44 = vor.u32 %v8176_v30, %v6208_v29  ;;  %v6064_v46 = vld [vmem:[%s9023_s27 + $0x108] sm:$0xf] }
 0x1ce   : > { %4885 = vmatpush.bf16.msra.mxu2 %v6305_v57  ;;  %4854 = vmatmul.bf16.vlgmr.msrb.gmra.mxu3 %v9426_v43  ;;  %v6240_v57 = vld [vmem:[%s9023_s27 + $0x268] sm:$0xf]  ;;  %v4584_v61 = vpop.f32.mrf.mxu2  ;;  %v6113_v5 = vor.u32 %v8152_v56, %v6112_v53  ;;  %v8204_v53 = vld [vmem:[%s9023_s27 + $0x314] sm:$0xf0] }
 0x1cf   : > { %4898 = vmatpush.bf16.msra.mxu3 %v6433_v0  ;;  %4841 = vmatmul.bf16.vlgmr.msrb.gmra.mxu2 %v9422_v39  ;;  %v5985_v0 = vor.u32 %v8120_v51, %v5984_v50  ;;  %v6241_v7 = vor.u32 %v8184_v58, %v6240_v57  ;;  %v4608_v33 = vpop.f32.mrf.mxu0  ;;  %v8172_v50 = vld [vmem:[%s9023_s27 + $0x214] sm:$0xf0]  ;;  %v6320_v51 = vld [vmem:[%s9023_s27 + $0x308] sm:$0xf]  ;;  %v5937_v58 = vor.u32 %v8108_v41, %v5936_v40 }
 0x1d0   : > { %v4609_v34 = vadd.f32 %v4608_v33, %v4596_v37  ;;  %v8264_v56 = vld [vmem:[%s9023_s27 + $0x4f4] sm:$0xf0]  ;;  %v6688_v57 = vld [vmem:[%s9023_s27 + $0x5e8] sm:$0xf] }
 0x1d1   : > { %4860 = vmatpush.bf16.msra.mxu0 %v6033_v14  ;;  %4873 = vmatpush.bf16.msra.mxu1 %v6161_v15  ;;  %v6369_v14 = vor.u32 %v8216_v60, %v6368_v59  ;;  %v8148_v15 = vld [vmem:[%s9023_s27 + $0x154] sm:$0xf0]  ;;  %v6816_v60 = vld [vmem:[%s9023_s27 + $0x6e8] sm:$0xf] }
 0x1d2   : > { %4886 = vmatpush.bf16.msra.mxu2 %v6289_v62  ;;  %v6224_v62 = vld [vmem:[%s9023_s27 + $0x248] sm:$0xf]  ;;  %v6097_v1 = vor.u32 %v8148_v15, %v6096_v13  ;;  %v8296_v59 = vld [vmem:[%s9023_s27 + $0x5f4] sm:$0xf0] }
 0x1d3   : > { %4899 = vmatpush.bf16.msra.mxu3 %v6417_v19  ;;  %v5969_v19 = vor.u32 %v8116_v9, %v5968_v8  ;;  %v6225_v20 = vor.u32 %v8180_v16, %v6224_v62  ;;  %v8328_v61 = vld [vmem:[%s9023_s27 + $0x6f4] sm:$0xf0]  ;;  %v6321_v8 = vor.u32 %v8204_v53, %v6320_v51  ;;  %v6689_v13 = vor.u32 %v8296_v59, %v6688_v57  ;;  %v6544_v15 = vld [vmem:[%s9023_s27 + $0x4c8] sm:$0xf] }
 0x1d4   : > { %v8260_v62 = vld [vmem:[%s9023_s27 + $0x4d4] sm:$0xf0]  ;;  %v6672_v16 = vld [vmem:[%s9023_s27 + $0x5c8] sm:$0xf] }
 0x1d5   : > { %4861 = vmatpush.bf16.msra.mxu0 %v6017_v28  ;;  %4874 = vmatpush.bf16.msra.mxu1 %v6145_v31  ;;  %v8144_v28 = vld [vmem:[%s9023_s27 + $0x134] sm:$0xf0]  ;;  %v6336_v31 = vld [vmem:[%s9023_s27 + $0x328] sm:$0xf] }
 0x1d6   : > { %4887 = vmatpush.bf16.msra.mxu2 %v6273_v32  ;;  %v8208_v32 = vld [vmem:[%s9023_s27 + $0x334] sm:$0xf0]  ;;  %v6081_v35 = vor.u32 %v8144_v28, %v6080_v27  ;;  %v6928_v26 = vld [vmem:[%s9023_s27 + $0x7c8] sm:$0xf] }
 0x1d7   : > { %4900 = vmatpush.bf16.msra.mxu3 %v6401_v36  ;;  %v4621_v36 = vpop.f32.mrf.mxu1  ;;  %v4610_v17 = vpop.f32.mrf.mxu0  ;;  %v8356_v27 = vld [vmem:[%s9023_s27 + $0x7d4] sm:$0xf0]  ;;  %v6528_v30 = vld [vmem:[%s9023_s27 + $0x4a8] sm:$0xf] }
 0x1d8   : > { %v4622_v37 = vadd.f32 %v4621_v36, %v4609_v34  ;;  %v6929_v33 = vor.u32 %v8356_v27, %v6928_v26  ;;  %v6784_v34 = vld [vmem:[%s9023_s27 + $0x6a8] sm:$0xf]  ;;  %v8320_v36 = vld [vmem:[%s9023_s27 + $0x6b4] sm:$0xf0] }
 0x1d9   : > { %4862 = vmatpush.bf16.msra.mxu0 %v6001_v4  ;;  %4875 = vmatpush.bf16.msra.mxu1 %v6129_v47  ;;  %v8140_v4 = vld [vmem:[%s9023_s27 + $0x114] sm:$0xf0]  ;;  %v6192_v47 = vld [vmem:[%s9023_s27 + $0x208] sm:$0xf]  ;;  %v6785_v51 = vor.u32 %v8320_v36, %v6784_v34 }
 0x1da   : > { %4888 = vmatpush.bf16.msra.mxu2 %v6257_v49  ;;  %v6337_v49 = vor.u32 %v8208_v32, %v6336_v31  ;;  %v6193_v3 = vor.u32 %v8172_v50, %v6192_v47  ;;  %v8256_v31 = vld [vmem:[%s9023_s27 + $0x4b4] sm:$0xf0]  ;;  %v6656_v32 = vld [vmem:[%s9023_s27 + $0x5a8] sm:$0xf]  ;;  %v8686_v47 = vld [vmem:[%s9493_s18] sm:$0xf] }
 0x1db   : > { %4901 = vmatpush.bf16.msra.mxu3 %v6385_v55  ;;  %v6560_v55 = vld [vmem:[%s9023_s27 + $0x4e8] sm:$0xf]  ;;  %v8352_v41 = vld [vmem:[%s9023_s27 + $0x7b4] sm:$0xf0] }
 0x1dc   : > { %v6561_v9 = vor.u32 %v8264_v56, %v6560_v55  ;;  %v6912_v40 = vld [vmem:[%s9023_s27 + $0x7a8] sm:$0xf]  ;;  %v8252_v55 = vld [vmem:[%s9023_s27 + $0x494] sm:$0xf0] }
 0x1dd   : > { %4863 = vmatpush.bf16.msra.mxu0 %v5985_v0  ;;  %4876 = vmatpush.bf16.msra.mxu1 %v6113_v5  ;;  %v6065_v0 = vor.u32 %v8140_v4, %v6064_v46  ;;  %v6944_v5 = vld [vmem:[%s9023_s27 + $0x7e8] sm:$0xf]  ;;  %v6913_v57 = vor.u32 %v8352_v41, %v6912_v40  ;;  %v8308_v36 = vld [vmem:[%s9023_s27 + $0x654] sm:$0xf0] }
 0x1de   : > { %4889 = vmatpush.bf16.msra.mxu2 %v6241_v7  ;;  %v8360_v7 = vld [vmem:[%s9023_s27 + $0x7f4] sm:$0xf0]  ;;  %v6512_v53 = vld [vmem:[%s9023_s27 + $0x488] sm:$0xf] }
 0x1df   : > { %4902 = vmatpush.bf16.msra.mxu3 %v6369_v14  ;;  %v6817_v14 = vor.u32 %v8328_v61, %v6816_v60  ;;  %v6945_v18 = vor.u32 %v8360_v7, %v6944_v5  ;;  %v4623_v24 = vpop.f32.mrf.mxu1  ;;  %v4647_v4 = vpop.f32.mrf.mxu3  ;;  %v6640_v56 = vld [vmem:[%s9023_s27 + $0x588] sm:$0xf]  ;;  %v8316_v60 = vld [vmem:[%s9023_s27 + $0x694] sm:$0xf0]  ;;  %v6513_v5 = vor.u32 %v8252_v55, %v6512_v53 }
 0x1e0   : > { %v6768_v59 = vld [vmem:[%s9023_s27 + $0x688] sm:$0xf]  ;;  %v8344_v24 = vld [vmem:[%s9023_s27 + $0x774] sm:$0xf0] }
 0x1e1   : > { %4864 = vmatpush.bf16.msra.mxu0 %v5969_v19  ;;  %4877 = vmatpush.bf16.msra.mxu1 %v6097_v1  ;;  %v8292_v19 = vld [vmem:[%s9023_s27 + $0x5d4] sm:$0xf0]  ;;  %v6800_v1 = vld [vmem:[%s9023_s27 + $0x6c8] sm:$0xf] }
 0x1e2   : > { %4890 = vmatpush.bf16.msra.mxu2 %v6225_v20  ;;  %v8324_v20 = vld [vmem:[%s9023_s27 + $0x6d4] sm:$0xf0]  ;;  %v6673_v28 = vor.u32 %v8292_v19, %v6672_v16  ;;  %v6896_v61 = vld [vmem:[%s9023_s27 + $0x788] sm:$0xf] }
 0x1e3   : > { %4903 = vmatpush.bf16.msra.mxu3 %v6353_v23  ;;  %v6545_v23 = vor.u32 %v8260_v62, %v6544_v15  ;;  %v6801_v29 = vor.u32 %v8324_v20, %v6800_v1  ;;  %v8248_v15 = vld [vmem:[%s9023_s27 + $0x474] sm:$0xf0]  ;;  %v6624_v62 = vld [vmem:[%s9023_s27 + $0x568] sm:$0xf] }
 0x1e4   : > { %v6752_v19 = vld [vmem:[%s9023_s27 + $0x668] sm:$0xf]  ;;  %v8312_v1 = vld [vmem:[%s9023_s27 + $0x674] sm:$0xf0] }
 0x1e5   : > { %4865 = vmatpush.bf16.msra.mxu0 %v5953_v25  ;;  %4878 = vmatpush.bf16.msra.mxu1 %v6081_v35  ;;  %v8288_v25 = vld [vmem:[%s9023_s27 + $0x5b4] sm:$0xf0]  ;;  %v4634_v35 = vpop.f32.mrf.mxu2  ;;  %v6880_v20 = vld [vmem:[%s9023_s27 + $0x768] sm:$0xf] }
 0x1e6   : > { %4891 = vmatpush.bf16.msra.mxu2 %v6209_v44  ;;  %v6529_v44 = vor.u32 %v8256_v31, %v6528_v30  ;;  %v4635_v46 = vadd.f32 %v4634_v35, %v4622_v37  ;;  %v6657_v50 = vor.u32 %v8288_v25, %v6656_v32  ;;  %v8284_v37 = vld [vmem:[%s9023_s27 + $0x594] sm:$0xf0]  ;;  %v6480_v30 = vld [vmem:[%s9023_s27 + $0x448] sm:$0xf] }
 0x1e7   : > { %4904 = vmatpush.bf16.msra.mxu3 %v6337_v49  ;;  %v1876_v49 = vperm.slane %v8686_v47, 1  ;;  %v8244_v31 = vld [vmem:[%s9023_s27 + $0x454] sm:$0xf0]  ;;  %v6608_v32 = vld [vmem:[%s9023_s27 + $0x548] sm:$0xf] }
 0x1e8   : > { %v8276_v25 = vld [vmem:[%s9023_s27 + $0x554] sm:$0xf0]  ;;  %v6736_v34 = vld [vmem:[%s9023_s27 + $0x648] sm:$0xf] }
 0x1e9   : > { %4866 = vmatpush.bf16.msra.mxu0 %v5937_v58  ;;  %4879 = vmatpush.bf16.msra.mxu1 %v6065_v0  ;;  %v9753_v58 = vadd.f32 %v4647_v4, %v4635_v46  ;;  %v8348_v0 = vld [vmem:[%s9023_s27 + $0x794] sm:$0xf0]  ;;  %v6864_v40 = vld [vmem:[%s9023_s27 + $0x748] sm:$0xf]  ;;  %v6609_v4 = vor.u32 %v8276_v25, %v6608_v32  ;;  %v6737_v47 = vor.u32 %v8308_v36, %v6736_v34 }
 0x1ea   : > { %4892 = vmatpush.bf16.msra.mxu2 %v6193_v3  ;;  %v4660_v3 = vpop.f32.mrf.mxu0  ;;  %v6897_v16 = vor.u32 %v8348_v0, %v6896_v61  ;;  %v8340_v41 = vld [vmem:[%s9023_s27 + $0x754] sm:$0xf0] }
 0x1eb   : > { %4905 = vmatpush.bf16.msra.mxu3 %v6321_v8  ;;  %v4661_v7 = vadd.f32 %v4660_v3, %v1876_v49  ;;  %v4673_v8 = vpop.f32.mrf.mxu1  ;;  %v6464_v49 = vld [vmem:[%s9023_s27 + $0x428] sm:$0xf]  ;;  %v6865_v53 = vor.u32 %v8340_v41, %v6864_v40  ;;  %v8272_v55 = vld [vmem:[%s9023_s27 + $0x534] sm:$0xf0] }
 0x1ec   : > { %4867 = vmatmul.bf16.vlgmr.msra.gmra.mxu0 %v9160_v42  ;;  %4880 = vmatmul.bf16.vlgmr.msra.gmra.mxu1 %v9165_v52  ;;  %v6448_v3 = vld [vmem:[%s9023_s27 + $0x408] sm:$0xf]  ;;  %v8488_v32 = vld [vmem:[%s9023_s27 + $0xbf4] sm:$0xf0] }
 0x1ed   : > { %4911 = vmatpush.bf16.msrb.mxu0 %v6561_v9  ;;  %4924 = vmatpush.bf16.msrb.mxu1 %v6689_v13  ;;  %v6641_v9 = vor.u32 %v8284_v37, %v6640_v56  ;;  %v6769_v13 = vor.u32 %v8316_v60, %v6768_v59  ;;  %v4674_v17 = vadd.f32 %v4673_v8, %v4661_v7  ;;  %v4636_v26 = vpop.f32.mrf.mxu2  ;;  %v6720_v56 = vld [vmem:[%s9023_s27 + $0x628] sm:$0xf]  ;;  %v8336_v59 = vld [vmem:[%s9023_s27 + $0x734] sm:$0xf0] }
 0x1ee   : > { %4937 = vmatpush.bf16.msrb.mxu2 %v6817_v14  ;;  %4906 = vmatmul.bf16.vlgmr.msra.gmra.mxu3 %v9182_v11  ;;  %v6496_v14 = vld [vmem:[%s9023_s27 + $0x468] sm:$0xf]  ;;  %v8388_v41 = vld [vmem:[%s9023_s27 + $0x8d4] sm:$0xf0] }
 0x1ef   : > { %4950 = vmatpush.bf16.msrb.mxu3 %v6945_v18  ;;  %4893 = vmatmul.bf16.vlgmr.msra.gmra.mxu2 %v9177_v6  ;;  %v8280_v18 = vld [vmem:[%s9023_s27 + $0x574] sm:$0xf0]  ;;  %v6497_v27 = vor.u32 %v8248_v15, %v6496_v14  ;;  %v6848_v37 = vld [vmem:[%s9023_s27 + $0x728] sm:$0xf] }
 0x1f0   : > { %v6704_v14 = vld [vmem:[%s9023_s27 + $0x608] sm:$0xf]  ;;  %v6849_v15 = vor.u32 %v8336_v59, %v6848_v37  ;;  %v8384_v59 = vld [vmem:[%s9023_s27 + $0x8b4] sm:$0xf0] }
 0x1f1   : > { %4912 = vmatpush.bf16.msrb.mxu0 %v6545_v23  ;;  %4925 = vmatpush.bf16.msrb.mxu1 %v6673_v28  ;;  %v4649_v23 = vpop.f32.mrf.mxu3  ;;  %v6625_v28 = vor.u32 %v8280_v18, %v6624_v62  ;;  %v8332_v18 = vld [vmem:[%s9023_s27 + $0x714] sm:$0xf0]  ;;  %v7056_v40 = vld [vmem:[%s9023_s27 + $0x8c8] sm:$0xf] }
 0x1f2   : > { %4938 = vmatpush.bf16.msrb.mxu2 %v6801_v29  ;;  %v6753_v29 = vor.u32 %v8312_v1, %v6752_v19  ;;  %v4662_v35 = vpop.f32.mrf.mxu0  ;;  %v7072_v1 = vld [vmem:[%s9023_s27 + $0x8e8] sm:$0xf] }
 0x1f3   : > { %4951 = vmatpush.bf16.msrb.mxu3 %v6929_v33  ;;  %v6881_v33 = vor.u32 %v8344_v24, %v6880_v20  ;;  %v4675_v46 = vpop.f32.mrf.mxu1  ;;  %v8392_v20 = vld [vmem:[%s9023_s27 + $0x8f4] sm:$0xf0]  ;;  %v7200_v24 = vld [vmem:[%s9023_s27 + $0x9e8] sm:$0xf] }
 0x1f4   : > { %v7328_v23 = vld [vmem:[%s9023_s27 + $0xae8] sm:$0xf]  ;;  %v7073_v25 = vor.u32 %v8392_v20, %v7072_v1  ;;  %v8444_v20 = vld [vmem:[%s9023_s27 + $0xa94] sm:$0xf0] }
 0x1f5   : > { %4913 = vmatpush.bf16.msrb.mxu0 %v6529_v44  ;;  %4926 = vmatpush.bf16.msrb.mxu1 %v6657_v50  ;;  %v6481_v44 = vor.u32 %v8244_v31, %v6480_v30  ;;  %v8240_v50 = vld [vmem:[%s9023_s27 + $0x434] sm:$0xf0]  ;;  %v4686_v60 = vpop.f32.mrf.mxu2  ;;  %v7456_v31 = vld [vmem:[%s9023_s27 + $0xbe8] sm:$0xf] }
 0x1f6   : > { %4939 = vmatpush.bf16.msrb.mxu2 %v6785_v51  ;;  %v6592_v51 = vld [vmem:[%s9023_s27 + $0x528] sm:$0xf]  ;;  %v6465_v61 = vor.u32 %v8240_v50, %v6464_v49  ;;  %v4687_v0 = vadd.f32 %v4686_v60, %v4674_v17  ;;  %v7457_v46 = vor.u32 %v8488_v32, %v7456_v31  ;;  %v8452_v49 = vld [vmem:[%s9023_s27 + $0xad4] sm:$0xf0] }
 0x1f7   : > { %4952 = vmatpush.bf16.msrb.mxu3 %v6913_v57  ;;  %v8304_v57 = vld [vmem:[%s9023_s27 + $0x634] sm:$0xf0]  ;;  %v6593_v7 = vor.u32 %v8272_v55, %v6592_v51  ;;  %v6832_v17 = vld [vmem:[%s9023_s27 + $0x708] sm:$0xf] }
 0x1f8   : > { %v6721_v8 = vor.u32 %v8304_v57, %v6720_v56  ;;  %v7184_v35 = vld [vmem:[%s9023_s27 + $0x9c8] sm:$0xf]  ;;  %v8484_v51 = vld [vmem:[%s9023_s27 + $0xbd4] sm:$0xf0] }
 0x1f9   : > { %4914 = vmatpush.bf16.msrb.mxu0 %v6513_v5  ;;  %4927 = vmatpush.bf16.msrb.mxu1 %v6641_v9  ;;  %v8236_v5 = vld [vmem:[%s9023_s27 + $0x414] sm:$0xf0]  ;;  %v6576_v9 = vld [vmem:[%s9023_s27 + $0x508] sm:$0xf]  ;;  %v4699_v62 = vpop.f32.mrf.mxu3 }
 0x1fa   : > { %4940 = vmatpush.bf16.msrb.mxu2 %v6769_v13  ;;  %v8268_v13 = vld [vmem:[%s9023_s27 + $0x514] sm:$0xf0]  ;;  %v9792_v19 = vadd.f32 %v4699_v62, %v4687_v0  ;;  %v6449_v26 = vor.u32 %v8236_v5, %v6448_v3  ;;  %v7440_v50 = vld [vmem:[%s9023_s27 + $0xbc8] sm:$0xf] }
 0x1fb   : > { %4953 = vmatpush.bf16.msrb.mxu3 %v6897_v16  ;;  %v8300_v16 = vld [vmem:[%s9023_s27 + $0x614] sm:$0xf0]  ;;  %v7040_v37 = vld [vmem:[%s9023_s27 + $0x8a8] sm:$0xf] }
 0x1fc   : > { %v6705_v30 = vor.u32 %v8300_v16, %v6704_v14  ;;  %v7168_v60 = vld [vmem:[%s9023_s27 + $0x9a8] sm:$0xf]  ;;  %v8416_v0 = vld [vmem:[%s9023_s27 + $0x9b4] sm:$0xf0] }
 0x1fd   : > { %4915 = vmatpush.bf16.msrb.mxu0 %v6497_v27  ;;  %4928 = vmatpush.bf16.msrb.mxu1 %v6625_v28  ;;  %v8424_v27 = vld [vmem:[%s9023_s27 + $0x9f4] sm:$0xf0]  ;;  %v7296_v3 = vld [vmem:[%s9023_s27 + $0xaa8] sm:$0xf] }
 0x1fe   : > { %4941 = vmatpush.bf16.msrb.mxu2 %v6753_v29  ;;  %v8456_v28 = vld [vmem:[%s9023_s27 + $0xaf4] sm:$0xf0]  ;;  %v6577_v29 = vor.u32 %v8268_v13, %v6576_v9  ;;  %v7201_v34 = vor.u32 %v8424_v27, %v7200_v24  ;;  %v7041_v9 = vor.u32 %v8384_v59, %v7040_v37  ;;  %v7169_v13 = vor.u32 %v8416_v0, %v7168_v60  ;;  %v7152_v16 = vld [vmem:[%s9023_s27 + $0x988] sm:$0xf] }
 0x1ff   : > { %4954 = vmatpush.bf16.msrb.mxu3 %v6881_v33  ;;  %v6833_v33 = vor.u32 %v8332_v18, %v6832_v17  ;;  %v7329_v36 = vor.u32 %v8456_v28, %v7328_v23  ;;  %v8448_v5 = vld [vmem:[%s9023_s27 + $0xab4] sm:$0xf0]  ;;  %v7280_v1 = vld [vmem:[%s9023_s27 + $0xa88] sm:$0xf] }
 0x200   : > { %v7297_v14 = vor.u32 %v8448_v5, %v7296_v3  ;;  %v8380_v62 = vld [vmem:[%s9023_s27 + $0x894] sm:$0xf0]  ;;  %v7281_v31 = vor.u32 %v8444_v20, %v7280_v1  ;;  %v7008_v32 = vld [vmem:[%s9023_s27 + $0x868] sm:$0xf] }
 0x201   : > { %4916 = vmatpush.bf16.msrb.mxu0 %v6481_v44  ;;  %4929 = vmatpush.bf16.msrb.mxu1 %v6609_v4  ;;  %v4688_v44 = vpop.f32.mrf.mxu2  ;;  %v8420_v4 = vld [vmem:[%s9023_s27 + $0x9d4] sm:$0xf0]  ;;  %v4701_v55 = vpop.f32.mrf.mxu3  ;;  %v7376_v0 = vld [vmem:[%s9023_s27 + $0xb48] sm:$0xf] }
 0x202   : > { %4942 = vmatpush.bf16.msrb.mxu2 %v6737_v47  ;;  %v7312_v47 = vld [vmem:[%s9023_s27 + $0xac8] sm:$0xf]  ;;  %v7185_v56 = vor.u32 %v8420_v4, %v7184_v35  ;;  %v8412_v18 = vld [vmem:[%s9023_s27 + $0x994] sm:$0xf0] }
 0x203   : > { %4955 = vmatpush.bf16.msrb.mxu3 %v6865_v53  ;;  %v7057_v53 = vor.u32 %v8388_v41, %v7056_v40  ;;  %v7313_v57 = vor.u32 %v8452_v49, %v7312_v47  ;;  %v8476_v27 = vld [vmem:[%s9023_s27 + $0xb94] sm:$0xf0]  ;;  %v7264_v41 = vld [vmem:[%s9023_s27 + $0xa68] sm:$0xf] }
 0x204   : > { %v8408_v40 = vld [vmem:[%s9023_s27 + $0x974] sm:$0xf0]  ;;  %v7392_v35 = vld [vmem:[%s9023_s27 + $0xb68] sm:$0xf] }
 0x205   : > { %4917 = vmatpush.bf16.msrb.mxu0 %v6465_v61  ;;  %4930 = vmatpush.bf16.msrb.mxu1 %v6593_v7  ;;  %v7441_v61 = vor.u32 %v8484_v51, %v7440_v50  ;;  %v7424_v7 = vld [vmem:[%s9023_s27 + $0xba8] sm:$0xf]  ;;  %v8472_v44 = vld [vmem:[%s9023_s27 + $0xb74] sm:$0xf0] }
 0x206   : > { %4943 = vmatpush.bf16.msrb.mxu2 %v6721_v8  ;;  %v8480_v8 = vld [vmem:[%s9023_s27 + $0xbb4] sm:$0xf0]  ;;  %v6992_v49 = vld [vmem:[%s9023_s27 + $0x848] sm:$0xf] }
 0x207   : > { %4956 = vmatpush.bf16.msrb.mxu3 %v6849_v15  ;;  %v7024_v15 = vld [vmem:[%s9023_s27 + $0x888] sm:$0xf]  ;;  %v7425_v17 = vor.u32 %v8480_v8, %v7424_v7  ;;  %v8372_v50 = vld [vmem:[%s9023_s27 + $0x854] sm:$0xf0] }
 0x208   : > { %v7120_v51 = vld [vmem:[%s9023_s27 + $0x948] sm:$0xf]  ;;  %v8436_v37 = vld [vmem:[%s9023_s27 + $0xa54] sm:$0xf0]  ;;  %v6993_v7 = vor.u32 %v8372_v50, %v6992_v49 }
 0x209   : > { %4918 = vmatpush.bf16.msrb.mxu0 %v6449_v26  ;;  %4931 = vmatpush.bf16.msrb.mxu1 %v6577_v29  ;;  %v4712_v24 = vpop.f32.mrf.mxu0  ;;  %v7408_v26 = vld [vmem:[%s9023_s27 + $0xb88] sm:$0xf]  ;;  %v4725_v28 = vpop.f32.mrf.mxu1  ;;  %v7025_v29 = vor.u32 %v8380_v62, %v7024_v15  ;;  %v8468_v3 = vld [vmem:[%s9023_s27 + $0xb54] sm:$0xf0] }
 0x20a   : > { %4944 = vmatpush.bf16.msrb.mxu2 %v6705_v30  ;;  %v4713_v23 = vadd.f32 %v4712_v24, %v9792_v19  ;;  %v7153_v30 = vor.u32 %v8412_v18, %v7152_v16  ;;  %v8440_v19 = vld [vmem:[%s9023_s27 + $0xa74] sm:$0xf0]  ;;  %v7104_v62 = vld [vmem:[%s9023_s27 + $0x928] sm:$0xf]  ;;  %v7377_v16 = vor.u32 %v8468_v3, %v7376_v0 }
 0x20b   : > { %4957 = vmatpush.bf16.msrb.mxu3 %v6833_v33  ;;  %v8376_v33 = vld [vmem:[%s9023_s27 + $0x874] sm:$0xf0]  ;;  %v7265_v47 = vor.u32 %v8440_v19, %v7264_v41  ;;  %v7232_v18 = vld [vmem:[%s9023_s27 + $0xa28] sm:$0xf] }
 0x20c   : > { %4919 = vmatmul.bf16.vlgmr.msrb.gmra.mxu0 %v9240_v38  ;;  %4932 = vmatmul.bf16.vlgmr.msrb.gmra.mxu1 %v9245_v48  ;;  %v8368_v15 = vld [vmem:[%s9023_s27 + $0x834] sm:$0xf0]  ;;  %v7360_v20 = vld [vmem:[%s9023_s27 + $0xb28] sm:$0xf] }
 0x20d   : > { %4963 = vmatpush.bf16.msra.mxu0 %v7073_v25  ;;  %4976 = vmatpush.bf16.msra.mxu1 %v7201_v34  ;;  %v7136_v25 = vld [vmem:[%s9023_s27 + $0x968] sm:$0xf]  ;;  %v4726_v34 = vadd.f32 %v4725_v28, %v4713_v23  ;;  %v8432_v1 = vld [vmem:[%s9023_s27 + $0xa34] sm:$0xf0] }
 0x20e   : > { %4989 = vmatpush.bf16.msra.mxu2 %v7329_v36  ;;  %4958 = vmatmul.bf16.vlgmr.msrb.gmra.mxu3 %v9262_v12  ;;  %v7409_v36 = vor.u32 %v8476_v27, %v7408_v26  ;;  %v7137_v4 = vor.u32 %v8408_v40, %v7136_v25  ;;  %v8464_v24 = vld [vmem:[%s9023_s27 + $0xb34] sm:$0xf0]  ;;  %v6960_v27 = vld [vmem:[%s9023_s27 + $0x808] sm:$0xf] }
 0x20f   : > { %5002 = vmatpush.bf16.msra.mxu3 %v7457_v46  ;;  %4945 = vmatmul.bf16.vlgmr.msrb.gmra.mxu2 %v9260_v10  ;;  %v7009_v46 = vor.u32 %v8376_v33, %v7008_v32  ;;  %v8364_v23 = vld [vmem:[%s9023_s27 + $0x814] sm:$0xf0]  ;;  %v7216_v32 = vld [vmem:[%s9023_s27 + $0xa08] sm:$0xf]  ;;  %v7361_v33 = vor.u32 %v8464_v24, %v7360_v20 }
 0x210   : > { %v8460_v40 = vld [vmem:[%s9023_s27 + $0xb14] sm:$0xf0]  ;;  %v7584_v19 = vld [vmem:[%s9023_s27 + $0xce8] sm:$0xf] }
 0x211   : > { %4964 = vmatpush.bf16.msra.mxu0 %v7057_v53  ;;  %4977 = vmatpush.bf16.msra.mxu1 %v7185_v56  ;;  %v7393_v53 = vor.u32 %v8472_v44, %v7392_v35  ;;  %v8404_v56 = vld [vmem:[%s9023_s27 + $0x954] sm:$0xf0]  ;;  %v4751_v60 = vpop.f32.mrf.mxu3  ;;  %v4727_v5 = vpop.f32.mrf.mxu1  ;;  %v7712_v44 = vld [vmem:[%s9023_s27 + $0xde8] sm:$0xf] }
 0x212   : > { %4990 = vmatpush.bf16.msra.mxu2 %v7313_v57  ;;  %v4738_v55 = vpop.f32.mrf.mxu2  ;;  %v7248_v57 = vld [vmem:[%s9023_s27 + $0xa48] sm:$0xf]  ;;  %v8520_v35 = vld [vmem:[%s9023_s27 + $0xcf4] sm:$0xf0] }
 0x213   : > { %5003 = vmatpush.bf16.msra.mxu3 %v7441_v61  ;;  %v4739_v59 = vadd.f32 %v4738_v55, %v4726_v34  ;;  %v4714_v61 = vpop.f32.mrf.mxu0  ;;  %v8428_v34 = vld [vmem:[%s9023_s27 + $0xa14] sm:$0xf0]  ;;  %v7696_v0 = vld [vmem:[%s9023_s27 + $0xdc8] sm:$0xf] }
 0x214   : > { %v8584_v49 = vld [vmem:[%s9023_s27 + $0xef4] sm:$0xf0] }
 0x215   : > { %4965 = vmatpush.bf16.msra.mxu0 %v7041_v9  ;;  %4978 = vmatpush.bf16.msra.mxu1 %v7169_v13  ;;  %v9847_v8 = vadd.f32 %v4751_v60, %v4739_v59  ;;  %v7121_v9 = vor.u32 %v8404_v56, %v7120_v51  ;;  %v7249_v13 = vor.u32 %v8436_v37, %v7248_v57  ;;  %v8616_v55 = vld [vmem:[%s9023_s27 + $0xff4] sm:$0xf0]  ;;  %v7568_v60 = vld [vmem:[%s9023_s27 + $0xcc8] sm:$0xf] }
 0x216   : > { %4991 = vmatpush.bf16.msra.mxu2 %v7297_v14  ;;  %v6976_v14 = vld [vmem:[%s9023_s27 + $0x828] sm:$0xf]  ;;  %v7217_v51 = vor.u32 %v8428_v34, %v7216_v32  ;;  %v7585_v57 = vor.u32 %v8520_v35, %v7584_v19  ;;  %v8516_v61 = vld [vmem:[%s9023_s27 + $0xcd4] sm:$0xf0] }
 0x217   : > { %5004 = vmatpush.bf16.msra.mxu3 %v7425_v17  ;;  %v8400_v17 = vld [vmem:[%s9023_s27 + $0x934] sm:$0xf0]  ;;  %v6977_v26 = vor.u32 %v8368_v15, %v6976_v14  ;;  %v7569_v15 = vor.u32 %v8516_v61, %v7568_v60  ;;  %v7536_v32 = vld [vmem:[%s9023_s27 + $0xc88] sm:$0xf] }
 0x218   : > { %v7105_v28 = vor.u32 %v8400_v17, %v7104_v62  ;;  %v8548_v5 = vld [vmem:[%s9023_s27 + $0xdd4] sm:$0xf0]  ;;  %v7552_v17 = vld [vmem:[%s9023_s27 + $0xca8] sm:$0xf] }
 0x219   : > { %4966 = vmatpush.bf16.msra.mxu0 %v7025_v29  ;;  %4979 = vmatpush.bf16.msra.mxu1 %v7153_v30  ;;  %v7233_v29 = vor.u32 %v8432_v1, %v7232_v18  ;;  %v7088_v30 = vld [vmem:[%s9023_s27 + $0x908] sm:$0xf]  ;;  %v4753_v41 = vpop.f32.mrf.mxu3  ;;  %v8612_v14 = vld [vmem:[%s9023_s27 + $0xfd4] sm:$0xf0]  ;;  %v7697_v62 = vor.u32 %v8548_v5, %v7696_v0 }
 0x21a   : > { %4992 = vmatpush.bf16.msra.mxu2 %v7281_v31  ;;  %v8396_v31 = vld [vmem:[%s9023_s27 + $0x914] sm:$0xf0]  ;;  %v4740_v25 = vpop.f32.mrf.mxu2  ;;  %v7680_v1 = vld [vmem:[%s9023_s27 + $0xda8] sm:$0xf] }
 0x21b   : > { %5005 = vmatpush.bf16.msra.mxu3 %v7409_v36  ;;  %v7344_v36 = vld [vmem:[%s9023_s27 + $0xb08] sm:$0xf]  ;;  %v7089_v50 = vor.u32 %v8396_v31, %v7088_v30  ;;  %v8512_v18 = vld [vmem:[%s9023_s27 + $0xcb4] sm:$0xf0] }
 0x21c   : > { %v7345_v56 = vor.u32 %v8460_v40, %v7344_v36  ;;  %v8544_v24 = vld [vmem:[%s9023_s27 + $0xdb4] sm:$0xf0]  ;;  %v7664_v25 = vld [vmem:[%s9023_s27 + $0xd88] sm:$0xf] }
 0x21d   : > { %4967 = vmatpush.bf16.msra.mxu0 %v7009_v46  ;;  %4980 = vmatpush.bf16.msra.mxu1 %v7137_v4  ;;  %v6961_v46 = vor.u32 %v8364_v23, %v6960_v27  ;;  %v8552_v4 = vld [vmem:[%s9023_s27 + $0xdf4] sm:$0xf0]  ;;  %v7936_v23 = vld [vmem:[%s9023_s27 + $0xfa8] sm:$0xf]  ;;  %v7681_v30 = vor.u32 %v8544_v24, %v7680_v1 }
 0x21e   : > { %4993 = vmatpush.bf16.msra.mxu2 %v7265_v47  ;;  %v7840_v47 = vld [vmem:[%s9023_s27 + $0xee8] sm:$0xf]  ;;  %v7713_v37 = vor.u32 %v8552_v4, %v7712_v44  ;;  %v8576_v27 = vld [vmem:[%s9023_s27 + $0xeb4] sm:$0xf0] }
 0x21f   : > { %5006 = vmatpush.bf16.msra.mxu3 %v7393_v53  ;;  %v7968_v53 = vld [vmem:[%s9023_s27 + $0xfe8] sm:$0xf]  ;;  %v7841_v59 = vor.u32 %v8584_v49, %v7840_v47  ;;  %v8540_v36 = vld [vmem:[%s9023_s27 + $0xd94] sm:$0xf0] }
 0x220   : > { %v7969_v3 = vor.u32 %v8616_v55, %v7968_v53  ;;  %v7792_v40 = vld [vmem:[%s9023_s27 + $0xe88] sm:$0xf]  ;;  %v8572_v41 = vld [vmem:[%s9023_s27 + $0xe94] sm:$0xf0]  ;;  %v7665_v49 = vor.u32 %v8540_v36, %v7664_v25 }
 0x221   : > { %4968 = vmatpush.bf16.msra.mxu0 %v6993_v7  ;;  %4981 = vmatpush.bf16.msra.mxu1 %v7121_v9  ;;  %v7824_v7 = vld [vmem:[%s9023_s27 + $0xec8] sm:$0xf]  ;;  %v8580_v9 = vld [vmem:[%s9023_s27 + $0xed4] sm:$0xf0] }
 0x222   : > { %4994 = vmatpush.bf16.msra.mxu2 %v7249_v13  ;;  %v7952_v13 = vld [vmem:[%s9023_s27 + $0xfc8] sm:$0xf]  ;;  %v8604_v44 = vld [vmem:[%s9023_s27 + $0xf94] sm:$0xf0] }
 0x223   : > { %5007 = vmatpush.bf16.msra.mxu3 %v7377_v16  ;;  %v7825_v16 = vor.u32 %v8580_v9, %v7824_v7  ;;  %v7953_v20 = vor.u32 %v8612_v14, %v7952_v13  ;;  %v7920_v35 = vld [vmem:[%s9023_s27 + $0xf88] sm:$0xf]  ;;  %v8504_v53 = vld [vmem:[%s9023_s27 + $0xc74] sm:$0xf0] }
 0x224   : > { %v7648_v55 = vld [vmem:[%s9023_s27 + $0xd68] sm:$0xf]  ;;  %v8600_v61 = vld [vmem:[%s9023_s27 + $0xf74] sm:$0xf0] }
 0x225   : > { %4969 = vmatpush.bf16.msra.mxu0 %v6977_v26  ;;  %4982 = vmatpush.bf16.msra.mxu1 %v7105_v28  ;;  %v7808_v26 = vld [vmem:[%s9023_s27 + $0xea8] sm:$0xf]  ;;  %v8608_v28 = vld [vmem:[%s9023_s27 + $0xfb4] sm:$0xf0] }
 0x226   : > { %4995 = vmatpush.bf16.msra.mxu2 %v7233_v29  ;;  %v7553_v29 = vor.u32 %v8512_v18, %v7552_v17  ;;  %v7809_v31 = vor.u32 %v8576_v27, %v7808_v26  ;;  %v7937_v34 = vor.u32 %v8608_v28, %v7936_v23  ;;  %v7904_v60 = vld [vmem:[%s9023_s27 + $0xf68] sm:$0xf]  ;;  %v8500_v9 = vld [vmem:[%s9023_s27 + $0xc54] sm:$0xf0] }
 0x227   : > { %5008 = vmatpush.bf16.msra.mxu3 %v7361_v33  ;;  %v8508_v33 = vld [vmem:[%s9023_s27 + $0xc94] sm:$0xf0]  ;;  %v7504_v7 = vld [vmem:[%s9023_s27 + $0xc48] sm:$0xf]  ;;  %v7905_v14 = vor.u32 %v8600_v61, %v7904_v60  ;;  %v6050_v60 = vld [vmem:[%s9023_s27 + $0xf8] sm:$0xf0] }
 0x228   : > { %v7537_v47 = vor.u32 %v8508_v33, %v7536_v32  ;;  %v7632_v13 = vld [vmem:[%s9023_s27 + $0xd48] sm:$0xf]  ;;  %v8564_v17 = vld [vmem:[%s9023_s27 + $0xe54] sm:$0xf0]  ;;  %v7505_v23 = vor.u32 %v8500_v9, %v7504_v7  ;;  %v8166_v61 = vld [vmem:[%s9023_s27 + $0x1ec] sm:$0xf] }
 0x229   : > { %4970 = vmatpush.bf16.msra.mxu0 %v6961_v46  ;;  %4983 = vmatpush.bf16.msra.mxu1 %v7089_v50  ;;  %v4764_v19 = vpop.f32.mrf.mxu0  ;;  %v4777_v4 = vpop.f32.mrf.mxu1  ;;  %v7793_v50 = vor.u32 %v8572_v41, %v7792_v40  ;;  %v7888_v24 = vld [vmem:[%s9023_s27 + $0xf48] sm:$0xf]  ;;  %v8596_v26 = vld [vmem:[%s9023_s27 + $0xf54] sm:$0xf0]  ;;  %v6306_v7 = vld [vmem:[%s9023_s27 + $0x2f8] sm:$0xf0] }
 0x22a   : > { %4996 = vmatpush.bf16.msra.mxu2 %v7217_v51  ;;  %v4765_v46 = vadd.f32 %v4764_v19, %v9847_v8  ;;  %v7520_v51 = vld [vmem:[%s9023_s27 + $0xc68] sm:$0xf]  ;;  %v8568_v8 = vld [vmem:[%s9023_s27 + $0xe74] sm:$0xf0]  ;;  %v7889_v25 = vor.u32 %v8596_v26, %v7888_v24  ;;  %v8162_v24 = vld [vmem:[%s9023_s27 + $0x1cc] sm:$0xf] }
 0x22b   : > { %5009 = vmatpush.bf16.msra.mxu3 %v7345_v56  ;;  %v7521_v0 = vor.u32 %v8504_v53, %v7520_v51  ;;  %v8496_v32 = vld [vmem:[%s9023_s27 + $0xc34] sm:$0xf0]  ;;  %v7616_v33 = vld [vmem:[%s9023_s27 + $0xd28] sm:$0xf] }
 0x22c   : > { %4971 = vmatmul.bf16.vlgmr.msra.gmra.mxu0 %v9322_v45  ;;  %4984 = vmatmul.bf16.vlgmr.msra.gmra.mxu1 %v9327_v54  ;;  %v4778_v56 = vadd.f32 %v4777_v4, %v4765_v46  ;;  %v7744_v36 = vld [vmem:[%s9023_s27 + $0xe28] sm:$0xf]  ;;  %v8560_v40 = vld [vmem:[%s9023_s27 + $0xe34] sm:$0xf0] }
 0x22d   : > { %5015 = vmatpush.bf16.msrb.mxu0 %v7585_v57  ;;  %5028 = vmatpush.bf16.msrb.mxu1 %v7713_v37  ;;  %v7921_v57 = vor.u32 %v8604_v44, %v7920_v35  ;;  %v8536_v37 = vld [vmem:[%s9023_s27 + $0xd74] sm:$0xf0]  ;;  %v7872_v41 = vld [vmem:[%s9023_s27 + $0xf28] sm:$0xf] }
 0x22e   : > { %5041 = vmatpush.bf16.msrb.mxu2 %v7841_v59  ;;  %5010 = vmatmul.bf16.vlgmr.msra.gmra.mxu3 %v9344_v22  ;;  %v7776_v59 = vld [vmem:[%s9023_s27 + $0xe68] sm:$0xf]  ;;  %v8592_v19 = vld [vmem:[%s9023_s27 + $0xf34] sm:$0xf0] }
 0x22f   : > { %5054 = vmatpush.bf16.msrb.mxu3 %v7969_v3  ;;  %4997 = vmatmul.bf16.vlgmr.msra.gmra.mxu2 %v9342_v21  ;;  %v7649_v3 = vor.u32 %v8536_v37, %v7648_v55  ;;  %v7777_v5 = vor.u32 %v8568_v8, %v7776_v59  ;;  %v7472_v44 = vld [vmem:[%s9023_s27 + $0xc08] sm:$0xf]  ;;  %v8492_v46 = vld [vmem:[%s9023_s27 + $0xc14] sm:$0xf0]  ;;  %v7873_v53 = vor.u32 %v8592_v19, %v7872_v41  ;;  %v8134_v8 = vld [vmem:[%s9023_s27 + $0xec] sm:$0xf] }
 0x230   : > { %v7728_v51 = vld [vmem:[%s9023_s27 + $0xe08] sm:$0xf]  ;;  %v8588_v37 = vld [vmem:[%s9023_s27 + $0xf14] sm:$0xf0]  ;;  %v6146_v19 = vld [vmem:[%s9023_s27 + $0x1b8] sm:$0xf0] }
 0x231   : > { %5016 = vmatpush.bf16.msrb.mxu0 %v7569_v15  ;;  %5029 = vmatpush.bf16.msrb.mxu1 %v7697_v62  ;;  %v8532_v62 = vld [vmem:[%s9023_s27 + $0xd54] sm:$0xf0]  ;;  %v4803_v1 = vpop.f32.mrf.mxu3  ;;  %v4779_v27 = vpop.f32.mrf.mxu1 }
 0x232   : > { %5042 = vmatpush.bf16.msrb.mxu2 %v7825_v16  ;;  %v4790_v15 = vpop.f32.mrf.mxu2  ;;  %v7760_v16 = vld [vmem:[%s9023_s27 + $0xe48] sm:$0xf]  ;;  %v6162_v27 = vld [vmem:[%s9023_s27 + $0x1d8] sm:$0xf0] }
 0x233   : > { %5055 = vmatpush.bf16.msrb.mxu3 %v7953_v20  ;;  %v4791_v18 = vadd.f32 %v4790_v15, %v4778_v56  ;;  %v4766_v20 = vpop.f32.mrf.mxu0  ;;  %v8556_v56 = vld [vmem:[%s9023_s27 + $0xe14] sm:$0xf0]  ;;  %v6434_v15 = vld [vmem:[%s9023_s27 + $0x3f8] sm:$0xf0] }
 0x234   : > { %v6034_v20 = vld [vmem:[%s9023_s27 + $0xd8] sm:$0xf0] }
 0x235   : > { %5017 = vmatpush.bf16.msrb.mxu0 %v7553_v29  ;;  %5030 = vmatpush.bf16.msrb.mxu1 %v7681_v30  ;;  %v9918_v28 = vadd.f32 %v4803_v1, %v4791_v18  ;;  %v7633_v29 = vor.u32 %v8532_v62, %v7632_v13  ;;  %v7761_v30 = vor.u32 %v8564_v17, %v7760_v16  ;;  %v8130_v1 = vld [vmem:[%s9023_s27 + $0xcc] sm:$0xf] }
 0x236   : > { %5043 = vmatpush.bf16.msrb.mxu2 %v7809_v31  ;;  %v7488_v31 = vld [vmem:[%s9023_s27 + $0xc28] sm:$0xf]  ;;  %v7729_v13 = vor.u32 %v8556_v56, %v7728_v51  ;;  %v6053_v16 = vor.u32 %v8134_v8, %v6050_v60  ;;  %v8122_v51 = vld [vmem:[%s9023_s27 + $0x8c] sm:$0xf] }
 0x237   : > { %5056 = vmatpush.bf16.msrb.mxu3 %v7937_v34  ;;  %v8528_v34 = vld [vmem:[%s9023_s27 + $0xd34] sm:$0xf0]  ;;  %v7489_v35 = vor.u32 %v8496_v32, %v7488_v31  ;;  %v6418_v31 = vld [vmem:[%s9023_s27 + $0x3d8] sm:$0xf0]  ;;  %v6037_v32 = vor.u32 %v8130_v1, %v6034_v20  ;;  %v8218_v60 = vld [vmem:[%s9023_s27 + $0x38c] sm:$0xf] }
 0x238   : > { %v7617_v4 = vor.u32 %v8528_v34, %v7616_v33  ;;  %v6165_v33 = vor.u32 %v8162_v24, %v6162_v27  ;;  %v8126_v34 = vld [vmem:[%s9023_s27 + $0xac] sm:$0xf]  ;;  %v6370_v20 = vld [vmem:[%s9023_s27 + $0x378] sm:$0xf0] }
 0x239   : > { %5018 = vmatpush.bf16.msrb.mxu0 %v7537_v47  ;;  %5031 = vmatpush.bf16.msrb.mxu1 %v7665_v49  ;;  %v7745_v47 = vor.u32 %v8560_v40, %v7744_v36  ;;  %v7600_v49 = vld [vmem:[%s9023_s27 + $0xd08] sm:$0xf]  ;;  %v4805_v59 = vpop.f32.mrf.mxu3  ;;  %v6018_v36 = vld [vmem:[%s9023_s27 + $0xb8] sm:$0xf0]  ;;  %v8158_v40 = vld [vmem:[%s9023_s27 + $0x1ac] sm:$0xf] }
 0x23a   : > { %5044 = vmatpush.bf16.msrb.mxu2 %v7793_v50  ;;  %v8524_v50 = vld [vmem:[%s9023_s27 + $0xd14] sm:$0xf0]  ;;  %v4792_v55 = vpop.f32.mrf.mxu2  ;;  %v6258_v59 = vld [vmem:[%s9023_s27 + $0x298] sm:$0xf0]  ;;  %v8214_v1 = vld [vmem:[%s9023_s27 + $0x36c] sm:$0xf] }
 0x23b   : > { %5057 = vmatpush.bf16.msrb.mxu3 %v7921_v57  ;;  %v7856_v57 = vld [vmem:[%s9023_s27 + $0xf08] sm:$0xf]  ;;  %v7601_v9 = vor.u32 %v8524_v50, %v7600_v49  ;;  %v6149_v49 = vor.u32 %v8158_v40, %v6146_v19  ;;  %v8154_v55 = vld [vmem:[%s9023_s27 + $0x18c] sm:$0xf] }
 0x23c   : > { %v7857_v62 = vor.u32 %v8588_v37, %v7856_v57  ;;  %v6130_v57 = vld [vmem:[%s9023_s27 + $0x198] sm:$0xf0]  ;;  %v8186_v37 = vld [vmem:[%s9023_s27 + $0x28c] sm:$0xf] }
 0x23d   : > { %5019 = vmatpush.bf16.msrb.mxu0 %v7521_v0  ;;  %5032 = vmatpush.bf16.msrb.mxu1 %v7649_v3  ;;  %v7473_v0 = vor.u32 %v8492_v46, %v7472_v44  ;;  %v6178_v3 = vld [vmem:[%s9023_s27 + $0x1f8] sm:$0xf0]  ;;  %v8222_v46 = vld [vmem:[%s9023_s27 + $0x3ac] sm:$0xf] }
 0x23e   : > { %5045 = vmatpush.bf16.msrb.mxu2 %v7777_v5  ;;  %v8198_v5 = vld [vmem:[%s9023_s27 + $0x2ec] sm:$0xf]  ;;  %v6181_v17 = vor.u32 %v8166_v61, %v6178_v3  ;;  %v6274_v44 = vld [vmem:[%s9023_s27 + $0x2b8] sm:$0xf0] }
 0x23f   : > { %5058 = vmatpush.bf16.msrb.mxu3 %v7905_v14  ;;  %v8230_v14 = vld [vmem:[%s9023_s27 + $0x3ec] sm:$0xf]  ;;  %v6309_v18 = vor.u32 %v8198_v5, %v6306_v7  ;;  %v6386_v61 = vld [vmem:[%s9023_s27 + $0x398] sm:$0xf0]  ;;  %v6133_v7 = vor.u32 %v8154_v55, %v6130_v57 }
 0x240   : > { %v6437_v26 = vor.u32 %v8230_v14, %v6434_v15  ;;  %v5986_v14 = vld [vmem:[%s9023_s27 + $0x78] sm:$0xf0]  ;;  %v8150_v15 = vld [vmem:[%s9023_s27 + $0x16c] sm:$0xf] }
 0x241   : > { %5020 = vmatpush.bf16.msrb.mxu0 %v7505_v23  ;;  %5033 = vmatpush.bf16.msrb.mxu1 %v7633_v29  ;;  %v8194_v23 = vld [vmem:[%s9023_s27 + $0x2cc] sm:$0xf]  ;;  %v6290_v29 = vld [vmem:[%s9023_s27 + $0x2d8] sm:$0xf0] }
 0x242   : > { %5046 = vmatpush.bf16.msrb.mxu2 %v7761_v30  ;;  %v8226_v30 = vld [vmem:[%s9023_s27 + $0x3cc] sm:$0xf] }
 0x243   : > { %5059 = vmatpush.bf16.msrb.mxu3 %v7889_v25  ;;  %v6293_v25 = vor.u32 %v8194_v23, %v6290_v29  ;;  %v6421_v41 = vor.u32 %v8226_v30, %v6418_v31  ;;  %v8114_v23 = vld [vmem:[%s9023_s27 + $0x4c] sm:$0xf]  ;;  %v5970_v29 = vld [vmem:[%s9023_s27 + $0x58] sm:$0xf0]  ;;  %v6373_v31 = vor.u32 %v8214_v1, %v6370_v20 }
 0x244   : > { %v8146_v30 = vld [vmem:[%s9023_s27 + $0x14c] sm:$0xf]  ;;  %v6562_v20 = vld [vmem:[%s9023_s27 + $0x4f8] sm:$0xf0] }
 0x245   : > { %5021 = vmatpush.bf16.msrb.mxu0 %v7489_v35  ;;  %5034 = vmatpush.bf16.msrb.mxu1 %v7617_v4  ;;  %v8190_v35 = vld [vmem:[%s9023_s27 + $0x2ac] sm:$0xf]  ;;  %v6402_v4 = vld [vmem:[%s9023_s27 + $0x3b8] sm:$0xf0] }
 0x246   : > { %5047 = vmatpush.bf16.msrb.mxu2 %v7745_v47  ;;  %v6021_v47 = vor.u32 %v8126_v34, %v6018_v36  ;;  %v6277_v50 = vor.u32 %v8190_v35, %v6274_v44  ;;  %v6405_v56 = vor.u32 %v8222_v46, %v6402_v4  ;;  %v6226_v34 = vld [vmem:[%s9023_s27 + $0x258] sm:$0xf0]  ;;  %v8210_v19 = vld [vmem:[%s9023_s27 + $0x34c] sm:$0xf]  ;;  %v5973_v46 = vor.u32 %v8114_v23, %v5970_v29 }
 0x247   : > { %5060 = vmatpush.bf16.msrb.mxu3 %v7873_v53  ;;  %v6002_v53 = vld [vmem:[%s9023_s27 + $0x98] sm:$0xf0]  ;;  %v8174_v57 = vld [vmem:[%s9023_s27 + $0x22c] sm:$0xf] }
 0x248   : > { %v6005_v5 = vor.u32 %v8122_v51, %v6002_v53  ;;  %v6354_v35 = vld [vmem:[%s9023_s27 + $0x358] sm:$0xf0]  ;;  %v8142_v53 = vld [vmem:[%s9023_s27 + $0x12c] sm:$0xf] }
 0x249   : > { %5022 = vmatpush.bf16.msrb.mxu0 %v7473_v0  ;;  %5035 = vmatpush.bf16.msrb.mxu1 %v7601_v9  ;;  %v4816_v8 = vpop.f32.mrf.mxu0  ;;  %v4829_v3 = vpop.f32.mrf.mxu1  ;;  %v6261_v9 = vor.u32 %v8186_v37, %v6258_v59  ;;  %v5954_v51 = vld [vmem:[%s9023_s27 + $0x38] sm:$0xf0]  ;;  %v6357_v55 = vor.u32 %v8210_v19, %v6354_v35  ;;  %v8262_v1 = vld [vmem:[%s9023_s27 + $0x4ec] sm:$0xf] }
 0x24a   : > { %5048 = vmatpush.bf16.msrb.mxu2 %v7729_v13  ;;  %v4817_v0 = vadd.f32 %v4816_v8, %v9918_v28  ;;  %v8118_v13 = vld [vmem:[%s9023_s27 + $0x6c] sm:$0xf]  ;;  %v6242_v28 = vld [vmem:[%s9023_s27 + $0x278] sm:$0xf0] }
 0x24b   : > { %5061 = vmatpush.bf16.msrb.mxu3 %v7857_v62  ;;  %v5989_v24 = vor.u32 %v8118_v13, %v5986_v14  ;;  %v6210_v37 = vld [vmem:[%s9023_s27 + $0x238] sm:$0xf0]  ;;  %v8206_v8 = vld [vmem:[%s9023_s27 + $0x32c] sm:$0xf] }
 0x24c   : > { %5023 = vmatmul.bf16.vlgmr.msrb.gmra.mxu0 %v9401_v63  ;;  %5036 = vmatmul.bf16.vlgmr.msrb.gmra.mxu1 %v9404_v2  ;;  %v4830_v62 = vadd.f32 %v4829_v3, %v4817_v0  ;;  %v8106_v0 = vld [vmem:[%s9023_s27 + $0xc] sm:$0xf]  ;;  %v5938_v3 = vld [vmem:[%s9023_s27 + $0x18] sm:$0xf0] }
 0x24d   : > { %5067 = vmatpush.bf16.msra.mxu0 %v6053_v16  ;;  %5080 = vmatpush.bf16.msra.mxu1 %v6181_v17  ;;  %v6389_v16 = vor.u32 %v8218_v60, %v6386_v61  ;;  %v6114_v17 = vld [vmem:[%s9023_s27 + $0x178] sm:$0xf0]  ;;  %v8138_v13 = vld [vmem:[%s9023_s27 + $0x10c] sm:$0xf] }
 0x24e   : > { %5093 = vmatpush.bf16.msra.mxu2 %v6309_v18  ;;  %5062 = vmatmul.bf16.vlgmr.msrb.gmra.mxu3 %v9426_v43  ;;  %v8182_v18 = vld [vmem:[%s9023_s27 + $0x26c] sm:$0xf]  ;;  %v6338_v60 = vld [vmem:[%s9023_s27 + $0x338] sm:$0xf0] }
 0x24f   : > { %5106 = vmatpush.bf16.msra.mxu3 %v6437_v26  ;;  %5049 = vmatmul.bf16.vlgmr.msrb.gmra.mxu2 %v9422_v39  ;;  %v6117_v26 = vor.u32 %v8150_v15, %v6114_v17  ;;  %v6245_v27 = vor.u32 %v8182_v18, %v6242_v28  ;;  %v6066_v14 = vld [vmem:[%s9023_s27 + $0x118] sm:$0xf0]  ;;  %v8170_v15 = vld [vmem:[%s9023_s27 + $0x20c] sm:$0xf] }
 0x250   : > { %v6194_v17 = vld [vmem:[%s9023_s27 + $0x218] sm:$0xf0]  ;;  %v8202_v18 = vld [vmem:[%s9023_s27 + $0x30c] sm:$0xf] }
 0x251   : > { %5068 = vmatpush.bf16.msra.mxu0 %v6037_v32  ;;  %5081 = vmatpush.bf16.msra.mxu1 %v6165_v33  ;;  %v6098_v33 = vld [vmem:[%s9023_s27 + $0x158] sm:$0xf0]  ;;  %v4855_v40 = vpop.f32.mrf.mxu3  ;;  %v4831_v44 = vpop.f32.mrf.mxu1  ;;  %v8326_v23 = vld [vmem:[%s9023_s27 + $0x6ec] sm:$0xf] }
 0x252   : > { %5094 = vmatpush.bf16.msra.mxu2 %v6293_v25  ;;  %v4842_v32 = vpop.f32.mrf.mxu2  ;;  %v8178_v25 = vld [vmem:[%s9023_s27 + $0x24c] sm:$0xf]  ;;  %v6818_v29 = vld [vmem:[%s9023_s27 + $0x6f8] sm:$0xf0] }
 0x253   : > { %5107 = vmatpush.bf16.msra.mxu3 %v6421_v41  ;;  %v4843_v36 = vadd.f32 %v4842_v32, %v4830_v62  ;;  %v4818_v41 = vpop.f32.mrf.mxu0  ;;  %v6341_v62 = vor.u32 %v8206_v8, %v6338_v60  ;;  %v8358_v32 = vld [vmem:[%s9023_s27 + $0x7ec] sm:$0xf]  ;;  %v6546_v19 = vld [vmem:[%s9023_s27 + $0x4d8] sm:$0xf0] }
 0x254   : > { %v8258_v41 = vld [vmem:[%s9023_s27 + $0x4cc] sm:$0xf]  ;;  %v6658_v8 = vld [vmem:[%s9023_s27 + $0x5b8] sm:$0xf0] }
 0x255   : > { %5069 = vmatpush.bf16.msra.mxu0 %v6021_v47  ;;  %5082 = vmatpush.bf16.msra.mxu1 %v6149_v49  ;;  %v4856_v4 = vadd.f32 %v4855_v40, %v4843_v36  ;;  %v6101_v47 = vor.u32 %v8146_v30, %v6098_v33  ;;  %v6229_v49 = vor.u32 %v8178_v25, %v6226_v34  ;;  %v6946_v33 = vld [vmem:[%s9023_s27 + $0x7f8] sm:$0xf0]  ;;  %v8290_v35 = vld [vmem:[%s9023_s27 + $0x5cc] sm:$0xf] }
 0x256   : > { %5095 = vmatpush.bf16.msra.mxu2 %v6277_v50  ;;  %v8110_v50 = vld [vmem:[%s9023_s27 + $0x2c] sm:$0xf]  ;;  %v6069_v30 = vor.u32 %v8138_v13, %v6066_v14  ;;  %v6565_v34 = vor.u32 %v8262_v1, %v6562_v20  ;;  %v6821_v40 = vor.u32 %v8326_v23, %v6818_v29  ;;  %v6949_v44 = vor.u32 %v8358_v32, %v6946_v33  ;;  %v6514_v14 = vld [vmem:[%s9023_s27 + $0x498] sm:$0xf0] }
 0x257   : > { %5108 = vmatpush.bf16.msra.mxu3 %v6405_v56  ;;  %v6082_v56 = vld [vmem:[%s9023_s27 + $0x138] sm:$0xf0]  ;;  %v5279_v59 = vrot.slane %v4856_v4, 6  ;;  %v5957_v61 = vor.u32 %v8110_v50, %v5954_v51  ;;  %v8322_v4 = vld [vmem:[%s9023_s27 + $0x6cc] sm:$0xf]  ;;  %v6549_v51 = vor.u32 %v8258_v41, %v6546_v19 }
 0x258   : > { %v6930_v50 = vld [vmem:[%s9023_s27 + $0x7d8] sm:$0xf0]  ;;  %v8318_v60 = vld [vmem:[%s9023_s27 + $0x6ac] sm:$0xf] }
 0x259   : > { %5070 = vmatpush.bf16.msra.mxu0 %v6005_v5  ;;  %5083 = vmatpush.bf16.msra.mxu1 %v6133_v7  ;;  %v10001_v5 = vsel %vm5282_vm0, %v9753_v58, %v5279_v59  ;;  %v6085_v7 = vor.u32 %v8142_v53, %v6082_v56  ;;  %v6322_v58 = vld [vmem:[%s9023_s27 + $0x318] sm:$0xf0]  ;;  %v4857_v28 = vpop.f32.mrf.mxu3  ;;  %v8254_v56 = vld [vmem:[%s9023_s27 + $0x4ac] sm:$0xf] }
 0x25a   : > { %5096 = vmatpush.bf16.msra.mxu2 %v6261_v9  ;;  %v6213_v9 = vor.u32 %v8174_v57, %v6210_v37  ;;  %v6325_v25 = vor.u32 %v8202_v18, %v6322_v58  ;;  %v6530_v57 = vld [vmem:[%s9023_s27 + $0x4b8] sm:$0xf0]  ;;  %v8286_v37 = vld [vmem:[%s9023_s27 + $0x5ac] sm:$0xf] }
 0x25b   : > { %5109 = vmatpush.bf16.msra.mxu3 %v6389_v16  ;;  %v4844_v16 = vpop.f32.mrf.mxu2  ;;  %v8346_v58 = vld [vmem:[%s9023_s27 + $0x78c] sm:$0xf]  ;;  %v6898_v28 = vld [vmem:[%s9023_s27 + $0x798] sm:$0xf0] }
 0x25c   : > { %v8314_v16 = vld [vmem:[%s9023_s27 + $0x68c] sm:$0xf]  ;;  %v6498_v29 = vld [vmem:[%s9023_s27 + $0x478] sm:$0xf0]  ;;  %v6901_v32 = vor.u32 %v8346_v58, %v6898_v28 }
 0x25d   : > { %5071 = vmatpush.bf16.msra.mxu0 %v5989_v24  ;;  %5084 = vmatpush.bf16.msra.mxu1 %v6117_v26  ;;  %v8294_v24 = vld [vmem:[%s9023_s27 + $0x5ec] sm:$0xf]  ;;  %v5941_v26 = vor.u32 %v8106_v0, %v5938_v3  ;;  %v6914_v3 = vld [vmem:[%s9023_s27 + $0x7b8] sm:$0xf0] }
 0x25e   : > { %5097 = vmatpush.bf16.msra.mxu2 %v6245_v27  ;;  %v6690_v27 = vld [vmem:[%s9023_s27 + $0x5f8] sm:$0xf0]  ;;  %v8350_v0 = vld [vmem:[%s9023_s27 + $0x7ac] sm:$0xf] }
 0x25f   : > { %5110 = vmatpush.bf16.msra.mxu3 %v6373_v31  ;;  %v6197_v31 = vor.u32 %v8170_v15, %v6194_v17  ;;  %v6693_v36 = vor.u32 %v8294_v24, %v6690_v27  ;;  %v8282_v15 = vld [vmem:[%s9023_s27 + $0x58c] sm:$0xf]  ;;  %v6770_v17 = vld [vmem:[%s9023_s27 + $0x698] sm:$0xf0] }
 0x260   : > { %v6773_v27 = vor.u32 %v8314_v16, %v6770_v17  ;;  %v8246_v23 = vld [vmem:[%s9023_s27 + $0x46c] sm:$0xf]  ;;  %v6626_v33 = vld [vmem:[%s9023_s27 + $0x578] sm:$0xf0] }
 0x261   : > { %5072 = vmatpush.bf16.msra.mxu0 %v5973_v46  ;;  %5085 = vmatpush.bf16.msra.mxu1 %v6101_v47  ;;  %v6674_v46 = vld [vmem:[%s9023_s27 + $0x5d8] sm:$0xf0]  ;;  %v6501_v41 = vor.u32 %v8246_v23, %v6498_v29  ;;  %v8234_v17 = vld [vmem:[%s9023_s27 + $0x40c] sm:$0xf] }
 0x262   : > { %5098 = vmatpush.bf16.msra.mxu2 %v6229_v49  ;;  %v6802_v47 = vld [vmem:[%s9023_s27 + $0x6d8] sm:$0xf0]  ;;  %v8354_v49 = vld [vmem:[%s9023_s27 + $0x7cc] sm:$0xf]  ;;  %v6677_v53 = vor.u32 %v8290_v35, %v6674_v46 }
 0x263   : > { %5111 = vmatpush.bf16.msra.mxu3 %v6357_v55  ;;  %v6805_v55 = vor.u32 %v8322_v4, %v6802_v47  ;;  %v6933_v59 = vor.u32 %v8354_v49, %v6930_v50  ;;  %v6482_v46 = vld [vmem:[%s9023_s27 + $0x458] sm:$0xf0]  ;;  %v8274_v4 = vld [vmem:[%s9023_s27 + $0x54c] sm:$0xf] }
 0x264   : > { %v6610_v50 = vld [vmem:[%s9023_s27 + $0x558] sm:$0xf0]  ;;  %v8330_v29 = vld [vmem:[%s9023_s27 + $0x70c] sm:$0xf] }
 0x265   : > { %5073 = vmatpush.bf16.msra.mxu0 %v5957_v61  ;;  %5086 = vmatpush.bf16.msra.mxu1 %v6085_v7  ;;  %v6786_v61 = vld [vmem:[%s9023_s27 + $0x6b8] sm:$0xf0]  ;;  %v10038_v7 = vld [vmem:[%s9493_s18] sm:$0xf] }
 0x266   : > { %5099 = vmatpush.bf16.msra.mxu2 %v6213_v9  ;;  %v1877_v9 = vperm.slane %v10038_v7, 2  ;;  %v6789_v13 = vor.u32 %v8318_v60, %v6786_v61  ;;  %v6706_v23 = vld [vmem:[%s9023_s27 + $0x618] sm:$0xf0] }
 0x267   : > { %5112 = vmatpush.bf16.msra.mxu3 %v6341_v62  ;;  %v6917_v62 = vor.u32 %v8350_v0, %v6914_v3  ;;  %v6613_v0 = vor.u32 %v8274_v4, %v6610_v50 }
 0x269   : > { %5074 = vmatpush.bf16.msra.mxu0 %v5941_v26  ;;  %5087 = vmatpush.bf16.msra.mxu1 %v6069_v30  ;;  %v4868_v18 = vpop.f32.mrf.mxu0  ;;  %v4881_v20 = vpop.f32.mrf.mxu1  ;;  %v8278_v30 = vld [vmem:[%s9023_s27 + $0x56c] sm:$0xf] }
 0x26a   : > { %5100 = vmatpush.bf16.msra.mxu2 %v6197_v31  ;;  %v4869_v1 = vadd.f32 %v4868_v18, %v1877_v9  ;;  %v6629_v19 = vor.u32 %v8278_v30, %v6626_v33  ;;  %v6466_v9 = vld [vmem:[%s9023_s27 + $0x438] sm:$0xf0] }
 0x26b   : > { %5113 = vmatpush.bf16.msra.mxu3 %v6325_v25  ;;  %v8310_v25 = vld [vmem:[%s9023_s27 + $0x66c] sm:$0xf]  ;;  %v6450_v18 = vld [vmem:[%s9023_s27 + $0x418] sm:$0xf0] }
 0x26c   : > { %5075 = vmatmul.bf16.vlgmr.msra.gmra.mxu0 %v9160_v42  ;;  %5088 = vmatmul.bf16.vlgmr.msra.gmra.mxu1 %v9165_v52  ;;  %v6533_v42 = vor.u32 %v8254_v56, %v6530_v57  ;;  %v6661_v52 = vor.u32 %v8286_v37, %v6658_v8  ;;  %v4882_v31 = vadd.f32 %v4881_v20, %v4869_v1  ;;  %v8338_v37 = vld [vmem:[%s9023_s27 + $0x74c] sm:$0xf]  ;;  %v6578_v20 = vld [vmem:[%s9023_s27 + $0x518] sm:$0xf0] }
 0x26d   : > { %5119 = vmatpush.bf16.msrb.mxu0 %v6565_v34  ;;  %5132 = vmatpush.bf16.msrb.mxu1 %v6693_v36  ;;  %v6754_v34 = vld [vmem:[%s9023_s27 + $0x678] sm:$0xf0]  ;;  %v8342_v36 = vld [vmem:[%s9023_s27 + $0x76c] sm:$0xf] }
 0x26e   : > { %5145 = vmatpush.bf16.msrb.mxu2 %v6821_v40  ;;  %5114 = vmatmul.bf16.vlgmr.msra.gmra.mxu3 %v9182_v11  ;;  %v6642_v11 = vld [vmem:[%s9023_s27 + $0x598] sm:$0xf0]  ;;  %v6757_v35 = vor.u32 %v8310_v25, %v6754_v34  ;;  %v8266_v1 = vld [vmem:[%s9023_s27 + $0x50c] sm:$0xf]  ;;  %v6453_v34 = vor.u32 %v8234_v17, %v6450_v18 }
 0x26f   : > { %5158 = vmatpush.bf16.msrb.mxu3 %v6949_v44  ;;  %5101 = vmatmul.bf16.vlgmr.msra.gmra.mxu2 %v9177_v6  ;;  %v8250_v6 = vld [vmem:[%s9023_s27 + $0x48c] sm:$0xf]  ;;  %v6645_v26 = vor.u32 %v8282_v15, %v6642_v11  ;;  %v6882_v40 = vld [vmem:[%s9023_s27 + $0x778] sm:$0xf0] }
 0x270   : > { %v6517_v24 = vor.u32 %v8250_v6, %v6514_v14  ;;  %v8242_v44 = vld [vmem:[%s9023_s27 + $0x44c] sm:$0xf]  ;;  %v6885_v47 = vor.u32 %v8342_v36, %v6882_v40  ;;  %v6594_v6 = vld [vmem:[%s9023_s27 + $0x538] sm:$0xf0] }
 0x271   : > { %5120 = vmatpush.bf16.msrb.mxu0 %v6549_v51  ;;  %5133 = vmatpush.bf16.msrb.mxu1 %v6677_v53  ;;  %v8306_v51 = vld [vmem:[%s9023_s27 + $0x64c] sm:$0xf]  ;;  %v6738_v53 = vld [vmem:[%s9023_s27 + $0x658] sm:$0xf0]  ;;  %v4907_v56 = vpop.f32.mrf.mxu3  ;;  %v4870_v57 = vpop.f32.mrf.mxu0  ;;  %v6485_v60 = vor.u32 %v8242_v44, %v6482_v46 }
 0x272   : > { %5146 = vmatpush.bf16.msrb.mxu2 %v6805_v55  ;;  %v4894_v49 = vpop.f32.mrf.mxu2  ;;  %v4883_v8 = vpop.f32.mrf.mxu1  ;;  %v6741_v3 = vor.u32 %v8306_v51, %v6738_v53  ;;  %v8302_v14 = vld [vmem:[%s9023_s27 + $0x62c] sm:$0xf]  ;;  %v6722_v15 = vld [vmem:[%s9023_s27 + $0x638] sm:$0xf0] }
 0x273   : > { %5159 = vmatpush.bf16.msrb.mxu3 %v6933_v59  ;;  %v4895_v55 = vadd.f32 %v4894_v49, %v4882_v31  ;;  %v6866_v59 = vld [vmem:[%s9023_s27 + $0x758] sm:$0xf0]  ;;  %v6725_v28 = vor.u32 %v8302_v14, %v6722_v15  ;;  %v8422_v25 = vld [vmem:[%s9023_s27 + $0x9ec] sm:$0xf] }
 0x274   : > { %v6850_v11 = vld [vmem:[%s9023_s27 + $0x738] sm:$0xf0]  ;;  %v8454_v40 = vld [vmem:[%s9023_s27 + $0xaec] sm:$0xf] }
 0x275   : > { %5121 = vmatpush.bf16.msrb.mxu0 %v6533_v42  ;;  %5134 = vmatpush.bf16.msrb.mxu1 %v6661_v52  ;;  %v10065_v61 = vadd.f32 %v4907_v56, %v4895_v55  ;;  %v8238_v42 = vld [vmem:[%s9023_s27 + $0x42c] sm:$0xf]  ;;  %v6834_v30 = vld [vmem:[%s9023_s27 + $0x718] sm:$0xf0] }
 0x276   : > { %5147 = vmatpush.bf16.msrb.mxu2 %v6789_v13  ;;  %v8270_v52 = vld [vmem:[%s9023_s27 + $0x52c] sm:$0xf]  ;;  %v6869_v13 = vor.u32 %v8338_v37, %v6866_v59  ;;  %v6469_v16 = vor.u32 %v8238_v42, %v6466_v9  ;;  %v7074_v33 = vld [vmem:[%s9023_s27 + $0x8f8] sm:$0xf0]  ;;  %v6837_v4 = vor.u32 %v8330_v29, %v6834_v30 }
 0x277   : > { %5160 = vmatpush.bf16.msrb.mxu3 %v6917_v62  ;;  %v8334_v62 = vld [vmem:[%s9023_s27 + $0x72c] sm:$0xf]  ;;  %v6597_v58 = vor.u32 %v8270_v52, %v6594_v6  ;;  %v7202_v36 = vld [vmem:[%s9023_s27 + $0x9f8] sm:$0xf0] }
 0x278   : > { %v8486_v44 = vld [vmem:[%s9023_s27 + $0xbec] sm:$0xf]  ;;  %v7458_v46 = vld [vmem:[%s9023_s27 + $0xbf8] sm:$0xf0]  ;;  %v7205_v49 = vor.u32 %v8422_v25, %v7202_v36 }
 0x279   : > { %5122 = vmatpush.bf16.msrb.mxu0 %v6517_v24  ;;  %5135 = vmatpush.bf16.msrb.mxu1 %v6645_v26  ;;  %v8298_v24 = vld [vmem:[%s9023_s27 + $0x60c] sm:$0xf]  ;;  %v6853_v26 = vor.u32 %v8334_v62, %v6850_v11  ;;  %v4909_v31 = vpop.f32.mrf.mxu3  ;;  %v7058_v53 = vld [vmem:[%s9023_s27 + $0x8d8] sm:$0xf0]  ;;  %v7461_v56 = vor.u32 %v8486_v44, %v7458_v46 }
 0x27a   : > { %5148 = vmatpush.bf16.msrb.mxu2 %v6773_v27  ;;  %v4896_v27 = vpop.f32.mrf.mxu2  ;;  %v8386_v51 = vld [vmem:[%s9023_s27 + $0x8cc] sm:$0xf]  ;;  %v7186_v57 = vld [vmem:[%s9023_s27 + $0x9d8] sm:$0xf0] }
 0x27b   : > { %5161 = vmatpush.bf16.msrb.mxu3 %v6901_v32  ;;  %v8390_v32 = vld [vmem:[%s9023_s27 + $0x8ec] sm:$0xf]  ;;  %v7314_v59 = vld [vmem:[%s9023_s27 + $0xad8] sm:$0xf0] }
 0x27c   : > { %v8418_v55 = vld [vmem:[%s9023_s27 + $0x9cc] sm:$0xf]  ;;  %v7042_v52 = vld [vmem:[%s9023_s27 + $0x8b8] sm:$0xf0] }
 0x27d   : > { %5123 = vmatpush.bf16.msrb.mxu0 %v6501_v41  ;;  %5136 = vmatpush.bf16.msrb.mxu1 %v6629_v19  ;;  %v7330_v41 = vld [vmem:[%s9023_s27 + $0xaf8] sm:$0xf0]  ;;  %v6581_v19 = vor.u32 %v8266_v1, %v6578_v20  ;;  %v8450_v37 = vld [vmem:[%s9023_s27 + $0xacc] sm:$0xf] }
 0x27e   : > { %5149 = vmatpush.bf16.msrb.mxu2 %v6757_v35  ;;  %v6709_v35 = vor.u32 %v8298_v24, %v6706_v23  ;;  %v7333_v50 = vor.u32 %v8454_v40, %v7330_v41  ;;  %v8482_v8 = vld [vmem:[%s9023_s27 + $0xbcc] sm:$0xf]  ;;  %v7317_v42 = vor.u32 %v8450_v37, %v7314_v59  ;;  %v7170_v14 = vld [vmem:[%s9023_s27 + $0x9b8] sm:$0xf0] }
 0x27f   : > { %5162 = vmatpush.bf16.msrb.mxu3 %v6885_v47  ;;  %v7077_v47 = vor.u32 %v8390_v32, %v7074_v33  ;;  %v8382_v9 = vld [vmem:[%s9023_s27 + $0x8ac] sm:$0xf]  ;;  %v7298_v62 = vld [vmem:[%s9023_s27 + $0xab8] sm:$0xf0] }
 0x280   : > { %v8446_v15 = vld [vmem:[%s9023_s27 + $0xaac] sm:$0xf]  ;;  %v7154_v1 = vld [vmem:[%s9023_s27 + $0x998] sm:$0xf0] }
 0x281   : > { %5124 = vmatpush.bf16.msrb.mxu0 %v6485_v60  ;;  %5137 = vmatpush.bf16.msrb.mxu1 %v6613_v0  ;;  %v7442_v60 = vld [vmem:[%s9023_s27 + $0xbd8] sm:$0xf0]  ;;  %v7061_v0 = vor.u32 %v8386_v51, %v7058_v53  ;;  %v8478_v11 = vld [vmem:[%s9023_s27 + $0xbac] sm:$0xf]  ;;  %v7301_v18 = vor.u32 %v8446_v15, %v7298_v62 }
 0x282   : > { %5150 = vmatpush.bf16.msrb.mxu2 %v6741_v3  ;;  %v7189_v3 = vor.u32 %v8418_v55, %v7186_v57  ;;  %v7445_v6 = vor.u32 %v8482_v8, %v7442_v60  ;;  %v8442_v20 = vld [vmem:[%s9023_s27 + $0xa8c] sm:$0xf]  ;;  %v7282_v24 = vld [vmem:[%s9023_s27 + $0xa98] sm:$0xf0] }
 0x283   : > { %5163 = vmatpush.bf16.msrb.mxu3 %v6869_v13  ;;  %v8414_v13 = vld [vmem:[%s9023_s27 + $0x9ac] sm:$0xf]  ;;  %v7410_v27 = vld [vmem:[%s9023_s27 + $0xb98] sm:$0xf0]  ;;  %v7285_v32 = vor.u32 %v8442_v20, %v7282_v24 }
 0x284   : > { %v7173_v17 = vor.u32 %v8414_v13, %v7170_v14  ;;  %v8374_v33 = vld [vmem:[%s9023_s27 + $0x86c] sm:$0xf]  ;;  %v7010_v25 = vld [vmem:[%s9023_s27 + $0x878] sm:$0xf0] }
 0x285   : > { %5125 = vmatpush.bf16.msrb.mxu0 %v6469_v16  ;;  %5138 = vmatpush.bf16.msrb.mxu1 %v6597_v58  ;;  %v7426_v16 = vld [vmem:[%s9023_s27 + $0xbb8] sm:$0xf0]  ;;  %v8378_v58 = vld [vmem:[%s9023_s27 + $0x88c] sm:$0xf]  ;;  %v7013_v46 = vor.u32 %v8374_v33, %v7010_v25 }
 0x286   : > { %5151 = vmatpush.bf16.msrb.mxu2 %v6725_v28  ;;  %v7026_v28 = vld [vmem:[%s9023_s27 + $0x898] sm:$0xf0]  ;;  %v8402_v51 = vld [vmem:[%s9023_s27 + $0x94c] sm:$0xf] }
 0x287   : > { %5164 = vmatpush.bf16.msrb.mxu3 %v6853_v26  ;;  %v8474_v26 = vld [vmem:[%s9023_s27 + $0xb8c] sm:$0xf]  ;;  %v7029_v30 = vor.u32 %v8378_v58, %v7026_v28  ;;  %v7138_v41 = vld [vmem:[%s9023_s27 + $0x978] sm:$0xf0] }
 0x288   : > { %v7413_v40 = vor.u32 %v8474_v26, %v7410_v27  ;;  %v7394_v44 = vld [vmem:[%s9023_s27 + $0xb78] sm:$0xf0]  ;;  %v8434_v57 = vld [vmem:[%s9023_s27 + $0xa4c] sm:$0xf] }
 0x289   : > { %5126 = vmatpush.bf16.msrb.mxu0 %v6453_v34  ;;  %5139 = vmatpush.bf16.msrb.mxu1 %v6581_v19  ;;  %v4933_v29 = vpop.f32.mrf.mxu1  ;;  %v8406_v34 = vld [vmem:[%s9023_s27 + $0x96c] sm:$0xf]  ;;  %v7250_v37 = vld [vmem:[%s9023_s27 + $0xa58] sm:$0xf0] }
 0x28a   : > { %5152 = vmatpush.bf16.msrb.mxu2 %v6709_v35  ;;  %v8438_v19 = vld [vmem:[%s9023_s27 + $0xa6c] sm:$0xf]  ;;  %v6978_v15 = vld [vmem:[%s9023_s27 + $0x838] sm:$0xf0] }
 0x28b   : > { %5165 = vmatpush.bf16.msrb.mxu3 %v6837_v4  ;;  %v8470_v35 = vld [vmem:[%s9023_s27 + $0xb6c] sm:$0xf]  ;;  %v7141_v4 = vor.u32 %v8406_v34, %v7138_v41  ;;  %v7362_v58 = vld [vmem:[%s9023_s27 + $0xb38] sm:$0xf0] }
 0x28c   : > { %5127 = vmatmul.bf16.vlgmr.msrb.gmra.mxu0 %v9240_v38  ;;  %5140 = vmatmul.bf16.vlgmr.msrb.gmra.mxu1 %v9245_v48  ;;  %v7045_v38 = vor.u32 %v8382_v9, %v7042_v52  ;;  %v8410_v48 = vld [vmem:[%s9023_s27 + $0x98c] sm:$0xf]  ;;  %v7397_v53 = vor.u32 %v8470_v35, %v7394_v44  ;;  %v7586_v25 = vld [vmem:[%s9023_s27 + $0xcf8] sm:$0xf0] }
 0x28d   : > { %5171 = vmatpush.bf16.msra.mxu0 %v7077_v47  ;;  %5184 = vmatpush.bf16.msra.mxu1 %v7205_v49  ;;  %v7157_v31 = vor.u32 %v8410_v48, %v7154_v1  ;;  %v8370_v49 = vld [vmem:[%s9023_s27 + $0x84c] sm:$0xf] }
 0x28e   : > { %5197 = vmatpush.bf16.msra.mxu2 %v7333_v50  ;;  %5166 = vmatmul.bf16.vlgmr.msrb.gmra.mxu3 %v9262_v12  ;;  %v4920_v12 = vpop.f32.mrf.mxu0  ;;  %v6994_v50 = vld [vmem:[%s9023_s27 + $0x858] sm:$0xf0]  ;;  %v8366_v14 = vld [vmem:[%s9023_s27 + $0x82c] sm:$0xf] }
 0x28f   : > { %5210 = vmatpush.bf16.msra.mxu3 %v7461_v56  ;;  %5153 = vmatmul.bf16.vlgmr.msrb.gmra.mxu2 %v9260_v10  ;;  %v7429_v10 = vor.u32 %v8478_v11, %v7426_v16  ;;  %v4921_v23 = vadd.f32 %v4920_v12, %v10065_v61  ;;  %v7266_v61 = vld [vmem:[%s9023_s27 + $0xa78] sm:$0xf0]  ;;  %v6997_v9 = vor.u32 %v8370_v49, %v6994_v50  ;;  %v8398_v62 = vld [vmem:[%s9023_s27 + $0x92c] sm:$0xf] }
 0x290   : > { %v7269_v47 = vor.u32 %v8438_v19, %v7266_v61  ;;  %v7122_v56 = vld [vmem:[%s9023_s27 + $0x958] sm:$0xf0]  ;;  %v6981_v28 = vor.u32 %v8366_v14, %v6978_v15  ;;  %v8362_v48 = vld [vmem:[%s9023_s27 + $0x80c] sm:$0xf] }
 0x291   : > { %5172 = vmatpush.bf16.msra.mxu0 %v7061_v0  ;;  %5185 = vmatpush.bf16.msra.mxu1 %v7189_v3  ;;  %v4934_v36 = vadd.f32 %v4933_v29, %v4921_v23  ;;  %v4959_v8 = vpop.f32.mrf.mxu3  ;;  %v8466_v0 = vld [vmem:[%s9023_s27 + $0xb4c] sm:$0xf]  ;;  %v7378_v3 = vld [vmem:[%s9023_s27 + $0xb58] sm:$0xf0]  ;;  %v7125_v13 = vor.u32 %v8402_v51, %v7122_v56 }
 0x292   : > { %5198 = vmatpush.bf16.msra.mxu2 %v7317_v42  ;;  %v4946_v55 = vpop.f32.mrf.mxu2  ;;  %v4935_v42 = vpop.f32.mrf.mxu1  ;;  %v7381_v11 = vor.u32 %v8466_v0, %v7378_v3  ;;  %v7106_v16 = vld [vmem:[%s9023_s27 + $0x938] sm:$0xf0]  ;;  %v8394_v24 = vld [vmem:[%s9023_s27 + $0x90c] sm:$0xf] }
 0x293   : > { %5211 = vmatpush.bf16.msra.mxu3 %v7445_v6  ;;  %v4947_v59 = vadd.f32 %v4946_v55, %v4934_v36  ;;  %v7253_v6 = vor.u32 %v8434_v57, %v7250_v37  ;;  %v7109_v1 = vor.u32 %v8398_v62, %v7106_v16  ;;  %v7090_v12 = vld [vmem:[%s9023_s27 + $0x918] sm:$0xf0]  ;;  %v8426_v26 = vld [vmem:[%s9023_s27 + $0xa0c] sm:$0xf] }
 0x294   : > { %v7218_v29 = vld [vmem:[%s9023_s27 + $0xa18] sm:$0xf0]  ;;  %v8518_v33 = vld [vmem:[%s9023_s27 + $0xcec] sm:$0xf]  ;;  %v7093_v61 = vor.u32 %v8394_v24, %v7090_v12 }
 0x295   : > { %5173 = vmatpush.bf16.msra.mxu0 %v7045_v38  ;;  %5186 = vmatpush.bf16.msra.mxu1 %v7173_v17  ;;  %v10136_v52 = vadd.f32 %v4959_v8, %v4947_v59  ;;  %v8430_v38 = vld [vmem:[%s9023_s27 + $0xa2c] sm:$0xf]  ;;  %v7234_v17 = vld [vmem:[%s9023_s27 + $0xa38] sm:$0xf0]  ;;  %v7221_v35 = vor.u32 %v8426_v26, %v7218_v29 }
 0x296   : > { %5199 = vmatpush.bf16.msra.mxu2 %v7301_v18  ;;  %v4922_v60 = vpop.f32.mrf.mxu0  ;;  %v8462_v18 = vld [vmem:[%s9023_s27 + $0xb2c] sm:$0xf]  ;;  %v7237_v20 = vor.u32 %v8430_v38, %v7234_v17  ;;  %v7842_v19 = vld [vmem:[%s9023_s27 + $0xef8] sm:$0xf0] }
 0x297   : > { %5212 = vmatpush.bf16.msra.mxu3 %v7429_v10  ;;  %v6962_v10 = vld [vmem:[%s9023_s27 + $0x818] sm:$0xf0]  ;;  %v7365_v27 = vor.u32 %v8462_v18, %v7362_v58  ;;  %v8550_v34 = vld [vmem:[%s9023_s27 + $0xdec] sm:$0xf] }
 0x298   : > { %v6965_v36 = vor.u32 %v8362_v48, %v6962_v10  ;;  %v8582_v41 = vld [vmem:[%s9023_s27 + $0xeec] sm:$0xf]  ;;  %v7698_v57 = vld [vmem:[%s9023_s27 + $0xdd8] sm:$0xf0] }
 0x299   : > { %5174 = vmatpush.bf16.msra.mxu0 %v7029_v30  ;;  %5187 = vmatpush.bf16.msra.mxu1 %v7157_v31  ;;  %v8458_v30 = vld [vmem:[%s9023_s27 + $0xb0c] sm:$0xf]  ;;  %v7346_v31 = vld [vmem:[%s9023_s27 + $0xb18] sm:$0xf0]  ;;  %v7845_v50 = vor.u32 %v8582_v41, %v7842_v19 }
 0x29a   : > { %5200 = vmatpush.bf16.msra.mxu2 %v7285_v32  ;;  %v4948_v23 = vpop.f32.mrf.mxu2  ;;  %v4961_v32 = vpop.f32.mrf.mxu3  ;;  %v8614_v44 = vld [vmem:[%s9023_s27 + $0xfec] sm:$0xf]  ;;  %v7826_v59 = vld [vmem:[%s9023_s27 + $0xed8] sm:$0xf0] }
 0x29b   : > { %5213 = vmatpush.bf16.msra.mxu3 %v7413_v40  ;;  %v7714_v40 = vld [vmem:[%s9023_s27 + $0xdf8] sm:$0xf0]  ;;  %v8514_v51 = vld [vmem:[%s9023_s27 + $0xccc] sm:$0xf] }
 0x29c   : > { %v7717_v49 = vor.u32 %v8550_v34, %v7714_v40  ;;  %v8546_v55 = vld [vmem:[%s9023_s27 + $0xdcc] sm:$0xf]  ;;  %v7954_v60 = vld [vmem:[%s9023_s27 + $0xfd8] sm:$0xf0] }
 0x29d   : > { %5175 = vmatpush.bf16.msra.mxu0 %v7013_v46  ;;  %5188 = vmatpush.bf16.msra.mxu1 %v7141_v4  ;;  %v7970_v46 = vld [vmem:[%s9023_s27 + $0xff8] sm:$0xf0]  ;;  %v7349_v4 = vor.u32 %v8458_v30, %v7346_v31  ;;  %v8578_v37 = vld [vmem:[%s9023_s27 + $0xecc] sm:$0xf]  ;;  %v7701_v3 = vor.u32 %v8546_v55, %v7698_v57 }
 0x29e   : > { %5201 = vmatpush.bf16.msra.mxu2 %v7269_v47  ;;  %v7589_v47 = vor.u32 %v8518_v33, %v7586_v25  ;;  %v7973_v56 = vor.u32 %v8614_v44, %v7970_v46  ;;  %v8610_v8 = vld [vmem:[%s9023_s27 + $0xfcc] sm:$0xf]  ;;  %v7829_v42 = vor.u32 %v8578_v37, %v7826_v59  ;;  %v7682_v15 = vld [vmem:[%s9023_s27 + $0xdb8] sm:$0xf0] }
 0x29f   : > { %5214 = vmatpush.bf16.msra.mxu3 %v7397_v53  ;;  %v7570_v53 = vld [vmem:[%s9023_s27 + $0xcd8] sm:$0xf0]  ;;  %v7957_v14 = vor.u32 %v8610_v8, %v7954_v60  ;;  %v8574_v62 = vld [vmem:[%s9023_s27 + $0xeac] sm:$0xf] }
 0x2a0   : > { %v7573_v0 = vor.u32 %v8514_v51, %v7570_v53  ;;  %v8606_v16 = vld [vmem:[%s9023_s27 + $0xfac] sm:$0xf]  ;;  %v7938_v38 = vld [vmem:[%s9023_s27 + $0xfb8] sm:$0xf0] }
 0x2a1   : > { %5176 = vmatpush.bf16.msra.mxu0 %v6997_v9  ;;  %5189 = vmatpush.bf16.msra.mxu1 %v7125_v13  ;;  %v8510_v9 = vld [vmem:[%s9023_s27 + $0xcac] sm:$0xf]  ;;  %v7554_v13 = vld [vmem:[%s9023_s27 + $0xcb8] sm:$0xf0] }
 0x2a2   : > { %5202 = vmatpush.bf16.msra.mxu2 %v7253_v6  ;;  %v8542_v6 = vld [vmem:[%s9023_s27 + $0xdac] sm:$0xf]  ;;  %v7666_v48 = vld [vmem:[%s9023_s27 + $0xd98] sm:$0xf0] }
 0x2a3   : > { %5215 = vmatpush.bf16.msra.mxu3 %v7381_v11  ;;  %v7810_v11 = vld [vmem:[%s9023_s27 + $0xeb8] sm:$0xf0]  ;;  %v7685_v17 = vor.u32 %v8542_v6, %v7682_v15  ;;  %v8506_v58 = vld [vmem:[%s9023_s27 + $0xc8c] sm:$0xf] }
 0x2a4   : > { %v7813_v18 = vor.u32 %v8574_v62, %v7810_v11  ;;  %v8570_v10 = vld [vmem:[%s9023_s27 + $0xe8c] sm:$0xf]  ;;  %v7922_v24 = vld [vmem:[%s9023_s27 + $0xf98] sm:$0xf0] }
 0x2a5   : > { %5177 = vmatpush.bf16.msra.mxu0 %v6981_v28  ;;  %5190 = vmatpush.bf16.msra.mxu1 %v7109_v1  ;;  %v7538_v28 = vld [vmem:[%s9023_s27 + $0xc98] sm:$0xf0]  ;;  %v8502_v30 = vld [vmem:[%s9023_s27 + $0xc6c] sm:$0xf] }
 0x2a6   : > { %5203 = vmatpush.bf16.msra.mxu2 %v7237_v20  ;;  %v7794_v1 = vld [vmem:[%s9023_s27 + $0xe98] sm:$0xf0]  ;;  %v8602_v20 = vld [vmem:[%s9023_s27 + $0xf8c] sm:$0xf] }
 0x2a7   : > { %5216 = vmatpush.bf16.msra.mxu3 %v7365_v27  ;;  %v7541_v27 = vor.u32 %v8506_v58, %v7538_v28  ;;  %v7797_v29 = vor.u32 %v8570_v10, %v7794_v1  ;;  %v7522_v31 = vld [vmem:[%s9023_s27 + $0xc78] sm:$0xf0]  ;;  %v8534_v32 = vld [vmem:[%s9023_s27 + $0xd6c] sm:$0xf]  ;;  %v7925_v25 = vor.u32 %v8602_v20, %v7922_v24 }
 0x2a8   : > { %v7650_v34 = vld [vmem:[%s9023_s27 + $0xd78] sm:$0xf0]  ;;  %v8598_v40 = vld [vmem:[%s9023_s27 + $0xf6c] sm:$0xf]  ;;  %v7525_v19 = vor.u32 %v8502_v30, %v7522_v31 }
 0x2a9   : > { %5178 = vmatpush.bf16.msra.mxu0 %v6965_v36  ;;  %5191 = vmatpush.bf16.msra.mxu1 %v7093_v61  ;;  %v4985_v26 = vpop.f32.mrf.mxu1  ;;  %v8566_v36 = vld [vmem:[%s9023_s27 + $0xe6c] sm:$0xf]  ;;  %v7906_v41 = vld [vmem:[%s9023_s27 + $0xf78] sm:$0xf0]  ;;  %v7653_v61 = vor.u32 %v8534_v32, %v7650_v34 }
 0x2aa   : > { %5204 = vmatpush.bf16.msra.mxu2 %v7221_v35  ;;  %v8498_v44 = vld [vmem:[%s9023_s27 + $0xc4c] sm:$0xf]  ;;  %v7506_v46 = vld [vmem:[%s9023_s27 + $0xc58] sm:$0xf0] }
 0x2ab   : > { %5217 = vmatpush.bf16.msra.mxu3 %v7349_v4  ;;  %v8530_v4 = vld [vmem:[%s9023_s27 + $0xd4c] sm:$0xf]  ;;  %v7762_v53 = vld [vmem:[%s9023_s27 + $0xe58] sm:$0xf0]  ;;  %v7509_v60 = vor.u32 %v8498_v44, %v7506_v46 }
 0x2ac   : > { %5179 = vmatmul.bf16.vlgmr.msra.gmra.mxu0 %v9322_v45  ;;  %5192 = vmatmul.bf16.vlgmr.msra.gmra.mxu1 %v9327_v54  ;;  %v7557_v45 = vor.u32 %v8510_v9, %v7554_v13  ;;  %v8538_v54 = vld [vmem:[%s9023_s27 + $0xd8c] sm:$0xf]  ;;  %v7890_v59 = vld [vmem:[%s9023_s27 + $0xf58] sm:$0xf0] }
 0x2ad   : > { %5223 = vmatpush.bf16.msrb.mxu0 %v7589_v47  ;;  %5236 = vmatpush.bf16.msrb.mxu1 %v7717_v49  ;;  %v7669_v23 = vor.u32 %v8538_v54, %v7666_v48  ;;  %v7909_v47 = vor.u32 %v8598_v40, %v7906_v41  ;;  %v8562_v51 = vld [vmem:[%s9023_s27 + $0xe4c] sm:$0xf]  ;;  %v7490_v13 = vld [vmem:[%s9023_s27 + $0xc38] sm:$0xf0] }
 0x2ae   : > { %5249 = vmatpush.bf16.msrb.mxu2 %v7845_v50  ;;  %5218 = vmatmul.bf16.vlgmr.msra.gmra.mxu3 %v9344_v22  ;;  %v4972_v22 = vpop.f32.mrf.mxu0  ;;  %v7634_v50 = vld [vmem:[%s9023_s27 + $0xd58] sm:$0xf0]  ;;  %v8594_v37 = vld [vmem:[%s9023_s27 + $0xf4c] sm:$0xf] }
 0x2af   : > { %5262 = vmatpush.bf16.msrb.mxu3 %v7973_v56  ;;  %5205 = vmatmul.bf16.vlgmr.msra.gmra.mxu2 %v9342_v21  ;;  %v7941_v21 = vor.u32 %v8606_v16, %v7938_v38  ;;  %v4973_v12 = vadd.f32 %v4972_v22, %v10136_v52  ;;  %v7778_v52 = vld [vmem:[%s9023_s27 + $0xe78] sm:$0xf0]  ;;  %v8494_v9 = vld [vmem:[%s9023_s27 + $0xc2c] sm:$0xf] }
 0x2b0   : > { %v7781_v35 = vor.u32 %v8566_v36, %v7778_v52  ;;  %v8526_v6 = vld [vmem:[%s9023_s27 + $0xd2c] sm:$0xf]  ;;  %v7618_v15 = vld [vmem:[%s9023_s27 + $0xd38] sm:$0xf0] }
 0x2b1   : > { %5224 = vmatpush.bf16.msrb.mxu0 %v7573_v0  ;;  %5237 = vmatpush.bf16.msrb.mxu1 %v7701_v3  ;;  %v4986_v33 = vadd.f32 %v4985_v26, %v4973_v12  ;;  %v5011_v56 = vpop.f32.mrf.mxu3  ;;  %v4987_v8 = vpop.f32.mrf.mxu1  ;;  %v7637_v3 = vor.u32 %v8530_v4, %v7634_v50  ;;  %v8558_v62 = vld [vmem:[%s9023_s27 + $0xe2c] sm:$0xf]  ;;  %v7746_v11 = vld [vmem:[%s9023_s27 + $0xe38] sm:$0xf0] }
 0x2b2   : > { %5250 = vmatpush.bf16.msrb.mxu2 %v7829_v42  ;;  %v4998_v49 = vpop.f32.mrf.mxu2  ;;  %v7765_v42 = vor.u32 %v8562_v51, %v7762_v53  ;;  %v8590_v16 = vld [vmem:[%s9023_s27 + $0xf2c] sm:$0xf]  ;;  %v7874_v38 = vld [vmem:[%s9023_s27 + $0xf38] sm:$0xf0] }
 0x2b3   : > { %5263 = vmatpush.bf16.msrb.mxu3 %v7957_v14  ;;  %v4999_v55 = vadd.f32 %v4998_v49, %v4986_v33  ;;  %v7893_v14 = vor.u32 %v8594_v37, %v7890_v59  ;;  %v8490_v58 = vld [vmem:[%s9023_s27 + $0xc0c] sm:$0xf]  ;;  %v7474_v28 = vld [vmem:[%s9023_s27 + $0xc18] sm:$0xf0] }
 0x2b4   : > { %v8522_v54 = vld [vmem:[%s9023_s27 + $0xd0c] sm:$0xf]  ;;  %v7602_v10 = vld [vmem:[%s9023_s27 + $0xd18] sm:$0xf0]  ;;  %v7477_v26 = vor.u32 %v8490_v58, %v7474_v28 }
 0x2b5   : > { %5225 = vmatpush.bf16.msrb.mxu0 %v7557_v45  ;;  %5238 = vmatpush.bf16.msrb.mxu1 %v7685_v17  ;;  %v5012_v0 = vadd.f32 %v5011_v56, %v4999_v55  ;;  %v7493_v45 = vor.u32 %v8494_v9, %v7490_v13  ;;  %v7621_v17 = vor.u32 %v8526_v6, %v7618_v15  ;;  %v8554_v1 = vld [vmem:[%s9023_s27 + $0xe0c] sm:$0xf]  ;;  %v7730_v22 = vld [vmem:[%s9023_s27 + $0xe18] sm:$0xf0] }
 0x2b6   : > { %5251 = vmatpush.bf16.msrb.mxu2 %v7813_v18  ;;  %v4974_v57 = vpop.f32.mrf.mxu0  ;;  %v7749_v18 = vor.u32 %v8558_v62, %v7746_v11  ;;  %v8586_v24 = vld [vmem:[%s9023_s27 + $0xf0c] sm:$0xf]  ;;  %v7858_v12 = vld [vmem:[%s9023_s27 + $0xf18] sm:$0xf0] }
 0x2b7   : > { %5264 = vmatpush.bf16.msrb.mxu3 %v7941_v21  ;;  %v7877_v21 = vor.u32 %v8590_v16, %v7874_v38 }
 0x2b9   : > { %5226 = vmatpush.bf16.msrb.mxu0 %v7541_v27  ;;  %5239 = vmatpush.bf16.msrb.mxu1 %v7669_v23  ;;  %v5013_v20 = vpop.f32.mrf.mxu3  ;;  %v7605_v27 = vor.u32 %v8522_v54, %v7602_v10  ;;  %v7733_v23 = vor.u32 %v8554_v1, %v7730_v22 }
 0x2ba   : > { %5252 = vmatpush.bf16.msrb.mxu2 %v7797_v29  ;;  %v5000_v48 = vpop.f32.mrf.mxu2  ;;  %v7861_v29 = vor.u32 %v8586_v24, %v7858_v12 }
 0x2bb   : > { %5265 = vmatpush.bf16.msrb.mxu3 %v7925_v25 }
 0x2bd   : > { %5227 = vmatpush.bf16.msrb.mxu0 %v7525_v19  ;;  %5240 = vmatpush.bf16.msrb.mxu1 %v7653_v61 }
 0x2be   : > { %5253 = vmatpush.bf16.msrb.mxu2 %v7781_v35 }
 0x2bf   : > { %5266 = vmatpush.bf16.msrb.mxu3 %v7909_v47 }
 0x2c1   : > { %5228 = vmatpush.bf16.msrb.mxu0 %v7509_v60  ;;  %5241 = vmatpush.bf16.msrb.mxu1 %v7637_v3 }
 0x2c2   : > { %5254 = vmatpush.bf16.msrb.mxu2 %v7765_v42 }
 0x2c3   : > { %5267 = vmatpush.bf16.msrb.mxu3 %v7893_v14 }
 0x2c5   : > { %5229 = vmatpush.bf16.msrb.mxu0 %v7493_v45  ;;  %5242 = vmatpush.bf16.msrb.mxu1 %v7621_v17 }
 0x2c6   : > { %5255 = vmatpush.bf16.msrb.mxu2 %v7749_v18 }
 0x2c7   : > { %5268 = vmatpush.bf16.msrb.mxu3 %v7877_v21 }
 0x2c9   : > { %5230 = vmatpush.bf16.msrb.mxu0 %v7477_v26  ;;  %5243 = vmatpush.bf16.msrb.mxu1 %v7605_v27  ;;  %v5024_v30 = vpop.f32.mrf.mxu0  ;;  %v5037_v32 = vpop.f32.mrf.mxu1 }
 0x2ca   : > { %5256 = vmatpush.bf16.msrb.mxu2 %v7733_v23  ;;  %v5025_v31 = vadd.f32 %v5024_v30, %v5012_v0 }
 0x2cb   : > { %5269 = vmatpush.bf16.msrb.mxu3 %v7861_v29 }
 0x2cc   : > { %5231 = vmatmul.bf16.vlgmr.msrb.gmra.mxu0 %v9401_v63  ;;  %5244 = vmatmul.bf16.vlgmr.msrb.gmra.mxu1 %v9404_v2  ;;  %v5038_v33 = vadd.f32 %v5037_v32, %v5025_v31  ;;  %v1878_v63 = vperm.slane %v10038_v7, 3 }
 0x2cd   : > { %5257 = vmatmul.bf16.vlgmr.msrb.gmra.mxu2 %v9422_v39 }
 0x2ce   : > { %5270 = vmatmul.bf16.vlgmr.msrb.gmra.mxu3 %v9426_v43 }
 0x2d1   : > { %v5063_v36 = vpop.f32.mrf.mxu3  ;;  %v5026_v52 = vpop.f32.mrf.mxu0 }
 0x2d2   : > { %v5050_v25 = vpop.f32.mrf.mxu2  ;;  %v5039_v40 = vpop.f32.mrf.mxu1 }
 0x2d3   : > { %v5051_v34 = vadd.f32 %v5050_v25, %v5038_v33 }
 0x2d5   : > { %v5064_v41 = vadd.f32 %v5063_v36, %v5051_v34 }
 0x2d7   : > { %v5280_v26 = vrot.slane %v5064_v41, 4 }
 0x2d9   : > { %v5065_v61 = vpop.f32.mrf.mxu3 }
 0x2da   : > { %v5052_v19 = vpop.f32.mrf.mxu2 }
 0x2e9   : > { %v5076_v35 = vpop.f32.mrf.mxu0  ;;  %v5089_v44 = vpop.f32.mrf.mxu1 }
 0x2ea   : > { %v5077_v2 = vadd.f32 %v5076_v35, %v1878_v63 }
 0x2ec   : > { %v5090_v39 = vadd.f32 %v5089_v44, %v5077_v2 }
 0x2f1   : > { %v5115_v4 = vpop.f32.mrf.mxu3  ;;  %v5078_v47 = vpop.f32.mrf.mxu0 }
 0x2f2   : > { %v5102_v46 = vpop.f32.mrf.mxu2  ;;  %v5091_v49 = vpop.f32.mrf.mxu1 }
 0x2f3   : > { %v5103_v43 = vadd.f32 %v5102_v46, %v5090_v39 }
 0x2f5   : > { %v5116_v50 = vadd.f32 %v5115_v4, %v5103_v43 }
 0x2f9   : > { %v5117_v53 = vpop.f32.mrf.mxu3 }
 0x2fa   : > { %v5104_v51 = vpop.f32.mrf.mxu2 }
 0x309   : > { %v5128_v55 = vpop.f32.mrf.mxu0  ;;  %v5141_v56 = vpop.f32.mrf.mxu1 }
 0x30a   : > { %v5129_v42 = vadd.f32 %v5128_v55, %v5116_v50 }
 0x30c   : > { %v5142_v15 = vadd.f32 %v5141_v56, %v5129_v42 }
 0x311   : > { %v5167_v37 = vpop.f32.mrf.mxu3  ;;  %v5130_v59 = vpop.f32.mrf.mxu0 }
 0x312   : > { %v5154_v57 = vpop.f32.mrf.mxu2  ;;  %v5143_v8 = vpop.f32.mrf.mxu1 }
 0x313   : > { %v5155_v62 = vadd.f32 %v5154_v57, %v5142_v15 }
 0x315   : > { %v5168_v38 = vadd.f32 %v5167_v37, %v5155_v62 }
 0x319   : > { %v5169_v7 = vpop.f32.mrf.mxu3 }
 0x31a   : > { %v5156_v60 = vpop.f32.mrf.mxu2 }
 0x329   : > { %v5180_v0 = vpop.f32.mrf.mxu0  ;;  %v5193_v3 = vpop.f32.mrf.mxu1 }
 0x32a   : > { %v5181_v45 = vadd.f32 %v5180_v0, %v5168_v38 }
 0x32c   : > { %v5194_v17 = vadd.f32 %v5193_v3, %v5181_v45 }
 0x331   : > { %v5219_v13 = vpop.f32.mrf.mxu3  ;;  %v5182_v6 = vpop.f32.mrf.mxu0 }
 0x332   : > { %v5206_v9 = vpop.f32.mrf.mxu2  ;;  %v5195_v14 = vpop.f32.mrf.mxu1 }
 0x333   : > { %v5207_v18 = vadd.f32 %v5206_v9, %v5194_v17 }
 0x335   : > { %v5220_v58 = vadd.f32 %v5219_v13, %v5207_v18 }
 0x339   : > { %v5221_v16 = vpop.f32.mrf.mxu3 }
 0x33a   : > { %v5208_v11 = vpop.f32.mrf.mxu2 }
 0x349   : > { %v5232_v28 = vpop.f32.mrf.mxu0  ;;  %v5245_v54 = vpop.f32.mrf.mxu1 }
 0x34a   : > { %v5233_v21 = vadd.f32 %v5232_v28, %v5220_v58 }
 0x34c   : > { %v5246_v48 = vadd.f32 %v5245_v54, %v5233_v21 }
 0x350   : > { %v5258_v10 = vpop.f32.mrf.mxu2 }
 0x351   : > { %v5259_v1 = vadd.f32 %v5258_v10, %v5246_v48  ;;  %v5271_v22 = vpop.f32.mrf.mxu3  ;;  %v5234_v20 = vpop.f32.mrf.mxu0 }
 0x352   : > { %v5247_v24 = vpop.f32.mrf.mxu1 }
 0x353   : > { %v5272_v12 = vadd.f32 %v5271_v22, %v5259_v1 }
 0x355   : > { %v5281_v27 = vrot.slane %v5272_v12, 2 }
 0x357   : > { %v5285_v23 = vsel %vm5284_vm1, %v5280_v26, %v5281_v27 }
 0x358   : > { %v5287_v29 = vsel %vm5286_vm2, %v10001_v5, %v5285_v23  ;;  %v5260_v30 = vpop.f32.mrf.mxu2 }
 0x359   : > { %5289 = vst [vmem:[%s313_s17] sm:$0xff] %v5287_v29  ;;  %v5273_v31 = vpop.f32.mrf.mxu3 }
 0x35a PF: > { %s10262_s24 = sld [smem:[#allocation11_spill]]  ;;  %p14_p8 = scmp.ge.s32.totalorder %s8910_s23, 6  }
 0x35b   : > { %s10263_s18 = smov %s8842_s19  ;;  %s10264_s19 = smov %s8846_s20 }
 0x35c   : > { %s10266_s21 = smov %s8910_s23  ;;  %16 = sbr.rel (!%p14_p8) target bundleno = 6 (0x6), region = 98 }
 0x360   : > { %s10265_s20 = smov %s10262_s24 }
 0x361   :  { %5312 = vsyncpa [#allocation3], 1 }
 0x362   :  { %5314 = vsyncpa [#allocation3 + $0x1], 1 }
 0x363   :  { %5315 = vsyncpa [#allocation5], 1 }

</bundles_post_ra>
